<compile_context>
chip_gen: v7x
topology: tpu7x:2x2x1
jax: 0.10.0
libtpu: 0.0.40
codegen_flags: <defaults>
</compile_context>

<pallas_src>
import math

import jax
import jax.numpy as jnp
from jax.experimental import pallas as pl
from jax.experimental.pallas import tpu as pltpu


# ----------------------------------------------------------------------------
# Configuration (small shapes, consistent with the module's structure)
# ----------------------------------------------------------------------------

CFG = dict(
    alphabet_size=12,
    padding_idx=1,
    embed_dim=32,
    ffn_embed_dim=64,
    heads=4,
    layers=2,
    max_positions=32,
    dim_pair=(16, 32),          # small analog of [64] + [128]*6 + [256]*5
    msa2pair_hidden=4,
    res2net=dict(planes=16, expansion=2, base_width=32, scale=4, n_blocks=2),
)

_NEG = -1e4  # ESM-style key-padding mask value


# ----------------------------------------------------------------------------
# Fused Pallas kernels
# ----------------------------------------------------------------------------

def fused_linear(x, w, b=None, *, ln=None, act=None, residual=None,
                 out_dtype=jnp.float32, block_rows=512):
    """y = act( (LN(x) if ln else x) @ w + b + residual ).

    One kernel: optional pre-LayerNorm, bf16 MXU matmul with f32 accumulation,
    bias / residual / activation epilogue.  Tiled over rows (parallel grid).
    """
    M, K = x.shape
    N = w.shape[1]
    if b is None:
        b = jnp.zeros((N,), jnp.float32)
    has_ln = ln is not None
    has_res = residual is not None
    tm = M if M <= block_rows else block_rows

    def kernel(*refs):
        idx = 0
        x_ref = refs[idx]; idx += 1
        if has_ln:
            g_ref, be_ref = refs[idx], refs[idx + 1]; idx += 2
        w_ref, b_ref = refs[idx], refs[idx + 1]; idx += 2
        if has_res:
            r_ref = refs[idx]; idx += 1
        o_ref = refs[idx]

        xv = x_ref[...]
        if has_ln:
            xv = xv.astype(jnp.float32)
            mu = jnp.mean(xv, axis=-1, keepdims=True)
            xc = xv - mu
            var = jnp.mean(xc * xc, axis=-1, keepdims=True)
            xv = xc * jax.lax.rsqrt(var + 1e-5) * g_ref[...] + be_ref[...]
        y = jnp.dot(xv.astype(jnp.bfloat16), w_ref[...].astype(jnp.bfloat16),
                    preferred_element_type=jnp.float32)
        y = y + b_ref[...]
        if has_res:
            y = y + r_ref[...].astype(jnp.float32)
        if act == "gelu":
            y = jax.nn.gelu(y, approximate=True)
        elif act == "relu":
            y = jnp.maximum(y, 0.0)
        o_ref[...] = y.astype(o_ref.dtype)

    in_specs = [pl.BlockSpec((tm, K), lambda i: (i, 0))]
    operands = [x]
    if has_ln:
        gamma, beta = ln
        in_specs += [pl.BlockSpec((1, K), lambda i: (0, 0)),
                     pl.BlockSpec((1, K), lambda i: (0, 0))]
        operands += [gamma.reshape(1, K), beta.reshape(1, K)]
    in_specs += [pl.BlockSpec((K, N), lambda i: (0, 0)),
                 pl.BlockSpec((1, N), lambda i: (0, 0))]
    operands += [w, b.reshape(1, N)]
    if has_res:
        in_specs.append(pl.BlockSpec((tm, N), lambda i: (i, 0)))
        operands.append(residual)

    return pl.pallas_call(
        kernel,
        out_shape=jax.ShapeDtypeStruct((M, N), out_dtype),
        grid=(pl.cdiv(M, tm),),
        in_specs=in_specs,
        out_specs=pl.BlockSpec((tm, N), lambda i: (i, 0)),
        compiler_params=pltpu.CompilerParams(dimension_semantics=("parallel",)),
    )(*operands)


def fused_layernorm(x, gamma, beta, row_scale=None, out_dtype=jnp.float32,
                    block_rows=1024):
    """LayerNorm (+ optional per-row scale, used for padding zeroing), row-tiled."""
    M, D = x.shape
    tm = M if M <= block_rows else block_rows
    has_scale = row_scale is not None

    def kernel(*refs):
        if has_scale:
            x_ref, g_ref, b_ref, s_ref, o_ref = refs
        else:
            x_ref, g_ref, b_ref, o_ref = refs
        xv = x_ref[...].astype(jnp.float32)
        mu = jnp.mean(xv, axis=-1, keepdims=True)
        xc = xv - mu
        var = jnp.mean(xc * xc, axis=-1, keepdims=True)
        y = xc * jax.lax.rsqrt(var + 1e-5) * g_ref[...] + b_ref[...]
        if has_scale:
            y = y * s_ref[...]
        o_ref[...] = y.astype(o_ref.dtype)

    in_specs = [pl.BlockSpec((tm, D), lambda i: (i, 0)),
                pl.BlockSpec((1, D), lambda i: (0, 0)),
                pl.BlockSpec((1, D), lambda i: (0, 0))]
    operands = [x, gamma.reshape(1, D), beta.reshape(1, D)]
    if has_scale:
        in_specs.append(pl.BlockSpec((tm, 1), lambda i: (i, 0)))
        operands.append(row_scale)

    return pl.pallas_call(
        kernel,
        out_shape=jax.ShapeDtypeStruct((M, D), out_dtype),
        grid=(pl.cdiv(M, tm),),
        in_specs=in_specs,
        out_specs=pl.BlockSpec((tm, D), lambda i: (i, 0)),
        compiler_params=pltpu.CompilerParams(dimension_semantics=("parallel",)),
    )(*operands)


def row_attention(q, k, v, bias, key_mask, scale):
    """Fused tied-row attention: scores + pair bias + key-pad mask + softmax + PV.
    One grid step per batch element; all heads batched inside the kernel.
    q/k/v are (B, H, C, R*Dh) bf16; bias is (B, H, C, C); key_mask is (B, 1, C)."""
    B, H, C, E = q.shape

    def kernel(q_ref, k_ref, v_ref, b_ref, m_ref, o_ref):
        qv, kv, vv = q_ref[0], k_ref[0], v_ref[0]            # (H, C, E)
        s = jnp.einsum("hqd,hkd->hqk", qv, kv,
                       preferred_element_type=jnp.float32) * scale
        s = s + b_ref[0] + m_ref[0, 0][None, None, :]
        m = jnp.max(s, axis=-1, keepdims=True)
        e = jnp.exp(s - m)
        p = e * pl.reciprocal(jnp.sum(e, axis=-1, keepdims=True), approx=True)
        ctx = jnp.einsum("hqk,hkd->hqd", p.astype(jnp.bfloat16), vv,
                         preferred_element_type=jnp.float32)
        o_ref[0] = ctx.astype(o_ref.dtype)

    qkv_spec = pl.BlockSpec((1, H, C, E), lambda b: (b, 0, 0, 0))
    return pl.pallas_call(
        kernel,
        out_shape=jax.ShapeDtypeStruct((B, H, C, E), jnp.bfloat16),
        grid=(B,),
        in_specs=[qkv_spec, qkv_spec, qkv_spec,
                  pl.BlockSpec((1, H, C, C), lambda b: (b, 0, 0, 0)),
                  pl.BlockSpec((1, 1, C), lambda b: (b, 0, 0))],
        out_specs=qkv_spec,
        compiler_params=pltpu.CompilerParams(dimension_semantics=("parallel",)),
    )(q, k, v, bias, key_mask)


def col_attention(q, k, v, mask_add, scale):
    """Fused column attention.  All (column, head) pairs of one batch element are
    processed in a single grid step via a batched einsum (batch dim G = C*H).
    mask_add is compact (B, G, 1, R) and broadcast over the query dim in-kernel."""
    B, G, R, Dh = q.shape

    def kernel(q_ref, k_ref, v_ref, m_ref, o_ref):
        qv, kv, vv = q_ref[0], k_ref[0], v_ref[0]
        s = jnp.einsum("grd,gsd->grs", qv, kv,
                       preferred_element_type=jnp.float32) * scale
        s = s + m_ref[0]                                       # (G,1,R) broadcast
        m = jnp.max(s, axis=-1, keepdims=True)
        e = jnp.exp(s - m)
        p = e * pl.reciprocal(jnp.sum(e, axis=-1, keepdims=True), approx=True)
        ctx = jnp.einsum("grs,gsd->grd", p.astype(jnp.bfloat16), vv,
                         preferred_element_type=jnp.float32)
        o_ref[0] = ctx.astype(o_ref.dtype)

    spec = pl.BlockSpec((1, G, R, Dh), lambda b: (b, 0, 0, 0))
    return pl.pallas_call(
        kernel,
        out_shape=jax.ShapeDtypeStruct((B, G, R, Dh), jnp.bfloat16),
        grid=(B,),
        in_specs=[spec, spec, spec,
                  pl.BlockSpec((1, G, 1, R), lambda b: (b, 0, 0, 0))],
        out_specs=spec,
        compiler_params=pltpu.CompilerParams(dimension_semantics=("parallel",)),
    )(q, k, v, mask_add)


def pallas_bmm(a, b, scale=1.0, out_dtype=jnp.bfloat16):
    """Batched matmul (G, M, K) @ (G, K, N) * scale, bf16 MXU / f32 accumulate."""
    G, M, K = a.shape
    _, _, N = b.shape

    def kernel(a_ref, b_ref, o_ref):
        acc = jnp.dot(a_ref[0].astype(jnp.bfloat16),
                      b_ref[0].astype(jnp.bfloat16),
                      preferred_element_type=jnp.float32)
        o_ref[0] = (acc * scale).astype(o_ref.dtype)

    return pl.pallas_call(
        kernel,
        out_shape=jax.ShapeDtypeStruct((G, M, N), out_dtype),
        grid=(G,),
        in_specs=[pl.BlockSpec((1, M, K), lambda g: (g, 0, 0)),
                  pl.BlockSpec((1, K, N), lambda g: (g, 0, 0))],
        out_specs=pl.BlockSpec((1, M, N), lambda g: (g, 0, 0)),
        compiler_params=pltpu.CompilerParams(dimension_semantics=("parallel",)),
    )(a, b)


def pallas_conv3x3(x, w, dilation=1, relu=True):
    """'Same' 3x3 dilated conv, stride 1, channels-last, bias-free.

    The padded image tile is DMA'd into VMEM once per batch element; nine
    statically-shifted in-VMEM views are contracted against the (Cin, Cout)
    filter taps with bf16 MXU dots, accumulated in f32 (no HBM im2col).
    """
    B, Hh, Ww, Cin = x.shape
    Cout = w.shape[-1]
    d = dilation
    xp = jnp.pad(x, ((0, 0), (d, d), (d, d), (0, 0)))
    Hp, Wp = Hh + 2 * d, Ww + 2 * d

    def kernel(x_ref, w_ref, o_ref):
        xv = x_ref[0].astype(jnp.bfloat16)                      # (Hp, Wp, Cin)
        acc = jnp.zeros((Hh * Ww, Cout), jnp.float32)
        for ki in range(3):
            for kj in range(3):
                patch = xv[ki * d:ki * d + Hh, kj * d:kj * d + Ww, :]
                patch = patch.reshape(Hh * Ww, Cin)
                acc = acc + jnp.dot(patch, w_ref[ki * 3 + kj],
                                    preferred_element_type=jnp.float32)
        if relu:
            acc = jnp.maximum(acc, 0.0)
        o_ref[0] = acc.reshape(Hh, Ww, Cout).astype(o_ref.dtype)

    return pl.pallas_call(
        kernel,
        out_shape=jax.ShapeDtypeStruct((B, Hh, Ww, Cout), jnp.float32),
        grid=(B,),
        in_specs=[pl.BlockSpec((1, Hp, Wp, Cin), lambda b: (b, 0, 0, 0)),
                  pl.BlockSpec((9, Cin, Cout), lambda b: (0, 0, 0))],
        out_specs=pl.BlockSpec((1, Hh, Ww, Cout), lambda b: (b, 0, 0, 0)),
        compiler_params=pltpu.CompilerParams(dimension_semantics=("parallel",)),
    )(xp, w)


def avg_pool3x3(x):
    # nn.AvgPool2d(kernel_size=3, stride=1, padding=1), count_include_pad=True.
    # Tiny cold path (only the 'stage' block's last split); plain jnp is fine.
    B, H, W, C = x.shape
    xp = jnp.pad(x, ((0, 0), (1, 1), (1, 1), (0, 0)))
    acc = jnp.zeros_like(x)
    for di in range(3):
        for dj in range(3):
            acc = acc + xp[:, di:di + H, dj:dj + W, :]
    return acc / 9.0


# ----------------------------------------------------------------------------
# Deterministic parameter initialization (matmul weights stored in bf16)
# ----------------------------------------------------------------------------

class KeyGen:
    def __init__(self, key):
        self._key = key

    def __call__(self):
        self._key, sub = jax.random.split(self._key)
        return sub


def _w(kg, shape, scale=0.02):
    return (scale * jax.random.normal(kg(), shape, dtype=jnp.float32))


def _wb(kg, shape, scale=0.02):
    return _w(kg, shape, scale).astype(jnp.bfloat16)


def _z(*shape):
    return jnp.zeros(shape, jnp.float32)


def _ones(*shape):
    return jnp.ones(shape, jnp.float32)


def init_axial_layer(kg, D, F, H, Cp):
    p = {}
    for pre in ("row", "col"):
        p[f"{pre}_wqkv"] = _wb(kg, (D, 3 * D))      # fused q,k,v projection
        p[f"{pre}_bqkv"] = _z(3 * D)
        p[f"{pre}_wo"] = _wb(kg, (D, D))
        p[f"{pre}_bo"] = _z(D)
        p[f"{pre}_ln_g"] = _ones(D)
        p[f"{pre}_ln_b"] = _z(D)
    p["pair_w"] = _wb(kg, (Cp, H))                  # pair bias projection
    p["pair_b"] = _z(H)
    p["w1"] = _wb(kg, (D, F))
    p["b1"] = _z(F)
    p["w2"] = _wb(kg, (F, D))
    p["b2"] = _z(D)
    p["ffn_ln_g"] = _ones(D)
    p["ffn_ln_b"] = _z(D)
    return p


def init_msa2pair(kg, D, hidden, out_dim):
    return dict(
        w_lr=_wb(kg, (D, 2 * hidden)), b_lr=_z(2 * hidden),
        wo=_wb(kg, (hidden * hidden, out_dim)), bo=_z(out_dim),
    )


def init_res2net_group(kg, inplanes, planes, n_blocks, expansion, base_width,
                       scale):
    outplanes = planes * expansion
    width = int(math.floor(planes * base_width / 64.0))
    blocks = []
    cur_in = inplanes
    for _ in range(n_blocks):
        blk = dict(
            w1=_wb(kg, (cur_in, width * scale)),
            w3x3=[_wb(kg, (9, width, width)) for _ in range(scale - 1)],
            w3=_wb(kg, (width * scale, outplanes)),
        )
        if cur_in != outplanes:
            blk["wd"] = _wb(kg, (cur_in, outplanes))    # 1x1 shortcut downsample
        blocks.append(blk)
        cur_in = outplanes
    return blocks


def init_params(key):
    kg = KeyGen(key)
    D, F, H = CFG["embed_dim"], CFG["ffn_embed_dim"], CFG["heads"]
    V, pad = CFG["alphabet_size"], CFG["padding_idx"]

    params = {}
    tab = _w(kg, (V, D))
    params["embed_tokens"] = tab.at[pad].set(0.0)
    n_pos = CFG["max_positions"] + pad + 1
    pos = _w(kg, (n_pos, D))
    params["embed_positions"] = pos.at[pad].set(0.0)
    params["ln_before_g"] = _ones(D)
    params["ln_before_b"] = _z(D)

    params["layers"] = [
        init_axial_layer(kg, D, F, H, CFG["dim_pair"][i])
        for i in range(CFG["layers"])
    ]
    params["msa2pair"] = [
        init_msa2pair(kg, D, CFG["msa2pair_hidden"], CFG["dim_pair"][i])
        for i in range(CFG["layers"])
    ]

    rc = CFG["res2net"]
    groups = []
    for g in range(CFG["layers"]):
        inpl = CFG["dim_pair"][0] if g == 0 else rc["planes"] * rc["expansion"]
        groups.append(init_res2net_group(
            kg, inpl, rc["planes"], rc["n_blocks"], rc["expansion"],
            rc["base_width"], rc["scale"]))
    params["res2net"] = groups
    return params


# ----------------------------------------------------------------------------
# Model forward
# ----------------------------------------------------------------------------

def axial_transformer_layer(x2d, f2d, p, B, R, C, row_key_mask, col_mask_add):
    D, H = CFG["embed_dim"], CFG["heads"]
    Dh = D // H
    M = B * R * C

    # --- tied row self-attention (pre-LN residual) with pair bias from f2d ---
    qkv = fused_linear(x2d, p["row_wqkv"], p["row_bqkv"],
                       ln=(p["row_ln_g"], p["row_ln_b"]),
                       out_dtype=jnp.bfloat16)                    # (M, 3D)
    qkv = qkv.reshape(B, R, C, 3, H, Dh)
    q = jnp.transpose(qkv[:, :, :, 0], (0, 3, 2, 1, 4)).reshape(B, H, C, R * Dh)
    k = jnp.transpose(qkv[:, :, :, 1], (0, 3, 2, 1, 4)).reshape(B, H, C, R * Dh)
    v = jnp.transpose(qkv[:, :, :, 2], (0, 3, 2, 1, 4)).reshape(B, H, C, R * Dh)

    Cp = f2d.shape[-1]
    bias = fused_linear(f2d.reshape(B * C * C, Cp), p["pair_w"], p["pair_b"])
    bias = bias.reshape(B, C, C, H).transpose(0, 3, 1, 2)          # (B,H,C,C)

    scale = (Dh ** -0.5) / math.sqrt(R)
    ctx = row_attention(q, k, v, bias, row_key_mask, scale)        # (B,H,C,R*Dh)
    ctx = ctx.reshape(B, H, C, R, Dh).transpose(0, 3, 2, 1, 4).reshape(M, D)
    x2d = fused_linear(ctx, p["row_wo"], p["row_bo"], residual=x2d)

    # --- column self-attention (pre-LN residual) ---
    # TODO(synk): ESM's ColumnSelfAttention num_rows==1 shortcut is not special-cased.
    qkv = fused_linear(x2d, p["col_wqkv"], p["col_bqkv"],
                       ln=(p["col_ln_g"], p["col_ln_b"]),
                       out_dtype=jnp.bfloat16)
    qkv = qkv.reshape(B, R, C, 3, H, Dh)
    q = jnp.transpose(qkv[:, :, :, 0], (0, 2, 3, 1, 4)).reshape(B, C * H, R, Dh)
    k = jnp.transpose(qkv[:, :, :, 1], (0, 2, 3, 1, 4)).reshape(B, C * H, R, Dh)
    v = jnp.transpose(qkv[:, :, :, 2], (0, 2, 3, 1, 4)).reshape(B, C * H, R, Dh)

    ctx = col_attention(q, k, v, col_mask_add, Dh ** -0.5)         # (B,C*H,R,Dh)
    ctx = ctx.reshape(B, C, H, R, Dh).transpose(0, 3, 1, 2, 4).reshape(M, D)
    x2d = fused_linear(ctx, p["col_wo"], p["col_bo"], residual=x2d)

    # --- feed-forward (pre-LN residual), GELU fused in the matmul epilogue ---
    h = fused_linear(x2d, p["w1"], p["b1"],
                     ln=(p["ffn_ln_g"], p["ffn_ln_b"]), act="gelu")
    x2d = fused_linear(h, p["w2"], p["b2"], residual=x2d)
    return x2d


def outer_product_msa(x2d, f2d, p, B, R, C):
    # Mean outer product over rows; the residual add into f2d is fused into the
    # final projection kernel.
    hid = p["w_lr"].shape[1] // 2
    Cp = f2d.shape[-1]
    lr = fused_linear(x2d, p["w_lr"], p["b_lr"], out_dtype=jnp.bfloat16)
    lr = lr.reshape(B, R, C, 2 * hid)
    left = jnp.transpose(lr[..., :hid], (0, 2, 3, 1)).reshape(B, C * hid, R)
    right = lr[..., hid:].reshape(B, R, C * hid)
    outer = pallas_bmm(left, right, scale=1.0 / R)                 # (B,C*hid,C*hid)
    outer = outer.reshape(B, C, hid, C, hid).transpose(0, 1, 3, 2, 4)
    outer = outer.reshape(B * C * C, hid * hid)
    out = fused_linear(outer, p["wo"], p["bo"],
                       residual=f2d.reshape(B * C * C, Cp))
    return out.reshape(B, C, C, Cp)


def bottle2neck_forward(x, blk, stype, dilation):
    # TODO(synk): bn1/bns/bn3 BatchNorms are identity at fresh init (eval) and omitted.
    B, Hh, Ww, Cin = x.shape
    rc = CFG["res2net"]
    scale = rc["scale"]
    width = blk["w3x3"][0].shape[-1]
    M = B * Hh * Ww
    x2d = x.reshape(M, Cin)

    out = fused_linear(x2d, blk["w1"], None, act="relu")           # (M, width*scale)
    out = out.reshape(B, Hh, Ww, width * scale)

    outs = []
    sp = None
    for i in range(scale - 1):
        piece = out[..., i * width:(i + 1) * width]
        sp = piece if (i == 0 or stype == "stage") else sp + piece
        sp = pallas_conv3x3(sp, blk["w3x3"][i], dilation=dilation, relu=True)
        outs.append(sp)
    last = out[..., (scale - 1) * width:]
    if stype == "stage":
        last = avg_pool3x3(last)
    outs.append(last)
    cat = jnp.concatenate(outs, axis=-1).reshape(M, width * scale)

    shortcut = x2d if "wd" not in blk else fused_linear(x2d, blk["wd"], None)
    y = fused_linear(cat, blk["w3"], None, residual=shortcut, act="relu")
    return y.reshape(B, Hh, Ww, blk["w3"].shape[-1])


def res2net_group_forward(x, blocks, first_is_stage):
    d = 1
    for bi, blk in enumerate(blocks):
        if bi == 0:
            stype = "stage" if first_is_stage else "normal"
            dilation = 1
        else:
            d = (2 * d) % 31
            stype = "normal"
            dilation = d
        x = bottle2neck_forward(x, blk, stype, dilation)
    return x


def msa_transformer_forward(params, tokens, f2d):
    B, R, C = tokens.shape
    D, H = CFG["embed_dim"], CFG["heads"]
    pad = CFG["padding_idx"]
    M = B * R * C

    padding_mask = (tokens == pad)                                 # (B,R,C) bool

    # embedding + learned positional embedding (ESM LearnedPositionalEmbedding)
    x = params["embed_tokens"][tokens]                             # (B,R,C,D)
    tok2d = tokens.reshape(B * R, C)
    pos_mask = (tok2d != pad).astype(jnp.int32)
    positions = jnp.cumsum(pos_mask, axis=1) * pos_mask + pad
    x = x + params["embed_positions"][positions].reshape(B, R, C, D)
    # msa_position_embedding is None (embed_positions_msa=False)
    # dropout_module: identity in eval mode

    # emb LayerNorm fused with unconditional padding zeroing (no host sync / branch)
    keep = 1.0 - padding_mask.reshape(M, 1).astype(jnp.float32)
    x2d = fused_layernorm(x.reshape(M, D), params["ln_before_g"],
                          params["ln_before_b"], row_scale=keep)   # (M, D)

    # additive key-padding masks for attention (all zeros when no padding)
    row_key_mask = jnp.where(padding_mask[:, 0, :], _NEG, 0.0)     # (B, C)
    row_key_mask = row_key_mask.reshape(B, 1, C)
    colm = jnp.where(padding_mask, _NEG, 0.0)                      # (B, R, C)
    # compact (B, C*H, 1, R): broadcast over heads only; query-dim broadcast in-kernel
    col_mask_add = jnp.broadcast_to(
        jnp.transpose(colm, (0, 2, 1))[:, :, None, None, :],       # (B,C,1,1,R)
        (B, C, H, 1, R)).reshape(B, C * H, 1, R)

    for li in range(CFG["layers"]):
        x2d = axial_transformer_layer(x2d, f2d, params["layers"][li],
                                      B, R, C, row_key_mask, col_mask_add)
        f2d = outer_product_msa(x2d, f2d, params["msa2pair"][li], B, R, C)
        # Rearrange('b i j d->b d i j') / Res2Net / Rearrange back, kept channels-last
        f2d = res2net_group_forward(f2d, params["res2net"][li],
                                    first_is_stage=(li == 0))
    return f2d


# ----------------------------------------------------------------------------
# Main
# ----------------------------------------------------------------------------

if __name__ == "__main__":
    B, R, C = 1, 4, 8
    key = jax.random.PRNGKey(0)
    k_par, k_tok, k_f2d = jax.random.split(key, 3)

    params = init_params(k_par)
    # tokens in [2, alphabet_size): no padding in this example (masks are all-zero)
    tokens = jax.random.randint(k_tok, (B, R, C), 2, CFG["alphabet_size"])
    f2d = 0.1 * jax.random.normal(k_f2d, (B, C, C, CFG["dim_pair"][0]),
                                  dtype=jnp.float32)

    fwd = jax.jit(msa_transformer_forward)
    out = jax.block_until_ready(fwd(params, tokens, f2d))

    expected_pair_dim = CFG["res2net"]["planes"] * CFG["res2net"]["expansion"]
    assert out.shape == (B, C, C, expected_pair_dim), out.shape
    assert bool(jnp.all(jnp.isfinite(out)))
    print("KERNEL_OK")
</pallas_src>

<mosaic_0001>
module attributes {stable_mosaic.version = 11 : i64} {
  func.func @kernel(%arg0: i32, %arg1: memref<32x32xf32, #tpu.memory_space<vmem>>, %arg2: memref<1x32xf32, #tpu.memory_space<vmem>>, %arg3: memref<1x32xf32, #tpu.memory_space<vmem>>, %arg4: memref<32x1xf32, #tpu.memory_space<vmem>>, %arg5: memref<32x32xf32, #tpu.memory_space<vmem>>) attributes {dimension_semantics = [#tpu.dimension_semantics<parallel>], iteration_bounds = array<i64: 1>, scalar_prefetch = 0 : i64, scratch_operands = 0 : i64, tpu.core_type = #tpu.core_type<tc>, window_params = [{transform_indices = @transform_0, window_bounds = array<i64: 32, 32>}, {pipeline_mode = #tpu.pipeline_mode<synchronous>, transform_indices = @transform_1, window_bounds = array<i64: 1, 32>}, {pipeline_mode = #tpu.pipeline_mode<synchronous>, transform_indices = @transform_2, window_bounds = array<i64: 1, 32>}, {transform_indices = @transform_3, window_bounds = array<i64: 32, 1>}, {transform_indices = @transform_4, window_bounds = array<i64: 32, 32>}]} {
    %c0 = arith.constant 0 : index
    %c0_0 = arith.constant 0 : index
    %0 = vector.load %arg1[%c0, %c0_0] : memref<32x32xf32, #tpu.memory_space<vmem>>, vector<32x32xf32>
    %cst = arith.constant dense<0.000000e+00> : vector<32xf32>
    %1 = vector.multi_reduction <add>, %0, %cst [1] : vector<32x32xf32> to vector<32xf32>
    %2 = vector.shape_cast %1 : vector<32xf32> to vector<32x1xf32>
    %cst_1 = arith.constant 3.200000e+01 : f32
    %3 = vector.broadcast %cst_1 : f32 to vector<32x1xf32>
    %4 = arith.divf %2, %3 : vector<32x1xf32>
    %5 = vector.broadcast %4 : vector<32x1xf32> to vector<32x32xf32>
    %6 = arith.subf %0, %5 : vector<32x32xf32>
    %7 = arith.mulf %6, %6 : vector<32x32xf32>
    %cst_2 = arith.constant dense<0.000000e+00> : vector<32xf32>
    %8 = vector.multi_reduction <add>, %7, %cst_2 [1] : vector<32x32xf32> to vector<32xf32>
    %9 = vector.shape_cast %8 : vector<32xf32> to vector<32x1xf32>
    %cst_3 = arith.constant 3.200000e+01 : f32
    %10 = vector.broadcast %cst_3 : f32 to vector<32x1xf32>
    %11 = arith.divf %9, %10 : vector<32x1xf32>
    %cst_4 = arith.constant 9.99999974E-6 : f32
    %12 = vector.broadcast %cst_4 : f32 to vector<32x1xf32>
    %13 = arith.addf %11, %12 : vector<32x1xf32>
    %14 = math.rsqrt %13 : vector<32x1xf32>
    %15 = vector.broadcast %14 : vector<32x1xf32> to vector<32x32xf32>
    %16 = arith.mulf %6, %15 : vector<32x32xf32>
    %c0_5 = arith.constant 0 : index
    %c0_6 = arith.constant 0 : index
    %17 = vector.load %arg2[%c0_5, %c0_6] : memref<1x32xf32, #tpu.memory_space<vmem>>, vector<1x32xf32>
    %18 = vector.broadcast %17 : vector<1x32xf32> to vector<32x32xf32>
    %19 = arith.mulf %16, %18 : vector<32x32xf32>
    %c0_7 = arith.constant 0 : index
    %c0_8 = arith.constant 0 : index
    %20 = vector.load %arg3[%c0_7, %c0_8] : memref<1x32xf32, #tpu.memory_space<vmem>>, vector<1x32xf32>
    %21 = vector.broadcast %20 : vector<1x32xf32> to vector<32x32xf32>
    %22 = arith.addf %19, %21 : vector<32x32xf32>
    %c0_9 = arith.constant 0 : index
    %c0_10 = arith.constant 0 : index
    %23 = vector.load %arg4[%c0_9, %c0_10] : memref<32x1xf32, #tpu.memory_space<vmem>>, vector<32x1xf32>
    %24 = vector.broadcast %23 : vector<32x1xf32> to vector<32x32xf32>
    %25 = arith.mulf %22, %24 : vector<32x32xf32>
    %c0_11 = arith.constant 0 : index
    %c0_12 = arith.constant 0 : index
    %26 = vector.load %arg5[%c0_11, %c0_12] : memref<32x32xf32, #tpu.memory_space<vmem>>, vector<32x32xf32>
    tpu.vector_store %arg5[%c0_11, %c0_12], %25 {strides = array<i32>} : memref<32x32xf32, #tpu.memory_space<vmem>>, vector<32x32xf32>,
    return
  }
  func.func @transform_0(%arg0: i32) -> (i32, i32) {
    %c0_i32 = arith.constant 0 : i32
    %c0_i32_0 = arith.constant 0 : i32
    return %arg0, %c0_i32 : i32, i32
  }
  func.func @transform_1(%arg0: i32) -> (i32, i32) {
    %c0_i32 = arith.constant 0 : i32
    %c0_i32_0 = arith.constant 0 : i32
    %c0_i32_1 = arith.constant 0 : i32
    return %c0_i32, %c0_i32_0 : i32, i32
  }
  func.func @transform_2(%arg0: i32) -> (i32, i32) {
    %c0_i32 = arith.constant 0 : i32
    %c0_i32_0 = arith.constant 0 : i32
    %c0_i32_1 = arith.constant 0 : i32
    return %c0_i32, %c0_i32_0 : i32, i32
  }
  func.func @transform_3(%arg0: i32) -> (i32, i32) {
    %c0_i32 = arith.constant 0 : i32
    %c0_i32_0 = arith.constant 0 : i32
    return %arg0, %c0_i32 : i32, i32
  }
  func.func @transform_4(%arg0: i32) -> (i32, i32) {
    %c0_i32 = arith.constant 0 : i32
    %c0_i32_0 = arith.constant 0 : i32
    return %arg0, %c0_i32 : i32, i32
  }
}

module attributes {stable_mosaic.version = 11 : i64} {
  func.func @kernel(%arg0: i32, %arg1: memref<32x32xf32, #tpu.memory_space<vmem>>, %arg2: memref<1x32xf32, #tpu.memory_space<vmem>>, %arg3: memref<1x32xf32, #tpu.memory_space<vmem>>, %arg4: memref<32x96xbf16, #tpu.memory_space<vmem>>, %arg5: memref<1x96xf32, #tpu.memory_space<vmem>>, %arg6: memref<32x96xbf16, #tpu.memory_space<vmem>>) attributes {dimension_semantics = [#tpu.dimension_semantics<parallel>], iteration_bounds = array<i64: 1>, scalar_prefetch = 0 : i64, scratch_operands = 0 : i64, tpu.core_type = #tpu.core_type<tc>, window_params = [{transform_indices = @transform_0, window_bounds = array<i64: 32, 32>}, {pipeline_mode = #tpu.pipeline_mode<synchronous>, transform_indices = @transform_1, window_bounds = array<i64: 1, 32>}, {pipeline_mode = #tpu.pipeline_mode<synchronous>, transform_indices = @transform_2, window_bounds = array<i64: 1, 32>}, {pipeline_mode = #tpu.pipeline_mode<synchronous>, transform_indices = @transform_3, window_bounds = array<i64: 32, 96>}, {pipeline_mode = #tpu.pipeline_mode<synchronous>, transform_indices = @transform_4, window_bounds = array<i64: 1, 96>}, {transform_indices = @transform_5, window_bounds = array<i64: 32, 96>}]} {
    %c0 = arith.constant 0 : index
    %c0_0 = arith.constant 0 : index
    %0 = vector.load %arg1[%c0, %c0_0] : memref<32x32xf32, #tpu.memory_space<vmem>>, vector<32x32xf32>
    %cst = arith.constant dense<0.000000e+00> : vector<32xf32>
    %1 = vector.multi_reduction <add>, %0, %cst [1] : vector<32x32xf32> to vector<32xf32>
    %2 = vector.shape_cast %1 : vector<32xf32> to vector<32x1xf32>
    %cst_1 = arith.constant 3.200000e+01 : f32
    %3 = vector.broadcast %cst_1 : f32 to vector<32x1xf32>
    %4 = arith.divf %2, %3 : vector<32x1xf32>
    %5 = vector.broadcast %4 : vector<32x1xf32> to vector<32x32xf32>
    %6 = arith.subf %0, %5 : vector<32x32xf32>
    %7 = arith.mulf %6, %6 : vector<32x32xf32>
    %cst_2 = arith.constant dense<0.000000e+00> : vector<32xf32>
    %8 = vector.multi_reduction <add>, %7, %cst_2 [1] : vector<32x32xf32> to vector<32xf32>
    %9 = vector.shape_cast %8 : vector<32xf32> to vector<32x1xf32>
    %cst_3 = arith.constant 3.200000e+01 : f32
    %10 = vector.broadcast %cst_3 : f32 to vector<32x1xf32>
    %11 = arith.divf %9, %10 : vector<32x1xf32>
    %cst_4 = arith.constant 9.99999974E-6 : f32
    %12 = vector.broadcast %cst_4 : f32 to vector<32x1xf32>
    %13 = arith.addf %11, %12 : vector<32x1xf32>
    %14 = math.rsqrt %13 : vector<32x1xf32>
    %15 = vector.broadcast %14 : vector<32x1xf32> to vector<32x32xf32>
    %16 = arith.mulf %6, %15 : vector<32x32xf32>
    %c0_5 = arith.constant 0 : index
    %c0_6 = arith.constant 0 : index
    %17 = vector.load %arg2[%c0_5, %c0_6] : memref<1x32xf32, #tpu.memory_space<vmem>>, vector<1x32xf32>
    %18 = vector.broadcast %17 : vector<1x32xf32> to vector<32x32xf32>
    %19 = arith.mulf %16, %18 : vector<32x32xf32>
    %c0_7 = arith.constant 0 : index
    %c0_8 = arith.constant 0 : index
    %20 = vector.load %arg3[%c0_7, %c0_8] : memref<1x32xf32, #tpu.memory_space<vmem>>, vector<1x32xf32>
    %21 = vector.broadcast %20 : vector<1x32xf32> to vector<32x32xf32>
    %22 = arith.addf %19, %21 : vector<32x32xf32>
    %23 = arith.truncf %22 : vector<32x32xf32> to vector<32x32xbf16>
    %c0_9 = arith.constant 0 : index
    %c0_10 = arith.constant 0 : index
    %24 = vector.load %arg4[%c0_9, %c0_10] : memref<32x96xbf16, #tpu.memory_space<vmem>>, vector<32x96xbf16>
    %cst_11 = arith.constant dense<0.000000e+00> : vector<32x96xf32>
    %25 = tpu.matmul %23, %24, %cst_11 {dimension_numbers = #tpu.dot_dimension_numbers<[1], [0], [0], [1], [0, 0, 1, 1], [], []>} : vector<32x32xbf16>, vector<32x96xbf16>, vector<32x96xf32> -> vector<32x96xf32>
    %c0_12 = arith.constant 0 : index
    %c0_13 = arith.constant 0 : index
    %26 = vector.load %arg5[%c0_12, %c0_13] : memref<1x96xf32, #tpu.memory_space<vmem>>, vector<1x96xf32>
    %27 = vector.broadcast %26 : vector<1x96xf32> to vector<32x96xf32>
    %28 = arith.addf %25, %27 : vector<32x96xf32>
    %29 = arith.truncf %28 : vector<32x96xf32> to vector<32x96xbf16>
    %c0_14 = arith.constant 0 : index
    %c0_15 = arith.constant 0 : index
    %30 = vector.load %arg6[%c0_14, %c0_15] : memref<32x96xbf16, #tpu.memory_space<vmem>>, vector<32x96xbf16>
    tpu.vector_store %arg6[%c0_14, %c0_15], %29 {strides = array<i32>} : memref<32x96xbf16, #tpu.memory_space<vmem>>, vector<32x96xbf16>,
    return
  }
  func.func @transform_0(%arg0: i32) -> (i32, i32) {
    %c0_i32 = arith.constant 0 : i32
    %c0_i32_0 = arith.constant 0 : i32
    return %arg0, %c0_i32 : i32, i32
  }
  func.func @transform_1(%arg0: i32) -> (i32, i32) {
    %c0_i32 = arith.constant 0 : i32
    %c0_i32_0 = arith.constant 0 : i32
    %c0_i32_1 = arith.constant 0 : i32
    return %c0_i32, %c0_i32_0 : i32, i32
  }
  func.func @transform_2(%arg0: i32) -> (i32, i32) {
    %c0_i32 = arith.constant 0 : i32
    %c0_i32_0 = arith.constant 0 : i32
    %c0_i32_1 = arith.constant 0 : i32
    return %c0_i32, %c0_i32_0 : i32, i32
  }
  func.func @transform_3(%arg0: i32) -> (i32, i32) {
    %c0_i32 = arith.constant 0 : i32
    %c0_i32_0 = arith.constant 0 : i32
    %c0_i32_1 = arith.constant 0 : i32
    return %c0_i32, %c0_i32_0 : i32, i32
  }
  func.func @transform_4(%arg0: i32) -> (i32, i32) {
    %c0_i32 = arith.constant 0 : i32
    %c0_i32_0 = arith.constant 0 : i32
    %c0_i32_1 = arith.constant 0 : i32
    return %c0_i32, %c0_i32_0 : i32, i32
  }
  func.func @transform_5(%arg0: i32) -> (i32, i32) {
    %c0_i32 = arith.constant 0 : i32
    %c0_i32_0 = arith.constant 0 : i32
    return %arg0, %c0_i32 : i32, i32
  }
}

module attributes {stable_mosaic.version = 11 : i64} {
  func.func @kernel(%arg0: i32, %arg1: memref<1x4x8x32xbf16, #tpu.memory_space<vmem>>, %arg2: memref<1x4x8x32xbf16, #tpu.memory_space<vmem>>, %arg3: memref<1x4x8x32xbf16, #tpu.memory_space<vmem>>, %arg4: memref<1x4x8x8xf32, #tpu.memory_space<vmem>>, %arg5: memref<1x1x8xf32, #tpu.memory_space<vmem>>, %arg6: memref<1x4x8x32xbf16, #tpu.memory_space<vmem>>) attributes {dimension_semantics = [#tpu.dimension_semantics<parallel>], iteration_bounds = array<i64: 1>, scalar_prefetch = 0 : i64, scratch_operands = 0 : i64, tpu.core_type = #tpu.core_type<tc>, window_params = [{transform_indices = @transform_0, window_bounds = array<i64: 1, 4, 8, 32>}, {transform_indices = @transform_1, window_bounds = array<i64: 1, 4, 8, 32>}, {transform_indices = @transform_2, window_bounds = array<i64: 1, 4, 8, 32>}, {transform_indices = @transform_3, window_bounds = array<i64: 1, 4, 8, 8>}, {transform_indices = @transform_4, window_bounds = array<i64: 1, 1, 8>}, {transform_indices = @transform_5, window_bounds = array<i64: 1, 4, 8, 32>}]} {
    %c0 = arith.constant 0 : index
    %c0_0 = arith.constant 0 : index
    %c0_1 = arith.constant 0 : index
    %c0_2 = arith.constant 0 : index
    %0 = vector.load %arg1[%c0, %c0_0, %c0_1, %c0_2] : memref<1x4x8x32xbf16, #tpu.memory_space<vmem>>, vector<1x4x8x32xbf16>
    %1 = vector.shape_cast %0 : vector<1x4x8x32xbf16> to vector<4x8x32xbf16>
    %c0_3 = arith.constant 0 : index
    %c0_4 = arith.constant 0 : index
    %c0_5 = arith.constant 0 : index
    %c0_6 = arith.constant 0 : index
    %2 = vector.load %arg2[%c0_3, %c0_4, %c0_5, %c0_6] : memref<1x4x8x32xbf16, #tpu.memory_space<vmem>>, vector<1x4x8x32xbf16>
    %3 = vector.shape_cast %2 : vector<1x4x8x32xbf16> to vector<4x8x32xbf16>
    %c0_7 = arith.constant 0 : index
    %c0_8 = arith.constant 0 : index
    %c0_9 = arith.constant 0 : index
    %c0_10 = arith.constant 0 : index
    %4 = vector.load %arg3[%c0_7, %c0_8, %c0_9, %c0_10] : memref<1x4x8x32xbf16, #tpu.memory_space<vmem>>, vector<1x4x8x32xbf16>
    %5 = vector.shape_cast %4 : vector<1x4x8x32xbf16> to vector<4x8x32xbf16>
    "tpu.trace_start"() <{level = 10 : i32, message = "hqd,hkd->hqk"}> : () -> ()
    %cst = arith.constant dense<0.000000e+00> : vector<4x8x8xf32>
    %6 = tpu.matmul %1, %3, %cst {dimension_numbers = #tpu.dot_dimension_numbers<[2], [2], [1], [1], [0, 0, 0, 1, 1, 1], [0], [0]>} : vector<4x8x32xbf16>, vector<4x8x32xbf16>, vector<4x8x8xf32> -> vector<4x8x8xf32>
    "tpu.trace_stop"() : () -> ()
    %cst_11 = arith.constant 0.176776692 : f32
    %7 = vector.broadcast %cst_11 : f32 to vector<4x8x8xf32>
    %8 = arith.mulf %6, %7 : vector<4x8x8xf32>
    %c0_12 = arith.constant 0 : index
    %c0_13 = arith.constant 0 : index
    %c0_14 = arith.constant 0 : index
    %c0_15 = arith.constant 0 : index
    %9 = vector.load %arg4[%c0_12, %c0_13, %c0_14, %c0_15] : memref<1x4x8x8xf32, #tpu.memory_space<vmem>>, vector<1x4x8x8xf32>
    %10 = vector.shape_cast %9 : vector<1x4x8x8xf32> to vector<4x8x8xf32>
    %11 = arith.addf %8, %10 : vector<4x8x8xf32>
    %c0_16 = arith.constant 0 : index
    %c0_17 = arith.constant 0 : index
    %c0_18 = arith.constant 0 : index
    %12 = vector.load %arg5[%c0_16, %c0_17, %c0_18] : memref<1x1x8xf32, #tpu.memory_space<vmem>>, vector<1x1x8xf32>
    %13 = vector.shape_cast %12 : vector<1x1x8xf32> to vector<8xf32>
    %14 = vector.shape_cast %13 : vector<8xf32> to vector<1x1x8xf32>
    %15 = vector.broadcast %14 : vector<1x1x8xf32> to vector<4x8x8xf32>
    %16 = arith.addf %11, %15 : vector<4x8x8xf32>
    %cst_19 = arith.constant dense<0xFF800000> : vector<4x8xf32>
    %17 = vector.multi_reduction <maximumf>, %16, %cst_19 [2] : vector<4x8x8xf32> to vector<4x8xf32>
    %18 = vector.shape_cast %17 : vector<4x8xf32> to vector<4x8x1xf32>
    %19 = vector.broadcast %18 : vector<4x8x1xf32> to vector<4x8x8xf32>
    %20 = arith.subf %16, %19 : vector<4x8x8xf32>
    %21 = math.exp %20 : vector<4x8x8xf32>
    %cst_20 = arith.constant dense<0.000000e+00> : vector<4x8xf32>
    %22 = vector.multi_reduction <add>, %21, %cst_20 [2] : vector<4x8x8xf32> to vector<4x8xf32>
    %23 = vector.shape_cast %22 : vector<4x8xf32> to vector<4x8x1xf32>
    %24 = tpu.reciprocal %23 {approx = true} : vector<4x8x1xf32> -> vector<4x8x1xf32>
    %25 = vector.broadcast %24 : vector<4x8x1xf32> to vector<4x8x8xf32>
    %26 = arith.mulf %21, %25 : vector<4x8x8xf32>
    %27 = arith.truncf %26 : vector<4x8x8xf32> to vector<4x8x8xbf16>
    "tpu.trace_start"() <{level = 10 : i32, message = "hqk,hkd->hqd"}> : () -> ()
    %cst_21 = arith.constant dense<0.000000e+00> : vector<4x8x32xf32>
    %28 = tpu.matmul %27, %5, %cst_21 {dimension_numbers = #tpu.dot_dimension_numbers<[2], [1], [1], [2], [0, 0, 0, 1, 1, 2], [0], [0]>} : vector<4x8x8xbf16>, vector<4x8x32xbf16>, vector<4x8x32xf32> -> vector<4x8x32xf32>
    "tpu.trace_stop"() : () -> ()
    %29 = arith.truncf %28 : vector<4x8x32xf32> to vector<4x8x32xbf16>
    %c0_22 = arith.constant 0 : index
    %c0_23 = arith.constant 0 : index
    %c0_24 = arith.constant 0 : index
    %c0_25 = arith.constant 0 : index
    %30 = vector.load %arg6[%c0_22, %c0_23, %c0_24, %c0_25] : memref<1x4x8x32xbf16, #tpu.memory_space<vmem>>, vector<1x4x8x32xbf16>
    %31 = vector.shape_cast %30 : vector<1x4x8x32xbf16> to vector<4x8x32xbf16>
    %32 = vector.shape_cast %29 : vector<4x8x32xbf16> to vector<1x4x8x32xbf16>
    tpu.vector_store %arg6[%c0_22, %c0_23, %c0_24, %c0_25], %32 {strides = array<i32>} : memref<1x4x8x32xbf16, #tpu.memory_space<vmem>>, vector<1x4x8x32xbf16>,
    return
  }
  func.func @transform_0(%arg0: i32) -> (i32, i32, i32, i32) {
    %c0_i32 = arith.constant 0 : i32
    %c0_i32_0 = arith.constant 0 : i32
    %c0_i32_1 = arith.constant 0 : i32
    %c0_i32_2 = arith.constant 0 : i32
    return %arg0, %c0_i32, %c0_i32_0, %c0_i32_1 : i32, i32, i32, i32
  }
  func.func @transform_1(%arg0: i32) -> (i32, i32, i32, i32) {
    %c0_i32 = arith.constant 0 : i32
    %c0_i32_0 = arith.constant 0 : i32
    %c0_i32_1 = arith.constant 0 : i32
    %c0_i32_2 = arith.constant 0 : i32
    return %arg0, %c0_i32, %c0_i32_0, %c0_i32_1 : i32, i32, i32, i32
  }
  func.func @transform_2(%arg0: i32) -> (i32, i32, i32, i32) {
    %c0_i32 = arith.constant 0 : i32
    %c0_i32_0 = arith.constant 0 : i32
    %c0_i32_1 = arith.constant 0 : i32
    %c0_i32_2 = arith.constant 0 : i32
    return %arg0, %c0_i32, %c0_i32_0, %c0_i32_1 : i32, i32, i32, i32
  }
  func.func @transform_3(%arg0: i32) -> (i32, i32, i32, i32) {
    %c0_i32 = arith.constant 0 : i32
    %c0_i32_0 = arith.constant 0 : i32
    %c0_i32_1 = arith.constant 0 : i32
    %c0_i32_2 = arith.constant 0 : i32
    return %arg0, %c0_i32, %c0_i32_0, %c0_i32_1 : i32, i32, i32, i32
  }
  func.func @transform_4(%arg0: i32) -> (i32, i32, i32) {
    %c0_i32 = arith.constant 0 : i32
    %c0_i32_0 = arith.constant 0 : i32
    %c0_i32_1 = arith.constant 0 : i32
    return %arg0, %c0_i32, %c0_i32_0 : i32, i32, i32
  }
  func.func @transform_5(%arg0: i32) -> (i32, i32, i32, i32) {
    %c0_i32 = arith.constant 0 : i32
    %c0_i32_0 = arith.constant 0 : i32
    %c0_i32_1 = arith.constant 0 : i32
    %c0_i32_2 = arith.constant 0 : i32
    return %arg0, %c0_i32, %c0_i32_0, %c0_i32_1 : i32, i32, i32, i32
  }
}

module attributes {stable_mosaic.version = 11 : i64} {
  func.func @kernel(%arg0: i32, %arg1: memref<64x16xf32, #tpu.memory_space<vmem>>, %arg2: memref<16x4xbf16, #tpu.memory_space<vmem>>, %arg3: memref<1x4xf32, #tpu.memory_space<vmem>>, %arg4: memref<64x4xf32, #tpu.memory_space<vmem>>) attributes {dimension_semantics = [#tpu.dimension_semantics<parallel>], iteration_bounds = array<i64: 1>, scalar_prefetch = 0 : i64, scratch_operands = 0 : i64, tpu.core_type = #tpu.core_type<tc>, window_params = [{transform_indices = @transform_0, window_bounds = array<i64: 64, 16>}, {pipeline_mode = #tpu.pipeline_mode<synchronous>, transform_indices = @transform_1, window_bounds = array<i64: 16, 4>}, {pipeline_mode = #tpu.pipeline_mode<synchronous>, transform_indices = @transform_2, window_bounds = array<i64: 1, 4>}, {transform_indices = @transform_3, window_bounds = array<i64: 64, 4>}]} {
    %c0 = arith.constant 0 : index
    %c0_0 = arith.constant 0 : index
    %0 = vector.load %arg1[%c0, %c0_0] : memref<64x16xf32, #tpu.memory_space<vmem>>, vector<64x16xf32>
    %1 = arith.truncf %0 : vector<64x16xf32> to vector<64x16xbf16>
    %c0_1 = arith.constant 0 : index
    %c0_2 = arith.constant 0 : index
    %2 = vector.load %arg2[%c0_1, %c0_2] : memref<16x4xbf16, #tpu.memory_space<vmem>>, vector<16x4xbf16>
    %cst = arith.constant dense<0.000000e+00> : vector<64x4xf32>
    %3 = tpu.matmul %1, %2, %cst {dimension_numbers = #tpu.dot_dimension_numbers<[1], [0], [0], [1], [0, 0, 1, 1], [], []>} : vector<64x16xbf16>, vector<16x4xbf16>, vector<64x4xf32> -> vector<64x4xf32>
    %c0_3 = arith.constant 0 : index
    %c0_4 = arith.constant 0 : index
    %4 = vector.load %arg3[%c0_3, %c0_4] : memref<1x4xf32, #tpu.memory_space<vmem>>, vector<1x4xf32>
    %5 = vector.broadcast %4 : vector<1x4xf32> to vector<64x4xf32>
    %6 = arith.addf %3, %5 : vector<64x4xf32>
    %c0_5 = arith.constant 0 : index
    %c0_6 = arith.constant 0 : index
    %7 = vector.load %arg4[%c0_5, %c0_6] : memref<64x4xf32, #tpu.memory_space<vmem>>, vector<64x4xf32>
    tpu.vector_store %arg4[%c0_5, %c0_6], %6 {strides = array<i32>} : memref<64x4xf32, #tpu.memory_space<vmem>>, vector<64x4xf32>,
    return
  }
  func.func @transform_0(%arg0: i32) -> (i32, i32) {
    %c0_i32 = arith.constant 0 : i32
    %c0_i32_0 = arith.constant 0 : i32
    return %arg0, %c0_i32 : i32, i32
  }
  func.func @transform_1(%arg0: i32) -> (i32, i32) {
    %c0_i32 = arith.constant 0 : i32
    %c0_i32_0 = arith.constant 0 : i32
    %c0_i32_1 = arith.constant 0 : i32
    return %c0_i32, %c0_i32_0 : i32, i32
  }
  func.func @transform_2(%arg0: i32) -> (i32, i32) {
    %c0_i32 = arith.constant 0 : i32
    %c0_i32_0 = arith.constant 0 : i32
    %c0_i32_1 = arith.constant 0 : i32
    return %c0_i32, %c0_i32_0 : i32, i32
  }
  func.func @transform_3(%arg0: i32) -> (i32, i32) {
    %c0_i32 = arith.constant 0 : i32
    %c0_i32_0 = arith.constant 0 : i32
    return %arg0, %c0_i32 : i32, i32
  }
}

module attributes {stable_mosaic.version = 11 : i64} {
  func.func @kernel(%arg0: i32, %arg1: memref<32x32xbf16, #tpu.memory_space<vmem>>, %arg2: memref<32x32xbf16, #tpu.memory_space<vmem>>, %arg3: memref<1x32xf32, #tpu.memory_space<vmem>>, %arg4: memref<32x32xf32, #tpu.memory_space<vmem>>, %arg5: memref<32x32xf32, #tpu.memory_space<vmem>>) attributes {dimension_semantics = [#tpu.dimension_semantics<parallel>], iteration_bounds = array<i64: 1>, scalar_prefetch = 0 : i64, scratch_operands = 0 : i64, tpu.core_type = #tpu.core_type<tc>, window_params = [{transform_indices = @transform_0, window_bounds = array<i64: 32, 32>}, {pipeline_mode = #tpu.pipeline_mode<synchronous>, transform_indices = @transform_1, window_bounds = array<i64: 32, 32>}, {pipeline_mode = #tpu.pipeline_mode<synchronous>, transform_indices = @transform_2, window_bounds = array<i64: 1, 32>}, {transform_indices = @transform_3, window_bounds = array<i64: 32, 32>}, {transform_indices = @transform_4, window_bounds = array<i64: 32, 32>}]} {
    %c0 = arith.constant 0 : index
    %c0_0 = arith.constant 0 : index
    %0 = vector.load %arg1[%c0, %c0_0] : memref<32x32xbf16, #tpu.memory_space<vmem>>, vector<32x32xbf16>
    %c0_1 = arith.constant 0 : index
    %c0_2 = arith.constant 0 : index
    %1 = vector.load %arg2[%c0_1, %c0_2] : memref<32x32xbf16, #tpu.memory_space<vmem>>, vector<32x32xbf16>
    %cst = arith.constant dense<0.000000e+00> : vector<32x32xf32>
    %2 = tpu.matmul %0, %1, %cst {dimension_numbers = #tpu.dot_dimension_numbers<[1], [0], [0], [1], [0, 0, 1, 1], [], []>} : vector<32x32xbf16>, vector<32x32xbf16>, vector<32x32xf32> -> vector<32x32xf32>
    %c0_3 = arith.constant 0 : index
    %c0_4 = arith.constant 0 : index
    %3 = vector.load %arg3[%c0_3, %c0_4] : memref<1x32xf32, #tpu.memory_space<vmem>>, vector<1x32xf32>
    %4 = vector.broadcast %3 : vector<1x32xf32> to vector<32x32xf32>
    %5 = arith.addf %2, %4 : vector<32x32xf32>
    %c0_5 = arith.constant 0 : index
    %c0_6 = arith.constant 0 : index
    %6 = vector.load %arg4[%c0_5, %c0_6] : memref<32x32xf32, #tpu.memory_space<vmem>>, vector<32x32xf32>
    %7 = arith.addf %5, %6 : vector<32x32xf32>
    %c0_7 = arith.constant 0 : index
    %c0_8 = arith.constant 0 : index
    %8 = vector.load %arg5[%c0_7, %c0_8] : memref<32x32xf32, #tpu.memory_space<vmem>>, vector<32x32xf32>
    tpu.vector_store %arg5[%c0_7, %c0_8], %7 {strides = array<i32>} : memref<32x32xf32, #tpu.memory_space<vmem>>, vector<32x32xf32>,
    return
  }
  func.func @transform_0(%arg0: i32) -> (i32, i32) {
    %c0_i32 = arith.constant 0 : i32
    %c0_i32_0 = arith.constant 0 : i32
    return %arg0, %c0_i32 : i32, i32
  }
  func.func @transform_1(%arg0: i32) -> (i32, i32) {
    %c0_i32 = arith.constant 0 : i32
    %c0_i32_0 = arith.constant 0 : i32
    %c0_i32_1 = arith.constant 0 : i32
    return %c0_i32, %c0_i32_0 : i32, i32
  }
  func.func @transform_2(%arg0: i32) -> (i32, i32) {
    %c0_i32 = arith.constant 0 : i32
    %c0_i32_0 = arith.constant 0 : i32
    %c0_i32_1 = arith.constant 0 : i32
    return %c0_i32, %c0_i32_0 : i32, i32
  }
  func.func @transform_3(%arg0: i32) -> (i32, i32) {
    %c0_i32 = arith.constant 0 : i32
    %c0_i32_0 = arith.constant 0 : i32
    return %arg0, %c0_i32 : i32, i32
  }
  func.func @transform_4(%arg0: i32) -> (i32, i32) {
    %c0_i32 = arith.constant 0 : i32
    %c0_i32_0 = arith.constant 0 : i32
    return %arg0, %c0_i32 : i32, i32
  }
}

module attributes {stable_mosaic.version = 11 : i64} {
  func.func @kernel(%arg0: i32, %arg1: memref<32x64xf32, #tpu.memory_space<vmem>>, %arg2: memref<64x32xbf16, #tpu.memory_space<vmem>>, %arg3: memref<1x32xf32, #tpu.memory_space<vmem>>, %arg4: memref<32x32xf32, #tpu.memory_space<vmem>>, %arg5: memref<32x32xf32, #tpu.memory_space<vmem>>) attributes {dimension_semantics = [#tpu.dimension_semantics<parallel>], iteration_bounds = array<i64: 1>, scalar_prefetch = 0 : i64, scratch_operands = 0 : i64, tpu.core_type = #tpu.core_type<tc>, window_params = [{transform_indices = @transform_0, window_bounds = array<i64: 32, 64>}, {pipeline_mode = #tpu.pipeline_mode<synchronous>, transform_indices = @transform_1, window_bounds = array<i64: 64, 32>}, {pipeline_mode = #tpu.pipeline_mode<synchronous>, transform_indices = @transform_2, window_bounds = array<i64: 1, 32>}, {transform_indices = @transform_3, window_bounds = array<i64: 32, 32>}, {transform_indices = @transform_4, window_bounds = array<i64: 32, 32>}]} {
    %c0 = arith.constant 0 : index
    %c0_0 = arith.constant 0 : index
    %0 = vector.load %arg1[%c0, %c0_0] : memref<32x64xf32, #tpu.memory_space<vmem>>, vector<32x64xf32>
    %1 = arith.truncf %0 : vector<32x64xf32> to vector<32x64xbf16>
    %c0_1 = arith.constant 0 : index
    %c0_2 = arith.constant 0 : index
    %2 = vector.load %arg2[%c0_1, %c0_2] : memref<64x32xbf16, #tpu.memory_space<vmem>>, vector<64x32xbf16>
    %cst = arith.constant dense<0.000000e+00> : vector<32x32xf32>
    %3 = tpu.matmul %1, %2, %cst {dimension_numbers = #tpu.dot_dimension_numbers<[1], [0], [0], [1], [0, 0, 1, 1], [], []>} : vector<32x64xbf16>, vector<64x32xbf16>, vector<32x32xf32> -> vector<32x32xf32>
    %c0_3 = arith.constant 0 : index
    %c0_4 = arith.constant 0 : index
    %4 = vector.load %arg3[%c0_3, %c0_4] : memref<1x32xf32, #tpu.memory_space<vmem>>, vector<1x32xf32>
    %5 = vector.broadcast %4 : vector<1x32xf32> to vector<32x32xf32>
    %6 = arith.addf %3, %5 : vector<32x32xf32>
    %c0_5 = arith.constant 0 : index
    %c0_6 = arith.constant 0 : index
    %7 = vector.load %arg4[%c0_5, %c0_6] : memref<32x32xf32, #tpu.memory_space<vmem>>, vector<32x32xf32>
    %8 = arith.addf %6, %7 : vector<32x32xf32>
    %c0_7 = arith.constant 0 : index
    %c0_8 = arith.constant 0 : index
    %9 = vector.load %arg5[%c0_7, %c0_8] : memref<32x32xf32, #tpu.memory_space<vmem>>, vector<32x32xf32>
    tpu.vector_store %arg5[%c0_7, %c0_8], %8 {strides = array<i32>} : memref<32x32xf32, #tpu.memory_space<vmem>>, vector<32x32xf32>,
    return
  }
  func.func @transform_0(%arg0: i32) -> (i32, i32) {
    %c0_i32 = arith.constant 0 : i32
    %c0_i32_0 = arith.constant 0 : i32
    return %arg0, %c0_i32 : i32, i32
  }
  func.func @transform_1(%arg0: i32) -> (i32, i32) {
    %c0_i32 = arith.constant 0 : i32
    %c0_i32_0 = arith.constant 0 : i32
    %c0_i32_1 = arith.constant 0 : i32
    return %c0_i32, %c0_i32_0 : i32, i32
  }
  func.func @transform_2(%arg0: i32) -> (i32, i32) {
    %c0_i32 = arith.constant 0 : i32
    %c0_i32_0 = arith.constant 0 : i32
    %c0_i32_1 = arith.constant 0 : i32
    return %c0_i32, %c0_i32_0 : i32, i32
  }
  func.func @transform_3(%arg0: i32) -> (i32, i32) {
    %c0_i32 = arith.constant 0 : i32
    %c0_i32_0 = arith.constant 0 : i32
    return %arg0, %c0_i32 : i32, i32
  }
  func.func @transform_4(%arg0: i32) -> (i32, i32) {
    %c0_i32 = arith.constant 0 : i32
    %c0_i32_0 = arith.constant 0 : i32
    return %arg0, %c0_i32 : i32, i32
  }
}

module attributes {stable_mosaic.version = 11 : i64} {
  func.func @kernel(%arg0: i32, %arg1: memref<32x32xf32, #tpu.memory_space<vmem>>, %arg2: memref<1x32xf32, #tpu.memory_space<vmem>>, %arg3: memref<1x32xf32, #tpu.memory_space<vmem>>, %arg4: memref<32x64xbf16, #tpu.memory_space<vmem>>, %arg5: memref<1x64xf32, #tpu.memory_space<vmem>>, %arg6: memref<32x64xf32, #tpu.memory_space<vmem>>) attributes {dimension_semantics = [#tpu.dimension_semantics<parallel>], iteration_bounds = array<i64: 1>, scalar_prefetch = 0 : i64, scratch_operands = 0 : i64, tpu.core_type = #tpu.core_type<tc>, window_params = [{transform_indices = @transform_0, window_bounds = array<i64: 32, 32>}, {pipeline_mode = #tpu.pipeline_mode<synchronous>, transform_indices = @transform_1, window_bounds = array<i64: 1, 32>}, {pipeline_mode = #tpu.pipeline_mode<synchronous>, transform_indices = @transform_2, window_bounds = array<i64: 1, 32>}, {pipeline_mode = #tpu.pipeline_mode<synchronous>, transform_indices = @transform_3, window_bounds = array<i64: 32, 64>}, {pipeline_mode = #tpu.pipeline_mode<synchronous>, transform_indices = @transform_4, window_bounds = array<i64: 1, 64>}, {transform_indices = @transform_5, window_bounds = array<i64: 32, 64>}]} {
    %c0 = arith.constant 0 : index
    %c0_0 = arith.constant 0 : index
    %0 = vector.load %arg1[%c0, %c0_0] : memref<32x32xf32, #tpu.memory_space<vmem>>, vector<32x32xf32>
    %cst = arith.constant dense<0.000000e+00> : vector<32xf32>
    %1 = vector.multi_reduction <add>, %0, %cst [1] : vector<32x32xf32> to vector<32xf32>
    %2 = vector.shape_cast %1 : vector<32xf32> to vector<32x1xf32>
    %cst_1 = arith.constant 3.200000e+01 : f32
    %3 = vector.broadcast %cst_1 : f32 to vector<32x1xf32>
    %4 = arith.divf %2, %3 : vector<32x1xf32>
    %5 = vector.broadcast %4 : vector<32x1xf32> to vector<32x32xf32>
    %6 = arith.subf %0, %5 : vector<32x32xf32>
    %7 = arith.mulf %6, %6 : vector<32x32xf32>
    %cst_2 = arith.constant dense<0.000000e+00> : vector<32xf32>
    %8 = vector.multi_reduction <add>, %7, %cst_2 [1] : vector<32x32xf32> to vector<32xf32>
    %9 = vector.shape_cast %8 : vector<32xf32> to vector<32x1xf32>
    %cst_3 = arith.constant 3.200000e+01 : f32
    %10 = vector.broadcast %cst_3 : f32 to vector<32x1xf32>
    %11 = arith.divf %9, %10 : vector<32x1xf32>
    %cst_4 = arith.constant 9.99999974E-6 : f32
    %12 = vector.broadcast %cst_4 : f32 to vector<32x1xf32>
    %13 = arith.addf %11, %12 : vector<32x1xf32>
    %14 = math.rsqrt %13 : vector<32x1xf32>
    %15 = vector.broadcast %14 : vector<32x1xf32> to vector<32x32xf32>
    %16 = arith.mulf %6, %15 : vector<32x32xf32>
    %c0_5 = arith.constant 0 : index
    %c0_6 = arith.constant 0 : index
    %17 = vector.load %arg2[%c0_5, %c0_6] : memref<1x32xf32, #tpu.memory_space<vmem>>, vector<1x32xf32>
    %18 = vector.broadcast %17 : vector<1x32xf32> to vector<32x32xf32>
    %19 = arith.mulf %16, %18 : vector<32x32xf32>
    %c0_7 = arith.constant 0 : index
    %c0_8 = arith.constant 0 : index
    %20 = vector.load %arg3[%c0_7, %c0_8] : memref<1x32xf32, #tpu.memory_space<vmem>>, vector<1x32xf32>
    %21 = vector.broadcast %20 : vector<1x32xf32> to vector<32x32xf32>
    %22 = arith.addf %19, %21 : vector<32x32xf32>
    %23 = arith.truncf %22 : vector<32x32xf32> to vector<32x32xbf16>
    %c0_9 = arith.constant 0 : index
    %c0_10 = arith.constant 0 : index
    %24 = vector.load %arg4[%c0_9, %c0_10] : memref<32x64xbf16, #tpu.memory_space<vmem>>, vector<32x64xbf16>
    %cst_11 = arith.constant dense<0.000000e+00> : vector<32x64xf32>
    %25 = tpu.matmul %23, %24, %cst_11 {dimension_numbers = #tpu.dot_dimension_numbers<[1], [0], [0], [1], [0, 0, 1, 1], [], []>} : vector<32x32xbf16>, vector<32x64xbf16>, vector<32x64xf32> -> vector<32x64xf32>
    %c0_12 = arith.constant 0 : index
    %c0_13 = arith.constant 0 : index
    %26 = vector.load %arg5[%c0_12, %c0_13] : memref<1x64xf32, #tpu.memory_space<vmem>>, vector<1x64xf32>
    %27 = vector.broadcast %26 : vector<1x64xf32> to vector<32x64xf32>
    %28 = arith.addf %25, %27 : vector<32x64xf32>
    %29 = arith.mulf %28, %28 : vector<32x64xf32>
    %30 = arith.mulf %28, %29 : vector<32x64xf32>
    %cst_14 = arith.constant 4.471500e-02 : f32
    %31 = vector.broadcast %cst_14 : f32 to vector<32x64xf32>
    %32 = arith.mulf %31, %30 : vector<32x64xf32>
    %33 = arith.addf %28, %32 : vector<32x64xf32>
    %cst_15 = arith.constant 0.797884583 : f32
    %34 = vector.broadcast %cst_15 : f32 to vector<32x64xf32>
    %35 = arith.mulf %34, %33 : vector<32x64xf32>
    %36 = math.tanh %35 : vector<32x64xf32>
    %cst_16 = arith.constant 1.000000e+00 : f32
    %37 = vector.broadcast %cst_16 : f32 to vector<32x64xf32>
    %38 = arith.addf %37, %36 : vector<32x64xf32>
    %cst_17 = arith.constant 5.000000e-01 : f32
    %39 = vector.broadcast %cst_17 : f32 to vector<32x64xf32>
    %40 = arith.mulf %39, %38 : vector<32x64xf32>
    %41 = arith.mulf %28, %40 : vector<32x64xf32>
    %c0_18 = arith.constant 0 : index
    %c0_19 = arith.constant 0 : index
    %42 = vector.load %arg6[%c0_18, %c0_19] : memref<32x64xf32, #tpu.memory_space<vmem>>, vector<32x64xf32>
    tpu.vector_store %arg6[%c0_18, %c0_19], %41 {strides = array<i32>} : memref<32x64xf32, #tpu.memory_space<vmem>>, vector<32x64xf32>,
    return
  }
  func.func @transform_0(%arg0: i32) -> (i32, i32) {
    %c0_i32 = arith.constant 0 : i32
    %c0_i32_0 = arith.constant 0 : i32
    return %arg0, %c0_i32 : i32, i32
  }
  func.func @transform_1(%arg0: i32) -> (i32, i32) {
    %c0_i32 = arith.constant 0 : i32
    %c0_i32_0 = arith.constant 0 : i32
    %c0_i32_1 = arith.constant 0 : i32
    return %c0_i32, %c0_i32_0 : i32, i32
  }
  func.func @transform_2(%arg0: i32) -> (i32, i32) {
    %c0_i32 = arith.constant 0 : i32
    %c0_i32_0 = arith.constant 0 : i32
    %c0_i32_1 = arith.constant 0 : i32
    return %c0_i32, %c0_i32_0 : i32, i32
  }
  func.func @transform_3(%arg0: i32) -> (i32, i32) {
    %c0_i32 = arith.constant 0 : i32
    %c0_i32_0 = arith.constant 0 : i32
    %c0_i32_1 = arith.constant 0 : i32
    return %c0_i32, %c0_i32_0 : i32, i32
  }
  func.func @transform_4(%arg0: i32) -> (i32, i32) {
    %c0_i32 = arith.constant 0 : i32
    %c0_i32_0 = arith.constant 0 : i32
    %c0_i32_1 = arith.constant 0 : i32
    return %c0_i32, %c0_i32_0 : i32, i32
  }
  func.func @transform_5(%arg0: i32) -> (i32, i32) {
    %c0_i32 = arith.constant 0 : i32
    %c0_i32_0 = arith.constant 0 : i32
    return %arg0, %c0_i32 : i32, i32
  }
}

module attributes {stable_mosaic.version = 11 : i64} {
  func.func @kernel(%arg0: i32, %arg1: memref<1x32x4x8xbf16, #tpu.memory_space<vmem>>, %arg2: memref<1x32x4x8xbf16, #tpu.memory_space<vmem>>, %arg3: memref<1x32x4x8xbf16, #tpu.memory_space<vmem>>, %arg4: memref<1x32x1x4xf32, #tpu.memory_space<vmem>>, %arg5: memref<1x32x4x8xbf16, #tpu.memory_space<vmem>>) attributes {dimension_semantics = [#tpu.dimension_semantics<parallel>], iteration_bounds = array<i64: 1>, scalar_prefetch = 0 : i64, scratch_operands = 0 : i64, tpu.core_type = #tpu.core_type<tc>, window_params = [{transform_indices = @transform_0, window_bounds = array<i64: 1, 32, 4, 8>}, {transform_indices = @transform_1, window_bounds = array<i64: 1, 32, 4, 8>}, {transform_indices = @transform_2, window_bounds = array<i64: 1, 32, 4, 8>}, {transform_indices = @transform_3, window_bounds = array<i64: 1, 32, 1, 4>}, {transform_indices = @transform_4, window_bounds = array<i64: 1, 32, 4, 8>}]} {
    %c0 = arith.constant 0 : index
    %c0_0 = arith.constant 0 : index
    %c0_1 = arith.constant 0 : index
    %c0_2 = arith.constant 0 : index
    %0 = vector.load %arg1[%c0, %c0_0, %c0_1, %c0_2] : memref<1x32x4x8xbf16, #tpu.memory_space<vmem>>, vector<1x32x4x8xbf16>
    %1 = vector.shape_cast %0 : vector<1x32x4x8xbf16> to vector<32x4x8xbf16>
    %c0_3 = arith.constant 0 : index
    %c0_4 = arith.constant 0 : index
    %c0_5 = arith.constant 0 : index
    %c0_6 = arith.constant 0 : index
    %2 = vector.load %arg2[%c0_3, %c0_4, %c0_5, %c0_6] : memref<1x32x4x8xbf16, #tpu.memory_space<vmem>>, vector<1x32x4x8xbf16>
    %3 = vector.shape_cast %2 : vector<1x32x4x8xbf16> to vector<32x4x8xbf16>
    %c0_7 = arith.constant 0 : index
    %c0_8 = arith.constant 0 : index
    %c0_9 = arith.constant 0 : index
    %c0_10 = arith.constant 0 : index
    %4 = vector.load %arg3[%c0_7, %c0_8, %c0_9, %c0_10] : memref<1x32x4x8xbf16, #tpu.memory_space<vmem>>, vector<1x32x4x8xbf16>
    %5 = vector.shape_cast %4 : vector<1x32x4x8xbf16> to vector<32x4x8xbf16>
    "tpu.trace_start"() <{level = 10 : i32, message = "grd,gsd->grs"}> : () -> ()
    %cst = arith.constant dense<0.000000e+00> : vector<32x4x4xf32>
    %6 = tpu.matmul %1, %3, %cst {dimension_numbers = #tpu.dot_dimension_numbers<[2], [2], [1], [1], [0, 0, 0, 1, 1, 1], [0], [0]>} : vector<32x4x8xbf16>, vector<32x4x8xbf16>, vector<32x4x4xf32> -> vector<32x4x4xf32>
    "tpu.trace_stop"() : () -> ()
    %cst_11 = arith.constant 0.353553385 : f32
    %7 = vector.broadcast %cst_11 : f32 to vector<32x4x4xf32>
    %8 = arith.mulf %6, %7 : vector<32x4x4xf32>
    %c0_12 = arith.constant 0 : index
    %c0_13 = arith.constant 0 : index
    %c0_14 = arith.constant 0 : index
    %c0_15 = arith.constant 0 : index
    %9 = vector.load %arg4[%c0_12, %c0_13, %c0_14, %c0_15] : memref<1x32x1x4xf32, #tpu.memory_space<vmem>>, vector<1x32x1x4xf32>
    %10 = vector.shape_cast %9 : vector<1x32x1x4xf32> to vector<32x1x4xf32>
    %11 = vector.broadcast %10 : vector<32x1x4xf32> to vector<32x4x4xf32>
    %12 = arith.addf %8, %11 : vector<32x4x4xf32>
    %cst_16 = arith.constant dense<0xFF800000> : vector<32x4xf32>
    %13 = vector.multi_reduction <maximumf>, %12, %cst_16 [2] : vector<32x4x4xf32> to vector<32x4xf32>
    %14 = vector.shape_cast %13 : vector<32x4xf32> to vector<32x4x1xf32>
    %15 = vector.broadcast %14 : vector<32x4x1xf32> to vector<32x4x4xf32>
    %16 = arith.subf %12, %15 : vector<32x4x4xf32>
    %17 = math.exp %16 : vector<32x4x4xf32>
    %cst_17 = arith.constant dense<0.000000e+00> : vector<32x4xf32>
    %18 = vector.multi_reduction <add>, %17, %cst_17 [2] : vector<32x4x4xf32> to vector<32x4xf32>
    %19 = vector.shape_cast %18 : vector<32x4xf32> to vector<32x4x1xf32>
    %20 = tpu.reciprocal %19 {approx = true} : vector<32x4x1xf32> -> vector<32x4x1xf32>
    %21 = vector.broadcast %20 : vector<32x4x1xf32> to vector<32x4x4xf32>
    %22 = arith.mulf %17, %21 : vector<32x4x4xf32>
    %23 = arith.truncf %22 : vector<32x4x4xf32> to vector<32x4x4xbf16>
    "tpu.trace_start"() <{level = 10 : i32, message = "grs,gsd->grd"}> : () -> ()
    %cst_18 = arith.constant dense<0.000000e+00> : vector<32x4x8xf32>
    %24 = tpu.matmul %23, %5, %cst_18 {dimension_numbers = #tpu.dot_dimension_numbers<[2], [1], [1], [2], [0, 0, 0, 1, 1, 2], [0], [0]>} : vector<32x4x4xbf16>, vector<32x4x8xbf16>, vector<32x4x8xf32> -> vector<32x4x8xf32>
    "tpu.trace_stop"() : () -> ()
    %25 = arith.truncf %24 : vector<32x4x8xf32> to vector<32x4x8xbf16>
    %c0_19 = arith.constant 0 : index
    %c0_20 = arith.constant 0 : index
    %c0_21 = arith.constant 0 : index
    %c0_22 = arith.constant 0 : index
    %26 = vector.load %arg5[%c0_19, %c0_20, %c0_21, %c0_22] : memref<1x32x4x8xbf16, #tpu.memory_space<vmem>>, vector<1x32x4x8xbf16>
    %27 = vector.shape_cast %26 : vector<1x32x4x8xbf16> to vector<32x4x8xbf16>
    %28 = vector.shape_cast %25 : vector<32x4x8xbf16> to vector<1x32x4x8xbf16>
    tpu.vector_store %arg5[%c0_19, %c0_20, %c0_21, %c0_22], %28 {strides = array<i32>} : memref<1x32x4x8xbf16, #tpu.memory_space<vmem>>, vector<1x32x4x8xbf16>,
    return
  }
  func.func @transform_0(%arg0: i32) -> (i32, i32, i32, i32) {
    %c0_i32 = arith.constant 0 : i32
    %c0_i32_0 = arith.constant 0 : i32
    %c0_i32_1 = arith.constant 0 : i32
    %c0_i32_2 = arith.constant 0 : i32
    return %arg0, %c0_i32, %c0_i32_0, %c0_i32_1 : i32, i32, i32, i32
  }
  func.func @transform_1(%arg0: i32) -> (i32, i32, i32, i32) {
    %c0_i32 = arith.constant 0 : i32
    %c0_i32_0 = arith.constant 0 : i32
    %c0_i32_1 = arith.constant 0 : i32
    %c0_i32_2 = arith.constant 0 : i32
    return %arg0, %c0_i32, %c0_i32_0, %c0_i32_1 : i32, i32, i32, i32
  }
  func.func @transform_2(%arg0: i32) -> (i32, i32, i32, i32) {
    %c0_i32 = arith.constant 0 : i32
    %c0_i32_0 = arith.constant 0 : i32
    %c0_i32_1 = arith.constant 0 : i32
    %c0_i32_2 = arith.constant 0 : i32
    return %arg0, %c0_i32, %c0_i32_0, %c0_i32_1 : i32, i32, i32, i32
  }
  func.func @transform_3(%arg0: i32) -> (i32, i32, i32, i32) {
    %c0_i32 = arith.constant 0 : i32
    %c0_i32_0 = arith.constant 0 : i32
    %c0_i32_1 = arith.constant 0 : i32
    %c0_i32_2 = arith.constant 0 : i32
    return %arg0, %c0_i32, %c0_i32_0, %c0_i32_1 : i32, i32, i32, i32
  }
  func.func @transform_4(%arg0: i32) -> (i32, i32, i32, i32) {
    %c0_i32 = arith.constant 0 : i32
    %c0_i32_0 = arith.constant 0 : i32
    %c0_i32_1 = arith.constant 0 : i32
    %c0_i32_2 = arith.constant 0 : i32
    return %arg0, %c0_i32, %c0_i32_0, %c0_i32_1 : i32, i32, i32, i32
  }
}

module attributes {stable_mosaic.version = 11 : i64} {
  func.func @kernel(%arg0: i32, %arg1: memref<32x32xf32, #tpu.memory_space<vmem>>, %arg2: memref<32x8xbf16, #tpu.memory_space<vmem>>, %arg3: memref<1x8xf32, #tpu.memory_space<vmem>>, %arg4: memref<32x8xbf16, #tpu.memory_space<vmem>>) attributes {dimension_semantics = [#tpu.dimension_semantics<parallel>], iteration_bounds = array<i64: 1>, scalar_prefetch = 0 : i64, scratch_operands = 0 : i64, tpu.core_type = #tpu.core_type<tc>, window_params = [{transform_indices = @transform_0, window_bounds = array<i64: 32, 32>}, {pipeline_mode = #tpu.pipeline_mode<synchronous>, transform_indices = @transform_1, window_bounds = array<i64: 32, 8>}, {pipeline_mode = #tpu.pipeline_mode<synchronous>, transform_indices = @transform_2, window_bounds = array<i64: 1, 8>}, {transform_indices = @transform_3, window_bounds = array<i64: 32, 8>}]} {
    %c0 = arith.constant 0 : index
    %c0_0 = arith.constant 0 : index
    %0 = vector.load %arg1[%c0, %c0_0] : memref<32x32xf32, #tpu.memory_space<vmem>>, vector<32x32xf32>
    %1 = arith.truncf %0 : vector<32x32xf32> to vector<32x32xbf16>
    %c0_1 = arith.constant 0 : index
    %c0_2 = arith.constant 0 : index
    %2 = vector.load %arg2[%c0_1, %c0_2] : memref<32x8xbf16, #tpu.memory_space<vmem>>, vector<32x8xbf16>
    %cst = arith.constant dense<0.000000e+00> : vector<32x8xf32>
    %3 = tpu.matmul %1, %2, %cst {dimension_numbers = #tpu.dot_dimension_numbers<[1], [0], [0], [1], [0, 0, 1, 1], [], []>} : vector<32x32xbf16>, vector<32x8xbf16>, vector<32x8xf32> -> vector<32x8xf32>
    %c0_3 = arith.constant 0 : index
    %c0_4 = arith.constant 0 : index
    %4 = vector.load %arg3[%c0_3, %c0_4] : memref<1x8xf32, #tpu.memory_space<vmem>>, vector<1x8xf32>
    %5 = vector.broadcast %4 : vector<1x8xf32> to vector<32x8xf32>
    %6 = arith.addf %3, %5 : vector<32x8xf32>
    %7 = arith.truncf %6 : vector<32x8xf32> to vector<32x8xbf16>
    %c0_5 = arith.constant 0 : index
    %c0_6 = arith.constant 0 : index
    %8 = vector.load %arg4[%c0_5, %c0_6] : memref<32x8xbf16, #tpu.memory_space<vmem>>, vector<32x8xbf16>
    tpu.vector_store %arg4[%c0_5, %c0_6], %7 {strides = array<i32>} : memref<32x8xbf16, #tpu.memory_space<vmem>>, vector<32x8xbf16>,
    return
  }
  func.func @transform_0(%arg0: i32) -> (i32, i32) {
    %c0_i32 = arith.constant 0 : i32
    %c0_i32_0 = arith.constant 0 : i32
    return %arg0, %c0_i32 : i32, i32
  }
  func.func @transform_1(%arg0: i32) -> (i32, i32) {
    %c0_i32 = arith.constant 0 : i32
    %c0_i32_0 = arith.constant 0 : i32
    %c0_i32_1 = arith.constant 0 : i32
    return %c0_i32, %c0_i32_0 : i32, i32
  }
  func.func @transform_2(%arg0: i32) -> (i32, i32) {
    %c0_i32 = arith.constant 0 : i32
    %c0_i32_0 = arith.constant 0 : i32
    %c0_i32_1 = arith.constant 0 : i32
    return %c0_i32, %c0_i32_0 : i32, i32
  }
  func.func @transform_3(%arg0: i32) -> (i32, i32) {
    %c0_i32 = arith.constant 0 : i32
    %c0_i32_0 = arith.constant 0 : i32
    return %arg0, %c0_i32 : i32, i32
  }
}

module attributes {stable_mosaic.version = 11 : i64} {
  func.func @kernel(%arg0: i32, %arg1: memref<1x32x4xbf16, #tpu.memory_space<vmem>>, %arg2: memref<1x4x32xbf16, #tpu.memory_space<vmem>>, %arg3: memref<1x32x32xbf16, #tpu.memory_space<vmem>>) attributes {dimension_semantics = [#tpu.dimension_semantics<parallel>], iteration_bounds = array<i64: 1>, scalar_prefetch = 0 : i64, scratch_operands = 0 : i64, tpu.core_type = #tpu.core_type<tc>, window_params = [{transform_indices = @transform_0, window_bounds = array<i64: 1, 32, 4>}, {transform_indices = @transform_1, window_bounds = array<i64: 1, 4, 32>}, {transform_indices = @transform_2, window_bounds = array<i64: 1, 32, 32>}]} {
    %c0 = arith.constant 0 : index
    %c0_0 = arith.constant 0 : index
    %c0_1 = arith.constant 0 : index
    %0 = vector.load %arg1[%c0, %c0_0, %c0_1] : memref<1x32x4xbf16, #tpu.memory_space<vmem>>, vector<1x32x4xbf16>
    %1 = vector.shape_cast %0 : vector<1x32x4xbf16> to vector<32x4xbf16>
    %c0_2 = arith.constant 0 : index
    %c0_3 = arith.constant 0 : index
    %c0_4 = arith.constant 0 : index
    %2 = vector.load %arg2[%c0_2, %c0_3, %c0_4] : memref<1x4x32xbf16, #tpu.memory_space<vmem>>, vector<1x4x32xbf16>
    %3 = vector.shape_cast %2 : vector<1x4x32xbf16> to vector<4x32xbf16>
    %cst = arith.constant dense<0.000000e+00> : vector<32x32xf32>
    %4 = tpu.matmul %1, %3, %cst {dimension_numbers = #tpu.dot_dimension_numbers<[1], [0], [0], [1], [0, 0, 1, 1], [], []>} : vector<32x4xbf16>, vector<4x32xbf16>, vector<32x32xf32> -> vector<32x32xf32>
    %cst_5 = arith.constant 2.500000e-01 : f32
    %5 = vector.broadcast %cst_5 : f32 to vector<32x32xf32>
    %6 = arith.mulf %4, %5 : vector<32x32xf32>
    %7 = arith.truncf %6 : vector<32x32xf32> to vector<32x32xbf16>
    %c0_6 = arith.constant 0 : index
    %c0_7 = arith.constant 0 : index
    %c0_8 = arith.constant 0 : index
    %8 = vector.load %arg3[%c0_6, %c0_7, %c0_8] : memref<1x32x32xbf16, #tpu.memory_space<vmem>>, vector<1x32x32xbf16>
    %9 = vector.shape_cast %8 : vector<1x32x32xbf16> to vector<32x32xbf16>
    %10 = vector.shape_cast %7 : vector<32x32xbf16> to vector<1x32x32xbf16>
    tpu.vector_store %arg3[%c0_6, %c0_7, %c0_8], %10 {strides = array<i32>} : memref<1x32x32xbf16, #tpu.memory_space<vmem>>, vector<1x32x32xbf16>,
    return
  }
  func.func @transform_0(%arg0: i32) -> (i32, i32, i32) {
    %c0_i32 = arith.constant 0 : i32
    %c0_i32_0 = arith.constant 0 : i32
    %c0_i32_1 = arith.constant 0 : i32
    return %arg0, %c0_i32, %c0_i32_0 : i32, i32, i32
  }
  func.func @transform_1(%arg0: i32) -> (i32, i32, i32) {
    %c0_i32 = arith.constant 0 : i32
    %c0_i32_0 = arith.constant 0 : i32
    %c0_i32_1 = arith.constant 0 : i32
    return %arg0, %c0_i32, %c0_i32_0 : i32, i32, i32
  }
  func.func @transform_2(%arg0: i32) -> (i32, i32, i32) {
    %c0_i32 = arith.constant 0 : i32
    %c0_i32_0 = arith.constant 0 : i32
    %c0_i32_1 = arith.constant 0 : i32
    return %arg0, %c0_i32, %c0_i32_0 : i32, i32, i32
  }
}

module attributes {stable_mosaic.version = 11 : i64} {
  func.func @kernel(%arg0: i32, %arg1: memref<64x16xf32, #tpu.memory_space<vmem>>, %arg2: memref<16x32xbf16, #tpu.memory_space<vmem>>, %arg3: memref<1x32xf32, #tpu.memory_space<vmem>>, %arg4: memref<64x32xf32, #tpu.memory_space<vmem>>) attributes {dimension_semantics = [#tpu.dimension_semantics<parallel>], iteration_bounds = array<i64: 1>, scalar_prefetch = 0 : i64, scratch_operands = 0 : i64, tpu.core_type = #tpu.core_type<tc>, window_params = [{transform_indices = @transform_0, window_bounds = array<i64: 64, 16>}, {pipeline_mode = #tpu.pipeline_mode<synchronous>, transform_indices = @transform_1, window_bounds = array<i64: 16, 32>}, {pipeline_mode = #tpu.pipeline_mode<synchronous>, transform_indices = @transform_2, window_bounds = array<i64: 1, 32>}, {transform_indices = @transform_3, window_bounds = array<i64: 64, 32>}]} {
    %c0 = arith.constant 0 : index
    %c0_0 = arith.constant 0 : index
    %0 = vector.load %arg1[%c0, %c0_0] : memref<64x16xf32, #tpu.memory_space<vmem>>, vector<64x16xf32>
    %1 = arith.truncf %0 : vector<64x16xf32> to vector<64x16xbf16>
    %c0_1 = arith.constant 0 : index
    %c0_2 = arith.constant 0 : index
    %2 = vector.load %arg2[%c0_1, %c0_2] : memref<16x32xbf16, #tpu.memory_space<vmem>>, vector<16x32xbf16>
    %cst = arith.constant dense<0.000000e+00> : vector<64x32xf32>
    %3 = tpu.matmul %1, %2, %cst {dimension_numbers = #tpu.dot_dimension_numbers<[1], [0], [0], [1], [0, 0, 1, 1], [], []>} : vector<64x16xbf16>, vector<16x32xbf16>, vector<64x32xf32> -> vector<64x32xf32>
    %c0_3 = arith.constant 0 : index
    %c0_4 = arith.constant 0 : index
    %4 = vector.load %arg3[%c0_3, %c0_4] : memref<1x32xf32, #tpu.memory_space<vmem>>, vector<1x32xf32>
    %5 = vector.broadcast %4 : vector<1x32xf32> to vector<64x32xf32>
    %6 = arith.addf %3, %5 : vector<64x32xf32>
    %cst_5 = arith.constant 0.000000e+00 : f32
    %7 = vector.broadcast %cst_5 : f32 to vector<64x32xf32>
    %8 = arith.maximumf %6, %7 : vector<64x32xf32>
    %c0_6 = arith.constant 0 : index
    %c0_7 = arith.constant 0 : index
    %9 = vector.load %arg4[%c0_6, %c0_7] : memref<64x32xf32, #tpu.memory_space<vmem>>, vector<64x32xf32>
    tpu.vector_store %arg4[%c0_6, %c0_7], %8 {strides = array<i32>} : memref<64x32xf32, #tpu.memory_space<vmem>>, vector<64x32xf32>,
    return
  }
  func.func @transform_0(%arg0: i32) -> (i32, i32) {
    %c0_i32 = arith.constant 0 : i32
    %c0_i32_0 = arith.constant 0 : i32
    return %arg0, %c0_i32 : i32, i32
  }
  func.func @transform_1(%arg0: i32) -> (i32, i32) {
    %c0_i32 = arith.constant 0 : i32
    %c0_i32_0 = arith.constant 0 : i32
    %c0_i32_1 = arith.constant 0 : i32
    return %c0_i32, %c0_i32_0 : i32, i32
  }
  func.func @transform_2(%arg0: i32) -> (i32, i32) {
    %c0_i32 = arith.constant 0 : i32
    %c0_i32_0 = arith.constant 0 : i32
    %c0_i32_1 = arith.constant 0 : i32
    return %c0_i32, %c0_i32_0 : i32, i32
  }
  func.func @transform_3(%arg0: i32) -> (i32, i32) {
    %c0_i32 = arith.constant 0 : i32
    %c0_i32_0 = arith.constant 0 : i32
    return %arg0, %c0_i32 : i32, i32
  }
}

module attributes {stable_mosaic.version = 11 : i64} {
  func.func @kernel(%arg0: i32, %arg1: memref<64x16xbf16, #tpu.memory_space<vmem>>, %arg2: memref<16x16xbf16, #tpu.memory_space<vmem>>, %arg3: memref<1x16xf32, #tpu.memory_space<vmem>>, %arg4: memref<64x16xf32, #tpu.memory_space<vmem>>, %arg5: memref<64x16xf32, #tpu.memory_space<vmem>>) attributes {dimension_semantics = [#tpu.dimension_semantics<parallel>], iteration_bounds = array<i64: 1>, scalar_prefetch = 0 : i64, scratch_operands = 0 : i64, tpu.core_type = #tpu.core_type<tc>, window_params = [{transform_indices = @transform_0, window_bounds = array<i64: 64, 16>}, {pipeline_mode = #tpu.pipeline_mode<synchronous>, transform_indices = @transform_1, window_bounds = array<i64: 16, 16>}, {pipeline_mode = #tpu.pipeline_mode<synchronous>, transform_indices = @transform_2, window_bounds = array<i64: 1, 16>}, {transform_indices = @transform_3, window_bounds = array<i64: 64, 16>}, {transform_indices = @transform_4, window_bounds = array<i64: 64, 16>}]} {
    %c0 = arith.constant 0 : index
    %c0_0 = arith.constant 0 : index
    %0 = vector.load %arg1[%c0, %c0_0] : memref<64x16xbf16, #tpu.memory_space<vmem>>, vector<64x16xbf16>
    %c0_1 = arith.constant 0 : index
    %c0_2 = arith.constant 0 : index
    %1 = vector.load %arg2[%c0_1, %c0_2] : memref<16x16xbf16, #tpu.memory_space<vmem>>, vector<16x16xbf16>
    %cst = arith.constant dense<0.000000e+00> : vector<64x16xf32>
    %2 = tpu.matmul %0, %1, %cst {dimension_numbers = #tpu.dot_dimension_numbers<[1], [0], [0], [1], [0, 0, 1, 1], [], []>} : vector<64x16xbf16>, vector<16x16xbf16>, vector<64x16xf32> -> vector<64x16xf32>
    %c0_3 = arith.constant 0 : index
    %c0_4 = arith.constant 0 : index
    %3 = vector.load %arg3[%c0_3, %c0_4] : memref<1x16xf32, #tpu.memory_space<vmem>>, vector<1x16xf32>
    %4 = vector.broadcast %3 : vector<1x16xf32> to vector<64x16xf32>
    %5 = arith.addf %2, %4 : vector<64x16xf32>
    %c0_5 = arith.constant 0 : index
    %c0_6 = arith.constant 0 : index
    %6 = vector.load %arg4[%c0_5, %c0_6] : memref<64x16xf32, #tpu.memory_space<vmem>>, vector<64x16xf32>
    %7 = arith.addf %5, %6 : vector<64x16xf32>
    %c0_7 = arith.constant 0 : index
    %c0_8 = arith.constant 0 : index
    %8 = vector.load %arg5[%c0_7, %c0_8] : memref<64x16xf32, #tpu.memory_space<vmem>>, vector<64x16xf32>
    tpu.vector_store %arg5[%c0_7, %c0_8], %7 {strides = array<i32>} : memref<64x16xf32, #tpu.memory_space<vmem>>, vector<64x16xf32>,
    return
  }
  func.func @transform_0(%arg0: i32) -> (i32, i32) {
    %c0_i32 = arith.constant 0 : i32
    %c0_i32_0 = arith.constant 0 : i32
    return %arg0, %c0_i32 : i32, i32
  }
  func.func @transform_1(%arg0: i32) -> (i32, i32) {
    %c0_i32 = arith.constant 0 : i32
    %c0_i32_0 = arith.constant 0 : i32
    %c0_i32_1 = arith.constant 0 : i32
    return %c0_i32, %c0_i32_0 : i32, i32
  }
  func.func @transform_2(%arg0: i32) -> (i32, i32) {
    %c0_i32 = arith.constant 0 : i32
    %c0_i32_0 = arith.constant 0 : i32
    %c0_i32_1 = arith.constant 0 : i32
    return %c0_i32, %c0_i32_0 : i32, i32
  }
  func.func @transform_3(%arg0: i32) -> (i32, i32) {
    %c0_i32 = arith.constant 0 : i32
    %c0_i32_0 = arith.constant 0 : i32
    return %arg0, %c0_i32 : i32, i32
  }
  func.func @transform_4(%arg0: i32) -> (i32, i32) {
    %c0_i32 = arith.constant 0 : i32
    %c0_i32_0 = arith.constant 0 : i32
    return %arg0, %c0_i32 : i32, i32
  }
}

module attributes {stable_mosaic.version = 11 : i64} {
  func.func @kernel(%arg0: i32, %arg1: memref<1x10x10x8xf32, #tpu.memory_space<vmem>>, %arg2: memref<9x8x8xbf16, #tpu.memory_space<vmem>>, %arg3: memref<1x8x8x8xf32, #tpu.memory_space<vmem>>) attributes {dimension_semantics = [#tpu.dimension_semantics<parallel>], iteration_bounds = array<i64: 1>, scalar_prefetch = 0 : i64, scratch_operands = 0 : i64, tpu.core_type = #tpu.core_type<tc>, window_params = [{transform_indices = @transform_0, window_bounds = array<i64: 1, 10, 10, 8>}, {pipeline_mode = #tpu.pipeline_mode<synchronous>, transform_indices = @transform_1, window_bounds = array<i64: 9, 8, 8>}, {transform_indices = @transform_2, window_bounds = array<i64: 1, 8, 8, 8>}]} {
    %c0 = arith.constant 0 : index
    %c0_0 = arith.constant 0 : index
    %c0_1 = arith.constant 0 : index
    %c0_2 = arith.constant 0 : index
    %0 = vector.load %arg1[%c0, %c0_0, %c0_1, %c0_2] : memref<1x10x10x8xf32, #tpu.memory_space<vmem>>, vector<1x10x10x8xf32>
    %1 = vector.shape_cast %0 : vector<1x10x10x8xf32> to vector<10x10x8xf32>
    %2 = arith.truncf %1 : vector<10x10x8xf32> to vector<10x10x8xbf16>
    %cst = arith.constant 0.000000e+00 : f32
    %3 = vector.broadcast %cst : f32 to vector<64x8xf32>
    %4 = vector.extract_strided_slice %2 {offsets = [0, 0, 0], sizes = [8, 8, 8], strides = [1, 1, 1]} : vector<10x10x8xbf16> to vector<8x8x8xbf16>
    %5 = vector.shape_cast %4 : vector<8x8x8xbf16> to vector<64x8xbf16>
    %c0_3 = arith.constant 0 : index
    %c0_4 = arith.constant 0 : index
    %c0_5 = arith.constant 0 : index
    %6 = vector.load %arg2[%c0_3, %c0_4, %c0_5] : memref<9x8x8xbf16, #tpu.memory_space<vmem>>, vector<1x8x8xbf16>
    %7 = vector.shape_cast %6 : vector<1x8x8xbf16> to vector<8x8xbf16>
    %cst_6 = arith.constant dense<0.000000e+00> : vector<64x8xf32>
    %8 = tpu.matmul %5, %7, %cst_6 {dimension_numbers = #tpu.dot_dimension_numbers<[1], [0], [0], [1], [0, 0, 1, 1], [], []>} : vector<64x8xbf16>, vector<8x8xbf16>, vector<64x8xf32> -> vector<64x8xf32>
    %9 = arith.addf %3, %8 : vector<64x8xf32>
    %10 = vector.extract_strided_slice %2 {offsets = [0, 1, 0], sizes = [8, 8, 8], strides = [1, 1, 1]} : vector<10x10x8xbf16> to vector<8x8x8xbf16>
    %11 = vector.shape_cast %10 : vector<8x8x8xbf16> to vector<64x8xbf16>
    %c1 = arith.constant 1 : index
    %c0_7 = arith.constant 0 : index
    %c0_8 = arith.constant 0 : index
    %12 = vector.load %arg2[%c1, %c0_7, %c0_8] : memref<9x8x8xbf16, #tpu.memory_space<vmem>>, vector<1x8x8xbf16>
    %13 = vector.shape_cast %12 : vector<1x8x8xbf16> to vector<8x8xbf16>
    %cst_9 = arith.constant dense<0.000000e+00> : vector<64x8xf32>
    %14 = tpu.matmul %11, %13, %cst_9 {dimension_numbers = #tpu.dot_dimension_numbers<[1], [0], [0], [1], [0, 0, 1, 1], [], []>} : vector<64x8xbf16>, vector<8x8xbf16>, vector<64x8xf32> -> vector<64x8xf32>
    %15 = arith.addf %9, %14 : vector<64x8xf32>
    %16 = vector.extract_strided_slice %2 {offsets = [0, 2, 0], sizes = [8, 8, 8], strides = [1, 1, 1]} : vector<10x10x8xbf16> to vector<8x8x8xbf16>
    %17 = vector.shape_cast %16 : vector<8x8x8xbf16> to vector<64x8xbf16>
    %c2 = arith.constant 2 : index
    %c0_10 = arith.constant 0 : index
    %c0_11 = arith.constant 0 : index
    %18 = vector.load %arg2[%c2, %c0_10, %c0_11] : memref<9x8x8xbf16, #tpu.memory_space<vmem>>, vector<1x8x8xbf16>
    %19 = vector.shape_cast %18 : vector<1x8x8xbf16> to vector<8x8xbf16>
    %cst_12 = arith.constant dense<0.000000e+00> : vector<64x8xf32>
    %20 = tpu.matmul %17, %19, %cst_12 {dimension_numbers = #tpu.dot_dimension_numbers<[1], [0], [0], [1], [0, 0, 1, 1], [], []>} : vector<64x8xbf16>, vector<8x8xbf16>, vector<64x8xf32> -> vector<64x8xf32>
    %21 = arith.addf %15, %20 : vector<64x8xf32>
    %22 = vector.extract_strided_slice %2 {offsets = [1, 0, 0], sizes = [8, 8, 8], strides = [1, 1, 1]} : vector<10x10x8xbf16> to vector<8x8x8xbf16>
    %23 = vector.shape_cast %22 : vector<8x8x8xbf16> to vector<64x8xbf16>
    %c3 = arith.constant 3 : index
    %c0_13 = arith.constant 0 : index
    %c0_14 = arith.constant 0 : index
    %24 = vector.load %arg2[%c3, %c0_13, %c0_14] : memref<9x8x8xbf16, #tpu.memory_space<vmem>>, vector<1x8x8xbf16>
    %25 = vector.shape_cast %24 : vector<1x8x8xbf16> to vector<8x8xbf16>
    %cst_15 = arith.constant dense<0.000000e+00> : vector<64x8xf32>
    %26 = tpu.matmul %23, %25, %cst_15 {dimension_numbers = #tpu.dot_dimension_numbers<[1], [0], [0], [1], [0, 0, 1, 1], [], []>} : vector<64x8xbf16>, vector<8x8xbf16>, vector<64x8xf32> -> vector<64x8xf32>
    %27 = arith.addf %21, %26 : vector<64x8xf32>
    %28 = vector.extract_strided_slice %2 {offsets = [1, 1, 0], sizes = [8, 8, 8], strides = [1, 1, 1]} : vector<10x10x8xbf16> to vector<8x8x8xbf16>
    %29 = vector.shape_cast %28 : vector<8x8x8xbf16> to vector<64x8xbf16>
    %c4 = arith.constant 4 : index
    %c0_16 = arith.constant 0 : index
    %c0_17 = arith.constant 0 : index
    %30 = vector.load %arg2[%c4, %c0_16, %c0_17] : memref<9x8x8xbf16, #tpu.memory_space<vmem>>, vector<1x8x8xbf16>
    %31 = vector.shape_cast %30 : vector<1x8x8xbf16> to vector<8x8xbf16>
    %cst_18 = arith.constant dense<0.000000e+00> : vector<64x8xf32>
    %32 = tpu.matmul %29, %31, %cst_18 {dimension_numbers = #tpu.dot_dimension_numbers<[1], [0], [0], [1], [0, 0, 1, 1], [], []>} : vector<64x8xbf16>, vector<8x8xbf16>, vector<64x8xf32> -> vector<64x8xf32>
    %33 = arith.addf %27, %32 : vector<64x8xf32>
    %34 = vector.extract_strided_slice %2 {offsets = [1, 2, 0], sizes = [8, 8, 8], strides = [1, 1, 1]} : vector<10x10x8xbf16> to vector<8x8x8xbf16>
    %35 = vector.shape_cast %34 : vector<8x8x8xbf16> to vector<64x8xbf16>
    %c5 = arith.constant 5 : index
    %c0_19 = arith.constant 0 : index
    %c0_20 = arith.constant 0 : index
    %36 = vector.load %arg2[%c5, %c0_19, %c0_20] : memref<9x8x8xbf16, #tpu.memory_space<vmem>>, vector<1x8x8xbf16>
    %37 = vector.shape_cast %36 : vector<1x8x8xbf16> to vector<8x8xbf16>
    %cst_21 = arith.constant dense<0.000000e+00> : vector<64x8xf32>
    %38 = tpu.matmul %35, %37, %cst_21 {dimension_numbers = #tpu.dot_dimension_numbers<[1], [0], [0], [1], [0, 0, 1, 1], [], []>} : vector<64x8xbf16>, vector<8x8xbf16>, vector<64x8xf32> -> vector<64x8xf32>
    %39 = arith.addf %33, %38 : vector<64x8xf32>
    %40 = vector.extract_strided_slice %2 {offsets = [2, 0, 0], sizes = [8, 8, 8], strides = [1, 1, 1]} : vector<10x10x8xbf16> to vector<8x8x8xbf16>
    %41 = vector.shape_cast %40 : vector<8x8x8xbf16> to vector<64x8xbf16>
    %c6 = arith.constant 6 : index
    %c0_22 = arith.constant 0 : index
    %c0_23 = arith.constant 0 : index
    %42 = vector.load %arg2[%c6, %c0_22, %c0_23] : memref<9x8x8xbf16, #tpu.memory_space<vmem>>, vector<1x8x8xbf16>
    %43 = vector.shape_cast %42 : vector<1x8x8xbf16> to vector<8x8xbf16>
    %cst_24 = arith.constant dense<0.000000e+00> : vector<64x8xf32>
    %44 = tpu.matmul %41, %43, %cst_24 {dimension_numbers = #tpu.dot_dimension_numbers<[1], [0], [0], [1], [0, 0, 1, 1], [], []>} : vector<64x8xbf16>, vector<8x8xbf16>, vector<64x8xf32> -> vector<64x8xf32>
    %45 = arith.addf %39, %44 : vector<64x8xf32>
    %46 = vector.extract_strided_slice %2 {offsets = [2, 1, 0], sizes = [8, 8, 8], strides = [1, 1, 1]} : vector<10x10x8xbf16> to vector<8x8x8xbf16>
    %47 = vector.shape_cast %46 : vector<8x8x8xbf16> to vector<64x8xbf16>
    %c7 = arith.constant 7 : index
    %c0_25 = arith.constant 0 : index
    %c0_26 = arith.constant 0 : index
    %48 = vector.load %arg2[%c7, %c0_25, %c0_26] : memref<9x8x8xbf16, #tpu.memory_space<vmem>>, vector<1x8x8xbf16>
    %49 = vector.shape_cast %48 : vector<1x8x8xbf16> to vector<8x8xbf16>
    %cst_27 = arith.constant dense<0.000000e+00> : vector<64x8xf32>
    %50 = tpu.matmul %47, %49, %cst_27 {dimension_numbers = #tpu.dot_dimension_numbers<[1], [0], [0], [1], [0, 0, 1, 1], [], []>} : vector<64x8xbf16>, vector<8x8xbf16>, vector<64x8xf32> -> vector<64x8xf32>
    %51 = arith.addf %45, %50 : vector<64x8xf32>
    %52 = vector.extract_strided_slice %2 {offsets = [2, 2, 0], sizes = [8, 8, 8], strides = [1, 1, 1]} : vector<10x10x8xbf16> to vector<8x8x8xbf16>
    %53 = vector.shape_cast %52 : vector<8x8x8xbf16> to vector<64x8xbf16>
    %c8 = arith.constant 8 : index
    %c0_28 = arith.constant 0 : index
    %c0_29 = arith.constant 0 : index
    %54 = vector.load %arg2[%c8, %c0_28, %c0_29] : memref<9x8x8xbf16, #tpu.memory_space<vmem>>, vector<1x8x8xbf16>
    %55 = vector.shape_cast %54 : vector<1x8x8xbf16> to vector<8x8xbf16>
    %cst_30 = arith.constant dense<0.000000e+00> : vector<64x8xf32>
    %56 = tpu.matmul %53, %55, %cst_30 {dimension_numbers = #tpu.dot_dimension_numbers<[1], [0], [0], [1], [0, 0, 1, 1], [], []>} : vector<64x8xbf16>, vector<8x8xbf16>, vector<64x8xf32> -> vector<64x8xf32>
    %57 = arith.addf %51, %56 : vector<64x8xf32>
    %cst_31 = arith.constant 0.000000e+00 : f32
    %58 = vector.broadcast %cst_31 : f32 to vector<64x8xf32>
    %59 = arith.maximumf %57, %58 : vector<64x8xf32>
    %60 = vector.shape_cast %59 : vector<64x8xf32> to vector<8x8x8xf32>
    %c0_32 = arith.constant 0 : index
    %c0_33 = arith.constant 0 : index
    %c0_34 = arith.constant 0 : index
    %c0_35 = arith.constant 0 : index
    %61 = vector.load %arg3[%c0_32, %c0_33, %c0_34, %c0_35] : memref<1x8x8x8xf32, #tpu.memory_space<vmem>>, vector<1x8x8x8xf32>
    %62 = vector.shape_cast %61 : vector<1x8x8x8xf32> to vector<8x8x8xf32>
    %63 = vector.shape_cast %60 : vector<8x8x8xf32> to vector<1x8x8x8xf32>
    tpu.vector_store %arg3[%c0_32, %c0_33, %c0_34, %c0_35], %63 {strides = array<i32>} : memref<1x8x8x8xf32, #tpu.memory_space<vmem>>, vector<1x8x8x8xf32>,
    return
  }
  func.func @transform_0(%arg0: i32) -> (i32, i32, i32, i32) {
    %c0_i32 = arith.constant 0 : i32
    %c0_i32_0 = arith.constant 0 : i32
    %c0_i32_1 = arith.constant 0 : i32
    %c0_i32_2 = arith.constant 0 : i32
    return %arg0, %c0_i32, %c0_i32_0, %c0_i32_1 : i32, i32, i32, i32
  }
  func.func @transform_1(%arg0: i32) -> (i32, i32, i32) {
    %c0_i32 = arith.constant 0 : i32
    %c0_i32_0 = arith.constant 0 : i32
    %c0_i32_1 = arith.constant 0 : i32
    %c0_i32_2 = arith.constant 0 : i32
    return %c0_i32, %c0_i32_0, %c0_i32_1 : i32, i32, i32
  }
  func.func @transform_2(%arg0: i32) -> (i32, i32, i32, i32) {
    %c0_i32 = arith.constant 0 : i32
    %c0_i32_0 = arith.constant 0 : i32
    %c0_i32_1 = arith.constant 0 : i32
    %c0_i32_2 = arith.constant 0 : i32
    return %arg0, %c0_i32, %c0_i32_0, %c0_i32_1 : i32, i32, i32, i32
  }
}

module attributes {stable_mosaic.version = 11 : i64} {
  func.func @kernel(%arg0: i32, %arg1: memref<64x32xf32, #tpu.memory_space<vmem>>, %arg2: memref<32x32xbf16, #tpu.memory_space<vmem>>, %arg3: memref<1x32xf32, #tpu.memory_space<vmem>>, %arg4: memref<64x32xf32, #tpu.memory_space<vmem>>, %arg5: memref<64x32xf32, #tpu.memory_space<vmem>>) attributes {dimension_semantics = [#tpu.dimension_semantics<parallel>], iteration_bounds = array<i64: 1>, scalar_prefetch = 0 : i64, scratch_operands = 0 : i64, tpu.core_type = #tpu.core_type<tc>, window_params = [{transform_indices = @transform_0, window_bounds = array<i64: 64, 32>}, {pipeline_mode = #tpu.pipeline_mode<synchronous>, transform_indices = @transform_1, window_bounds = array<i64: 32, 32>}, {pipeline_mode = #tpu.pipeline_mode<synchronous>, transform_indices = @transform_2, window_bounds = array<i64: 1, 32>}, {transform_indices = @transform_3, window_bounds = array<i64: 64, 32>}, {transform_indices = @transform_4, window_bounds = array<i64: 64, 32>}]} {
    %c0 = arith.constant 0 : index
    %c0_0 = arith.constant 0 : index
    %0 = vector.load %arg1[%c0, %c0_0] : memref<64x32xf32, #tpu.memory_space<vmem>>, vector<64x32xf32>
    %1 = arith.truncf %0 : vector<64x32xf32> to vector<64x32xbf16>
    %c0_1 = arith.constant 0 : index
    %c0_2 = arith.constant 0 : index
    %2 = vector.load %arg2[%c0_1, %c0_2] : memref<32x32xbf16, #tpu.memory_space<vmem>>, vector<32x32xbf16>
    %cst = arith.constant dense<0.000000e+00> : vector<64x32xf32>
    %3 = tpu.matmul %1, %2, %cst {dimension_numbers = #tpu.dot_dimension_numbers<[1], [0], [0], [1], [0, 0, 1, 1], [], []>} : vector<64x32xbf16>, vector<32x32xbf16>, vector<64x32xf32> -> vector<64x32xf32>
    %c0_3 = arith.constant 0 : index
    %c0_4 = arith.constant 0 : index
    %4 = vector.load %arg3[%c0_3, %c0_4] : memref<1x32xf32, #tpu.memory_space<vmem>>, vector<1x32xf32>
    %5 = vector.broadcast %4 : vector<1x32xf32> to vector<64x32xf32>
    %6 = arith.addf %3, %5 : vector<64x32xf32>
    %c0_5 = arith.constant 0 : index
    %c0_6 = arith.constant 0 : index
    %7 = vector.load %arg4[%c0_5, %c0_6] : memref<64x32xf32, #tpu.memory_space<vmem>>, vector<64x32xf32>
    %8 = arith.addf %6, %7 : vector<64x32xf32>
    %cst_7 = arith.constant 0.000000e+00 : f32
    %9 = vector.broadcast %cst_7 : f32 to vector<64x32xf32>
    %10 = arith.maximumf %8, %9 : vector<64x32xf32>
    %c0_8 = arith.constant 0 : index
    %c0_9 = arith.constant 0 : index
    %11 = vector.load %arg5[%c0_8, %c0_9] : memref<64x32xf32, #tpu.memory_space<vmem>>, vector<64x32xf32>
    tpu.vector_store %arg5[%c0_8, %c0_9], %10 {strides = array<i32>} : memref<64x32xf32, #tpu.memory_space<vmem>>, vector<64x32xf32>,
    return
  }
  func.func @transform_0(%arg0: i32) -> (i32, i32) {
    %c0_i32 = arith.constant 0 : i32
    %c0_i32_0 = arith.constant 0 : i32
    return %arg0, %c0_i32 : i32, i32
  }
  func.func @transform_1(%arg0: i32) -> (i32, i32) {
    %c0_i32 = arith.constant 0 : i32
    %c0_i32_0 = arith.constant 0 : i32
    %c0_i32_1 = arith.constant 0 : i32
    return %c0_i32, %c0_i32_0 : i32, i32
  }
  func.func @transform_2(%arg0: i32) -> (i32, i32) {
    %c0_i32 = arith.constant 0 : i32
    %c0_i32_0 = arith.constant 0 : i32
    %c0_i32_1 = arith.constant 0 : i32
    return %c0_i32, %c0_i32_0 : i32, i32
  }
  func.func @transform_3(%arg0: i32) -> (i32, i32) {
    %c0_i32 = arith.constant 0 : i32
    %c0_i32_0 = arith.constant 0 : i32
    return %arg0, %c0_i32 : i32, i32
  }
  func.func @transform_4(%arg0: i32) -> (i32, i32) {
    %c0_i32 = arith.constant 0 : i32
    %c0_i32_0 = arith.constant 0 : i32
    return %arg0, %c0_i32 : i32, i32
  }
}

module attributes {stable_mosaic.version = 11 : i64} {
  func.func @kernel(%arg0: i32, %arg1: memref<64x16xf32, #tpu.memory_space<vmem>>, %arg2: memref<16x32xbf16, #tpu.memory_space<vmem>>, %arg3: memref<1x32xf32, #tpu.memory_space<vmem>>, %arg4: memref<64x32xf32, #tpu.memory_space<vmem>>) attributes {dimension_semantics = [#tpu.dimension_semantics<parallel>], iteration_bounds = array<i64: 1>, scalar_prefetch = 0 : i64, scratch_operands = 0 : i64, tpu.core_type = #tpu.core_type<tc>, window_params = [{transform_indices = @transform_0, window_bounds = array<i64: 64, 16>}, {pipeline_mode = #tpu.pipeline_mode<synchronous>, transform_indices = @transform_1, window_bounds = array<i64: 16, 32>}, {pipeline_mode = #tpu.pipeline_mode<synchronous>, transform_indices = @transform_2, window_bounds = array<i64: 1, 32>}, {transform_indices = @transform_3, window_bounds = array<i64: 64, 32>}]} {
    %c0 = arith.constant 0 : index
    %c0_0 = arith.constant 0 : index
    %0 = vector.load %arg1[%c0, %c0_0] : memref<64x16xf32, #tpu.memory_space<vmem>>, vector<64x16xf32>
    %1 = arith.truncf %0 : vector<64x16xf32> to vector<64x16xbf16>
    %c0_1 = arith.constant 0 : index
    %c0_2 = arith.constant 0 : index
    %2 = vector.load %arg2[%c0_1, %c0_2] : memref<16x32xbf16, #tpu.memory_space<vmem>>, vector<16x32xbf16>
    %cst = arith.constant dense<0.000000e+00> : vector<64x32xf32>
    %3 = tpu.matmul %1, %2, %cst {dimension_numbers = #tpu.dot_dimension_numbers<[1], [0], [0], [1], [0, 0, 1, 1], [], []>} : vector<64x16xbf16>, vector<16x32xbf16>, vector<64x32xf32> -> vector<64x32xf32>
    %c0_3 = arith.constant 0 : index
    %c0_4 = arith.constant 0 : index
    %4 = vector.load %arg3[%c0_3, %c0_4] : memref<1x32xf32, #tpu.memory_space<vmem>>, vector<1x32xf32>
    %5 = vector.broadcast %4 : vector<1x32xf32> to vector<64x32xf32>
    %6 = arith.addf %3, %5 : vector<64x32xf32>
    %c0_5 = arith.constant 0 : index
    %c0_6 = arith.constant 0 : index
    %7 = vector.load %arg4[%c0_5, %c0_6] : memref<64x32xf32, #tpu.memory_space<vmem>>, vector<64x32xf32>
    tpu.vector_store %arg4[%c0_5, %c0_6], %6 {strides = array<i32>} : memref<64x32xf32, #tpu.memory_space<vmem>>, vector<64x32xf32>,
    return
  }
  func.func @transform_0(%arg0: i32) -> (i32, i32) {
    %c0_i32 = arith.constant 0 : i32
    %c0_i32_0 = arith.constant 0 : i32
    return %arg0, %c0_i32 : i32, i32
  }
  func.func @transform_1(%arg0: i32) -> (i32, i32) {
    %c0_i32 = arith.constant 0 : i32
    %c0_i32_0 = arith.constant 0 : i32
    %c0_i32_1 = arith.constant 0 : i32
    return %c0_i32, %c0_i32_0 : i32, i32
  }
  func.func @transform_2(%arg0: i32) -> (i32, i32) {
    %c0_i32 = arith.constant 0 : i32
    %c0_i32_0 = arith.constant 0 : i32
    %c0_i32_1 = arith.constant 0 : i32
    return %c0_i32, %c0_i32_0 : i32, i32
  }
  func.func @transform_3(%arg0: i32) -> (i32, i32) {
    %c0_i32 = arith.constant 0 : i32
    %c0_i32_0 = arith.constant 0 : i32
    return %arg0, %c0_i32 : i32, i32
  }
}

module attributes {stable_mosaic.version = 11 : i64} {
  func.func @kernel(%arg0: i32, %arg1: memref<64x32xf32, #tpu.memory_space<vmem>>, %arg2: memref<32x32xbf16, #tpu.memory_space<vmem>>, %arg3: memref<1x32xf32, #tpu.memory_space<vmem>>, %arg4: memref<64x32xf32, #tpu.memory_space<vmem>>) attributes {dimension_semantics = [#tpu.dimension_semantics<parallel>], iteration_bounds = array<i64: 1>, scalar_prefetch = 0 : i64, scratch_operands = 0 : i64, tpu.core_type = #tpu.core_type<tc>, window_params = [{transform_indices = @transform_0, window_bounds = array<i64: 64, 32>}, {pipeline_mode = #tpu.pipeline_mode<synchronous>, transform_indices = @transform_1, window_bounds = array<i64: 32, 32>}, {pipeline_mode = #tpu.pipeline_mode<synchronous>, transform_indices = @transform_2, window_bounds = array<i64: 1, 32>}, {transform_indices = @transform_3, window_bounds = array<i64: 64, 32>}]} {
    %c0 = arith.constant 0 : index
    %c0_0 = arith.constant 0 : index
    %0 = vector.load %arg1[%c0, %c0_0] : memref<64x32xf32, #tpu.memory_space<vmem>>, vector<64x32xf32>
    %1 = arith.truncf %0 : vector<64x32xf32> to vector<64x32xbf16>
    %c0_1 = arith.constant 0 : index
    %c0_2 = arith.constant 0 : index
    %2 = vector.load %arg2[%c0_1, %c0_2] : memref<32x32xbf16, #tpu.memory_space<vmem>>, vector<32x32xbf16>
    %cst = arith.constant dense<0.000000e+00> : vector<64x32xf32>
    %3 = tpu.matmul %1, %2, %cst {dimension_numbers = #tpu.dot_dimension_numbers<[1], [0], [0], [1], [0, 0, 1, 1], [], []>} : vector<64x32xbf16>, vector<32x32xbf16>, vector<64x32xf32> -> vector<64x32xf32>
    %c0_3 = arith.constant 0 : index
    %c0_4 = arith.constant 0 : index
    %4 = vector.load %arg3[%c0_3, %c0_4] : memref<1x32xf32, #tpu.memory_space<vmem>>, vector<1x32xf32>
    %5 = vector.broadcast %4 : vector<1x32xf32> to vector<64x32xf32>
    %6 = arith.addf %3, %5 : vector<64x32xf32>
    %cst_5 = arith.constant 0.000000e+00 : f32
    %7 = vector.broadcast %cst_5 : f32 to vector<64x32xf32>
    %8 = arith.maximumf %6, %7 : vector<64x32xf32>
    %c0_6 = arith.constant 0 : index
    %c0_7 = arith.constant 0 : index
    %9 = vector.load %arg4[%c0_6, %c0_7] : memref<64x32xf32, #tpu.memory_space<vmem>>, vector<64x32xf32>
    tpu.vector_store %arg4[%c0_6, %c0_7], %8 {strides = array<i32>} : memref<64x32xf32, #tpu.memory_space<vmem>>, vector<64x32xf32>,
    return
  }
  func.func @transform_0(%arg0: i32) -> (i32, i32) {
    %c0_i32 = arith.constant 0 : i32
    %c0_i32_0 = arith.constant 0 : i32
    return %arg0, %c0_i32 : i32, i32
  }
  func.func @transform_1(%arg0: i32) -> (i32, i32) {
    %c0_i32 = arith.constant 0 : i32
    %c0_i32_0 = arith.constant 0 : i32
    %c0_i32_1 = arith.constant 0 : i32
    return %c0_i32, %c0_i32_0 : i32, i32
  }
  func.func @transform_2(%arg0: i32) -> (i32, i32) {
    %c0_i32 = arith.constant 0 : i32
    %c0_i32_0 = arith.constant 0 : i32
    %c0_i32_1 = arith.constant 0 : i32
    return %c0_i32, %c0_i32_0 : i32, i32
  }
  func.func @transform_3(%arg0: i32) -> (i32, i32) {
    %c0_i32 = arith.constant 0 : i32
    %c0_i32_0 = arith.constant 0 : i32
    return %arg0, %c0_i32 : i32, i32
  }
}

module attributes {stable_mosaic.version = 11 : i64} {
  func.func @kernel(%arg0: i32, %arg1: memref<1x12x12x8xf32, #tpu.memory_space<vmem>>, %arg2: memref<9x8x8xbf16, #tpu.memory_space<vmem>>, %arg3: memref<1x8x8x8xf32, #tpu.memory_space<vmem>>) attributes {dimension_semantics = [#tpu.dimension_semantics<parallel>], iteration_bounds = array<i64: 1>, scalar_prefetch = 0 : i64, scratch_operands = 0 : i64, tpu.core_type = #tpu.core_type<tc>, window_params = [{transform_indices = @transform_0, window_bounds = array<i64: 1, 12, 12, 8>}, {pipeline_mode = #tpu.pipeline_mode<synchronous>, transform_indices = @transform_1, window_bounds = array<i64: 9, 8, 8>}, {transform_indices = @transform_2, window_bounds = array<i64: 1, 8, 8, 8>}]} {
    %c0 = arith.constant 0 : index
    %c0_0 = arith.constant 0 : index
    %c0_1 = arith.constant 0 : index
    %c0_2 = arith.constant 0 : index
    %0 = vector.load %arg1[%c0, %c0_0, %c0_1, %c0_2] : memref<1x12x12x8xf32, #tpu.memory_space<vmem>>, vector<1x12x12x8xf32>
    %1 = vector.shape_cast %0 : vector<1x12x12x8xf32> to vector<12x12x8xf32>
    %2 = arith.truncf %1 : vector<12x12x8xf32> to vector<12x12x8xbf16>
    %cst = arith.constant 0.000000e+00 : f32
    %3 = vector.broadcast %cst : f32 to vector<64x8xf32>
    %4 = vector.extract_strided_slice %2 {offsets = [0, 0, 0], sizes = [8, 8, 8], strides = [1, 1, 1]} : vector<12x12x8xbf16> to vector<8x8x8xbf16>
    %5 = vector.shape_cast %4 : vector<8x8x8xbf16> to vector<64x8xbf16>
    %c0_3 = arith.constant 0 : index
    %c0_4 = arith.constant 0 : index
    %c0_5 = arith.constant 0 : index
    %6 = vector.load %arg2[%c0_3, %c0_4, %c0_5] : memref<9x8x8xbf16, #tpu.memory_space<vmem>>, vector<1x8x8xbf16>
    %7 = vector.shape_cast %6 : vector<1x8x8xbf16> to vector<8x8xbf16>
    %cst_6 = arith.constant dense<0.000000e+00> : vector<64x8xf32>
    %8 = tpu.matmul %5, %7, %cst_6 {dimension_numbers = #tpu.dot_dimension_numbers<[1], [0], [0], [1], [0, 0, 1, 1], [], []>} : vector<64x8xbf16>, vector<8x8xbf16>, vector<64x8xf32> -> vector<64x8xf32>
    %9 = arith.addf %3, %8 : vector<64x8xf32>
    %10 = vector.extract_strided_slice %2 {offsets = [0, 2, 0], sizes = [8, 8, 8], strides = [1, 1, 1]} : vector<12x12x8xbf16> to vector<8x8x8xbf16>
    %11 = vector.shape_cast %10 : vector<8x8x8xbf16> to vector<64x8xbf16>
    %c1 = arith.constant 1 : index
    %c0_7 = arith.constant 0 : index
    %c0_8 = arith.constant 0 : index
    %12 = vector.load %arg2[%c1, %c0_7, %c0_8] : memref<9x8x8xbf16, #tpu.memory_space<vmem>>, vector<1x8x8xbf16>
    %13 = vector.shape_cast %12 : vector<1x8x8xbf16> to vector<8x8xbf16>
    %cst_9 = arith.constant dense<0.000000e+00> : vector<64x8xf32>
    %14 = tpu.matmul %11, %13, %cst_9 {dimension_numbers = #tpu.dot_dimension_numbers<[1], [0], [0], [1], [0, 0, 1, 1], [], []>} : vector<64x8xbf16>, vector<8x8xbf16>, vector<64x8xf32> -> vector<64x8xf32>
    %15 = arith.addf %9, %14 : vector<64x8xf32>
    %16 = vector.extract_strided_slice %2 {offsets = [0, 4, 0], sizes = [8, 8, 8], strides = [1, 1, 1]} : vector<12x12x8xbf16> to vector<8x8x8xbf16>
    %17 = vector.shape_cast %16 : vector<8x8x8xbf16> to vector<64x8xbf16>
    %c2 = arith.constant 2 : index
    %c0_10 = arith.constant 0 : index
    %c0_11 = arith.constant 0 : index
    %18 = vector.load %arg2[%c2, %c0_10, %c0_11] : memref<9x8x8xbf16, #tpu.memory_space<vmem>>, vector<1x8x8xbf16>
    %19 = vector.shape_cast %18 : vector<1x8x8xbf16> to vector<8x8xbf16>
    %cst_12 = arith.constant dense<0.000000e+00> : vector<64x8xf32>
    %20 = tpu.matmul %17, %19, %cst_12 {dimension_numbers = #tpu.dot_dimension_numbers<[1], [0], [0], [1], [0, 0, 1, 1], [], []>} : vector<64x8xbf16>, vector<8x8xbf16>, vector<64x8xf32> -> vector<64x8xf32>
    %21 = arith.addf %15, %20 : vector<64x8xf32>
    %22 = vector.extract_strided_slice %2 {offsets = [2, 0, 0], sizes = [8, 8, 8], strides = [1, 1, 1]} : vector<12x12x8xbf16> to vector<8x8x8xbf16>
    %23 = vector.shape_cast %22 : vector<8x8x8xbf16> to vector<64x8xbf16>
    %c3 = arith.constant 3 : index
    %c0_13 = arith.constant 0 : index
    %c0_14 = arith.constant 0 : index
    %24 = vector.load %arg2[%c3, %c0_13, %c0_14] : memref<9x8x8xbf16, #tpu.memory_space<vmem>>, vector<1x8x8xbf16>
    %25 = vector.shape_cast %24 : vector<1x8x8xbf16> to vector<8x8xbf16>
    %cst_15 = arith.constant dense<0.000000e+00> : vector<64x8xf32>
    %26 = tpu.matmul %23, %25, %cst_15 {dimension_numbers = #tpu.dot_dimension_numbers<[1], [0], [0], [1], [0, 0, 1, 1], [], []>} : vector<64x8xbf16>, vector<8x8xbf16>, vector<64x8xf32> -> vector<64x8xf32>
    %27 = arith.addf %21, %26 : vector<64x8xf32>
    %28 = vector.extract_strided_slice %2 {offsets = [2, 2, 0], sizes = [8, 8, 8], strides = [1, 1, 1]} : vector<12x12x8xbf16> to vector<8x8x8xbf16>
    %29 = vector.shape_cast %28 : vector<8x8x8xbf16> to vector<64x8xbf16>
    %c4 = arith.constant 4 : index
    %c0_16 = arith.constant 0 : index
    %c0_17 = arith.constant 0 : index
    %30 = vector.load %arg2[%c4, %c0_16, %c0_17] : memref<9x8x8xbf16, #tpu.memory_space<vmem>>, vector<1x8x8xbf16>
    %31 = vector.shape_cast %30 : vector<1x8x8xbf16> to vector<8x8xbf16>
    %cst_18 = arith.constant dense<0.000000e+00> : vector<64x8xf32>
    %32 = tpu.matmul %29, %31, %cst_18 {dimension_numbers = #tpu.dot_dimension_numbers<[1], [0], [0], [1], [0, 0, 1, 1], [], []>} : vector<64x8xbf16>, vector<8x8xbf16>, vector<64x8xf32> -> vector<64x8xf32>
    %33 = arith.addf %27, %32 : vector<64x8xf32>
    %34 = vector.extract_strided_slice %2 {offsets = [2, 4, 0], sizes = [8, 8, 8], strides = [1, 1, 1]} : vector<12x12x8xbf16> to vector<8x8x8xbf16>
    %35 = vector.shape_cast %34 : vector<8x8x8xbf16> to vector<64x8xbf16>
    %c5 = arith.constant 5 : index
    %c0_19 = arith.constant 0 : index
    %c0_20 = arith.constant 0 : index
    %36 = vector.load %arg2[%c5, %c0_19, %c0_20] : memref<9x8x8xbf16, #tpu.memory_space<vmem>>, vector<1x8x8xbf16>
    %37 = vector.shape_cast %36 : vector<1x8x8xbf16> to vector<8x8xbf16>
    %cst_21 = arith.constant dense<0.000000e+00> : vector<64x8xf32>
    %38 = tpu.matmul %35, %37, %cst_21 {dimension_numbers = #tpu.dot_dimension_numbers<[1], [0], [0], [1], [0, 0, 1, 1], [], []>} : vector<64x8xbf16>, vector<8x8xbf16>, vector<64x8xf32> -> vector<64x8xf32>
    %39 = arith.addf %33, %38 : vector<64x8xf32>
    %40 = vector.extract_strided_slice %2 {offsets = [4, 0, 0], sizes = [8, 8, 8], strides = [1, 1, 1]} : vector<12x12x8xbf16> to vector<8x8x8xbf16>
    %41 = vector.shape_cast %40 : vector<8x8x8xbf16> to vector<64x8xbf16>
    %c6 = arith.constant 6 : index
    %c0_22 = arith.constant 0 : index
    %c0_23 = arith.constant 0 : index
    %42 = vector.load %arg2[%c6, %c0_22, %c0_23] : memref<9x8x8xbf16, #tpu.memory_space<vmem>>, vector<1x8x8xbf16>
    %43 = vector.shape_cast %42 : vector<1x8x8xbf16> to vector<8x8xbf16>
    %cst_24 = arith.constant dense<0.000000e+00> : vector<64x8xf32>
    %44 = tpu.matmul %41, %43, %cst_24 {dimension_numbers = #tpu.dot_dimension_numbers<[1], [0], [0], [1], [0, 0, 1, 1], [], []>} : vector<64x8xbf16>, vector<8x8xbf16>, vector<64x8xf32> -> vector<64x8xf32>
    %45 = arith.addf %39, %44 : vector<64x8xf32>
    %46 = vector.extract_strided_slice %2 {offsets = [4, 2, 0], sizes = [8, 8, 8], strides = [1, 1, 1]} : vector<12x12x8xbf16> to vector<8x8x8xbf16>
    %47 = vector.shape_cast %46 : vector<8x8x8xbf16> to vector<64x8xbf16>
    %c7 = arith.constant 7 : index
    %c0_25 = arith.constant 0 : index
    %c0_26 = arith.constant 0 : index
    %48 = vector.load %arg2[%c7, %c0_25, %c0_26] : memref<9x8x8xbf16, #tpu.memory_space<vmem>>, vector<1x8x8xbf16>
    %49 = vector.shape_cast %48 : vector<1x8x8xbf16> to vector<8x8xbf16>
    %cst_27 = arith.constant dense<0.000000e+00> : vector<64x8xf32>
    %50 = tpu.matmul %47, %49, %cst_27 {dimension_numbers = #tpu.dot_dimension_numbers<[1], [0], [0], [1], [0, 0, 1, 1], [], []>} : vector<64x8xbf16>, vector<8x8xbf16>, vector<64x8xf32> -> vector<64x8xf32>
    %51 = arith.addf %45, %50 : vector<64x8xf32>
    %52 = vector.extract_strided_slice %2 {offsets = [4, 4, 0], sizes = [8, 8, 8], strides = [1, 1, 1]} : vector<12x12x8xbf16> to vector<8x8x8xbf16>
    %53 = vector.shape_cast %52 : vector<8x8x8xbf16> to vector<64x8xbf16>
    %c8 = arith.constant 8 : index
    %c0_28 = arith.constant 0 : index
    %c0_29 = arith.constant 0 : index
    %54 = vector.load %arg2[%c8, %c0_28, %c0_29] : memref<9x8x8xbf16, #tpu.memory_space<vmem>>, vector<1x8x8xbf16>
    %55 = vector.shape_cast %54 : vector<1x8x8xbf16> to vector<8x8xbf16>
    %cst_30 = arith.constant dense<0.000000e+00> : vector<64x8xf32>
    %56 = tpu.matmul %53, %55, %cst_30 {dimension_numbers = #tpu.dot_dimension_numbers<[1], [0], [0], [1], [0, 0, 1, 1], [], []>} : vector<64x8xbf16>, vector<8x8xbf16>, vector<64x8xf32> -> vector<64x8xf32>
    %57 = arith.addf %51, %56 : vector<64x8xf32>
    %cst_31 = arith.constant 0.000000e+00 : f32
    %58 = vector.broadcast %cst_31 : f32 to vector<64x8xf32>
    %59 = arith.maximumf %57, %58 : vector<64x8xf32>
    %60 = vector.shape_cast %59 : vector<64x8xf32> to vector<8x8x8xf32>
    %c0_32 = arith.constant 0 : index
    %c0_33 = arith.constant 0 : index
    %c0_34 = arith.constant 0 : index
    %c0_35 = arith.constant 0 : index
    %61 = vector.load %arg3[%c0_32, %c0_33, %c0_34, %c0_35] : memref<1x8x8x8xf32, #tpu.memory_space<vmem>>, vector<1x8x8x8xf32>
    %62 = vector.shape_cast %61 : vector<1x8x8x8xf32> to vector<8x8x8xf32>
    %63 = vector.shape_cast %60 : vector<8x8x8xf32> to vector<1x8x8x8xf32>
    tpu.vector_store %arg3[%c0_32, %c0_33, %c0_34, %c0_35], %63 {strides = array<i32>} : memref<1x8x8x8xf32, #tpu.memory_space<vmem>>, vector<1x8x8x8xf32>,
    return
  }
  func.func @transform_0(%arg0: i32) -> (i32, i32, i32, i32) {
    %c0_i32 = arith.constant 0 : i32
    %c0_i32_0 = arith.constant 0 : i32
    %c0_i32_1 = arith.constant 0 : i32
    %c0_i32_2 = arith.constant 0 : i32
    return %arg0, %c0_i32, %c0_i32_0, %c0_i32_1 : i32, i32, i32, i32
  }
  func.func @transform_1(%arg0: i32) -> (i32, i32, i32) {
    %c0_i32 = arith.constant 0 : i32
    %c0_i32_0 = arith.constant 0 : i32
    %c0_i32_1 = arith.constant 0 : i32
    %c0_i32_2 = arith.constant 0 : i32
    return %c0_i32, %c0_i32_0, %c0_i32_1 : i32, i32, i32
  }
  func.func @transform_2(%arg0: i32) -> (i32, i32, i32, i32) {
    %c0_i32 = arith.constant 0 : i32
    %c0_i32_0 = arith.constant 0 : i32
    %c0_i32_1 = arith.constant 0 : i32
    %c0_i32_2 = arith.constant 0 : i32
    return %arg0, %c0_i32, %c0_i32_0, %c0_i32_1 : i32, i32, i32, i32
  }
}

module attributes {stable_mosaic.version = 11 : i64} {
  func.func @kernel(%arg0: i32, %arg1: memref<64x32xf32, #tpu.memory_space<vmem>>, %arg2: memref<32x4xbf16, #tpu.memory_space<vmem>>, %arg3: memref<1x4xf32, #tpu.memory_space<vmem>>, %arg4: memref<64x4xf32, #tpu.memory_space<vmem>>) attributes {dimension_semantics = [#tpu.dimension_semantics<parallel>], iteration_bounds = array<i64: 1>, scalar_prefetch = 0 : i64, scratch_operands = 0 : i64, tpu.core_type = #tpu.core_type<tc>, window_params = [{transform_indices = @transform_0, window_bounds = array<i64: 64, 32>}, {pipeline_mode = #tpu.pipeline_mode<synchronous>, transform_indices = @transform_1, window_bounds = array<i64: 32, 4>}, {pipeline_mode = #tpu.pipeline_mode<synchronous>, transform_indices = @transform_2, window_bounds = array<i64: 1, 4>}, {transform_indices = @transform_3, window_bounds = array<i64: 64, 4>}]} {
    %c0 = arith.constant 0 : index
    %c0_0 = arith.constant 0 : index
    %0 = vector.load %arg1[%c0, %c0_0] : memref<64x32xf32, #tpu.memory_space<vmem>>, vector<64x32xf32>
    %1 = arith.truncf %0 : vector<64x32xf32> to vector<64x32xbf16>
    %c0_1 = arith.constant 0 : index
    %c0_2 = arith.constant 0 : index
    %2 = vector.load %arg2[%c0_1, %c0_2] : memref<32x4xbf16, #tpu.memory_space<vmem>>, vector<32x4xbf16>
    %cst = arith.constant dense<0.000000e+00> : vector<64x4xf32>
    %3 = tpu.matmul %1, %2, %cst {dimension_numbers = #tpu.dot_dimension_numbers<[1], [0], [0], [1], [0, 0, 1, 1], [], []>} : vector<64x32xbf16>, vector<32x4xbf16>, vector<64x4xf32> -> vector<64x4xf32>
    %c0_3 = arith.constant 0 : index
    %c0_4 = arith.constant 0 : index
    %4 = vector.load %arg3[%c0_3, %c0_4] : memref<1x4xf32, #tpu.memory_space<vmem>>, vector<1x4xf32>
    %5 = vector.broadcast %4 : vector<1x4xf32> to vector<64x4xf32>
    %6 = arith.addf %3, %5 : vector<64x4xf32>
    %c0_5 = arith.constant 0 : index
    %c0_6 = arith.constant 0 : index
    %7 = vector.load %arg4[%c0_5, %c0_6] : memref<64x4xf32, #tpu.memory_space<vmem>>, vector<64x4xf32>
    tpu.vector_store %arg4[%c0_5, %c0_6], %6 {strides = array<i32>} : memref<64x4xf32, #tpu.memory_space<vmem>>, vector<64x4xf32>,
    return
  }
  func.func @transform_0(%arg0: i32) -> (i32, i32) {
    %c0_i32 = arith.constant 0 : i32
    %c0_i32_0 = arith.constant 0 : i32
    return %arg0, %c0_i32 : i32, i32
  }
  func.func @transform_1(%arg0: i32) -> (i32, i32) {
    %c0_i32 = arith.constant 0 : i32
    %c0_i32_0 = arith.constant 0 : i32
    %c0_i32_1 = arith.constant 0 : i32
    return %c0_i32, %c0_i32_0 : i32, i32
  }
  func.func @transform_2(%arg0: i32) -> (i32, i32) {
    %c0_i32 = arith.constant 0 : i32
    %c0_i32_0 = arith.constant 0 : i32
    %c0_i32_1 = arith.constant 0 : i32
    return %c0_i32, %c0_i32_0 : i32, i32
  }
  func.func @transform_3(%arg0: i32) -> (i32, i32) {
    %c0_i32 = arith.constant 0 : i32
    %c0_i32_0 = arith.constant 0 : i32
    return %arg0, %c0_i32 : i32, i32
  }
}

module attributes {stable_mosaic.version = 11 : i64} {
  func.func @kernel(%arg0: i32, %arg1: memref<64x16xbf16, #tpu.memory_space<vmem>>, %arg2: memref<16x32xbf16, #tpu.memory_space<vmem>>, %arg3: memref<1x32xf32, #tpu.memory_space<vmem>>, %arg4: memref<64x32xf32, #tpu.memory_space<vmem>>, %arg5: memref<64x32xf32, #tpu.memory_space<vmem>>) attributes {dimension_semantics = [#tpu.dimension_semantics<parallel>], iteration_bounds = array<i64: 1>, scalar_prefetch = 0 : i64, scratch_operands = 0 : i64, tpu.core_type = #tpu.core_type<tc>, window_params = [{transform_indices = @transform_0, window_bounds = array<i64: 64, 16>}, {pipeline_mode = #tpu.pipeline_mode<synchronous>, transform_indices = @transform_1, window_bounds = array<i64: 16, 32>}, {pipeline_mode = #tpu.pipeline_mode<synchronous>, transform_indices = @transform_2, window_bounds = array<i64: 1, 32>}, {transform_indices = @transform_3, window_bounds = array<i64: 64, 32>}, {transform_indices = @transform_4, window_bounds = array<i64: 64, 32>}]} {
    %c0 = arith.constant 0 : index
    %c0_0 = arith.constant 0 : index
    %0 = vector.load %arg1[%c0, %c0_0] : memref<64x16xbf16, #tpu.memory_space<vmem>>, vector<64x16xbf16>
    %c0_1 = arith.constant 0 : index
    %c0_2 = arith.constant 0 : index
    %1 = vector.load %arg2[%c0_1, %c0_2] : memref<16x32xbf16, #tpu.memory_space<vmem>>, vector<16x32xbf16>
    %cst = arith.constant dense<0.000000e+00> : vector<64x32xf32>
    %2 = tpu.matmul %0, %1, %cst {dimension_numbers = #tpu.dot_dimension_numbers<[1], [0], [0], [1], [0, 0, 1, 1], [], []>} : vector<64x16xbf16>, vector<16x32xbf16>, vector<64x32xf32> -> vector<64x32xf32>
    %c0_3 = arith.constant 0 : index
    %c0_4 = arith.constant 0 : index
    %3 = vector.load %arg3[%c0_3, %c0_4] : memref<1x32xf32, #tpu.memory_space<vmem>>, vector<1x32xf32>
    %4 = vector.broadcast %3 : vector<1x32xf32> to vector<64x32xf32>
    %5 = arith.addf %2, %4 : vector<64x32xf32>
    %c0_5 = arith.constant 0 : index
    %c0_6 = arith.constant 0 : index
    %6 = vector.load %arg4[%c0_5, %c0_6] : memref<64x32xf32, #tpu.memory_space<vmem>>, vector<64x32xf32>
    %7 = arith.addf %5, %6 : vector<64x32xf32>
    %c0_7 = arith.constant 0 : index
    %c0_8 = arith.constant 0 : index
    %8 = vector.load %arg5[%c0_7, %c0_8] : memref<64x32xf32, #tpu.memory_space<vmem>>, vector<64x32xf32>
    tpu.vector_store %arg5[%c0_7, %c0_8], %7 {strides = array<i32>} : memref<64x32xf32, #tpu.memory_space<vmem>>, vector<64x32xf32>,
    return
  }
  func.func @transform_0(%arg0: i32) -> (i32, i32) {
    %c0_i32 = arith.constant 0 : i32
    %c0_i32_0 = arith.constant 0 : i32
    return %arg0, %c0_i32 : i32, i32
  }
  func.func @transform_1(%arg0: i32) -> (i32, i32) {
    %c0_i32 = arith.constant 0 : i32
    %c0_i32_0 = arith.constant 0 : i32
    %c0_i32_1 = arith.constant 0 : i32
    return %c0_i32, %c0_i32_0 : i32, i32
  }
  func.func @transform_2(%arg0: i32) -> (i32, i32) {
    %c0_i32 = arith.constant 0 : i32
    %c0_i32_0 = arith.constant 0 : i32
    %c0_i32_1 = arith.constant 0 : i32
    return %c0_i32, %c0_i32_0 : i32, i32
  }
  func.func @transform_3(%arg0: i32) -> (i32, i32) {
    %c0_i32 = arith.constant 0 : i32
    %c0_i32_0 = arith.constant 0 : i32
    return %arg0, %c0_i32 : i32, i32
  }
  func.func @transform_4(%arg0: i32) -> (i32, i32) {
    %c0_i32 = arith.constant 0 : i32
    %c0_i32_0 = arith.constant 0 : i32
    return %arg0, %c0_i32 : i32, i32
  }
}

module attributes {stable_mosaic.version = 11 : i64} {
  func.func @kernel(%arg0: i32, %arg1: memref<64x32xf32, #tpu.memory_space<vmem>>, %arg2: memref<32x32xbf16, #tpu.memory_space<vmem>>, %arg3: memref<1x32xf32, #tpu.memory_space<vmem>>, %arg4: memref<64x32xf32, #tpu.memory_space<vmem>>, %arg5: memref<64x32xf32, #tpu.memory_space<vmem>>) attributes {dimension_semantics = [#tpu.dimension_semantics<parallel>], iteration_bounds = array<i64: 1>, scalar_prefetch = 0 : i64, scratch_operands = 0 : i64, tpu.core_type = #tpu.core_type<tc>, window_params = [{transform_indices = @transform_0, window_bounds = array<i64: 64, 32>}, {pipeline_mode = #tpu.pipeline_mode<synchronous>, transform_indices = @transform_1, window_bounds = array<i64: 32, 32>}, {pipeline_mode = #tpu.pipeline_mode<synchronous>, transform_indices = @transform_2, window_bounds = array<i64: 1, 32>}, {transform_indices = @transform_3, window_bounds = array<i64: 64, 32>}, {transform_indices = @transform_4, window_bounds = array<i64: 64, 32>}]} {
    %c0 = arith.constant 0 : index
    %c0_0 = arith.constant 0 : index
    %0 = vector.load %arg1[%c0, %c0_0] : memref<64x32xf32, #tpu.memory_space<vmem>>, vector<64x32xf32>
    %1 = arith.truncf %0 : vector<64x32xf32> to vector<64x32xbf16>
    %c0_1 = arith.constant 0 : index
    %c0_2 = arith.constant 0 : index
    %2 = vector.load %arg2[%c0_1, %c0_2] : memref<32x32xbf16, #tpu.memory_space<vmem>>, vector<32x32xbf16>
    %cst = arith.constant dense<0.000000e+00> : vector<64x32xf32>
    %3 = tpu.matmul %1, %2, %cst {dimension_numbers = #tpu.dot_dimension_numbers<[1], [0], [0], [1], [0, 0, 1, 1], [], []>} : vector<64x32xbf16>, vector<32x32xbf16>, vector<64x32xf32> -> vector<64x32xf32>
    %c0_3 = arith.constant 0 : index
    %c0_4 = arith.constant 0 : index
    %4 = vector.load %arg3[%c0_3, %c0_4] : memref<1x32xf32, #tpu.memory_space<vmem>>, vector<1x32xf32>
    %5 = vector.broadcast %4 : vector<1x32xf32> to vector<64x32xf32>
    %6 = arith.addf %3, %5 : vector<64x32xf32>
    %c0_5 = arith.constant 0 : index
    %c0_6 = arith.constant 0 : index
    %7 = vector.load %arg4[%c0_5, %c0_6] : memref<64x32xf32, #tpu.memory_space<vmem>>, vector<64x32xf32>
    %8 = arith.addf %6, %7 : vector<64x32xf32>
    %cst_7 = arith.constant 0.000000e+00 : f32
    %9 = vector.broadcast %cst_7 : f32 to vector<64x32xf32>
    %10 = arith.maximumf %8, %9 : vector<64x32xf32>
    %c0_8 = arith.constant 0 : index
    %c0_9 = arith.constant 0 : index
    %11 = vector.load %arg5[%c0_8, %c0_9] : memref<64x32xf32, #tpu.memory_space<vmem>>, vector<64x32xf32>
    tpu.vector_store %arg5[%c0_8, %c0_9], %10 {strides = array<i32>} : memref<64x32xf32, #tpu.memory_space<vmem>>, vector<64x32xf32>,
    return
  }
  func.func @transform_0(%arg0: i32) -> (i32, i32) {
    %c0_i32 = arith.constant 0 : i32
    %c0_i32_0 = arith.constant 0 : i32
    return %arg0, %c0_i32 : i32, i32
  }
  func.func @transform_1(%arg0: i32) -> (i32, i32) {
    %c0_i32 = arith.constant 0 : i32
    %c0_i32_0 = arith.constant 0 : i32
    %c0_i32_1 = arith.constant 0 : i32
    return %c0_i32, %c0_i32_0 : i32, i32
  }
  func.func @transform_2(%arg0: i32) -> (i32, i32) {
    %c0_i32 = arith.constant 0 : i32
    %c0_i32_0 = arith.constant 0 : i32
    %c0_i32_1 = arith.constant 0 : i32
    return %c0_i32, %c0_i32_0 : i32, i32
  }
  func.func @transform_3(%arg0: i32) -> (i32, i32) {
    %c0_i32 = arith.constant 0 : i32
    %c0_i32_0 = arith.constant 0 : i32
    return %arg0, %c0_i32 : i32, i32
  }
  func.func @transform_4(%arg0: i32) -> (i32, i32) {
    %c0_i32 = arith.constant 0 : i32
    %c0_i32_0 = arith.constant 0 : i32
    return %arg0, %c0_i32 : i32, i32
  }
}

</mosaic_0001>

<bundles_post_ra>
// kernel: msa_transformer_forward.46
= control target key start
LH: loop header
LB: loop body
LE: loop exit
PB: predicated region body
PF: predicated region fallthrough
CT: control target
= control target key end

     0   :  { %vm21_vm0 = vcmask 261120   ;;  %v146_v8 = vmov 0   ;;  %s226_s0 = inlined_call_operand.vmem [shape: f32[32,32], index: 0, kind: input, shape index: {}]   ;;  %s227_s3 = inlined_call_operand.vmem [shape: f32[32,1], index: 3, kind: input, shape index: {}]   ;;  %s228_s1 = inlined_call_operand.vmem [shape: f32[1,32], index: 1, kind: input, shape index: {}]   ;;  %s229_s2 = inlined_call_operand.vmem [shape: f32[1,32], index: 2, kind: input, shape index: {}]   ;;  %s230_s4 = inlined_call_operand.vmem [shape: f32[32,32], index: 4, kind: output, shape index: {}]  }
   0x1   :  { %v17_v0 = vld [vmem:[%s226_s0] sm:$0xff]  ;;  %v19_v1 = vld [vmem:[%s226_s0 + $0x10] sm:$0xff]  ;;  %v18_v2 = vld [vmem:[%s226_s0 + $0x8] sm:$0xff]  ;;  %137 = vset.pattern.permute.xlu1 %v146_v8  ;;  %136 = vset.pattern.permute.xlu0 %v146_v8 }
   0x2   :  { %v22_v3 = vsel %vm21_vm0, %v17_v0, 0.0  ;;  %v28_v4 = vsel %vm21_vm0, %v19_v1, 0.0  ;;  %v20_v5 = vld [vmem:[%s226_s0 + $0x18] sm:$0xff]  ;;  %v25_v6 = vsel %vm21_vm0, %v18_v2, 0.0  ;;  %v98_v24 = vld [vmem:[%s227_s3 + $0x8] sm:$0xff]  ;;  %v99_v25 = vld [vmem:[%s227_s3 + $0x10] sm:$0xff] }
   0x3   :  { %23 = vadd.xlane.f32.xlu0 %v22_v3  ;;  %29 = vadd.xlane.f32.xlu1 %v28_v4  ;;  %v31_v7 = vsel %vm21_vm0, %v20_v5, 0.0  ;;  %v97_v26 = vld [vmem:[%s227_s3] sm:$0xff]  ;;  %v100_v32 = vld [vmem:[%s227_s3 + $0x18] sm:$0xff] }
   0x4   :  { %v133_v43 = vld [vmem:[%s228_s1] ss:$0 sm:$0xff] }
   0x5   :  { %v134_v45 = vld [vmem:[%s229_s2] ss:$0 sm:$0xff] }
   0x7   :  { %26 = vadd.xlane.f32.xlu0 %v25_v6  ;;  %32 = vadd.xlane.f32.xlu1 %v31_v7 }
  0x90   :  { %v24_v9 = vpop.xlane.xlu0 %23  ;;  %v30_v10 = vpop.xlane.xlu1 %29 }
  0x91   :  { %v35_v11 = vmul.f32 0.03125, %v24_v9  ;;  %v37_v12 = vmul.f32 0.03125, %v30_v10 }
  0x93   :  { %v39_v13 = vsub.f32 %v17_v0, %v35_v11  ;;  %v41_v14 = vsub.f32 %v19_v1, %v37_v12 }
  0x94   :  { %v27_v15 = vpop.xlane.xlu0 %26  ;;  %v33_v27 = vpop.xlane.xlu1 %32 }
  0x95   :  { %v36_v16 = vmul.f32 0.03125, %v27_v15  ;;  %v43_v17 = vmul.f32 %v39_v13, %v39_v13  ;;  %v45_v18 = vmul.f32 %v41_v14, %v41_v14  ;;  %v38_v28 = vmul.f32 0.03125, %v33_v27 }
  0x97   :  { %v40_v19 = vsub.f32 %v18_v2, %v36_v16  ;;  %v47_v20 = vsel %vm21_vm0, %v43_v17, 0.0  ;;  %v53_v21 = vsel %vm21_vm0, %v45_v18, 0.0  ;;  %v42_v29 = vsub.f32 %v20_v5, %v38_v28 }
  0x98   :  { %48 = vadd.xlane.f32.xlu0 %v47_v20 }
  0x99   :  { %v44_v22 = vmul.f32 %v40_v19, %v40_v19  ;;  %v46_v30 = vmul.f32 %v42_v29, %v42_v29 }
  0x9b   :  { %v50_v23 = vsel %vm21_vm0, %v44_v22, 0.0  ;;  %v56_v31 = vsel %vm21_vm0, %v46_v30, 0.0 }
  0x9c   :  { %54 = vadd.xlane.f32.xlu0 %v53_v21  ;;  %51 = vadd.xlane.f32.xlu1 %v50_v23 }
  0xad   :  { %108 = vperm.xlu1 %137, %v98_v24  }
  0xb1   :  { %113 = vperm.xlu1 %137, %v99_v25  }
  0xb2   :  { %103 = vperm.xlu0 %136, %v97_v26  }
  0xd5   :  { %57 = vadd.xlane.f32.xlu1 %v56_v31 }
  0xe6   :  { %118 = vperm.xlu1 %137, %v100_v32  }
 0x125   :  { %v49_v33 = vpop.xlane.xlu0 %48 }
 0x126   :  { %v59_v34 = vmul.f32 0.03125, %v49_v33 }
 0x128   :  { %v63_v35 = vadd.f32 1e-05, %v59_v34 }
 0x129   :  { %v52_v36 = vpop.xlane.xlu1 %51  ;;  %v55_v37 = vpop.xlane.xlu0 %54 }
 0x12a   :  { %138 = vrsqrt.f32 %v63_v35  ;;  %v60_v38 = vmul.f32 0.03125, %v52_v36  ;;  %v61_v39 = vmul.f32 0.03125, %v55_v37 }
 0x12c   :  { %v64_v40 = vadd.f32 1e-05, %v60_v38  ;;  %v65_v41 = vadd.f32 1e-05, %v61_v39 }
 0x12d   :  { %v109_v51 = vpop.permute.xlu1 %108 }
 0x12e   :  { %140 = vrsqrt.f32 %v64_v40 }
 0x12f   :  { %142 = vrsqrt.f32 %v65_v41 }
 0x131   :  { %v104_v48 = vpop.permute.xlu0 %103  ;;  %v114_v60 = vpop.permute.xlu1 %113 }
 0x134   :  { %v139_v42 = vpop.eup %138 }
 0x135   :  { %v71_v44 = vmul.f32 %v139_v42, %v39_v13 }
 0x137   :  { %v82_v46 = vmul.f32 %v133_v43, %v71_v44 }
 0x138   :  { %v141_v47 = vpop.eup %140 }
 0x139   :  { %v143_v49 = vpop.eup %142  ;;  %v72_v50 = vmul.f32 %v141_v47, %v40_v19  ;;  %v93_v52 = vadd.f32 %v134_v45, %v82_v46 }
 0x13a   :  { %v73_v53 = vmul.f32 %v143_v49, %v41_v14 }
 0x13b   :  { %v83_v54 = vmul.f32 %v133_v43, %v72_v50  ;;  %v121_v55 = vmul.f32 %v104_v48, %v93_v52 }
 0x13c   :  { %v84_v56 = vmul.f32 %v133_v43, %v73_v53 }
 0x13d   :  { %v94_v57 = vadd.f32 %v134_v45, %v83_v54  ;;  %125 = vst.msk [vmem:[%s230_s4] sm:$0xff] %vm21_vm0, %v121_v55 }
 0x13e   :  { %v95_v58 = vadd.f32 %v134_v45, %v84_v56 }
 0x13f   :  { %v122_v59 = vmul.f32 %v109_v51, %v94_v57 }
 0x140   :  { %v123_v61 = vmul.f32 %v114_v60, %v95_v58 }
 0x141   :  { %126 = vst.msk [vmem:[%s230_s4 + $0x8] sm:$0xff] %vm21_vm0, %v122_v59 }
 0x142   :  { %127 = vst.msk [vmem:[%s230_s4 + $0x10] sm:$0xff] %vm21_vm0, %v123_v61 }
 0x162   :  { %v58_v62 = vpop.xlane.xlu1 %57 }
 0x163   :  { %v62_v63 = vmul.f32 0.03125, %v58_v62 }
 0x165   :  { %v66_v0 = vadd.f32 1e-05, %v62_v63 }
 0x166   :  { %v119_v5 = vpop.permute.xlu1 %118 }
 0x167   :  { %144 = vrsqrt.f32 %v66_v0 }
 0x171   :  { %v145_v1 = vpop.eup %144 }
 0x172   :  { %v74_v2 = vmul.f32 %v145_v1, %v42_v29 }
 0x174   :  { %v85_v3 = vmul.f32 %v133_v43, %v74_v2 }
 0x176   :  { %v96_v4 = vadd.f32 %v134_v45, %v85_v3 }
 0x178   :  { %v124_v6 = vmul.f32 %v119_v5, %v96_v4 }
 0x17a   :  { %128 = vst.msk [vmem:[%s230_s4 + $0x18] sm:$0xff] %vm21_vm0, %v124_v6 }

// kernel: msa_transformer_forward.47
= control target key start
LH: loop header
LB: loop body
LE: loop exit
PB: predicated region body
PF: predicated region fallthrough
CT: control target
= control target key end

     0   :  { %vm25_vm0 = vcmask 261120   ;;  %vm197_vm1 = vcmask 781312   ;;  %s322_s0 = inlined_call_operand.vmem [shape: f32[32,32], index: 0, kind: input, shape index: {}]   ;;  %s323_s3 = inlined_call_operand.vmem [shape: bf16[32,96], index: 3, kind: input, shape index: {}]   ;;  %s324_s1 = inlined_call_operand.vmem [shape: f32[1,32], index: 1, kind: input, shape index: {}]   ;;  %s325_s2 = inlined_call_operand.vmem [shape: f32[1,32], index: 2, kind: input, shape index: {}]   ;;  %s326_s4 = inlined_call_operand.vmem [shape: f32[1,96], index: 4, kind: input, shape index: {}]   ;;  %s327_s5 = inlined_call_operand.vmem [shape: bf16[32,96], index: 5, kind: output, shape index: {}]  }
   0x1   :  { %v21_v0 = vld [vmem:[%s322_s0] sm:$0xff]  ;;  %v23_v1 = vld [vmem:[%s322_s0 + $0x10] sm:$0xff]  ;;  %v22_v2 = vld [vmem:[%s322_s0 + $0x8] sm:$0xff] }
   0x2   :  { %v26_v3 = vsel %vm25_vm0, %v21_v0, 0.0  ;;  %v32_v4 = vsel %vm25_vm0, %v23_v1, 0.0  ;;  %v24_v5 = vld [vmem:[%s322_s0 + $0x18] sm:$0xff]  ;;  %v29_v6 = vsel %vm25_vm0, %v22_v2, 0.0  ;;  %v233_v28 = vld [vmem:[%s323_s3] sm:$0xff]   ;;  %v234_v29 = vld [vmem:[%s323_s3 + $0x8] sm:$0xff]  }
   0x3   :  { %27 = vadd.xlane.f32.xlu0 %v26_v3  ;;  %33 = vadd.xlane.f32.xlu1 %v32_v4  ;;  %v35_v7 = vsel %vm25_vm0, %v24_v5, 0.0  ;;  %v206_v44 = vld [vmem:[%s324_s1] ss:$0 sm:$0xff] }
   0x4   :  { %225 = vmatprep.subr.bf16.mxu0 %v233_v28  ;;  %v207_v50 = vld [vmem:[%s325_s2] ss:$0 sm:$0xff] }
   0x5   :  { %226 = vmatpush3.bf16.msra.mxu0 %v233_v28  ;;  %v208_v62 = vld [vmem:[%s326_s4] ss:$0 sm:$0xff] }
   0x6   :  { %227 = vmatprep.subr.bf16.mxu0 %v234_v29 }
   0x7   :  { %30 = vadd.xlane.f32.xlu0 %v29_v6  ;;  %36 = vadd.xlane.f32.xlu1 %v35_v7 }
   0x9   :  { %228 = vmatpush3.bf16.msra.mxu0 %v234_v29 }
  0x90   :  { %v28_v8 = vpop.xlane.xlu0 %27  ;;  %v34_v9 = vpop.xlane.xlu1 %33 }
  0x91   :  { %v39_v10 = vmul.f32 0.03125, %v28_v8  ;;  %v41_v11 = vmul.f32 0.03125, %v34_v9 }
  0x93   :  { %v43_v12 = vsub.f32 %v21_v0, %v39_v10  ;;  %v45_v13 = vsub.f32 %v23_v1, %v41_v11 }
  0x94   :  { %v31_v14 = vpop.xlane.xlu0 %30  ;;  %v37_v15 = vpop.xlane.xlu1 %36 }
  0x95   :  { %v40_v16 = vmul.f32 0.03125, %v31_v14  ;;  %v42_v17 = vmul.f32 0.03125, %v37_v15  ;;  %v47_v18 = vmul.f32 %v43_v12, %v43_v12  ;;  %v49_v19 = vmul.f32 %v45_v13, %v45_v13 }
  0x97   :  { %v44_v20 = vsub.f32 %v22_v2, %v40_v16  ;;  %v46_v21 = vsub.f32 %v24_v5, %v42_v17  ;;  %v51_v22 = vsel %vm25_vm0, %v47_v18, 0.0  ;;  %v57_v23 = vsel %vm25_vm0, %v49_v19, 0.0 }
  0x98   :  { %52 = vadd.xlane.f32.xlu0 %v51_v22 }
  0x99   :  { %v48_v24 = vmul.f32 %v44_v20, %v44_v20  ;;  %v50_v25 = vmul.f32 %v46_v21, %v46_v21 }
  0x9b   :  { %v54_v26 = vsel %vm25_vm0, %v48_v24, 0.0  ;;  %v60_v27 = vsel %vm25_vm0, %v50_v25, 0.0 }
  0x9c   :  { %58 = vadd.xlane.f32.xlu0 %v57_v23  ;;  %55 = vadd.xlane.f32.xlu1 %v54_v26 }
  0xa0   :  { %61 = vadd.xlane.f32.xlu1 %v60_v27 }
 0x125   :  { %v53_v30 = vpop.xlane.xlu0 %52 }
 0x126   :  { %v63_v31 = vmul.f32 0.03125, %v53_v30 }
 0x128   :  { %v67_v32 = vadd.f32 1e-05, %v63_v31 }
 0x129   :  { %v56_v33 = vpop.xlane.xlu1 %55  ;;  %v59_v34 = vpop.xlane.xlu0 %58 }
 0x12a   :  { %235 = vrsqrt.f32 %v67_v32  ;;  %v64_v35 = vmul.f32 0.03125, %v56_v33  ;;  %v65_v36 = vmul.f32 0.03125, %v59_v34 }
 0x12c   :  { %v68_v37 = vadd.f32 1e-05, %v64_v35  ;;  %v69_v38 = vadd.f32 1e-05, %v65_v36 }
 0x12d   :  { %v62_v39 = vpop.xlane.xlu1 %61 }
 0x12e   :  { %237 = vrsqrt.f32 %v68_v37  ;;  %v66_v40 = vmul.f32 0.03125, %v62_v39 }
 0x12f   :  { %239 = vrsqrt.f32 %v69_v38 }
 0x130   :  { %v70_v41 = vadd.f32 1e-05, %v66_v40 }
 0x132   :  { %241 = vrsqrt.f32 %v70_v41 }
 0x134   :  { %v236_v42 = vpop.eup %235 }
 0x135   :  { %v75_v43 = vmul.f32 %v236_v42, %v43_v12 }
 0x137   :  { %v86_v48 = vmul.f32 %v206_v44, %v75_v43 }
 0x138   :  { %v238_v45 = vpop.eup %237 }
 0x139   :  { %v240_v46 = vpop.eup %239  ;;  %v76_v47 = vmul.f32 %v238_v45, %v44_v20  ;;  %v97_v54 = vadd.f32 %v207_v50, %v86_v48 }
 0x13a   :  { %v77_v49 = vmul.f32 %v240_v46, %v45_v13 }
 0x13b   :  { %v87_v51 = vmul.f32 %v206_v44, %v76_v47 }
 0x13c   :  { %v242_v52 = vpop.eup %241  ;;  %v88_v56 = vmul.f32 %v206_v44, %v77_v49 }
 0x13d   :  { %v78_v53 = vmul.f32 %v242_v52, %v46_v21  ;;  %v98_v55 = vadd.f32 %v207_v50, %v87_v51 }
 0x13e   :  { %v99_v59 = vadd.f32 %v207_v50, %v88_v56 }
 0x13f   :  { %v101_v57 = vpack.c.bf16 %v98_v55, %v97_v54  ;;  %v89_v58 = vmul.f32 %v206_v44, %v78_v53 }
 0x141   :  { %229 = vmatprep.mubr.msk.bf16.mxu0 %vm25_vm0, %v101_v57  ;;  %v100_v60 = vadd.f32 %v207_v50, %v89_v58 }
 0x143   :  { %v102_v61 = vpack.c.bf16 %v100_v60, %v99_v59 }
 0x145   :  { %230 = vmatmul.mubr.msk.bf16.vlgmr.msra.gmra.mrb[0].mxu0 %vm25_vm0, %v102_v61 }
 0x218   :  { %v231_v63 = vpop.f32.mrb[0].mxu0 }
 0x219   :  { %v175_v0 = vadd.f32 %v231_v63, %v208_v62  ;;  %v166_v1 = vpop.f32.mrb[1].mxu0 }
 0x21a   :  { %v167_v2 = vadd.f32 %v208_v62, %v166_v1  ;;  %v232_v3 = vpop.f32.mrb[2].mxu0 }
 0x21b   :  { %v219_v4 = vpack.c.bf16 %v175_v0, %v175_v0  ;;  %v178_v5 = vadd.f32 %v232_v3, %v208_v62  ;;  %v169_v6 = vpop.f32.mrb[3].mxu0 }
 0x21c   :  { %v217_v7 = vpack.c.bf16 %v167_v2, %v167_v2  ;;  %v170_v8 = vadd.f32 %v208_v62, %v169_v6 }
 0x21d   :  { %200 = vst.msk [vmem:[%s327_s5 + $0x8] sm:$0xf] %vm197_vm1, %v219_v4  ;;  %v220_v9 = vpack.c.bf16 %v178_v5, %v178_v5 }
 0x21e   :  { %198 = vst.msk [vmem:[%s327_s5] sm:$0xf] %vm197_vm1, %v217_v7  ;;  %v218_v10 = vpack.c.bf16 %v170_v8, %v170_v8 }
 0x21f   :  { %201 = vst.msk [vmem:[%s327_s5 + $0xc] sm:$0xf] %vm197_vm1, %v220_v9 }
 0x220   :  { %199 = vst.msk [vmem:[%s327_s5 + $0x4] sm:$0xf] %vm197_vm1, %v218_v10 }

// kernel: msa_transformer_forward.49
= control target key start
LH: loop header
LB: loop body
LE: loop exit
PB: predicated region body
PF: predicated region fallthrough
CT: control target
= control target key end

     0   :  { %vm33_vm0 = vcmask 261120   ;;  %v579_v0 = vmov 0.0   ;;  %vm580_vm1 = vmmov 0   ;;  %vm241_vm2 = vcmask 64512   ;;  %s722_s1 = inlined_call_operand.vmem [shape: bf16[1,4,8,32], index: 1, kind: input, shape index: {}]   ;;  %s723_s0 = inlined_call_operand.vmem [shape: bf16[1,4,8,32], index: 0, kind: input, shape index: {}]   ;;  %s724_s3 = inlined_call_operand.vmem [shape: f32[1,4,8,8], index: 3, kind: input, shape index: {}]   ;;  %s725_s4 = inlined_call_operand.vmem [shape: f32[1,1,8], index: 4, kind: input, shape index: {}]   ;;  %s726_s2 = inlined_call_operand.vmem [shape: bf16[1,4,8,32], index: 2, kind: input, shape index: {}]   ;;  %s727_s5 = inlined_call_operand.vmem [shape: bf16[1,4,8,32], index: 5, kind: output, shape index: {}]  }
   0x1   :  { %513 = vmatprep.subr.bf16.mxu0 %v579_v0  ;;  %v25_v1 = vld [vmem:[%s722_s1] sm:$0xf]  ;;  %519 = vmatprep.subr.bf16.mxu1 %v579_v0  ;;  %v26_v2 = vld [vmem:[%s722_s1 + $0x4] sm:$0xf]  ;;  %v27_v5 = vld [vmem:[%s722_s1 + $0x8] sm:$0xf] }
   0x2   :  { %v38_v3 = vsel %vm33_vm0, %v25_v1, 0  ;;  %v84_v4 = vsel %vm33_vm0, %v26_v2, 0  ;;  %515 = vmatprep.mubr.msk.bf16.mxu0 %vm580_vm1, %v579_v0  ;;  %521 = vmatprep.mubr.msk.bf16.mxu1 %vm580_vm1, %v579_v0  ;;  %v28_v6 = vld [vmem:[%s722_s1 + $0xc] sm:$0xf]  ;;  %v21_v7 = vld [vmem:[%s723_s0] sm:$0xf] }
   0x3   :  { %514 = vmatpush3.bf16.xpose.msra.mxu0 %v38_v3  ;;  %520 = vmatpush3.bf16.xpose.msra.mxu1 %v84_v4  ;;  %v22_v8 = vld [vmem:[%s723_s0 + $0x4] sm:$0xf]  ;;  %v130_v9 = vsel %vm33_vm0, %v27_v5, 0  ;;  %v176_v10 = vsel %vm33_vm0, %v28_v6, 0  ;;  %v23_v11 = vld [vmem:[%s723_s0 + $0x8] sm:$0xf] }
   0x4   :  { %525 = vmatprep.subr.bf16.mxu0 %v579_v0  ;;  %531 = vmatprep.subr.bf16.mxu1 %v579_v0  ;;  %v24_v12 = vld [vmem:[%s723_s0 + $0xc] sm:$0xf]  ;;  %v222_v14 = vld [vmem:[%s724_s3] sm:$0xff]  ;;  %v224_v32 = vld [vmem:[%s724_s3 + $0x10] sm:$0xff]  ;;  %vm293_vm3 = vcmask 1043456   ;;  %vm479_vm4 = vcmask 257024  }
   0x5   :  { %v223_v16 = vld [vmem:[%s724_s3 + $0x8] sm:$0xff]  ;;  %v492_v23 = vld [vmem:[%s725_s4] ss:$0 sm:$0xff]  ;;  %v225_v34 = vld [vmem:[%s724_s3 + $0x18] sm:$0xff] }
   0xa   :  { %516 = vmatmul.mubr.msk.bf16.vlgmr.msra.gmra.mrb[0].mxu0 %vm33_vm0, %v21_v7  ;;  %522 = vmatmul.mubr.msk.bf16.vlgmr.msra.gmra.mrb[0].mxu1 %vm33_vm0, %v22_v8  ;;  %v29_v7 = vld [vmem:[%s726_s2] sm:$0xf] }
   0xb   :  { %526 = vmatpush3.bf16.xpose.msra.mxu0 %v130_v9  ;;  %532 = vmatpush3.bf16.xpose.msra.mxu1 %v176_v10  ;;  %v295_v8 = vsel %vm293_vm3, %v29_v7, 0  ;;  %v30_v9 = vld [vmem:[%s726_s2 + $0x4] sm:$0xf] }
   0xc   :  { %527 = vmatprep.mubr.msk.bf16.mxu0 %vm580_vm1, %v579_v0  ;;  %533 = vmatprep.mubr.msk.bf16.mxu1 %vm580_vm1, %v579_v0  ;;  %v341_v10 = vsel %vm293_vm3, %v30_v9, 0 }
   0xd   :  { %537 = vmatprep.subr.bf16.mxu0 %v579_v0  ;;  %543 = vmatprep.subr.bf16.mxu1 %v579_v0 }
  0x12   :  { %528 = vmatmul.mubr.msk.bf16.vlgmr.msra.gmra.mrb[4].mxu0 %vm33_vm0, %v23_v11  ;;  %534 = vmatmul.mubr.msk.bf16.vlgmr.msra.gmra.mrb[4].mxu1 %vm33_vm0, %v24_v12  ;;  %v31_v11 = vld [vmem:[%s726_s2 + $0x8] sm:$0xf] }
  0x13   :  { %539 = vmatprep.mubr.msk.bf16.mxu0 %vm580_vm1, %v579_v0  ;;  %545 = vmatprep.mubr.msk.bf16.mxu1 %vm580_vm1, %v579_v0  ;;  %v387_v12 = vsel %vm293_vm3, %v31_v11, 0 }
  0x14   :  { %538 = vmatpush3.bf16.msra.mxu0 %v295_v8  ;;  %544 = vmatpush3.bf16.msra.mxu1 %v341_v10 }
  0x15   :  { %549 = vmatprep.subr.bf16.mxu0 %v579_v0  ;;  %555 = vmatprep.subr.bf16.mxu1 %v579_v0 }
  0xdd   :  { %v74_v13 = vpop.f32.mrb[0].mxu0  ;;  %v120_v15 = vpop.f32.mrb[0].mxu1 }
  0xde   :  { %v218_v17 = vmul.f32 0.17677669, %v74_v13  ;;  %v517_v18 = vpop.f32.mrb[1].mxu0  ;;  %v219_v19 = vmul.f32 0.17677669, %v120_v15  ;;  %v523_v20 = vpop.f32.mrb[1].mxu1 }
  0xdf   :  { %v77_v21 = vpop.f32.mrb[2].mxu0  ;;  %v123_v22 = vpop.f32.mrb[2].mxu1  ;;  %v32_v13 = vld [vmem:[%s726_s2 + $0xc] sm:$0xf] }
  0xe0   :  { %v226_v24 = vadd.f32 %v222_v14, %v218_v17  ;;  %v227_v25 = vadd.f32 %v223_v16, %v219_v19  ;;  %v518_v26 = vpop.f32.mrb[3].mxu0  ;;  %v524_v27 = vpop.f32.mrb[3].mxu1  ;;  %v433_v14 = vsel %vm293_vm3, %v32_v13, 0 }
  0xe2   :  { %v237_v28 = vadd.f32 %v492_v23, %v226_v24  ;;  %v238_v29 = vadd.f32 %v492_v23, %v227_v25 }
  0xe4   :  { %v242_v30 = vsel %vm241_vm2, %v237_v28, -inf  ;;  %v245_v35 = vsel %vm241_vm2, %v238_v29, -inf }
  0xe5   :  { %243 = vmax.xlane.f32.xlu0 %v242_v30  ;;  %v166_v31 = vpop.f32.mrb[4].mxu0  ;;  %v212_v33 = vpop.f32.mrb[4].mxu1 }
  0xe6   :  { %v220_v36 = vmul.f32 0.17677669, %v166_v31  ;;  %v529_v37 = vpop.f32.mrb[5].mxu0  ;;  %v221_v38 = vmul.f32 0.17677669, %v212_v33  ;;  %v535_v39 = vpop.f32.mrb[5].mxu1 }
  0xe7   :  { %v169_v40 = vpop.f32.mrb[6].mxu0  ;;  %v215_v41 = vpop.f32.mrb[6].mxu1 }
  0xe8   :  { %v228_v42 = vadd.f32 %v224_v32, %v220_v36  ;;  %v229_v43 = vadd.f32 %v225_v34, %v221_v38  ;;  %v530_v44 = vpop.f32.mrb[7].mxu0  ;;  %v536_v45 = vpop.f32.mrb[7].mxu1 }
  0xe9   :  { %246 = vmax.xlane.f32.xlu0 %v245_v35 }
  0xea   :  { %v239_v46 = vadd.f32 %v492_v23, %v228_v42  ;;  %v240_v47 = vadd.f32 %v492_v23, %v229_v43 }
  0xec   :  { %v248_v48 = vsel %vm241_vm2, %v239_v46, -inf  ;;  %v251_v49 = vsel %vm241_vm2, %v240_v47, -inf }
  0xed   :  { %249 = vmax.xlane.f32.xlu1 %v248_v48 }
  0xf1   :  { %252 = vmax.xlane.f32.xlu1 %v251_v49 }
 0x172   :  { %v244_v50 = vpop.xlane.xlu0 %243 }
 0x173   :  { %v254_v51 = vsub.f32 %v237_v28, %v244_v50 }
 0x175   :  { %v258_v52 = vmul.f32 1.442695, %v254_v51 }
 0x176   :  { %v247_v53 = vpop.xlane.xlu0 %246 }
 0x177   :  { %563 = vpow2.f32 %v258_v52  ;;  %v255_v54 = vsub.f32 %v238_v29, %v247_v53 }
 0x179   :  { %v260_v55 = vmul.f32 1.442695, %v255_v54 }
 0x17a   :  { %v250_v56 = vpop.xlane.xlu1 %249 }
 0x17b   :  { %565 = vpow2.f32 %v260_v55  ;;  %v256_v57 = vsub.f32 %v239_v46, %v250_v56 }
 0x17d   :  { %v262_v58 = vmul.f32 1.442695, %v256_v57 }
 0x17e   :  { %v253_v59 = vpop.xlane.xlu1 %252 }
 0x17f   :  { %567 = vpow2.f32 %v262_v58  ;;  %v257_v60 = vsub.f32 %v240_v47, %v253_v59 }
 0x181   :  { %v564_v61 = vpop.eup %563  ;;  %v264_v62 = vmul.f32 1.442695, %v257_v60 }
 0x182   :  { %v266_v63 = vsel %vm241_vm2, %v564_v61, 0.0 }
 0x183   :  { %569 = vpow2.f32 %v264_v62  ;;  %267 = vadd.xlane.f32.xlu0 %v266_v63 }
 0x185   :  { %v566_v1 = vpop.eup %565 }
 0x186   :  { %v269_v2 = vsel %vm241_vm2, %v566_v1, 0.0 }
 0x187   :  { %270 = vadd.xlane.f32.xlu1 %v269_v2 }
 0x189   :  { %v568_v3 = vpop.eup %567 }
 0x18a   :  { %v272_v4 = vsel %vm241_vm2, %v568_v3, 0.0 }
 0x18b   :  { %273 = vadd.xlane.f32.xlu0 %v272_v4 }
 0x18d   :  { %v570_v5 = vpop.eup %569 }
 0x18e   :  { %v275_v6 = vsel %vm241_vm2, %v570_v5, 0.0 }
 0x18f   :  { %276 = vadd.xlane.f32.xlu1 %v275_v6 }
 0x210   :  { %v268_v15 = vpop.xlane.xlu0 %267 }
 0x211   :  { %571 = vrcp.f32 %v268_v15 }
 0x214   :  { %v271_v16 = vpop.xlane.xlu1 %270 }
 0x215   :  { %573 = vrcp.f32 %v271_v16 }
 0x218   :  { %v274_v17 = vpop.xlane.xlu0 %273 }
 0x219   :  { %575 = vrcp.f32 %v274_v17 }
 0x21b   :  { %v572_v18 = vpop.eup %571 }
 0x21c   :  { %v282_v19 = vmul.f32 %v572_v18, %v564_v61  ;;  %v277_v20 = vpop.xlane.xlu1 %276 }
 0x21d   :  { %577 = vrcp.f32 %v277_v20 }
 0x21e   :  { %v286_v21 = vpack.c.bf16 %v282_v19, %v282_v19 }
 0x21f   :  { %v574_v22 = vpop.eup %573 }
 0x220   :  { %v283_v23 = vmul.f32 %v574_v22, %v566_v1  ;;  %540 = vmatmul.mubr.msk.bf16.vlgmr.msra.gmra.mrb[8].mxu0 %vm241_vm2, %v286_v21 }
 0x221   :  { %550 = vmatpush3.bf16.msra.mxu0 %v387_v12  ;;  %551 = vmatprep.mubr.msk.bf16.mxu0 %vm580_vm1, %v579_v0 }
 0x222   :  { %v287_v24 = vpack.c.bf16 %v283_v23, %v283_v23 }
 0x223   :  { %v576_v25 = vpop.eup %575 }
 0x224   :  { %v284_v26 = vmul.f32 %v576_v25, %v568_v3  ;;  %546 = vmatmul.mubr.msk.bf16.vlgmr.msra.gmra.mrb[8].mxu1 %vm241_vm2, %v287_v24 }
 0x225   :  { %556 = vmatpush3.bf16.msra.mxu1 %v433_v14  ;;  %557 = vmatprep.mubr.msk.bf16.mxu1 %vm580_vm1, %v579_v0 }
 0x226   :  { %v288_v27 = vpack.c.bf16 %v284_v26, %v284_v26 }
 0x227   :  { %v578_v28 = vpop.eup %577 }
 0x228   :  { %v285_v29 = vmul.f32 %v578_v28, %v570_v5  ;;  %552 = vmatmul.mubr.msk.bf16.vlgmr.msra.gmra.mrb[12].mxu0 %vm241_vm2, %v288_v27 }
 0x22a   :  { %v289_v30 = vpack.c.bf16 %v285_v29, %v285_v29 }
 0x22c   :  { %558 = vmatmul.mubr.msk.bf16.vlgmr.msra.gmra.mrb[12].mxu1 %vm241_vm2, %v289_v30 }
 0x2f3   :  { %v331_v31 = vpop.f32.mrb[8].mxu0 }
 0x2f4   :  { %v475_v32 = vpack.c.bf16 %v331_v31, %v331_v31  ;;  %v541_v33 = vpop.f32.mrb[9].mxu0 }
 0x2f5   :  { %v334_v34 = vpop.f32.mrb[10].mxu0 }
 0x2f6   :  { %480 = vst.msk [vmem:[%s727_s5] sm:$0xf] %vm479_vm4, %v475_v32  ;;  %v542_v35 = vpop.f32.mrb[11].mxu0 }
 0x2f7   :  { %v377_v0 = vpop.f32.mrb[8].mxu1 }
 0x2f8   :  { %v476_v36 = vpack.c.bf16 %v377_v0, %v377_v0  ;;  %v547_v37 = vpop.f32.mrb[9].mxu1 }
 0x2f9   :  { %v380_v38 = vpop.f32.mrb[10].mxu1 }
 0x2fa   :  { %481 = vst.msk [vmem:[%s727_s5 + $0x4] sm:$0xf] %vm479_vm4, %v476_v36  ;;  %v548_v39 = vpop.f32.mrb[11].mxu1 }
 0x2fb   :  { %v423_v40 = vpop.f32.mrb[12].mxu0 }
 0x2fc   :  { %v477_v41 = vpack.c.bf16 %v423_v40, %v423_v40  ;;  %v553_v42 = vpop.f32.mrb[13].mxu0 }
 0x2fd   :  { %v426_v43 = vpop.f32.mrb[14].mxu0 }
 0x2fe   :  { %482 = vst.msk [vmem:[%s727_s5 + $0x8] sm:$0xf] %vm479_vm4, %v477_v41  ;;  %v554_v44 = vpop.f32.mrb[15].mxu0 }
 0x2ff   :  { %v469_v45 = vpop.f32.mrb[12].mxu1 }
 0x300   :  { %v478_v46 = vpack.c.bf16 %v469_v45, %v469_v45  ;;  %v559_v47 = vpop.f32.mrb[13].mxu1 }
 0x301   :  { %v472_v48 = vpop.f32.mrb[14].mxu1 }
 0x302   :  { %483 = vst.msk [vmem:[%s727_s5 + $0xc] sm:$0xf] %vm479_vm4, %v478_v46  ;;  %v560_v49 = vpop.f32.mrb[15].mxu1 }

// kernel: msa_transformer_forward.48
= control target key start
LH: loop header
LB: loop body
LE: loop exit
PB: predicated region body
PF: predicated region fallthrough
CT: control target
= control target key end

     0   :  { %vm42_vm0 = vcmask 130048   ;;  %vm120_vm1 = vcmask 31744   ;;  %s243_s1 = inlined_call_operand.vmem [shape: bf16[16,4], index: 1, kind: input, shape index: {}]   ;;  %s244_s0 = inlined_call_operand.vmem [shape: f32[64,16], index: 0, kind: input, shape index: {}]   ;;  %s245_s2 = inlined_call_operand.vmem [shape: f32[1,4], index: 2, kind: input, shape index: {}]   ;;  %s246_s3 = inlined_call_operand.vmem [shape: f32[64,4], index: 3, kind: output, shape index: {}]  }
   0x1   :  { %v156_v0 = vld [vmem:[%s243_s1] sm:$0xff]   ;;  %v16_v2 = vld [vmem:[%s244_s0 + $0x8] sm:$0xff]  ;;  %v17_v6 = vld [vmem:[%s244_s0 + $0x10] sm:$0xff] }
   0x2   :  { %v15_v1 = vld [vmem:[%s244_s0] sm:$0xff]  ;;  %144 = vmatprep.subr.bf16.mxu0 %v156_v0  ;;  %154 = vmatprep.subr.bf16.mxu1 %v156_v0  ;;  %v20_v5 = vld [vmem:[%s244_s0 + $0x28] sm:$0xff]  ;;  %v18_v7 = vld [vmem:[%s244_s0 + $0x18] sm:$0xff] }
   0x3   :  { %v19_v3 = vld [vmem:[%s244_s0 + $0x20] sm:$0xff]  ;;  %v23_v4 = vpack.c.bf16 %v16_v2, %v15_v1  ;;  %145 = vmatpush3.bf16.msra.mxu0 %v156_v0  ;;  %155 = vmatpush3.bf16.msra.mxu1 %v156_v0  ;;  %v24_v9 = vpack.c.bf16 %v18_v7, %v17_v6  ;;  %v21_v10 = vld [vmem:[%s244_s0 + $0x30] sm:$0xff]  ;;  %v22_v11 = vld [vmem:[%s244_s0 + $0x38] sm:$0xff] }
   0x4   :  { %v25_v8 = vpack.c.bf16 %v20_v5, %v19_v3  ;;  %v26_v12 = vpack.c.bf16 %v22_v11, %v21_v10  ;;  %v133_v13 = vld [vmem:[%s245_s2] ss:$0 sm:$0xff] }
   0x5   :  { %146 = vmatprep.mubr.msk.bf16.mxu0 %vm42_vm0, %v23_v4 }
   0x6   :  { %150 = vmatprep.mubr.msk.bf16.mxu1 %vm42_vm0, %v25_v8  ;;  %147 = vmatmul.mubr.msk.bf16.vlgmr.msra.gmra.mrb[0].mxu0 %vm42_vm0, %v24_v9 }
   0x7   :  { %151 = vmatmul.mubr.msk.bf16.vlgmr.msra.gmra.mrb[0].mxu1 %vm42_vm0, %v26_v12 }
  0xd9   :  { %v148_v14 = vpop.f32.mrb[0].mxu0 }
  0xda   :  { %v152_v15 = vpop.f32.mrb[0].mxu1  ;;  %v98_v16 = vadd.f32 %v148_v14, %v133_v13  ;;  %v89_v18 = vpop.f32.mrb[1].mxu0 }
  0xdb   :  { %v114_v17 = vadd.f32 %v152_v15, %v133_v13  ;;  %v105_v19 = vpop.f32.mrb[1].mxu1  ;;  %v90_v20 = vadd.f32 %v133_v13, %v89_v18  ;;  %v149_v22 = vpop.f32.mrb[2].mxu0 }
  0xdc   :  { %v106_v21 = vadd.f32 %v133_v13, %v105_v19  ;;  %v153_v23 = vpop.f32.mrb[2].mxu1  ;;  %123 = vst.msk [vmem:[%s246_s3 + $0x10] sm:$0xff] %vm120_vm1, %v98_v16  ;;  %v101_v24 = vadd.f32 %v149_v22, %v133_v13  ;;  %v92_v26 = vpop.f32.mrb[3].mxu0 }
  0xdd   :  { %127 = vst.msk [vmem:[%s246_s3 + $0x30] sm:$0xff] %vm120_vm1, %v114_v17  ;;  %v117_v25 = vadd.f32 %v153_v23, %v133_v13  ;;  %v108_v27 = vpop.f32.mrb[3].mxu1  ;;  %121 = vst.msk [vmem:[%s246_s3] sm:$0xff] %vm120_vm1, %v90_v20  ;;  %v93_v28 = vadd.f32 %v133_v13, %v92_v26 }
  0xde   :  { %125 = vst.msk [vmem:[%s246_s3 + $0x20] sm:$0xff] %vm120_vm1, %v106_v21  ;;  %v109_v29 = vadd.f32 %v133_v13, %v108_v27  ;;  %124 = vst.msk [vmem:[%s246_s3 + $0x18] sm:$0xff] %vm120_vm1, %v101_v24 }
  0xdf   :  { %128 = vst.msk [vmem:[%s246_s3 + $0x38] sm:$0xff] %vm120_vm1, %v117_v25  ;;  %122 = vst.msk [vmem:[%s246_s3 + $0x8] sm:$0xff] %vm120_vm1, %v93_v28 }
  0xe0   :  { %126 = vst.msk [vmem:[%s246_s3 + $0x28] sm:$0xff] %vm120_vm1, %v109_v29 }

// kernel: msa_transformer_forward.50
= control target key start
LH: loop header
LB: loop body
LE: loop exit
PB: predicated region body
PF: predicated region fallthrough
CT: control target
= control target key end

     0   :  { %vm55_vm0 = vcmask 261120   ;;  %s220_s1 = inlined_call_operand.vmem [shape: bf16[32,32], index: 1, kind: input, shape index: {}]   ;;  %s221_s0 = inlined_call_operand.vmem [shape: bf16[32,32], index: 0, kind: input, shape index: {}]   ;;  %s222_s2 = inlined_call_operand.vmem [shape: f32[1,32], index: 2, kind: input, shape index: {}]   ;;  %s223_s3 = inlined_call_operand.vmem [shape: f32[32,32], index: 3, kind: input, shape index: {}]   ;;  %s224_s4 = inlined_call_operand.vmem [shape: f32[32,32], index: 4, kind: output, shape index: {}]  }
   0x1   :  { %v146_v0 = vld [vmem:[%s220_s1] sm:$0xff]   ;;  %v147_v1 = vld [vmem:[%s220_s1 + $0x8] sm:$0xff]   ;;  %v113_v6 = vld [vmem:[%s223_s3 + $0x10] sm:$0xff] }
   0x2   :  { %138 = vmatprep.subr.bf16.mxu0 %v146_v0  ;;  %v148_v2 = vld [vmem:[%s221_s0] sm:$0xff]   ;;  %v149_v3 = vld [vmem:[%s221_s0 + $0x8] sm:$0xff]   ;;  %v114_v12 = vld [vmem:[%s223_s3 + $0x18] sm:$0xff] }
   0x3   :  { %139 = vmatpush3.bf16.msra.mxu0 %v146_v0  ;;  %142 = vmatprep.mubr.msk.bf16.mxu0 %vm55_vm0, %v148_v2  ;;  %v127_v4 = vld [vmem:[%s222_s2] ss:$0 sm:$0xff]  ;;  %v112_v16 = vld [vmem:[%s223_s3 + $0x8] sm:$0xff] }
   0x4   :  { %140 = vmatprep.subr.bf16.mxu0 %v147_v1  ;;  %v111_v9 = vld [vmem:[%s223_s3] sm:$0xff] }
   0x7   :  { %141 = vmatpush3.bf16.msra.mxu0 %v147_v1 }
   0xa   :  { %143 = vmatmul.mubr.msk.bf16.vlgmr.msra.gmra.mrb[0].mxu0 %vm55_vm0, %v149_v3 }
  0xdd   :  { %v144_v5 = vpop.f32.mrb[0].mxu0 }
  0xde   :  { %v105_v7 = vadd.f32 %v144_v5, %v127_v4  ;;  %v96_v8 = vpop.f32.mrb[1].mxu0 }
  0xdf   :  { %v97_v10 = vadd.f32 %v127_v4, %v96_v8  ;;  %v145_v11 = vpop.f32.mrb[2].mxu0 }
  0xe0   :  { %v117_v13 = vadd.f32 %v113_v6, %v105_v7  ;;  %v108_v14 = vadd.f32 %v145_v11, %v127_v4  ;;  %v99_v15 = vpop.f32.mrb[3].mxu0 }
  0xe1   :  { %v115_v17 = vadd.f32 %v111_v9, %v97_v10  ;;  %v100_v18 = vadd.f32 %v127_v4, %v99_v15 }
  0xe2   :  { %121 = vst.msk [vmem:[%s224_s4 + $0x10] sm:$0xff] %vm55_vm0, %v117_v13  ;;  %v118_v19 = vadd.f32 %v114_v12, %v108_v14 }
  0xe3   :  { %119 = vst.msk [vmem:[%s224_s4] sm:$0xff] %vm55_vm0, %v115_v17  ;;  %v116_v20 = vadd.f32 %v112_v16, %v100_v18 }
  0xe4   :  { %122 = vst.msk [vmem:[%s224_s4 + $0x18] sm:$0xff] %vm55_vm0, %v118_v19 }
  0xe5   :  { %120 = vst.msk [vmem:[%s224_s4 + $0x8] sm:$0xff] %vm55_vm0, %v116_v20 }

// kernel: msa_transformer_forward.55
= control target key start
LH: loop header
LB: loop body
LE: loop exit
PB: predicated region body
PF: predicated region fallthrough
CT: control target
= control target key end

     0   :  { %vm63_vm0 = vcmask 523264   ;;  %vm127_vm1 = vcmask 261120   ;;  %s241_s1 = inlined_call_operand.vmem [shape: bf16[64,32], index: 1, kind: input, shape index: {}]   ;;  %s242_s0 = inlined_call_operand.vmem [shape: f32[32,64], index: 0, kind: input, shape index: {}]   ;;  %s243_s2 = inlined_call_operand.vmem [shape: f32[1,32], index: 2, kind: input, shape index: {}]   ;;  %s244_s3 = inlined_call_operand.vmem [shape: f32[32,32], index: 3, kind: input, shape index: {}]   ;;  %s245_s4 = inlined_call_operand.vmem [shape: f32[32,32], index: 4, kind: output, shape index: {}]  }
   0x1   :  { %v161_v0 = vld [vmem:[%s241_s1] sm:$0xff]   ;;  %v162_v1 = vld [vmem:[%s241_s1 + $0x8] sm:$0xff]   ;;  %v163_v2 = vld [vmem:[%s241_s1 + $0x10] sm:$0xff]  }
   0x2   :  { %149 = vmatprep.subr.bf16.mxu0 %v161_v0  ;;  %v18_v3 = vld [vmem:[%s242_s0] sm:$0xff]  ;;  %v19_v4 = vld [vmem:[%s242_s0 + $0x8] sm:$0xff]  ;;  %v164_v6 = vld [vmem:[%s241_s1 + $0x18] sm:$0xff]  }
   0x3   :  { %150 = vmatpush3.bf16.msra.mxu0 %v161_v0  ;;  %v22_v5 = vpack.c.bf16 %v19_v4, %v18_v3  ;;  %v20_v7 = vld [vmem:[%s242_s0 + $0x10] sm:$0xff]  ;;  %v21_v8 = vld [vmem:[%s242_s0 + $0x18] sm:$0xff]  ;;  %v136_v10 = vld [vmem:[%s243_s2] ss:$0 sm:$0xff] }
   0x4   :  { %151 = vmatprep.subr.bf16.mxu0 %v162_v1  ;;  %v23_v9 = vpack.c.bf16 %v21_v8, %v20_v7  ;;  %v121_v12 = vld [vmem:[%s244_s3 + $0x10] sm:$0xff]  ;;  %v119_v15 = vld [vmem:[%s244_s3] sm:$0xff]  ;;  %v122_v18 = vld [vmem:[%s244_s3 + $0x18] sm:$0xff] }
   0x5   :  { %157 = vmatprep.mubr.msk.bf16.mxu0 %vm63_vm0, %v22_v5  ;;  %v120_v22 = vld [vmem:[%s244_s3 + $0x8] sm:$0xff] }
   0x7   :  { %152 = vmatpush3.bf16.msra.mxu0 %v162_v1 }
   0x8   :  { %153 = vmatprep.subr.bf16.mxu0 %v163_v2 }
   0xb   :  { %154 = vmatpush3.bf16.msra.mxu0 %v163_v2 }
   0xc   :  { %155 = vmatprep.subr.bf16.mxu0 %v164_v6 }
   0xf   :  { %156 = vmatpush3.bf16.msra.mxu0 %v164_v6 }
  0x12   :  { %158 = vmatmul.mubr.msk.bf16.vlgmr.msra.gmra.mrb[0].mxu0 %vm63_vm0, %v23_v9 }
  0xe5   :  { %v159_v11 = vpop.f32.mrb[0].mxu0 }
  0xe6   :  { %v113_v13 = vadd.f32 %v159_v11, %v136_v10  ;;  %v104_v14 = vpop.f32.mrb[1].mxu0 }
  0xe7   :  { %v105_v16 = vadd.f32 %v136_v10, %v104_v14  ;;  %v160_v17 = vpop.f32.mrb[2].mxu0 }
  0xe8   :  { %v125_v19 = vadd.f32 %v121_v12, %v113_v13  ;;  %v116_v20 = vadd.f32 %v160_v17, %v136_v10  ;;  %v107_v21 = vpop.f32.mrb[3].mxu0 }
  0xe9   :  { %v123_v23 = vadd.f32 %v119_v15, %v105_v16  ;;  %v108_v24 = vadd.f32 %v136_v10, %v107_v21 }
  0xea   :  { %130 = vst.msk [vmem:[%s245_s4 + $0x10] sm:$0xff] %vm127_vm1, %v125_v19  ;;  %v126_v25 = vadd.f32 %v122_v18, %v116_v20 }
  0xeb   :  { %128 = vst.msk [vmem:[%s245_s4] sm:$0xff] %vm127_vm1, %v123_v23  ;;  %v124_v26 = vadd.f32 %v120_v22, %v108_v24 }
  0xec   :  { %131 = vst.msk [vmem:[%s245_s4 + $0x18] sm:$0xff] %vm127_vm1, %v126_v25 }
  0xed   :  { %129 = vst.msk [vmem:[%s245_s4 + $0x8] sm:$0xff] %vm127_vm1, %v124_v26 }

// kernel: msa_transformer_forward.54
= control target key start
LH: loop header
LB: loop body
LE: loop exit
PB: predicated region body
PF: predicated region fallthrough
CT: control target
= control target key end

     0   :  { %vm25_vm0 = vcmask 261120   ;;  %vm217_vm1 = vcmask 523264   ;;  %s342_s0 = inlined_call_operand.vmem [shape: f32[32,32], index: 0, kind: input, shape index: {}]   ;;  %s343_s3 = inlined_call_operand.vmem [shape: bf16[32,64], index: 3, kind: input, shape index: {}]   ;;  %s344_s1 = inlined_call_operand.vmem [shape: f32[1,32], index: 1, kind: input, shape index: {}]   ;;  %s345_s2 = inlined_call_operand.vmem [shape: f32[1,32], index: 2, kind: input, shape index: {}]   ;;  %s346_s4 = inlined_call_operand.vmem [shape: f32[1,64], index: 4, kind: input, shape index: {}]   ;;  %s347_s5 = inlined_call_operand.vmem [shape: f32[32,64], index: 5, kind: output, shape index: {}]  }
   0x1   :  { %v21_v0 = vld [vmem:[%s342_s0] sm:$0xff]  ;;  %v23_v1 = vld [vmem:[%s342_s0 + $0x10] sm:$0xff]  ;;  %v22_v2 = vld [vmem:[%s342_s0 + $0x8] sm:$0xff] }
   0x2   :  { %v26_v3 = vsel %vm25_vm0, %v21_v0, 0.0  ;;  %v32_v4 = vsel %vm25_vm0, %v23_v1, 0.0  ;;  %v24_v5 = vld [vmem:[%s342_s0 + $0x18] sm:$0xff]  ;;  %v29_v6 = vsel %vm25_vm0, %v22_v2, 0.0  ;;  %v245_v28 = vld [vmem:[%s343_s3] sm:$0xff]   ;;  %v246_v29 = vld [vmem:[%s343_s3 + $0x8] sm:$0xff]  }
   0x3   :  { %27 = vadd.xlane.f32.xlu0 %v26_v3  ;;  %33 = vadd.xlane.f32.xlu1 %v32_v4  ;;  %v35_v7 = vsel %vm25_vm0, %v24_v5, 0.0  ;;  %v226_v44 = vld [vmem:[%s344_s1] ss:$0 sm:$0xff] }
   0x4   :  { %237 = vmatprep.subr.bf16.mxu0 %v245_v28  ;;  %v227_v50 = vld [vmem:[%s345_s2] ss:$0 sm:$0xff] }
   0x5   :  { %238 = vmatpush3.bf16.msra.mxu0 %v245_v28  ;;  %v228_v62 = vld [vmem:[%s346_s4] ss:$0 sm:$0xff] }
   0x6   :  { %239 = vmatprep.subr.bf16.mxu0 %v246_v29 }
   0x7   :  { %30 = vadd.xlane.f32.xlu0 %v29_v6  ;;  %36 = vadd.xlane.f32.xlu1 %v35_v7 }
   0x9   :  { %240 = vmatpush3.bf16.msra.mxu0 %v246_v29 }
  0x90   :  { %v28_v8 = vpop.xlane.xlu0 %27  ;;  %v34_v9 = vpop.xlane.xlu1 %33 }
  0x91   :  { %v39_v10 = vmul.f32 0.03125, %v28_v8  ;;  %v41_v11 = vmul.f32 0.03125, %v34_v9 }
  0x93   :  { %v43_v12 = vsub.f32 %v21_v0, %v39_v10  ;;  %v45_v13 = vsub.f32 %v23_v1, %v41_v11 }
  0x94   :  { %v31_v14 = vpop.xlane.xlu0 %30  ;;  %v37_v15 = vpop.xlane.xlu1 %36 }
  0x95   :  { %v40_v16 = vmul.f32 0.03125, %v31_v14  ;;  %v42_v17 = vmul.f32 0.03125, %v37_v15  ;;  %v47_v18 = vmul.f32 %v43_v12, %v43_v12  ;;  %v49_v19 = vmul.f32 %v45_v13, %v45_v13 }
  0x97   :  { %v44_v20 = vsub.f32 %v22_v2, %v40_v16  ;;  %v46_v21 = vsub.f32 %v24_v5, %v42_v17  ;;  %v51_v22 = vsel %vm25_vm0, %v47_v18, 0.0  ;;  %v57_v23 = vsel %vm25_vm0, %v49_v19, 0.0 }
  0x98   :  { %52 = vadd.xlane.f32.xlu0 %v51_v22 }
  0x99   :  { %v48_v24 = vmul.f32 %v44_v20, %v44_v20  ;;  %v50_v25 = vmul.f32 %v46_v21, %v46_v21 }
  0x9b   :  { %v54_v26 = vsel %vm25_vm0, %v48_v24, 0.0  ;;  %v60_v27 = vsel %vm25_vm0, %v50_v25, 0.0 }
  0x9c   :  { %58 = vadd.xlane.f32.xlu0 %v57_v23  ;;  %55 = vadd.xlane.f32.xlu1 %v54_v26 }
  0xa0   :  { %61 = vadd.xlane.f32.xlu1 %v60_v27 }
 0x125   :  { %v53_v30 = vpop.xlane.xlu0 %52 }
 0x126   :  { %v63_v31 = vmul.f32 0.03125, %v53_v30 }
 0x128   :  { %v67_v32 = vadd.f32 1e-05, %v63_v31 }
 0x129   :  { %v56_v33 = vpop.xlane.xlu1 %55  ;;  %v59_v34 = vpop.xlane.xlu0 %58 }
 0x12a   :  { %247 = vrsqrt.f32 %v67_v32  ;;  %v64_v35 = vmul.f32 0.03125, %v56_v33  ;;  %v65_v36 = vmul.f32 0.03125, %v59_v34 }
 0x12c   :  { %v68_v37 = vadd.f32 1e-05, %v64_v35  ;;  %v69_v38 = vadd.f32 1e-05, %v65_v36 }
 0x12d   :  { %v62_v39 = vpop.xlane.xlu1 %61 }
 0x12e   :  { %249 = vrsqrt.f32 %v68_v37  ;;  %v66_v40 = vmul.f32 0.03125, %v62_v39 }
 0x12f   :  { %251 = vrsqrt.f32 %v69_v38 }
 0x130   :  { %v70_v41 = vadd.f32 1e-05, %v66_v40 }
 0x132   :  { %253 = vrsqrt.f32 %v70_v41 }
 0x134   :  { %v248_v42 = vpop.eup %247 }
 0x135   :  { %v75_v43 = vmul.f32 %v248_v42, %v43_v12 }
 0x137   :  { %v86_v48 = vmul.f32 %v226_v44, %v75_v43 }
 0x138   :  { %v250_v45 = vpop.eup %249 }
 0x139   :  { %v252_v46 = vpop.eup %251  ;;  %v76_v47 = vmul.f32 %v250_v45, %v44_v20  ;;  %v97_v54 = vadd.f32 %v227_v50, %v86_v48 }
 0x13a   :  { %v77_v49 = vmul.f32 %v252_v46, %v45_v13 }
 0x13b   :  { %v87_v51 = vmul.f32 %v226_v44, %v76_v47 }
 0x13c   :  { %v254_v52 = vpop.eup %253  ;;  %v88_v56 = vmul.f32 %v226_v44, %v77_v49 }
 0x13d   :  { %v78_v53 = vmul.f32 %v254_v52, %v46_v21  ;;  %v98_v55 = vadd.f32 %v227_v50, %v87_v51 }
 0x13e   :  { %v99_v59 = vadd.f32 %v227_v50, %v88_v56 }
 0x13f   :  { %v101_v57 = vpack.c.bf16 %v98_v55, %v97_v54  ;;  %v89_v58 = vmul.f32 %v226_v44, %v78_v53 }
 0x141   :  { %241 = vmatprep.mubr.msk.bf16.mxu0 %vm25_vm0, %v101_v57  ;;  %v100_v60 = vadd.f32 %v227_v50, %v89_v58 }
 0x143   :  { %v102_v61 = vpack.c.bf16 %v100_v60, %v99_v59 }
 0x145   :  { %242 = vmatmul.mubr.msk.bf16.vlgmr.msra.gmra.mrb[0].mxu0 %vm25_vm0, %v102_v61 }
 0x218   :  { %v243_v63 = vpop.f32.mrb[0].mxu0 }
 0x219   :  { %v175_v0 = vadd.f32 %v243_v63, %v228_v62  ;;  %v166_v1 = vpop.f32.mrb[1].mxu0 }
 0x21a   :  { %v167_v2 = vadd.f32 %v228_v62, %v166_v1  ;;  %v244_v3 = vpop.f32.mrb[2].mxu0 }
 0x21b   :  { %v183_v4 = vmul.f32 %v175_v0, %v175_v0  ;;  %v178_v5 = vadd.f32 %v244_v3, %v228_v62  ;;  %v169_v6 = vpop.f32.mrb[3].mxu0 }
 0x21c   :  { %v181_v7 = vmul.f32 %v167_v2, %v167_v2  ;;  %v170_v8 = vadd.f32 %v228_v62, %v169_v6 }
 0x21d   :  { %v187_v9 = vmul.f32 %v183_v4, %v175_v0  ;;  %v184_v10 = vmul.f32 %v178_v5, %v178_v5 }
 0x21e   :  { %v185_v11 = vmul.f32 %v181_v7, %v167_v2  ;;  %v182_v12 = vmul.f32 %v170_v8, %v170_v8 }
 0x21f   :  { %v191_v13 = vmul.f32 0.044715, %v187_v9  ;;  %v188_v14 = vmul.f32 %v184_v10, %v178_v5 }
 0x220   :  { %v189_v15 = vmul.f32 0.044715, %v185_v11  ;;  %v186_v16 = vmul.f32 %v182_v12, %v170_v8 }
 0x221   :  { %v195_v17 = vadd.f32 %v191_v13, %v175_v0  ;;  %v192_v18 = vmul.f32 0.044715, %v188_v14 }
 0x222   :  { %v193_v19 = vadd.f32 %v189_v15, %v167_v2  ;;  %v190_v20 = vmul.f32 0.044715, %v186_v16 }
 0x223   :  { %v199_v21 = vmul.f32 0.7978846, %v195_v17  ;;  %v196_v22 = vadd.f32 %v192_v18, %v178_v5 }
 0x224   :  { %v197_v23 = vmul.f32 0.7978846, %v193_v19  ;;  %v194_v24 = vadd.f32 %v190_v20, %v170_v8 }
 0x225   :  { %255 = vtanh.f32 %v199_v21  ;;  %v200_v25 = vmul.f32 0.7978846, %v196_v22 }
 0x226   :  { %257 = vtanh.f32 %v197_v23  ;;  %v198_v26 = vmul.f32 0.7978846, %v194_v24 }
 0x227   :  { %259 = vtanh.f32 %v200_v25 }
 0x228   :  { %261 = vtanh.f32 %v198_v26 }
 0x22f   :  { %v256_v27 = vpop.eup %255 }
 0x230   :  { %v258_v28 = vpop.eup %257  ;;  %v207_v29 = vadd.f32 1.0, %v256_v27 }
 0x231   :  { %v260_v30 = vpop.eup %259  ;;  %v205_v31 = vadd.f32 1.0, %v258_v28 }
 0x232   :  { %v262_v32 = vpop.eup %261  ;;  %v211_v33 = vmul.f32 0.5, %v207_v29  ;;  %v208_v34 = vadd.f32 1.0, %v260_v30 }
 0x233   :  { %v209_v35 = vmul.f32 0.5, %v205_v31  ;;  %v206_v36 = vadd.f32 1.0, %v262_v32 }
 0x234   :  { %v215_v37 = vmul.f32 %v211_v33, %v175_v0  ;;  %v212_v38 = vmul.f32 0.5, %v208_v34 }
 0x235   :  { %v213_v39 = vmul.f32 %v209_v35, %v167_v2  ;;  %v210_v40 = vmul.f32 0.5, %v206_v36 }
 0x236   :  { %220 = vst.msk [vmem:[%s347_s5 + $0x10] sm:$0xff] %vm217_vm1, %v215_v37  ;;  %v216_v41 = vmul.f32 %v212_v38, %v178_v5 }
 0x237   :  { %218 = vst.msk [vmem:[%s347_s5] sm:$0xff] %vm217_vm1, %v213_v39  ;;  %v214_v42 = vmul.f32 %v210_v40, %v170_v8 }
 0x238   :  { %221 = vst.msk [vmem:[%s347_s5 + $0x18] sm:$0xff] %vm217_vm1, %v216_v41 }
 0x239   :  { %219 = vst.msk [vmem:[%s347_s5 + $0x8] sm:$0xff] %vm217_vm1, %v214_v42 }

// kernel: msa_transformer_forward.56
= control target key start
LH: loop header
LB: loop body
LE: loop exit
PB: predicated region body
PF: predicated region fallthrough
CT: control target
= control target key end

     0   :  { %vm44_vm0 = vcmask 261120   ;;  %vm116_vm1 = vcmask 60416   ;;  %s205_s1 = inlined_call_operand.vmem [shape: bf16[32,8], index: 1, kind: input, shape index: {}]   ;;  %s206_s0 = inlined_call_operand.vmem [shape: f32[32,32], index: 0, kind: input, shape index: {}]   ;;  %s207_s2 = inlined_call_operand.vmem [shape: f32[1,8], index: 2, kind: input, shape index: {}]   ;;  %s208_s3 = inlined_call_operand.vmem [shape: bf16[32,8], index: 3, kind: output, shape index: {}]  }
   0x1   :  { %v150_v0 = vld [vmem:[%s205_s1] sm:$0xff]   ;;  %v151_v1 = vld [vmem:[%s205_s1 + $0x8] sm:$0xff]   ;;  %v17_v5 = vld [vmem:[%s206_s0 + $0x10] sm:$0xff] }
   0x2   :  { %142 = vmatprep.subr.bf16.mxu0 %v150_v0  ;;  %v15_v2 = vld [vmem:[%s206_s0] sm:$0xff]  ;;  %v16_v3 = vld [vmem:[%s206_s0 + $0x8] sm:$0xff]  ;;  %v18_v6 = vld [vmem:[%s206_s0 + $0x18] sm:$0xff] }
   0x3   :  { %143 = vmatpush3.bf16.msra.mxu0 %v150_v0  ;;  %v19_v4 = vpack.c.bf16 %v16_v3, %v15_v2  ;;  %v20_v7 = vpack.c.bf16 %v18_v6, %v17_v5  ;;  %v125_v8 = vld [vmem:[%s207_s2] ss:$0 sm:$0xff] }
   0x4   :  { %144 = vmatprep.subr.bf16.mxu0 %v151_v1 }
   0x5   :  { %146 = vmatprep.mubr.msk.bf16.mxu0 %vm44_vm0, %v19_v4 }
   0x7   :  { %145 = vmatpush3.bf16.msra.mxu0 %v151_v1 }
   0xa   :  { %147 = vmatmul.mubr.msk.bf16.vlgmr.msra.gmra.mrb[0].mxu0 %vm44_vm0, %v20_v7 }
  0xdd   :  { %v148_v9 = vpop.f32.mrb[0].mxu0 }
  0xde   :  { %v94_v10 = vadd.f32 %v148_v9, %v125_v8  ;;  %v85_v11 = vpop.f32.mrb[1].mxu0 }
  0xdf   :  { %v86_v12 = vadd.f32 %v125_v8, %v85_v11  ;;  %v149_v13 = vpop.f32.mrb[2].mxu0 }
  0xe0   :  { %v136_v14 = vpack.c.bf16 %v94_v10, %v94_v10  ;;  %v97_v15 = vadd.f32 %v149_v13, %v125_v8  ;;  %v88_v16 = vpop.f32.mrb[3].mxu0 }
  0xe1   :  { %v134_v17 = vpack.c.bf16 %v86_v12, %v86_v12  ;;  %v89_v18 = vadd.f32 %v125_v8, %v88_v16 }
  0xe2   :  { %119 = vst.msk [vmem:[%s208_s3 + $0x8] sm:$0xf] %vm116_vm1, %v136_v14  ;;  %v137_v19 = vpack.c.bf16 %v97_v15, %v97_v15 }
  0xe3   :  { %117 = vst.msk [vmem:[%s208_s3] sm:$0xf] %vm116_vm1, %v134_v17  ;;  %v135_v20 = vpack.c.bf16 %v89_v18, %v89_v18 }
  0xe4   :  { %120 = vst.msk [vmem:[%s208_s3 + $0xc] sm:$0xf] %vm116_vm1, %v137_v19 }
  0xe5   :  { %118 = vst.msk [vmem:[%s208_s3 + $0x4] sm:$0xf] %vm116_vm1, %v135_v20 }

// kernel: msa_transformer_forward.57
= control target key start
LH: loop header
LB: loop body
LE: loop exit
PB: predicated region body
PF: predicated region fallthrough
CT: control target
= control target key end

     0   :  { %vm34_vm0 = vcmask 1041408   ;;  %vm27_vm1 = vcmask 31744   ;;  %vm107_vm2 = vcmask 257024   ;;  %s176_s1 = inlined_call_operand.vmem [shape: bf16[1,4,32], index: 1, kind: input, shape index: {}]   ;;  %s177_s0 = inlined_call_operand.vmem [shape: bf16[1,32,4], index: 0, kind: input, shape index: {}]   ;;  %s178_s2 = inlined_call_operand.vmem [shape: bf16[1,32,32], index: 2, kind: output, shape index: {}]  }
   0x1   :  { %v16_v0 = vld [vmem:[%s176_s1] sm:$0x3]  ;;  %v139_v3 = vld [vmem:[%s177_s0 + $0x8] sm:$0xff]  }
   0x2   :  { %137 = vmatprep.subr.msk.bf16.mxu0 %vm34_vm0, %v16_v0  ;;  %v36_v1 = vsel %vm34_vm0, %v16_v0, 0  ;;  %v138_v2 = vld [vmem:[%s177_s0] sm:$0xff]  }
   0x3   :  { %132 = vmatpush3.bf16.msra.mxu0 %v36_v1  ;;  %133 = vmatprep.mubr.msk.bf16.mxu0 %vm27_vm1, %v138_v2 }
   0x6   :  { %134 = vmatmul.mubr.msk.bf16.vlgmr.msra.gmra.mrb[0].mxu0 %vm27_vm1, %v139_v3 }
  0xd9   :  { %v135_v4 = vpop.f32.mrb[0].mxu0 }
  0xda   :  { %v89_v5 = vmul.f32 0.25, %v135_v4  ;;  %v72_v6 = vpop.f32.mrb[1].mxu0 }
  0xdb   :  { %v87_v7 = vmul.f32 0.25, %v72_v6  ;;  %v136_v8 = vpop.f32.mrb[2].mxu0 }
  0xdc   :  { %v126_v9 = vpack.c.bf16 %v89_v5, %v89_v5  ;;  %v90_v10 = vmul.f32 0.25, %v136_v8  ;;  %v75_v11 = vpop.f32.mrb[3].mxu0 }
  0xdd   :  { %v124_v12 = vpack.c.bf16 %v87_v7, %v87_v7  ;;  %v88_v13 = vmul.f32 0.25, %v75_v11 }
  0xde   :  { %110 = vst.msk [vmem:[%s178_s2 + $0x8] sm:$0xf] %vm107_vm2, %v126_v9  ;;  %v127_v14 = vpack.c.bf16 %v90_v10, %v90_v10 }
  0xdf   :  { %108 = vst.msk [vmem:[%s178_s2] sm:$0xf] %vm107_vm2, %v124_v12  ;;  %v125_v15 = vpack.c.bf16 %v88_v13, %v88_v13 }
  0xe0   :  { %111 = vst.msk [vmem:[%s178_s2 + $0xc] sm:$0xf] %vm107_vm2, %v127_v14 }
  0xe1   :  { %109 = vst.msk [vmem:[%s178_s2 + $0x4] sm:$0xf] %vm107_vm2, %v125_v15 }

// kernel: msa_transformer_forward.59
= control target key start
LH: loop header
LB: loop body
LE: loop exit
PB: predicated region body
PF: predicated region fallthrough
CT: control target
= control target key end

     0   :  { %vm42_vm0 = vcmask 130048   ;;  %vm128_vm1 = vcmask 261120   ;;  %s251_s1 = inlined_call_operand.vmem [shape: bf16[16,32], index: 1, kind: input, shape index: {}]   ;;  %s252_s0 = inlined_call_operand.vmem [shape: f32[64,16], index: 0, kind: input, shape index: {}]   ;;  %s253_s2 = inlined_call_operand.vmem [shape: f32[1,32], index: 2, kind: input, shape index: {}]   ;;  %s254_s3 = inlined_call_operand.vmem [shape: f32[64,32], index: 3, kind: output, shape index: {}]  }
   0x1   :  { %v164_v0 = vld [vmem:[%s251_s1] sm:$0xff]   ;;  %v16_v2 = vld [vmem:[%s252_s0 + $0x8] sm:$0xff]  ;;  %v17_v6 = vld [vmem:[%s252_s0 + $0x10] sm:$0xff] }
   0x2   :  { %v15_v1 = vld [vmem:[%s252_s0] sm:$0xff]  ;;  %152 = vmatprep.subr.bf16.mxu0 %v164_v0  ;;  %162 = vmatprep.subr.bf16.mxu1 %v164_v0  ;;  %v20_v5 = vld [vmem:[%s252_s0 + $0x28] sm:$0xff]  ;;  %v18_v7 = vld [vmem:[%s252_s0 + $0x18] sm:$0xff] }
   0x3   :  { %v19_v3 = vld [vmem:[%s252_s0 + $0x20] sm:$0xff]  ;;  %v23_v4 = vpack.c.bf16 %v16_v2, %v15_v1  ;;  %153 = vmatpush3.bf16.msra.mxu0 %v164_v0  ;;  %163 = vmatpush3.bf16.msra.mxu1 %v164_v0  ;;  %v24_v9 = vpack.c.bf16 %v18_v7, %v17_v6  ;;  %v21_v10 = vld [vmem:[%s252_s0 + $0x30] sm:$0xff]  ;;  %v22_v11 = vld [vmem:[%s252_s0 + $0x38] sm:$0xff] }
   0x4   :  { %v25_v8 = vpack.c.bf16 %v20_v5, %v19_v3  ;;  %v26_v12 = vpack.c.bf16 %v22_v11, %v21_v10  ;;  %v141_v13 = vld [vmem:[%s253_s2] ss:$0 sm:$0xff] }
   0x5   :  { %154 = vmatprep.mubr.msk.bf16.mxu0 %vm42_vm0, %v23_v4 }
   0x6   :  { %158 = vmatprep.mubr.msk.bf16.mxu1 %vm42_vm0, %v25_v8  ;;  %155 = vmatmul.mubr.msk.bf16.vlgmr.msra.gmra.mrb[0].mxu0 %vm42_vm0, %v24_v9 }
   0x7   :  { %159 = vmatmul.mubr.msk.bf16.vlgmr.msra.gmra.mrb[0].mxu1 %vm42_vm0, %v26_v12 }
  0xd9   :  { %v156_v14 = vpop.f32.mrb[0].mxu0 }
  0xda   :  { %v160_v15 = vpop.f32.mrb[0].mxu1  ;;  %v98_v16 = vadd.f32 %v156_v14, %v141_v13  ;;  %v89_v18 = vpop.f32.mrb[1].mxu0 }
  0xdb   :  { %v114_v17 = vadd.f32 %v160_v15, %v141_v13  ;;  %v105_v19 = vpop.f32.mrb[1].mxu1  ;;  %v90_v20 = vadd.f32 %v141_v13, %v89_v18  ;;  %v157_v22 = vpop.f32.mrb[2].mxu0 }
  0xdc   :  { %v106_v21 = vadd.f32 %v141_v13, %v105_v19  ;;  %v161_v23 = vpop.f32.mrb[2].mxu1  ;;  %v122_v24 = vmax.f32 %v98_v16, 0.0  ;;  %v101_v26 = vadd.f32 %v157_v22, %v141_v13  ;;  %v92_v28 = vpop.f32.mrb[3].mxu0 }
  0xdd   :  { %v126_v25 = vmax.f32 %v114_v17, 0.0  ;;  %v117_v27 = vadd.f32 %v161_v23, %v141_v13  ;;  %v108_v29 = vpop.f32.mrb[3].mxu1  ;;  %v120_v30 = vmax.f32 %v90_v20, 0.0  ;;  %v93_v32 = vadd.f32 %v141_v13, %v92_v28 }
  0xde   :  { %v124_v31 = vmax.f32 %v106_v21, 0.0  ;;  %v109_v33 = vadd.f32 %v141_v13, %v108_v29  ;;  %131 = vst.msk [vmem:[%s254_s3 + $0x10] sm:$0xff] %vm128_vm1, %v122_v24  ;;  %v123_v34 = vmax.f32 %v101_v26, 0.0 }
  0xdf   :  { %135 = vst.msk [vmem:[%s254_s3 + $0x30] sm:$0xff] %vm128_vm1, %v126_v25  ;;  %v127_v35 = vmax.f32 %v117_v27, 0.0  ;;  %129 = vst.msk [vmem:[%s254_s3] sm:$0xff] %vm128_vm1, %v120_v30  ;;  %v121_v36 = vmax.f32 %v93_v32, 0.0 }
  0xe0   :  { %133 = vst.msk [vmem:[%s254_s3 + $0x20] sm:$0xff] %vm128_vm1, %v124_v31  ;;  %v125_v37 = vmax.f32 %v109_v33, 0.0  ;;  %132 = vst.msk [vmem:[%s254_s3 + $0x18] sm:$0xff] %vm128_vm1, %v123_v34 }
  0xe1   :  { %136 = vst.msk [vmem:[%s254_s3 + $0x38] sm:$0xff] %vm128_vm1, %v127_v35  ;;  %130 = vst.msk [vmem:[%s254_s3 + $0x8] sm:$0xff] %vm128_vm1, %v121_v36 }
  0xe2   :  { %134 = vst.msk [vmem:[%s254_s3 + $0x28] sm:$0xff] %vm128_vm1, %v125_v37 }

// kernel: msa_transformer_forward.58
= control target key start
LH: loop header
LB: loop body
LE: loop exit
PB: predicated region body
PF: predicated region fallthrough
CT: control target
= control target key end

     0   :  { %vm61_vm0 = vcmask 130048   ;;  %s302_s1 = inlined_call_operand.vmem [shape: bf16[16,16], index: 1, kind: input, shape index: {}]   ;;  %s303_s0 = inlined_call_operand.vmem [shape: bf16[64,16], index: 0, kind: input, shape index: {}]   ;;  %s304_s2 = inlined_call_operand.vmem [shape: f32[1,16], index: 2, kind: input, shape index: {}]   ;;  %s305_s3 = inlined_call_operand.vmem [shape: f32[64,16], index: 3, kind: input, shape index: {}]   ;;  %s306_s4 = inlined_call_operand.vmem [shape: f32[64,16], index: 4, kind: output, shape index: {}]  }
   0x1   :  { %v194_v0 = vld [vmem:[%s302_s1] sm:$0xff]   ;;  %v196_v2 = vld [vmem:[%s303_s0 + $0x10] sm:$0xff]   ;;  %v197_v3 = vld [vmem:[%s303_s0 + $0x8] sm:$0xff]  }
   0x2   :  { %v195_v1 = vld [vmem:[%s303_s0] sm:$0xff]   ;;  %182 = vmatprep.subr.bf16.mxu0 %v194_v0  ;;  %192 = vmatprep.subr.bf16.mxu1 %v194_v0  ;;  %v198_v4 = vld [vmem:[%s303_s0 + $0x18] sm:$0xff]   ;;  %v141_v7 = vld [vmem:[%s305_s3 + $0x10] sm:$0xff] }
   0x3   :  { %183 = vmatpush3.bf16.msra.mxu0 %v194_v0  ;;  %193 = vmatpush3.bf16.msra.mxu1 %v194_v0  ;;  %v167_v5 = vld [vmem:[%s304_s2] ss:$0 sm:$0xff]  ;;  %v145_v9 = vld [vmem:[%s305_s3 + $0x30] sm:$0xff]  ;;  %v142_v19 = vld [vmem:[%s305_s3 + $0x18] sm:$0xff] }
   0x4   :  { %184 = vmatprep.mubr.msk.bf16.mxu0 %vm61_vm0, %v195_v1  ;;  %188 = vmatprep.mubr.msk.bf16.mxu1 %vm61_vm0, %v196_v2  ;;  %v139_v13 = vld [vmem:[%s305_s3] sm:$0xff]  ;;  %v146_v21 = vld [vmem:[%s305_s3 + $0x38] sm:$0xff]  ;;  %v140_v27 = vld [vmem:[%s305_s3 + $0x8] sm:$0xff] }
   0x5   :  { %v143_v15 = vld [vmem:[%s305_s3 + $0x20] sm:$0xff]  ;;  %v144_v29 = vld [vmem:[%s305_s3 + $0x28] sm:$0xff] }
   0x6   :  { %185 = vmatmul.mubr.msk.bf16.vlgmr.msra.gmra.mrb[0].mxu0 %vm61_vm0, %v197_v3  ;;  %189 = vmatmul.mubr.msk.bf16.vlgmr.msra.gmra.mrb[0].mxu1 %vm61_vm0, %v198_v4 }
  0xd9   :  { %v186_v6 = vpop.f32.mrb[0].mxu0  ;;  %v190_v8 = vpop.f32.mrb[0].mxu1 }
  0xda   :  { %v117_v10 = vadd.f32 %v186_v6, %v167_v5  ;;  %v133_v11 = vadd.f32 %v190_v8, %v167_v5  ;;  %v108_v12 = vpop.f32.mrb[1].mxu0  ;;  %v124_v14 = vpop.f32.mrb[1].mxu1 }
  0xdb   :  { %v109_v16 = vadd.f32 %v167_v5, %v108_v12  ;;  %v125_v17 = vadd.f32 %v167_v5, %v124_v14  ;;  %v187_v18 = vpop.f32.mrb[2].mxu0  ;;  %v191_v20 = vpop.f32.mrb[2].mxu1 }
  0xdc   :  { %v149_v22 = vadd.f32 %v141_v7, %v117_v10  ;;  %v153_v23 = vadd.f32 %v145_v9, %v133_v11  ;;  %v120_v24 = vadd.f32 %v187_v18, %v167_v5  ;;  %v136_v25 = vadd.f32 %v191_v20, %v167_v5  ;;  %v111_v26 = vpop.f32.mrb[3].mxu0  ;;  %v127_v28 = vpop.f32.mrb[3].mxu1 }
  0xdd   :  { %v147_v30 = vadd.f32 %v139_v13, %v109_v16  ;;  %v151_v31 = vadd.f32 %v143_v15, %v125_v17  ;;  %v112_v32 = vadd.f32 %v167_v5, %v111_v26  ;;  %v128_v33 = vadd.f32 %v167_v5, %v127_v28 }
  0xde   :  { %157 = vst.msk [vmem:[%s306_s4 + $0x10] sm:$0xff] %vm61_vm0, %v149_v22  ;;  %161 = vst.msk [vmem:[%s306_s4 + $0x30] sm:$0xff] %vm61_vm0, %v153_v23  ;;  %v150_v34 = vadd.f32 %v142_v19, %v120_v24  ;;  %v154_v35 = vadd.f32 %v146_v21, %v136_v25 }
  0xdf   :  { %155 = vst.msk [vmem:[%s306_s4] sm:$0xff] %vm61_vm0, %v147_v30  ;;  %159 = vst.msk [vmem:[%s306_s4 + $0x20] sm:$0xff] %vm61_vm0, %v151_v31  ;;  %v148_v36 = vadd.f32 %v140_v27, %v112_v32  ;;  %v152_v37 = vadd.f32 %v144_v29, %v128_v33 }
  0xe0   :  { %158 = vst.msk [vmem:[%s306_s4 + $0x18] sm:$0xff] %vm61_vm0, %v150_v34  ;;  %162 = vst.msk [vmem:[%s306_s4 + $0x38] sm:$0xff] %vm61_vm0, %v154_v35 }
  0xe1   :  { %156 = vst.msk [vmem:[%s306_s4 + $0x8] sm:$0xff] %vm61_vm0, %v148_v36  ;;  %160 = vst.msk [vmem:[%s306_s4 + $0x28] sm:$0xff] %vm61_vm0, %v152_v37 }

// kernel: msa_transformer_forward.64
= control target key start
LH: loop header
LB: loop body
LE: loop exit
PB: predicated region body
PF: predicated region fallthrough
CT: control target
= control target key end

     0   :  { %vm53_vm0 = vcmask 261120   ;;  %s316_s1 = inlined_call_operand.vmem [shape: bf16[32,32], index: 1, kind: input, shape index: {}]   ;;  %s317_s0 = inlined_call_operand.vmem [shape: f32[64,32], index: 0, kind: input, shape index: {}]   ;;  %s318_s2 = inlined_call_operand.vmem [shape: f32[1,32], index: 2, kind: input, shape index: {}]   ;;  %s319_s3 = inlined_call_operand.vmem [shape: f32[64,32], index: 3, kind: input, shape index: {}]   ;;  %s320_s4 = inlined_call_operand.vmem [shape: f32[64,32], index: 4, kind: output, shape index: {}]  }
   0x1   :  { %v196_v0 = vld [vmem:[%s316_s1] sm:$0xff]   ;;  %v197_v1 = vld [vmem:[%s316_s1 + $0x8] sm:$0xff]   ;;  %v20_v7 = vld [vmem:[%s317_s0 + $0x10] sm:$0xff] }
   0x2   :  { %180 = vmatprep.subr.bf16.mxu0 %v196_v0  ;;  %192 = vmatprep.subr.bf16.mxu1 %v196_v0  ;;  %v18_v2 = vld [vmem:[%s317_s0] sm:$0xff]  ;;  %v19_v3 = vld [vmem:[%s317_s0 + $0x8] sm:$0xff]  ;;  %v21_v8 = vld [vmem:[%s317_s0 + $0x18] sm:$0xff] }
   0x3   :  { %v22_v4 = vld [vmem:[%s317_s0 + $0x20] sm:$0xff]  ;;  %181 = vmatpush3.bf16.msra.mxu0 %v196_v0  ;;  %194 = vmatpush3.bf16.msra.mxu1 %v196_v0  ;;  %v26_v5 = vpack.c.bf16 %v19_v3, %v18_v2  ;;  %v23_v6 = vld [vmem:[%s317_s0 + $0x28] sm:$0xff]  ;;  %v24_v10 = vld [vmem:[%s317_s0 + $0x30] sm:$0xff]  ;;  %v27_v12 = vpack.c.bf16 %v21_v8, %v20_v7 }
   0x4   :  { %182 = vmatprep.subr.bf16.mxu0 %v197_v1  ;;  %193 = vmatprep.subr.bf16.mxu1 %v197_v1  ;;  %v28_v9 = vpack.c.bf16 %v23_v6, %v22_v4  ;;  %v25_v11 = vld [vmem:[%s317_s0 + $0x38] sm:$0xff]  ;;  %v167_v14 = vld [vmem:[%s318_s2] ss:$0 sm:$0xff]  ;;  %v133_v16 = vld [vmem:[%s319_s3 + $0x10] sm:$0xff] }
   0x5   :  { %184 = vmatprep.mubr.msk.bf16.mxu0 %vm53_vm0, %v26_v5  ;;  %v29_v13 = vpack.c.bf16 %v25_v11, %v24_v10  ;;  %v137_v18 = vld [vmem:[%s319_s3 + $0x30] sm:$0xff]  ;;  %v131_v22 = vld [vmem:[%s319_s3] sm:$0xff]  ;;  %v134_v28 = vld [vmem:[%s319_s3 + $0x18] sm:$0xff] }
   0x6   :  { %188 = vmatprep.mubr.msk.bf16.mxu1 %vm53_vm0, %v28_v9  ;;  %v135_v24 = vld [vmem:[%s319_s3 + $0x20] sm:$0xff]  ;;  %v138_v30 = vld [vmem:[%s319_s3 + $0x38] sm:$0xff]  ;;  %v132_v36 = vld [vmem:[%s319_s3 + $0x8] sm:$0xff] }
   0x7   :  { %183 = vmatpush3.bf16.msra.mxu0 %v197_v1  ;;  %195 = vmatpush3.bf16.msra.mxu1 %v197_v1  ;;  %v136_v38 = vld [vmem:[%s319_s3 + $0x28] sm:$0xff] }
   0xa   :  { %185 = vmatmul.mubr.msk.bf16.vlgmr.msra.gmra.mrb[0].mxu0 %vm53_vm0, %v27_v12  ;;  %189 = vmatmul.mubr.msk.bf16.vlgmr.msra.gmra.mrb[0].mxu1 %vm53_vm0, %v29_v13 }
  0xdd   :  { %v186_v15 = vpop.f32.mrb[0].mxu0  ;;  %v190_v17 = vpop.f32.mrb[0].mxu1 }
  0xde   :  { %v109_v19 = vadd.f32 %v186_v15, %v167_v14  ;;  %v125_v20 = vadd.f32 %v190_v17, %v167_v14  ;;  %v100_v21 = vpop.f32.mrb[1].mxu0  ;;  %v116_v23 = vpop.f32.mrb[1].mxu1 }
  0xdf   :  { %v101_v25 = vadd.f32 %v167_v14, %v100_v21  ;;  %v117_v26 = vadd.f32 %v167_v14, %v116_v23  ;;  %v187_v27 = vpop.f32.mrb[2].mxu0  ;;  %v191_v29 = vpop.f32.mrb[2].mxu1 }
  0xe0   :  { %v141_v31 = vadd.f32 %v133_v16, %v109_v19  ;;  %v145_v32 = vadd.f32 %v137_v18, %v125_v20  ;;  %v112_v33 = vadd.f32 %v187_v27, %v167_v14  ;;  %v128_v34 = vadd.f32 %v191_v29, %v167_v14  ;;  %v103_v35 = vpop.f32.mrb[3].mxu0  ;;  %v119_v37 = vpop.f32.mrb[3].mxu1 }
  0xe1   :  { %v139_v39 = vadd.f32 %v131_v22, %v101_v25  ;;  %v143_v40 = vadd.f32 %v135_v24, %v117_v26  ;;  %v104_v41 = vadd.f32 %v167_v14, %v103_v35  ;;  %v120_v42 = vadd.f32 %v167_v14, %v119_v37 }
  0xe2   :  { %v149_v43 = vmax.f32 %v141_v31, 0.0  ;;  %v153_v44 = vmax.f32 %v145_v32, 0.0  ;;  %v142_v45 = vadd.f32 %v134_v28, %v112_v33  ;;  %v146_v46 = vadd.f32 %v138_v30, %v128_v34 }
  0xe3   :  { %v147_v47 = vmax.f32 %v139_v39, 0.0  ;;  %v151_v48 = vmax.f32 %v143_v40, 0.0  ;;  %v140_v49 = vadd.f32 %v132_v36, %v104_v41  ;;  %v144_v50 = vadd.f32 %v136_v38, %v120_v42 }
  0xe4   :  { %157 = vst.msk [vmem:[%s320_s4 + $0x10] sm:$0xff] %vm53_vm0, %v149_v43  ;;  %161 = vst.msk [vmem:[%s320_s4 + $0x30] sm:$0xff] %vm53_vm0, %v153_v44  ;;  %v150_v51 = vmax.f32 %v142_v45, 0.0  ;;  %v154_v52 = vmax.f32 %v146_v46, 0.0 }
  0xe5   :  { %155 = vst.msk [vmem:[%s320_s4] sm:$0xff] %vm53_vm0, %v147_v47  ;;  %159 = vst.msk [vmem:[%s320_s4 + $0x20] sm:$0xff] %vm53_vm0, %v151_v48  ;;  %v148_v53 = vmax.f32 %v140_v49, 0.0  ;;  %v152_v54 = vmax.f32 %v144_v50, 0.0 }
  0xe6   :  { %158 = vst.msk [vmem:[%s320_s4 + $0x18] sm:$0xff] %vm53_vm0, %v150_v51  ;;  %162 = vst.msk [vmem:[%s320_s4 + $0x38] sm:$0xff] %vm53_vm0, %v154_v52 }
  0xe7   :  { %156 = vst.msk [vmem:[%s320_s4 + $0x8] sm:$0xff] %vm53_vm0, %v148_v53  ;;  %160 = vst.msk [vmem:[%s320_s4 + $0x28] sm:$0xff] %vm53_vm0, %v152_v54 }

// kernel: msa_transformer_forward.52
= control target key start
LH: loop header
LB: loop body
LE: loop exit
PB: predicated region body
PF: predicated region fallthrough
CT: control target
= control target key end

     0   :  { %vm114_vm0 = vcmask 64512   ;;  %v4541_v0 = vmov 0.0   ;;  %vm4542_vm1 = vmmov 0   ;;  %vm1875_vm2 = vcmask 27648   ;;  %s5732_s1 = inlined_call_operand.vmem [shape: bf16[1,32,4,8], index: 1, kind: input, shape index: {}]   ;;  %s5733_s0 = inlined_call_operand.vmem [shape: bf16[1,32,4,8], index: 0, kind: input, shape index: {}]   ;;  %s5734_s3 = inlined_call_operand.vmem [shape: f32[1,32,1,4], index: 3, kind: input, shape index: {}]   ;;  %s5735_s2 = inlined_call_operand.vmem [shape: bf16[1,32,4,8], index: 2, kind: input, shape index: {}]   ;;  %s5736_s4 = inlined_call_operand.vmem [shape: bf16[1,32,4,8], index: 4, kind: output, shape index: {}]  }
   0x1   :  { %4027 = vmatprep.subr.bf16.mxu0 %v4541_v0  ;;  %4033 = vmatprep.subr.bf16.mxu1 %v4541_v0  ;;  %v50_v1 = vld [vmem:[%s5732_s1] sm:$0x3]  ;;  %v51_v2 = vld [vmem:[%s5732_s1 + $0x2] sm:$0x3]  ;;  %v52_v5 = vld [vmem:[%s5732_s1 + $0x4] sm:$0x3] }
   0x2   :  { %v119_v3 = vsel %vm114_vm0, %v50_v1, 0  ;;  %v165_v4 = vsel %vm114_vm0, %v51_v2, 0  ;;  %4029 = vmatprep.mubr.msk.bf16.mxu0 %vm4542_vm1, %v4541_v0  ;;  %4035 = vmatprep.mubr.msk.bf16.mxu1 %vm4542_vm1, %v4541_v0  ;;  %v53_v6 = vld [vmem:[%s5732_s1 + $0x6] sm:$0x3]  ;;  %v18_v7 = vld [vmem:[%s5733_s0] sm:$0x3] }
   0x3   :  { %4028 = vmatpush3.bf16.xpose.msra.mxu0 %v119_v3  ;;  %4034 = vmatpush3.bf16.xpose.msra.mxu1 %v165_v4  ;;  %v19_v8 = vld [vmem:[%s5733_s0 + $0x2] sm:$0x3]  ;;  %v211_v9 = vsel %vm114_vm0, %v52_v5, 0  ;;  %v257_v10 = vsel %vm114_vm0, %v53_v6, 0  ;;  %v54_v11 = vld [vmem:[%s5732_s1 + $0x8] sm:$0x3] }
   0x4   :  { %4039 = vmatprep.subr.bf16.mxu0 %v4541_v0  ;;  %4045 = vmatprep.subr.bf16.mxu1 %v4541_v0  ;;  %v55_v12 = vld [vmem:[%s5732_s1 + $0xa] sm:$0x3]  ;;  %v20_v13 = vld [vmem:[%s5733_s0 + $0x4] sm:$0x3]  ;;  %v21_v14 = vld [vmem:[%s5733_s0 + $0x6] sm:$0x3] }
   0x5   :  { %v303_v15 = vsel %vm114_vm0, %v54_v11, 0  ;;  %v349_v16 = vsel %vm114_vm0, %v55_v12, 0  ;;  %v56_v17 = vld [vmem:[%s5732_s1 + $0xc] sm:$0x3]  ;;  %v57_v18 = vld [vmem:[%s5732_s1 + $0xe] sm:$0x3] }
   0x6   :  { %v22_v19 = vld [vmem:[%s5733_s0 + $0x8] sm:$0x3]  ;;  %v23_v20 = vld [vmem:[%s5733_s0 + $0xa] sm:$0x3]  ;;  %v395_v21 = vsel %vm114_vm0, %v56_v17, 0  ;;  %v441_v22 = vsel %vm114_vm0, %v57_v18, 0 }
   0x7   :  { %v58_v23 = vld [vmem:[%s5732_s1 + $0x10] sm:$0x3]  ;;  %v59_v24 = vld [vmem:[%s5732_s1 + $0x12] sm:$0x3]  ;;  %v24_v25 = vld [vmem:[%s5733_s0 + $0xc] sm:$0x3] }
   0x8   :  { %v25_v26 = vld [vmem:[%s5733_s0 + $0xe] sm:$0x3]  ;;  %v487_v27 = vsel %vm114_vm0, %v58_v23, 0  ;;  %v533_v28 = vsel %vm114_vm0, %v59_v24, 0  ;;  %v60_v29 = vld [vmem:[%s5732_s1 + $0x14] sm:$0x3] }
   0x9   :  { %v61_v30 = vld [vmem:[%s5732_s1 + $0x16] sm:$0x3]  ;;  %v26_v31 = vld [vmem:[%s5733_s0 + $0x10] sm:$0x3]  ;;  %v27_v32 = vld [vmem:[%s5733_s0 + $0x12] sm:$0x3] }
   0xa   :  { %4030 = vmatmul.mubr.msk.bf16.vlgmr.msra.gmra.mrb[0].mxu0 %vm114_vm0, %v18_v7  ;;  %4036 = vmatmul.mubr.msk.bf16.vlgmr.msra.gmra.mrb[0].mxu1 %vm114_vm0, %v19_v8  ;;  %v579_v33 = vsel %vm114_vm0, %v60_v29, 0  ;;  %v625_v34 = vsel %vm114_vm0, %v61_v30, 0  ;;  %v62_v35 = vld [vmem:[%s5732_s1 + $0x18] sm:$0x3]  ;;  %v63_v36 = vld [vmem:[%s5732_s1 + $0x1a] sm:$0x3] }
   0xb   :  { %4040 = vmatpush3.bf16.xpose.msra.mxu0 %v211_v9  ;;  %4046 = vmatpush3.bf16.xpose.msra.mxu1 %v257_v10  ;;  %v28_v37 = vld [vmem:[%s5733_s0 + $0x14] sm:$0x3]  ;;  %v29_v38 = vld [vmem:[%s5733_s0 + $0x16] sm:$0x3]  ;;  %v671_v39 = vsel %vm114_vm0, %v62_v35, 0  ;;  %v717_v40 = vsel %vm114_vm0, %v63_v36, 0 }
   0xc   :  { %4041 = vmatprep.mubr.msk.bf16.mxu0 %vm4542_vm1, %v4541_v0  ;;  %4047 = vmatprep.mubr.msk.bf16.mxu1 %vm4542_vm1, %v4541_v0  ;;  %v64_v41 = vld [vmem:[%s5732_s1 + $0x1c] sm:$0x3]  ;;  %v65_v42 = vld [vmem:[%s5732_s1 + $0x1e] sm:$0x3]  ;;  %v30_v43 = vld [vmem:[%s5733_s0 + $0x18] sm:$0x3] }
   0xd   :  { %4051 = vmatprep.subr.bf16.mxu0 %v4541_v0  ;;  %4057 = vmatprep.subr.bf16.mxu1 %v4541_v0  ;;  %v31_v44 = vld [vmem:[%s5733_s0 + $0x1a] sm:$0x3]  ;;  %v763_v45 = vsel %vm114_vm0, %v64_v41, 0  ;;  %v809_v46 = vsel %vm114_vm0, %v65_v42, 0  ;;  %v66_v47 = vld [vmem:[%s5732_s1 + $0x20] sm:$0x3] }
   0xe   :  { %v67_v48 = vld [vmem:[%s5732_s1 + $0x22] sm:$0x3]  ;;  %v32_v49 = vld [vmem:[%s5733_s0 + $0x1c] sm:$0x3]  ;;  %v33_v50 = vld [vmem:[%s5733_s0 + $0x1e] sm:$0x3] }
   0xf   :  { %v855_v51 = vsel %vm114_vm0, %v66_v47, 0  ;;  %v901_v52 = vsel %vm114_vm0, %v67_v48, 0  ;;  %v68_v53 = vld [vmem:[%s5732_s1 + $0x24] sm:$0x3]  ;;  %v69_v54 = vld [vmem:[%s5732_s1 + $0x26] sm:$0x3] }
  0x10   :  { %v34_v55 = vld [vmem:[%s5733_s0 + $0x20] sm:$0x3]  ;;  %v35_v56 = vld [vmem:[%s5733_s0 + $0x22] sm:$0x3]  ;;  %v947_v57 = vsel %vm114_vm0, %v68_v53, 0  ;;  %v993_v58 = vsel %vm114_vm0, %v69_v54, 0 }
  0x11   :  { %v70_v59 = vld [vmem:[%s5732_s1 + $0x28] sm:$0x3]  ;;  %v71_v60 = vld [vmem:[%s5732_s1 + $0x2a] sm:$0x3]  ;;  %v36_v61 = vld [vmem:[%s5733_s0 + $0x24] sm:$0x3] }
  0x12   :  { %4042 = vmatmul.mubr.msk.bf16.vlgmr.msra.gmra.mrb[4].mxu0 %vm114_vm0, %v20_v13  ;;  %4048 = vmatmul.mubr.msk.bf16.vlgmr.msra.gmra.mrb[4].mxu1 %vm114_vm0, %v21_v14  ;;  %v37_v62 = vld [vmem:[%s5733_s0 + $0x26] sm:$0x3]  ;;  %v1039_v63 = vsel %vm114_vm0, %v70_v59, 0  ;;  %v1085_v1 = vsel %vm114_vm0, %v71_v60, 0  ;;  %v72_v2 = vld [vmem:[%s5732_s1 + $0x2c] sm:$0x3] }
  0x13   :  { %4052 = vmatpush3.bf16.xpose.msra.mxu0 %v303_v15  ;;  %4058 = vmatpush3.bf16.xpose.msra.mxu1 %v349_v16  ;;  %v73_v3 = vld [vmem:[%s5732_s1 + $0x2e] sm:$0x3]  ;;  %v38_v4 = vld [vmem:[%s5733_s0 + $0x28] sm:$0x3]  ;;  %v39_v5 = vld [vmem:[%s5733_s0 + $0x2a] sm:$0x3] }
  0x14   :  { %4053 = vmatprep.mubr.msk.bf16.mxu0 %vm4542_vm1, %v4541_v0  ;;  %4059 = vmatprep.mubr.msk.bf16.mxu1 %vm4542_vm1, %v4541_v0  ;;  %v1131_v6 = vsel %vm114_vm0, %v72_v2, 0  ;;  %v1177_v7 = vsel %vm114_vm0, %v73_v3, 0  ;;  %v74_v8 = vld [vmem:[%s5732_s1 + $0x30] sm:$0x3]  ;;  %v75_v9 = vld [vmem:[%s5732_s1 + $0x32] sm:$0x3] }
  0x15   :  { %4063 = vmatprep.subr.bf16.mxu0 %v4541_v0  ;;  %4069 = vmatprep.subr.bf16.mxu1 %v4541_v0  ;;  %v40_v10 = vld [vmem:[%s5733_s0 + $0x2c] sm:$0x3]  ;;  %v41_v11 = vld [vmem:[%s5733_s0 + $0x2e] sm:$0x3]  ;;  %v1223_v12 = vsel %vm114_vm0, %v74_v8, 0  ;;  %v1269_v13 = vsel %vm114_vm0, %v75_v9, 0 }
  0x16   :  { %v76_v14 = vld [vmem:[%s5732_s1 + $0x34] sm:$0x3]  ;;  %v77_v15 = vld [vmem:[%s5732_s1 + $0x36] sm:$0x3]  ;;  %v42_v16 = vld [vmem:[%s5733_s0 + $0x30] sm:$0x3] }
  0x17   :  { %v43_v17 = vld [vmem:[%s5733_s0 + $0x32] sm:$0x3]  ;;  %v1315_v18 = vsel %vm114_vm0, %v76_v14, 0  ;;  %v45_v23 = vld [vmem:[%s5733_s0 + $0x36] sm:$0x3]  ;;  %vm2264_vm3 = vcmask 1041408  }
  0x18   :  { %v47_v29 = vld [vmem:[%s5733_s0 + $0x3a] sm:$0x3]  ;;  %v3835_v36 = vld [vmem:[%s5734_s3] ss:$0 sm:$0xff]  ;;  %v3838_v53 = vld [vmem:[%s5734_s3 + $0x3] ss:$0 sm:$0xff] }
  0x19   :  { %vm2260_vm4 = vcmask 31744   ;;  %vm3766_vm5 = vcmask 58368  }
  0x1a   :  { %4054 = vmatmul.mubr.msk.bf16.vlgmr.msra.gmra.mrb[8].mxu0 %vm114_vm0, %v22_v19  ;;  %4060 = vmatmul.mubr.msk.bf16.vlgmr.msra.gmra.mrb[8].mxu1 %vm114_vm0, %v23_v20  ;;  %v1361_v19 = vsel %vm114_vm0, %v77_v15, 0  ;;  %v78_v20 = vld [vmem:[%s5732_s1 + $0x38] sm:$0x3] }
  0x1b   :  { %4064 = vmatpush3.bf16.xpose.msra.mxu0 %v395_v21  ;;  %4070 = vmatpush3.bf16.xpose.msra.mxu1 %v441_v22  ;;  %v79_v21 = vld [vmem:[%s5732_s1 + $0x3a] sm:$0x3]  ;;  %v44_v22 = vld [vmem:[%s5733_s0 + $0x34] sm:$0x3]  ;;  %v1407_v24 = vsel %vm114_vm0, %v78_v20, 0 }
  0x1c   :  { %4065 = vmatprep.mubr.msk.bf16.mxu0 %vm4542_vm1, %v4541_v0  ;;  %4071 = vmatprep.mubr.msk.bf16.mxu1 %vm4542_vm1, %v4541_v0 }
  0x1d   :  { %4075 = vmatprep.subr.bf16.mxu0 %v4541_v0  ;;  %4081 = vmatprep.subr.bf16.mxu1 %v4541_v0 }
  0x22   :  { %4066 = vmatmul.mubr.msk.bf16.vlgmr.msra.gmra.mrb[12].mxu0 %vm114_vm0, %v24_v25  ;;  %4072 = vmatmul.mubr.msk.bf16.vlgmr.msra.gmra.mrb[12].mxu1 %vm114_vm0, %v25_v26  ;;  %v1453_v25 = vsel %vm114_vm0, %v79_v21, 0  ;;  %v80_v26 = vld [vmem:[%s5732_s1 + $0x3c] sm:$0x3]  ;;  %v3842_v21 = vld [vmem:[%s5734_s3 + $0x7] ss:$0 sm:$0xff] }
  0x23   :  { %4076 = vmatpush3.bf16.xpose.msra.mxu0 %v487_v27  ;;  %4082 = vmatpush3.bf16.xpose.msra.mxu1 %v533_v28  ;;  %v81_v27 = vld [vmem:[%s5732_s1 + $0x3e] sm:$0x3]  ;;  %v46_v28 = vld [vmem:[%s5733_s0 + $0x38] sm:$0x3]  ;;  %v1499_v30 = vsel %vm114_vm0, %v80_v26, 0 }
  0x24   :  { %4077 = vmatprep.mubr.msk.bf16.mxu0 %vm4542_vm1, %v4541_v0  ;;  %4083 = vmatprep.mubr.msk.bf16.mxu1 %vm4542_vm1, %v4541_v0 }
  0x25   :  { %4087 = vmatprep.subr.bf16.mxu0 %v4541_v0  ;;  %4093 = vmatprep.subr.bf16.mxu1 %v4541_v0 }
  0x2a   :  { %4078 = vmatmul.mubr.msk.bf16.vlgmr.msra.gmra.mrb[16].mxu0 %vm114_vm0, %v26_v31  ;;  %4084 = vmatmul.mubr.msk.bf16.vlgmr.msra.gmra.mrb[16].mxu1 %vm114_vm0, %v27_v32  ;;  %v1545_v31 = vsel %vm114_vm0, %v81_v27, 0  ;;  %v48_v32 = vld [vmem:[%s5733_s0 + $0x3c] sm:$0x3] }
  0x2b   :  { %4088 = vmatpush3.bf16.xpose.msra.mxu0 %v579_v33  ;;  %4094 = vmatpush3.bf16.xpose.msra.mxu1 %v625_v34  ;;  %v49_v33 = vld [vmem:[%s5733_s0 + $0x3e] sm:$0x3] }
  0x2c   :  { %4089 = vmatprep.mubr.msk.bf16.mxu0 %vm4542_vm1, %v4541_v0  ;;  %4095 = vmatprep.mubr.msk.bf16.mxu1 %vm4542_vm1, %v4541_v0 }
  0x2d   :  { %4099 = vmatprep.subr.bf16.mxu0 %v4541_v0  ;;  %4105 = vmatprep.subr.bf16.mxu1 %v4541_v0 }
  0x32   :  { %4090 = vmatmul.mubr.msk.bf16.vlgmr.msra.gmra.mrb[20].mxu0 %vm114_vm0, %v28_v37  ;;  %4096 = vmatmul.mubr.msk.bf16.vlgmr.msra.gmra.mrb[20].mxu1 %vm114_vm0, %v29_v38  ;;  %v3836_v37 = vld [vmem:[%s5734_s3 + $0x1] ss:$0 sm:$0xff] }
  0x33   :  { %4100 = vmatpush3.bf16.xpose.msra.mxu0 %v671_v39  ;;  %4106 = vmatpush3.bf16.xpose.msra.mxu1 %v717_v40 }
  0x34   :  { %4101 = vmatprep.mubr.msk.bf16.mxu0 %vm4542_vm1, %v4541_v0  ;;  %4107 = vmatprep.mubr.msk.bf16.mxu1 %vm4542_vm1, %v4541_v0 }
  0x35   :  { %4111 = vmatprep.subr.bf16.mxu0 %v4541_v0  ;;  %4117 = vmatprep.subr.bf16.mxu1 %v4541_v0 }
  0x3a   :  { %4102 = vmatmul.mubr.msk.bf16.vlgmr.msra.gmra.mrb[24].mxu0 %vm114_vm0, %v30_v43  ;;  %4108 = vmatmul.mubr.msk.bf16.vlgmr.msra.gmra.mrb[24].mxu1 %vm114_vm0, %v31_v44 }
  0x3b   :  { %4112 = vmatpush3.bf16.xpose.msra.mxu0 %v763_v45  ;;  %4118 = vmatpush3.bf16.xpose.msra.mxu1 %v809_v46 }
  0x3c   :  { %4113 = vmatprep.mubr.msk.bf16.mxu0 %vm4542_vm1, %v4541_v0  ;;  %4119 = vmatprep.mubr.msk.bf16.mxu1 %vm4542_vm1, %v4541_v0 }
  0x3d   :  { %4123 = vmatprep.subr.bf16.mxu0 %v4541_v0  ;;  %4129 = vmatprep.subr.bf16.mxu1 %v4541_v0 }
  0x42   :  { %4114 = vmatmul.mubr.msk.bf16.vlgmr.msra.gmra.mrb[28].mxu0 %vm114_vm0, %v32_v49  ;;  %4120 = vmatmul.mubr.msk.bf16.vlgmr.msra.gmra.mrb[28].mxu1 %vm114_vm0, %v33_v50 }
  0x43   :  { %4124 = vmatpush3.bf16.xpose.msra.mxu0 %v855_v51  ;;  %4130 = vmatpush3.bf16.xpose.msra.mxu1 %v901_v52  ;;  %v3837_v52 = vld [vmem:[%s5734_s3 + $0x2] ss:$0 sm:$0xff] }
  0x44   :  { %4125 = vmatprep.mubr.msk.bf16.mxu0 %vm4542_vm1, %v4541_v0  ;;  %4131 = vmatprep.mubr.msk.bf16.mxu1 %vm4542_vm1, %v4541_v0 }
  0x45   :  { %4135 = vmatprep.subr.bf16.mxu0 %v4541_v0  ;;  %4141 = vmatprep.subr.bf16.mxu1 %v4541_v0 }
  0x4a   :  { %4126 = vmatmul.mubr.msk.bf16.vlgmr.msra.gmra.mrb[32].mxu0 %vm114_vm0, %v34_v55  ;;  %4132 = vmatmul.mubr.msk.bf16.vlgmr.msra.gmra.mrb[32].mxu1 %vm114_vm0, %v35_v56 }
  0x4b   :  { %4136 = vmatpush3.bf16.xpose.msra.mxu0 %v947_v57  ;;  %4142 = vmatpush3.bf16.xpose.msra.mxu1 %v993_v58 }
  0x4c   :  { %4137 = vmatprep.mubr.msk.bf16.mxu0 %vm4542_vm1, %v4541_v0  ;;  %4143 = vmatprep.mubr.msk.bf16.mxu1 %vm4542_vm1, %v4541_v0 }
  0x4d   :  { %4147 = vmatprep.subr.bf16.mxu0 %v4541_v0  ;;  %4153 = vmatprep.subr.bf16.mxu1 %v4541_v0 }
  0x52   :  { %4138 = vmatmul.mubr.msk.bf16.vlgmr.msra.gmra.mrb[36].mxu0 %vm114_vm0, %v36_v61  ;;  %4144 = vmatmul.mubr.msk.bf16.vlgmr.msra.gmra.mrb[36].mxu1 %vm114_vm0, %v37_v62 }
  0x53   :  { %4148 = vmatpush3.bf16.xpose.msra.mxu0 %v1039_v63  ;;  %4154 = vmatpush3.bf16.xpose.msra.mxu1 %v1085_v1 }
  0x54   :  { %4149 = vmatprep.mubr.msk.bf16.mxu0 %vm4542_vm1, %v4541_v0  ;;  %4155 = vmatprep.mubr.msk.bf16.mxu1 %vm4542_vm1, %v4541_v0 }
  0x55   :  { %4159 = vmatprep.subr.bf16.mxu0 %v4541_v0  ;;  %4165 = vmatprep.subr.bf16.mxu1 %v4541_v0 }
  0x5a   :  { %4150 = vmatmul.mubr.msk.bf16.vlgmr.msra.gmra.mrb[40].mxu0 %vm114_vm0, %v38_v4  ;;  %4156 = vmatmul.mubr.msk.bf16.vlgmr.msra.gmra.mrb[40].mxu1 %vm114_vm0, %v39_v5  ;;  %v3840_v5 = vld [vmem:[%s5734_s3 + $0x5] ss:$0 sm:$0xff] }
  0x5b   :  { %4160 = vmatpush3.bf16.xpose.msra.mxu0 %v1131_v6  ;;  %4166 = vmatpush3.bf16.xpose.msra.mxu1 %v1177_v7  ;;  %v3839_v6 = vld [vmem:[%s5734_s3 + $0x4] ss:$0 sm:$0xff] }
  0x5c   :  { %4161 = vmatprep.mubr.msk.bf16.mxu0 %vm4542_vm1, %v4541_v0  ;;  %4167 = vmatprep.mubr.msk.bf16.mxu1 %vm4542_vm1, %v4541_v0 }
  0x5d   :  { %4171 = vmatprep.subr.bf16.mxu0 %v4541_v0  ;;  %4177 = vmatprep.subr.bf16.mxu1 %v4541_v0 }
  0x62   :  { %4162 = vmatmul.mubr.msk.bf16.vlgmr.msra.gmra.mrb[44].mxu0 %vm114_vm0, %v40_v10  ;;  %4168 = vmatmul.mubr.msk.bf16.vlgmr.msra.gmra.mrb[44].mxu1 %vm114_vm0, %v41_v11 }
  0x63   :  { %4172 = vmatpush3.bf16.xpose.msra.mxu0 %v1223_v12  ;;  %4178 = vmatpush3.bf16.xpose.msra.mxu1 %v1269_v13 }
  0x64   :  { %4173 = vmatprep.mubr.msk.bf16.mxu0 %vm4542_vm1, %v4541_v0  ;;  %4183 = vmatprep.subr.bf16.mxu0 %v4541_v0 }
  0x65   :  { %4179 = vmatprep.mubr.msk.bf16.mxu1 %vm4542_vm1, %v4541_v0  ;;  %4189 = vmatprep.subr.bf16.mxu1 %v4541_v0 }
  0x6a   :  { %4174 = vmatmul.mubr.msk.bf16.vlgmr.msra.gmra.mrb[48].mxu0 %vm114_vm0, %v42_v16  ;;  %4180 = vmatmul.mubr.msk.bf16.vlgmr.msra.gmra.mrb[48].mxu1 %vm114_vm0, %v43_v17 }
  0x6b   :  { %4184 = vmatpush3.bf16.xpose.msra.mxu0 %v1315_v18  ;;  %4190 = vmatpush3.bf16.xpose.msra.mxu1 %v1361_v19 }
  0x6c   :  { %4185 = vmatprep.mubr.msk.bf16.mxu0 %vm4542_vm1, %v4541_v0  ;;  %4195 = vmatprep.subr.bf16.mxu0 %v4541_v0 }
  0x6d   :  { %4191 = vmatprep.mubr.msk.bf16.mxu1 %vm4542_vm1, %v4541_v0  ;;  %4201 = vmatprep.subr.bf16.mxu1 %v4541_v0 }
  0x72   :  { %4186 = vmatmul.mubr.msk.bf16.vlgmr.msra.gmra.mrb[52].mxu0 %vm114_vm0, %v44_v22  ;;  %4192 = vmatmul.mubr.msk.bf16.vlgmr.msra.gmra.mrb[52].mxu1 %vm114_vm0, %v45_v23  ;;  %v3841_v22 = vld [vmem:[%s5734_s3 + $0x6] ss:$0 sm:$0xff] }
  0x73   :  { %4196 = vmatpush3.bf16.xpose.msra.mxu0 %v1407_v24  ;;  %4202 = vmatpush3.bf16.xpose.msra.mxu1 %v1453_v25 }
  0x74   :  { %4197 = vmatprep.mubr.msk.bf16.mxu0 %vm4542_vm1, %v4541_v0  ;;  %4207 = vmatprep.subr.bf16.mxu0 %v4541_v0 }
  0x75   :  { %4203 = vmatprep.mubr.msk.bf16.mxu1 %vm4542_vm1, %v4541_v0  ;;  %4213 = vmatprep.subr.bf16.mxu1 %v4541_v0 }
  0x7a   :  { %4198 = vmatmul.mubr.msk.bf16.vlgmr.msra.gmra.mrb[56].mxu0 %vm114_vm0, %v46_v28  ;;  %4204 = vmatmul.mubr.msk.bf16.vlgmr.msra.gmra.mrb[56].mxu1 %vm114_vm0, %v47_v29 }
  0x7b   :  { %4208 = vmatpush3.bf16.xpose.msra.mxu0 %v1499_v30  ;;  %4214 = vmatpush3.bf16.xpose.msra.mxu1 %v1545_v31 }
  0x7c   :  { %4209 = vmatprep.mubr.msk.bf16.mxu0 %vm4542_vm1, %v4541_v0  ;;  %4215 = vmatprep.mubr.msk.bf16.mxu1 %vm4542_vm1, %v4541_v0 }
  0x7d   :  { %4219 = vmatprep.subr.bf16.mxu0 %v4541_v0  ;;  %4225 = vmatprep.subr.bf16.mxu1 %v4541_v0 }
  0x82   :  { %4210 = vmatmul.mubr.msk.bf16.vlgmr.msra.gmra.mrb[60].mxu0 %vm114_vm0, %v48_v32  ;;  %4216 = vmatmul.mubr.msk.bf16.vlgmr.msra.gmra.mrb[60].mxu1 %vm114_vm0, %v49_v33 }
  0x83   :  { %4221 = vmatprep.mubr.msk.bf16.mxu0 %vm4542_vm1, %v4541_v0  ;;  %4227 = vmatprep.mubr.msk.bf16.mxu1 %vm4542_vm1, %v4541_v0 }
  0xdd   :  { %v155_v34 = vpop.f32.mrb[0].mxu0  ;;  %v201_v35 = vpop.f32.mrb[0].mxu1 }
  0xde   :  { %v1587_v38 = vmul.f32 0.35355338, %v155_v34  ;;  %v4031_v39 = vpop.f32.mrb[1].mxu0  ;;  %v1588_v40 = vmul.f32 0.35355338, %v201_v35  ;;  %v4037_v41 = vpop.f32.mrb[1].mxu1 }
  0xdf   :  { %v158_v42 = vpop.f32.mrb[2].mxu0  ;;  %v204_v43 = vpop.f32.mrb[2].mxu1 }
  0xe0   :  { %v4032_v44 = vpop.f32.mrb[3].mxu0  ;;  %v4038_v45 = vpop.f32.mrb[3].mxu1  ;;  %v4932_v46 = vadd.f32 %v3835_v36, %v1587_v38  ;;  %v4934_v47 = vadd.f32 %v3836_v37, %v1588_v40  ;;  %v3844_v37 = vld [vmem:[%s5734_s3 + $0x9] ss:$0 sm:$0xff]  ;;  %v3843_v38 = vld [vmem:[%s5734_s3 + $0x8] ss:$0 sm:$0xff] }
  0xe2   :  { %v1876_v48 = vsel %vm1875_vm2, %v4932_v46, -inf  ;;  %v1879_v49 = vsel %vm1875_vm2, %v4934_v47, -inf }
  0xe3   :  { %1877 = vmax.xlane.f32.xlu0 %v1876_v48 }
  0xe5   :  { %v247_v50 = vpop.f32.mrb[4].mxu0  ;;  %v293_v51 = vpop.f32.mrb[4].mxu1 }
  0xe6   :  { %v1589_v54 = vmul.f32 0.35355338, %v247_v50  ;;  %v4043_v55 = vpop.f32.mrb[5].mxu0  ;;  %v1590_v56 = vmul.f32 0.35355338, %v293_v51  ;;  %v4049_v57 = vpop.f32.mrb[5].mxu1 }
  0xe7   :  { %1880 = vmax.xlane.f32.xlu0 %v1879_v49  ;;  %v250_v58 = vpop.f32.mrb[6].mxu0  ;;  %v296_v59 = vpop.f32.mrb[6].mxu1  ;;  %v3846_v55 = vld [vmem:[%s5734_s3 + $0xb] ss:$0 sm:$0xff] }
  0xe8   :  { %v4044_v60 = vpop.f32.mrb[7].mxu0  ;;  %v4050_v61 = vpop.f32.mrb[7].mxu1  ;;  %v4946_v62 = vadd.f32 %v3837_v52, %v1589_v54  ;;  %v4948_v63 = vadd.f32 %v3838_v53, %v1590_v56  ;;  %v3845_v56 = vld [vmem:[%s5734_s3 + $0xa] ss:$0 sm:$0xff] }
  0xea   :  { %v1882_v1 = vsel %vm1875_vm2, %v4946_v62, -inf  ;;  %v1885_v2 = vsel %vm1875_vm2, %v4948_v63, -inf }
  0xeb   :  { %1883 = vmax.xlane.f32.xlu1 %v1882_v1 }
  0xed   :  { %v339_v3 = vpop.f32.mrb[8].mxu0  ;;  %v385_v4 = vpop.f32.mrb[8].mxu1 }
  0xee   :  { %v1591_v7 = vmul.f32 0.35355338, %v339_v3  ;;  %v1592_v8 = vmul.f32 0.35355338, %v385_v4  ;;  %v4055_v9 = vpop.f32.mrb[9].mxu0  ;;  %v4061_v10 = vpop.f32.mrb[9].mxu1 }
  0xef   :  { %1886 = vmax.xlane.f32.xlu1 %v1885_v2  ;;  %v342_v11 = vpop.f32.mrb[10].mxu0  ;;  %v388_v12 = vpop.f32.mrb[10].mxu1  ;;  %v3848_v10 = vld [vmem:[%s5734_s3 + $0xd] ss:$0 sm:$0xff] }
  0xf0   :  { %v4056_v13 = vpop.f32.mrb[11].mxu0  ;;  %v4062_v14 = vpop.f32.mrb[11].mxu1  ;;  %v4960_v15 = vadd.f32 %v3840_v5, %v1592_v8  ;;  %v4962_v16 = vadd.f32 %v3839_v6, %v1591_v7  ;;  %v3847_v11 = vld [vmem:[%s5734_s3 + $0xc] ss:$0 sm:$0xff] }
  0xf2   :  { %v1891_v17 = vsel %vm1875_vm2, %v4960_v15, -inf  ;;  %v1888_v18 = vsel %vm1875_vm2, %v4962_v16, -inf }
  0xf3   :  { %1892 = vmax.xlane.f32.xlu1 %v1891_v17  ;;  %1889 = vmax.xlane.f32.xlu0 %v1888_v18 }
  0xf5   :  { %v431_v19 = vpop.f32.mrb[12].mxu0  ;;  %v477_v20 = vpop.f32.mrb[12].mxu1 }
  0xf6   :  { %v1593_v23 = vmul.f32 0.35355338, %v431_v19  ;;  %v1594_v24 = vmul.f32 0.35355338, %v477_v20  ;;  %v4067_v25 = vpop.f32.mrb[13].mxu0  ;;  %v4073_v26 = vpop.f32.mrb[13].mxu1 }
  0xf7   :  { %v434_v27 = vpop.f32.mrb[14].mxu0  ;;  %v480_v28 = vpop.f32.mrb[14].mxu1 }
  0xf8   :  { %v4068_v29 = vpop.f32.mrb[15].mxu0  ;;  %v4074_v30 = vpop.f32.mrb[15].mxu1  ;;  %v4974_v31 = vadd.f32 %v3842_v21, %v1594_v24  ;;  %v4976_v32 = vadd.f32 %v3841_v22, %v1593_v23  ;;  %v3850_v28 = vld [vmem:[%s5734_s3 + $0xf] ss:$0 sm:$0xff] }
  0xf9   :  { %v3849_v29 = vld [vmem:[%s5734_s3 + $0xe] ss:$0 sm:$0xff] }
  0xfa   :  { %v1897_v33 = vsel %vm1875_vm2, %v4974_v31, -inf  ;;  %v1894_v34 = vsel %vm1875_vm2, %v4976_v32, -inf }
  0xfb   :  { %1898 = vmax.xlane.f32.xlu1 %v1897_v33  ;;  %1895 = vmax.xlane.f32.xlu0 %v1894_v34 }
  0xfd   :  { %v523_v35 = vpop.f32.mrb[16].mxu0  ;;  %v569_v36 = vpop.f32.mrb[16].mxu1 }
  0xfe   :  { %v1595_v39 = vmul.f32 0.35355338, %v523_v35  ;;  %v1596_v40 = vmul.f32 0.35355338, %v569_v36  ;;  %v4079_v41 = vpop.f32.mrb[17].mxu0  ;;  %v4085_v42 = vpop.f32.mrb[17].mxu1 }
  0xff   :  { %v572_v43 = vpop.f32.mrb[18].mxu1  ;;  %v526_v44 = vpop.f32.mrb[18].mxu0 }
 0x100   :  { %v4988_v45 = vadd.f32 %v3844_v37, %v1596_v40  ;;  %v4990_v48 = vadd.f32 %v3843_v38, %v1595_v39  ;;  %v4080_v49 = vpop.f32.mrb[19].mxu0  ;;  %v4086_v50 = vpop.f32.mrb[19].mxu1 }
 0x101   :  { %v3852_v50 = vld [vmem:[%s5734_s3 + $0x11] ss:$0 sm:$0xff] }
 0x102   :  { %v1903_v51 = vsel %vm1875_vm2, %v4988_v45, -inf  ;;  %v1900_v52 = vsel %vm1875_vm2, %v4990_v48, -inf }
 0x103   :  { %1904 = vmax.xlane.f32.xlu1 %v1903_v51  ;;  %1901 = vmax.xlane.f32.xlu0 %v1900_v52  ;;  %v3851_v51 = vld [vmem:[%s5734_s3 + $0x10] ss:$0 sm:$0xff] }
 0x105   :  { %v615_v53 = vpop.f32.mrb[20].mxu0  ;;  %v661_v54 = vpop.f32.mrb[20].mxu1 }
 0x106   :  { %v1597_v57 = vmul.f32 0.35355338, %v615_v53  ;;  %v1598_v58 = vmul.f32 0.35355338, %v661_v54  ;;  %v4091_v59 = vpop.f32.mrb[21].mxu0  ;;  %v4097_v60 = vpop.f32.mrb[21].mxu1 }
 0x107   :  { %v664_v61 = vpop.f32.mrb[22].mxu1  ;;  %v618_v1 = vpop.f32.mrb[22].mxu0 }
 0x108   :  { %v5002_v2 = vadd.f32 %v3846_v55, %v1598_v58  ;;  %v5004_v3 = vadd.f32 %v3845_v56, %v1597_v57  ;;  %v4092_v4 = vpop.f32.mrb[23].mxu0  ;;  %v4098_v5 = vpop.f32.mrb[23].mxu1 }
 0x10a   :  { %v1909_v6 = vsel %vm1875_vm2, %v5002_v2, -inf  ;;  %v1906_v7 = vsel %vm1875_vm2, %v5004_v3, -inf }
 0x10b   :  { %1910 = vmax.xlane.f32.xlu1 %v1909_v6  ;;  %1907 = vmax.xlane.f32.xlu0 %v1906_v7  ;;  %v3854_v7 = vld [vmem:[%s5734_s3 + $0x13] ss:$0 sm:$0xff] }
 0x10d   :  { %v707_v8 = vpop.f32.mrb[24].mxu0  ;;  %v753_v9 = vpop.f32.mrb[24].mxu1 }
 0x10e   :  { %v1599_v12 = vmul.f32 0.35355338, %v707_v8  ;;  %v1600_v13 = vmul.f32 0.35355338, %v753_v9  ;;  %v4103_v14 = vpop.f32.mrb[25].mxu0  ;;  %v4109_v17 = vpop.f32.mrb[25].mxu1 }
 0x10f   :  { %v756_v18 = vpop.f32.mrb[26].mxu1  ;;  %v710_v19 = vpop.f32.mrb[26].mxu0  ;;  %v3853_v8 = vld [vmem:[%s5734_s3 + $0x12] ss:$0 sm:$0xff] }
 0x110   :  { %v5016_v20 = vadd.f32 %v3848_v10, %v1600_v13  ;;  %v5018_v21 = vadd.f32 %v3847_v11, %v1599_v12  ;;  %v4104_v22 = vpop.f32.mrb[27].mxu0  ;;  %v4110_v23 = vpop.f32.mrb[27].mxu1 }
 0x112   :  { %v1915_v24 = vsel %vm1875_vm2, %v5016_v20, -inf  ;;  %v1912_v25 = vsel %vm1875_vm2, %v5018_v21, -inf }
 0x113   :  { %1916 = vmax.xlane.f32.xlu1 %v1915_v24  ;;  %1913 = vmax.xlane.f32.xlu0 %v1912_v25 }
 0x115   :  { %v799_v26 = vpop.f32.mrb[28].mxu0  ;;  %v845_v27 = vpop.f32.mrb[28].mxu1 }
 0x116   :  { %v1601_v30 = vmul.f32 0.35355338, %v799_v26  ;;  %v1602_v33 = vmul.f32 0.35355338, %v845_v27  ;;  %v4115_v34 = vpop.f32.mrb[29].mxu0  ;;  %v4121_v35 = vpop.f32.mrb[29].mxu1 }
 0x117   :  { %v848_v36 = vpop.f32.mrb[30].mxu1  ;;  %v802_v37 = vpop.f32.mrb[30].mxu0  ;;  %v3856_v27 = vld [vmem:[%s5734_s3 + $0x15] ss:$0 sm:$0xff] }
 0x118   :  { %v5030_v38 = vadd.f32 %v3850_v28, %v1602_v33  ;;  %v5032_v39 = vadd.f32 %v3849_v29, %v1601_v30  ;;  %v4116_v40 = vpop.f32.mrb[31].mxu0  ;;  %v4122_v41 = vpop.f32.mrb[31].mxu1  ;;  %v3855_v28 = vld [vmem:[%s5734_s3 + $0x14] ss:$0 sm:$0xff] }
 0x11a   :  { %v1921_v42 = vsel %vm1875_vm2, %v5030_v38, -inf  ;;  %v1918_v43 = vsel %vm1875_vm2, %v5032_v39, -inf }
 0x11b   :  { %1922 = vmax.xlane.f32.xlu1 %v1921_v42  ;;  %1919 = vmax.xlane.f32.xlu0 %v1918_v43 }
 0x11d   :  { %v891_v44 = vpop.f32.mrb[32].mxu0  ;;  %v937_v49 = vpop.f32.mrb[32].mxu1 }
 0x11e   :  { %v1603_v52 = vmul.f32 0.35355338, %v891_v44  ;;  %v1604_v53 = vmul.f32 0.35355338, %v937_v49  ;;  %v4127_v54 = vpop.f32.mrb[33].mxu0  ;;  %v4133_v55 = vpop.f32.mrb[33].mxu1 }
 0x11f   :  { %v940_v56 = vpop.f32.mrb[34].mxu1  ;;  %v894_v57 = vpop.f32.mrb[34].mxu0 }
 0x120   :  { %v5044_v58 = vadd.f32 %v3852_v50, %v1604_v53  ;;  %v5046_v59 = vadd.f32 %v3851_v51, %v1603_v52  ;;  %v4128_v60 = vpop.f32.mrb[35].mxu0  ;;  %v4134_v61 = vpop.f32.mrb[35].mxu1  ;;  %v3858_v51 = vld [vmem:[%s5734_s3 + $0x17] ss:$0 sm:$0xff]  ;;  %v3857_v52 = vld [vmem:[%s5734_s3 + $0x16] ss:$0 sm:$0xff] }
 0x122   :  { %v1927_v1 = vsel %vm1875_vm2, %v5044_v58, -inf  ;;  %v1924_v4 = vsel %vm1875_vm2, %v5046_v59, -inf }
 0x123   :  { %1928 = vmax.xlane.f32.xlu1 %v1927_v1  ;;  %1925 = vmax.xlane.f32.xlu0 %v1924_v4 }
 0x125   :  { %v983_v5 = vpop.f32.mrb[36].mxu0  ;;  %v1029_v6 = vpop.f32.mrb[36].mxu1 }
 0x126   :  { %v1605_v9 = vmul.f32 0.35355338, %v983_v5  ;;  %v1606_v10 = vmul.f32 0.35355338, %v1029_v6  ;;  %v4139_v11 = vpop.f32.mrb[37].mxu0  ;;  %v4145_v12 = vpop.f32.mrb[37].mxu1 }
 0x127   :  { %v1032_v13 = vpop.f32.mrb[38].mxu1  ;;  %v986_v14 = vpop.f32.mrb[38].mxu0 }
 0x128   :  { %v5058_v17 = vadd.f32 %v3854_v7, %v1606_v10  ;;  %v5060_v18 = vadd.f32 %v3853_v8, %v1605_v9  ;;  %v4140_v19 = vpop.f32.mrb[39].mxu0  ;;  %v4146_v22 = vpop.f32.mrb[39].mxu1 }
 0x12a   :  { %v1933_v23 = vsel %vm1875_vm2, %v5058_v17, -inf  ;;  %v1930_v24 = vsel %vm1875_vm2, %v5060_v18, -inf }
 0x12b   :  { %1934 = vmax.xlane.f32.xlu1 %v1933_v23  ;;  %1931 = vmax.xlane.f32.xlu0 %v1930_v24 }
 0x12d   :  { %v1075_v25 = vpop.f32.mrb[40].mxu0  ;;  %v1121_v26 = vpop.f32.mrb[40].mxu1 }
 0x12e   :  { %v1607_v29 = vmul.f32 0.35355338, %v1075_v25  ;;  %v1608_v30 = vmul.f32 0.35355338, %v1121_v26  ;;  %v4151_v33 = vpop.f32.mrb[41].mxu0  ;;  %v4157_v34 = vpop.f32.mrb[41].mxu1 }
 0x12f   :  { %v1124_v35 = vpop.f32.mrb[42].mxu1  ;;  %v1078_v36 = vpop.f32.mrb[42].mxu0 }
 0x130   :  { %v5072_v37 = vadd.f32 %v3856_v27, %v1608_v30  ;;  %v5074_v40 = vadd.f32 %v3855_v28, %v1607_v29  ;;  %v4152_v41 = vpop.f32.mrb[43].mxu0  ;;  %v4158_v42 = vpop.f32.mrb[43].mxu1 }
 0x132   :  { %v1939_v43 = vsel %vm1875_vm2, %v5072_v37, -inf  ;;  %v1936_v44 = vsel %vm1875_vm2, %v5074_v40, -inf }
 0x133   :  { %1940 = vmax.xlane.f32.xlu1 %v1939_v43  ;;  %1937 = vmax.xlane.f32.xlu0 %v1936_v44 }
 0x135   :  { %v1167_v49 = vpop.f32.mrb[44].mxu0  ;;  %v1213_v50 = vpop.f32.mrb[44].mxu1 }
 0x136   :  { %v1609_v53 = vmul.f32 0.35355338, %v1167_v49  ;;  %v1610_v54 = vmul.f32 0.35355338, %v1213_v50  ;;  %v4163_v55 = vpop.f32.mrb[45].mxu0  ;;  %v4169_v56 = vpop.f32.mrb[45].mxu1 }
 0x137   :  { %v1170_v57 = vpop.f32.mrb[46].mxu0  ;;  %v1216_v60 = vpop.f32.mrb[46].mxu1 }
 0x138   :  { %v5086_v61 = vadd.f32 %v3858_v51, %v1610_v54  ;;  %v5088_v1 = vadd.f32 %v3857_v52, %v1609_v53  ;;  %v4170_v4 = vpop.f32.mrb[47].mxu1  ;;  %v4164_v5 = vpop.f32.mrb[47].mxu0 }
 0x13a   :  { %v1945_v6 = vsel %vm1875_vm2, %v5086_v61, -inf  ;;  %v1942_v7 = vsel %vm1875_vm2, %v5088_v1, -inf }
 0x13b   :  { %1946 = vmax.xlane.f32.xlu1 %v1945_v6  ;;  %1943 = vmax.xlane.f32.xlu0 %v1942_v7 }
 0x13d   :  { %v1259_v8 = vpop.f32.mrb[48].mxu0  ;;  %v1305_v9 = vpop.f32.mrb[48].mxu1 }
 0x13e   :  { %v4175_v10 = vpop.f32.mrb[49].mxu0  ;;  %v4181_v11 = vpop.f32.mrb[49].mxu1 }
 0x13f   :  { %v1262_v12 = vpop.f32.mrb[50].mxu0  ;;  %v1308_v13 = vpop.f32.mrb[50].mxu1  ;;  %v1611_v11 = vmul.f32 0.35355338, %v1259_v8 }
 0x140   :  { %v4176_v14 = vpop.f32.mrb[51].mxu0  ;;  %v4182_v19 = vpop.f32.mrb[51].mxu1  ;;  %v3859_v13 = vld [vmem:[%s5734_s3 + $0x18] ss:$0 sm:$0xff] }
 0x141   :  { %v1612_v19 = vmul.f32 0.35355338, %v1305_v9 }
 0x145   :  { %v1351_v22 = vpop.f32.mrb[52].mxu0  ;;  %v1397_v23 = vpop.f32.mrb[52].mxu1 }
 0x146   :  { %v4187_v24 = vpop.f32.mrb[53].mxu0  ;;  %v4193_v25 = vpop.f32.mrb[53].mxu1 }
 0x147   :  { %v1354_v26 = vpop.f32.mrb[54].mxu0  ;;  %v1400_v27 = vpop.f32.mrb[54].mxu1  ;;  %v5109_v24 = vadd.f32 %v3859_v13, %v1611_v11  ;;  %v3864_v11 = vld [vmem:[%s5734_s3 + $0x1d] ss:$0 sm:$0xff] }
 0x148   :  { %v4188_v28 = vpop.f32.mrb[55].mxu0  ;;  %v4194_v29 = vpop.f32.mrb[55].mxu1 }
 0x149   :  { %v1948_v9 = vsel %vm1875_vm2, %v5109_v24, -inf  ;;  %v1613_v29 = vmul.f32 0.35355338, %v1351_v22 }
 0x14d   :  { %v5094_v30 = vpop.f32.mrb[56].mxu0  ;;  %v5096_v33 = vpop.f32.mrb[56].mxu1 }
 0x14e   :  { %v4199_v34 = vpop.f32.mrb[57].mxu0  ;;  %v4205_v35 = vpop.f32.mrb[57].mxu1 }
 0x14f   :  { %v1446_v36 = vpop.f32.mrb[58].mxu0  ;;  %v1492_v41 = vpop.f32.mrb[58].mxu1 }
 0x150   :  { %v4200_v42 = vpop.f32.mrb[59].mxu0  ;;  %v4206_v43 = vpop.f32.mrb[59].mxu1 }
 0x151   :  { %v3861_v42 = vld [vmem:[%s5734_s3 + $0x1a] ss:$0 sm:$0xff] }
 0x152   :  { %v5133_v43 = vadd.f32 %v3861_v42, %v1613_v29 }
 0x155   :  { %v5098_v44 = vpop.f32.mrb[60].mxu0  ;;  %v5100_v49 = vpop.f32.mrb[60].mxu1 }
 0x156   :  { %v4211_v50 = vpop.f32.mrb[61].mxu0  ;;  %v4217_v51 = vpop.f32.mrb[61].mxu1 }
 0x157   :  { %v1538_v52 = vpop.f32.mrb[62].mxu0  ;;  %v1584_v53 = vpop.f32.mrb[62].mxu1  ;;  %v3862_v51 = vld [vmem:[%s5734_s3 + $0x1b] ss:$0 sm:$0xff] }
 0x158   :  { %v4212_v54 = vpop.f32.mrb[63].mxu0  ;;  %v4218_v55 = vpop.f32.mrb[63].mxu1 }
 0x170   :  { %v1878_v56 = vpop.xlane.xlu0 %1877 }
 0x171   :  { %v1972_v57 = vsub.f32 %v4932_v46, %v1878_v56  ;;  %v1954_v56 = vsel %vm1875_vm2, %v5133_v43, -inf }
 0x173   :  { %v2004_v60 = vmul.f32 1.442695, %v1972_v57  ;;  %v1615_v57 = vmul.f32 0.35355338, %v5094_v30 }
 0x174   :  { %v1881_v4 = vpop.xlane.xlu0 %1880 }
 0x175   :  { %4413 = vpow2.f32 %v2004_v60  ;;  %v1973_v5 = vsub.f32 %v4934_v47, %v1881_v4 }
 0x177   :  { %v2006_v6 = vmul.f32 1.442695, %v1973_v5 }
 0x178   :  { %v1884_v7 = vpop.xlane.xlu1 %1883 }
 0x179   :  { %4415 = vpow2.f32 %v2006_v6  ;;  %v1974_v10 = vsub.f32 %v4946_v62, %v1884_v7  ;;  %v3860_v62 = vld [vmem:[%s5734_s3 + $0x19] ss:$0 sm:$0xff]  ;;  %v3863_v7 = vld [vmem:[%s5734_s3 + $0x1c] ss:$0 sm:$0xff] }
 0x17a   :  { %v5122_v34 = vadd.f32 %v3860_v62, %v1612_v19 }
 0x17b   :  { %v2008_v12 = vmul.f32 1.442695, %v1974_v10  ;;  %v5159_v10 = vadd.f32 %v3863_v7, %v1615_v57 }
 0x17c   :  { %v1887_v14 = vpop.xlane.xlu1 %1886  ;;  %v1951_v22 = vsel %vm1875_vm2, %v5122_v34, -inf }
 0x17d   :  { %4417 = vpow2.f32 %v2008_v12  ;;  %v1975_v46 = vsub.f32 %v4948_v63, %v1887_v14  ;;  %v1960_v62 = vsel %vm1875_vm2, %v5159_v10, -inf }
 0x17f   :  { %v5111_v25 = vpop.eup %4413  ;;  %v2010_v47 = vmul.f32 1.442695, %v1975_v46 }
 0x180   :  { %v1893_v8 = vpop.xlane.xlu1 %1892  ;;  %v1890_v26 = vpop.xlane.xlu0 %1889  ;;  %v2068_v27 = vsel %vm1875_vm2, %v5111_v25, 0.0 }
 0x181   :  { %4419 = vpow2.f32 %v2010_v47  ;;  %v1977_v28 = vsub.f32 %v4960_v15, %v1893_v8  ;;  %v1976_v63 = vsub.f32 %v4962_v16, %v1890_v26  ;;  %2069 = vadd.xlane.f32.xlu0 %v2068_v27  ;;  %v1614_v16 = vmul.f32 0.35355338, %v1397_v23 }
 0x183   :  { %v5124_v35 = vpop.eup %4415  ;;  %v2014_v36 = vmul.f32 1.442695, %v1977_v28  ;;  %v2012_v41 = vmul.f32 1.442695, %v1976_v63  ;;  %v5147_v60 = vadd.f32 %v3862_v51, %v1614_v16  ;;  %v1617_v28 = vmul.f32 0.35355338, %v5098_v44 }
 0x184   :  { %v2071_v15 = vsel %vm1875_vm2, %v5124_v35, 0.0  ;;  %v3866_v44 = vld [vmem:[%s5734_s3 + $0x1f] ss:$0 sm:$0xff] }
 0x185   :  { %2072 = vadd.xlane.f32.xlu1 %v2071_v15  ;;  %1949 = vmax.xlane.f32.xlu0 %v1948_v9  ;;  %4421 = vpow2.f32 %v2012_v41  ;;  %v1957_v30 = vsel %vm1875_vm2, %v5147_v60, -inf }
 0x186   :  { %4423 = vpow2.f32 %v2014_v36 }
 0x187   :  { %v5135_v50 = vpop.eup %4417 }
 0x188   :  { %v1899_v52 = vpop.xlane.xlu1 %1898  ;;  %v1896_v53 = vpop.xlane.xlu0 %1895  ;;  %v2074_v54 = vsel %vm1875_vm2, %v5135_v50, 0.0 }
 0x189   :  { %v1979_v55 = vsub.f32 %v4974_v31, %v1899_v52  ;;  %v1978_v23 = vsub.f32 %v4976_v32, %v1896_v53  ;;  %1952 = vmax.xlane.f32.xlu1 %v1951_v22  ;;  %2075 = vadd.xlane.f32.xlu0 %v2074_v54  ;;  %v1616_v32 = vmul.f32 0.35355338, %v5096_v33  ;;  %v82_v52 = vld [vmem:[%s5735_s2] sm:$0x3] }
 0x18b   :  { %v5149_v4 = vpop.eup %4419  ;;  %v2018_v5 = vmul.f32 1.442695, %v1979_v55  ;;  %v2016_v6 = vmul.f32 1.442695, %v1978_v23  ;;  %v5174_v8 = vadd.f32 %v3864_v11, %v1616_v32 }
 0x18c   :  { %v2077_v31 = vsel %vm1875_vm2, %v5149_v4, 0.0 }
 0x18d   :  { %2078 = vadd.xlane.f32.xlu1 %v2077_v31  ;;  %1955 = vmax.xlane.f32.xlu0 %v1954_v56  ;;  %4425 = vpow2.f32 %v2016_v6  ;;  %v1963_v9 = vsel %vm1875_vm2, %v5174_v8, -inf  ;;  %v83_v56 = vld [vmem:[%s5735_s2 + $0x2] sm:$0x3] }
 0x18e   :  { %4427 = vpow2.f32 %v2018_v5  ;;  %v2312_v57 = vsel %vm2264_vm3, %v83_v56, 0 }
 0x18f   :  { %v5164_v12 = vpop.eup %4421  ;;  %4226 = vmatpush3.bf16.msra.mxu1 %v2312_v57 }
 0x190   :  { %v1905_v13 = vpop.xlane.xlu1 %1904  ;;  %v1902_v14 = vpop.xlane.xlu0 %1901  ;;  %v2080_v47 = vsel %vm1875_vm2, %v5164_v12, 0.0  ;;  %4237 = vmatprep.subr.bf16.mxu1 %v4541_v0 }
 0x191   :  { %v5166_v46 = vpop.eup %4423  ;;  %v1981_v19 = vsub.f32 %v4988_v45, %v1905_v13  ;;  %v1980_v33 = vsub.f32 %v4990_v48, %v1902_v14  ;;  %1958 = vmax.xlane.f32.xlu1 %v1957_v30  ;;  %2081 = vadd.xlane.f32.xlu0 %v2080_v47  ;;  %v3865_v45 = vld [vmem:[%s5734_s3 + $0x1e] ss:$0 sm:$0xff]  ;;  %v1618_v48 = vmul.f32 0.35355338, %v5100_v49 }
 0x192   :  { %v2083_v63 = vsel %vm1875_vm2, %v5166_v46, 0.0  ;;  %v5185_v29 = vadd.f32 %v3865_v45, %v1617_v28 }
 0x193   :  { %v2022_v26 = vmul.f32 1.442695, %v1981_v19  ;;  %v2020_v27 = vmul.f32 1.442695, %v1980_v33  ;;  %v5198_v51 = vadd.f32 %v3866_v44, %v1618_v48 }
 0x194   :  { %v1966_v55 = vsel %vm1875_vm2, %v5185_v29, -inf }
 0x195   :  { %2084 = vadd.xlane.f32.xlu1 %v2083_v63  ;;  %4429 = vpow2.f32 %v2020_v27  ;;  %1961 = vmax.xlane.f32.xlu0 %v1960_v62  ;;  %v1969_v23 = vsel %vm1875_vm2, %v5198_v51, -inf }
 0x196   :  { %4431 = vpow2.f32 %v2022_v26 }
 0x197   :  { %v5190_v36 = vpop.eup %4425 }
 0x198   :  { %v1911_v41 = vpop.xlane.xlu1 %1910  ;;  %v1908_v42 = vpop.xlane.xlu0 %1907  ;;  %v2086_v22 = vsel %vm1875_vm2, %v5190_v36, 0.0 }
 0x199   :  { %v5192_v15 = vpop.eup %4427  ;;  %v1983_v16 = vsub.f32 %v5002_v2, %v1911_v41  ;;  %v1982_v49 = vsub.f32 %v5004_v3, %v1908_v42  ;;  %1964 = vmax.xlane.f32.xlu1 %v1963_v9  ;;  %2087 = vadd.xlane.f32.xlu0 %v2086_v22  ;;  %v2266_v2 = vsel %vm2264_vm3, %v82_v52, 0 }
 0x19a   :  { %v2089_v3 = vsel %vm1875_vm2, %v5192_v15, 0.0  ;;  %4220 = vmatpush3.bf16.msra.mxu0 %v2266_v2 }
 0x19b   :  { %v2026_v53 = vmul.f32 1.442695, %v1983_v16  ;;  %v2024_v54 = vmul.f32 1.442695, %v1982_v49  ;;  %4231 = vmatprep.subr.bf16.mxu0 %v4541_v0 }
 0x19d   :  { %4433 = vpow2.f32 %v2026_v53  ;;  %2090 = vadd.xlane.f32.xlu1 %v2089_v3  ;;  %1967 = vmax.xlane.f32.xlu0 %v1966_v55 }
 0x19e   :  { %4435 = vpow2.f32 %v2024_v54 }
 0x19f   :  { %v5215_v5 = vpop.eup %4429 }
 0x1a0   :  { %v1917_v6 = vpop.xlane.xlu1 %1916  ;;  %v1914_v7 = vpop.xlane.xlu0 %1913  ;;  %v2092_v11 = vsel %vm1875_vm2, %v5215_v5, 0.0 }
 0x1a1   :  { %v5217_v31 = vpop.eup %4431  ;;  %v1985_v32 = vsub.f32 %v5016_v20, %v1917_v6  ;;  %v1984_v30 = vsub.f32 %v5018_v21, %v1914_v7  ;;  %1970 = vmax.xlane.f32.xlu1 %v1969_v23  ;;  %2093 = vadd.xlane.f32.xlu0 %v2092_v11 }
 0x1a2   :  { %v2095_v19 = vsel %vm1875_vm2, %v5217_v31, 0.0 }
 0x1a3   :  { %v2030_v13 = vmul.f32 1.442695, %v1985_v32  ;;  %v2028_v14 = vmul.f32 1.442695, %v1984_v30 }
 0x1a5   :  { %4437 = vpow2.f32 %v2030_v13  ;;  %2096 = vadd.xlane.f32.xlu1 %v2095_v19 }
 0x1a6   :  { %4439 = vpow2.f32 %v2028_v14 }
 0x1a7   :  { %v5226_v33 = vpop.eup %4433 }
 0x1a8   :  { %v5228_v20 = vpop.eup %4435  ;;  %v1923_v21 = vpop.xlane.xlu1 %1922  ;;  %v2101_v62 = vsel %vm1875_vm2, %v5226_v33, 0.0 }
 0x1a9   :  { %v1920_v47 = vpop.xlane.xlu0 %1919  ;;  %v1987_v26 = vsub.f32 %v5030_v38, %v1923_v21  ;;  %2102 = vadd.xlane.f32.xlu1 %v2101_v62  ;;  %v2098_v28 = vsel %vm1875_vm2, %v5228_v20, 0.0 }
 0x1aa   :  { %v1986_v27 = vsub.f32 %v5032_v39, %v1920_v47  ;;  %2099 = vadd.xlane.f32.xlu0 %v2098_v28 }
 0x1ab   :  { %v2034_v63 = vmul.f32 1.442695, %v1987_v26 }
 0x1ac   :  { %v2032_v45 = vmul.f32 1.442695, %v1986_v27 }
 0x1ad   :  { %4441 = vpow2.f32 %v2034_v63 }
 0x1ae   :  { %4443 = vpow2.f32 %v2032_v45 }
 0x1af   :  { %v5236_v48 = vpop.eup %4437 }
 0x1b0   :  { %v5238_v9 = vpop.eup %4439  ;;  %v1929_v44 = vpop.xlane.xlu1 %1928  ;;  %v2107_v38 = vsel %vm1875_vm2, %v5236_v48, 0.0 }
 0x1b1   :  { %v1926_v41 = vpop.xlane.xlu0 %1925  ;;  %v1989_v39 = vsub.f32 %v5044_v58, %v1929_v44  ;;  %2108 = vadd.xlane.f32.xlu1 %v2107_v38  ;;  %v2104_v16 = vsel %vm1875_vm2, %v5238_v9, 0.0 }
 0x1b2   :  { %v1988_v42 = vsub.f32 %v5046_v59, %v1926_v41  ;;  %2105 = vadd.xlane.f32.xlu0 %v2104_v16 }
 0x1b3   :  { %v2038_v49 = vmul.f32 1.442695, %v1989_v39 }
 0x1b4   :  { %v2036_v22 = vmul.f32 1.442695, %v1988_v42 }
 0x1b5   :  { %4445 = vpow2.f32 %v2038_v49 }
 0x1b6   :  { %4447 = vpow2.f32 %v2036_v22 }
 0x1b7   :  { %v5246_v52 = vpop.eup %4441 }
 0x1b8   :  { %v5248_v53 = vpop.eup %4443  ;;  %v1935_v54 = vpop.xlane.xlu1 %1934  ;;  %v2113_v58 = vsel %vm1875_vm2, %v5246_v52, 0.0 }
 0x1b9   :  { %v1932_v55 = vpop.xlane.xlu0 %1931  ;;  %v1991_v59 = vsub.f32 %v5058_v17, %v1935_v54  ;;  %2114 = vadd.xlane.f32.xlu1 %v2113_v58  ;;  %v2110_v3 = vsel %vm1875_vm2, %v5248_v53, 0.0 }
 0x1ba   :  { %v1990_v2 = vsub.f32 %v5060_v18, %v1932_v55  ;;  %2111 = vadd.xlane.f32.xlu0 %v2110_v3 }
 0x1bb   :  { %v2042_v23 = vmul.f32 1.442695, %v1991_v59 }
 0x1bc   :  { %v2040_v56 = vmul.f32 1.442695, %v1990_v2 }
 0x1bd   :  { %4449 = vpow2.f32 %v2042_v23 }
 0x1be   :  { %4451 = vpow2.f32 %v2040_v56  ;;  %v84_v56 = vld [vmem:[%s5735_s2 + $0x4] sm:$0x3] }
 0x1bf   :  { %v5256_v57 = vpop.eup %4445 }
 0x1c0   :  { %v5258_v6 = vpop.eup %4447  ;;  %v1941_v7 = vpop.xlane.xlu1 %1940  ;;  %v2119_v17 = vsel %vm1875_vm2, %v5256_v57, 0.0 }
 0x1c1   :  { %v1938_v32 = vpop.xlane.xlu0 %1937  ;;  %v1993_v18 = vsub.f32 %v5072_v37, %v1941_v7  ;;  %2120 = vadd.xlane.f32.xlu1 %v2119_v17  ;;  %v2116_v11 = vsel %vm1875_vm2, %v5258_v6, 0.0 }
 0x1c2   :  { %v1992_v30 = vsub.f32 %v5074_v40, %v1938_v32  ;;  %2117 = vadd.xlane.f32.xlu0 %v2116_v11 }
 0x1c3   :  { %v2046_v13 = vmul.f32 1.442695, %v1993_v18 }
 0x1c4   :  { %v2044_v14 = vmul.f32 1.442695, %v1992_v30  ;;  %v2358_v30 = vsel %vm2264_vm3, %v84_v56, 0 }
 0x1c5   :  { %4453 = vpow2.f32 %v2046_v13  ;;  %v85_v13 = vld [vmem:[%s5735_s2 + $0x6] sm:$0x3] }
 0x1c6   :  { %4455 = vpow2.f32 %v2044_v14 }
 0x1c7   :  { %v5266_v19 = vpop.eup %4449 }
 0x1c8   :  { %v5268_v21 = vpop.eup %4451  ;;  %v1947_v47 = vpop.xlane.xlu1 %1946  ;;  %v2125_v37 = vsel %vm1875_vm2, %v5266_v19, 0.0 }
 0x1c9   :  { %v1944_v62 = vpop.xlane.xlu0 %1943  ;;  %v1995_v40 = vsub.f32 %v5086_v61, %v1947_v47  ;;  %2126 = vadd.xlane.f32.xlu1 %v2125_v37  ;;  %v2122_v27 = vsel %vm1875_vm2, %v5268_v21, 0.0  ;;  %v2404_v37 = vsel %vm2264_vm3, %v85_v13, 0 }
 0x1ca   :  { %v1994_v26 = vsub.f32 %v5088_v1, %v1944_v62  ;;  %2123 = vadd.xlane.f32.xlu0 %v2122_v27 }
 0x1cb   :  { %v2050_v28 = vmul.f32 1.442695, %v1995_v40 }
 0x1cc   :  { %v2048_v63 = vmul.f32 1.442695, %v1994_v26 }
 0x1cd   :  { %4457 = vpow2.f32 %v2050_v28  ;;  %v86_v28 = vld [vmem:[%s5735_s2 + $0x8] sm:$0x3] }
 0x1ce   :  { %4459 = vpow2.f32 %v2048_v63 }
 0x1cf   :  { %v5276_v45 = vpop.eup %4453 }
 0x1d0   :  { %v5278_v44 = vpop.eup %4455  ;;  %v2131_v41 = vsel %vm1875_vm2, %v5276_v45, 0.0 }
 0x1d1   :  { %2132 = vadd.xlane.f32.xlu1 %v2131_v41  ;;  %v2128_v61 = vsel %vm1875_vm2, %v5278_v44, 0.0 }
 0x1d2   :  { %2129 = vadd.xlane.f32.xlu0 %v2128_v61 }
 0x1d7   :  { %v5284_v1 = vpop.eup %4457 }
 0x1d8   :  { %v5286_v38 = vpop.eup %4459  ;;  %v2137_v39 = vsel %vm1875_vm2, %v5284_v1, 0.0 }
 0x1d9   :  { %2138 = vadd.xlane.f32.xlu1 %v2137_v39  ;;  %v2134_v42 = vsel %vm1875_vm2, %v5286_v38, 0.0 }
 0x1da   :  { %2135 = vadd.xlane.f32.xlu0 %v2134_v42 }
 0x20e   :  { %v2070_v16 = vpop.xlane.xlu0 %2069 }
 0x20f   :  { %4461 = vrcp.f32 %v2070_v16  ;;  %v2450_v16 = vsel %vm2264_vm3, %v86_v28, 0  ;;  %v90_v28 = vld [vmem:[%s5735_s2 + $0x10] sm:$0x3] }
 0x212   :  { %v2073_v49 = vpop.xlane.xlu1 %2072  ;;  %v1950_v22 = vpop.xlane.xlu0 %1949 }
 0x213   :  { %4463 = vrcp.f32 %v2073_v49  ;;  %v1996_v54 = vsub.f32 %v5109_v24, %v1950_v22 }
 0x215   :  { %v2052_v55 = vmul.f32 1.442695, %v1996_v54 }
 0x216   :  { %v1953_v58 = vpop.xlane.xlu1 %1952  ;;  %v2076_v59 = vpop.xlane.xlu0 %2075 }
 0x217   :  { %4465 = vpow2.f32 %v2052_v55  ;;  %v1997_v2 = vsub.f32 %v5122_v34, %v1953_v58 }
 0x218   :  { %4467 = vrcp.f32 %v2076_v59 }
 0x219   :  { %v4462_v3 = vpop.eup %4461  ;;  %v2054_v23 = vmul.f32 1.442695, %v1997_v2 }
 0x21a   :  { %v2196_v7 = vmul.f32 %v4462_v3, %v5111_v25  ;;  %v2079_v32 = vpop.xlane.xlu1 %2078  ;;  %v1956_v17 = vpop.xlane.xlu0 %1955 }
 0x21b   :  { %4469 = vpow2.f32 %v2054_v23  ;;  %v1998_v24 = vsub.f32 %v5133_v43, %v1956_v17 }
 0x21c   :  { %4471 = vrcp.f32 %v2079_v32  ;;  %v2228_v18 = vpack.c.bf16 %v2196_v7, %v2196_v7  ;;  %v88_v32 = vld [vmem:[%s5735_s2 + $0xc] sm:$0x3] }
 0x21d   :  { %v4464_v34 = vpop.eup %4463  ;;  %v2056_v11 = vmul.f32 1.442695, %v1998_v24 }
 0x21e   :  { %v2197_v14 = vmul.f32 %v4464_v34, %v5124_v35  ;;  %v1959_v47 = vpop.xlane.xlu1 %1958  ;;  %4222 = vmatmul.mubr.msk.bf16.vlgmr.msra.gmra.mrb[64].mxu0 %vm2260_vm4, %v2228_v18  ;;  %v2082_v43 = vpop.xlane.xlu0 %2081 }
 0x21f   :  { %4473 = vpow2.f32 %v2056_v11  ;;  %v1999_v25 = vsub.f32 %v5147_v60, %v1959_v47  ;;  %4232 = vmatpush3.bf16.msra.mxu0 %v2358_v30  ;;  %4233 = vmatprep.mubr.msk.bf16.mxu0 %vm4542_vm1, %v4541_v0  ;;  %v2542_v11 = vsel %vm2264_vm3, %v88_v32, 0 }
 0x220   :  { %4475 = vrcp.f32 %v2082_v43  ;;  %v2229_v62 = vpack.c.bf16 %v2197_v14, %v2197_v14  ;;  %4243 = vmatprep.subr.bf16.mxu0 %v4541_v0 }
 0x221   :  { %v5310_v40 = vpop.eup %4465  ;;  %v2058_v35 = vmul.f32 1.442695, %v1999_v25 }
 0x222   :  { %v4468_v26 = vpop.eup %4467  ;;  %4228 = vmatmul.mubr.msk.bf16.vlgmr.msra.gmra.mrb[64].mxu1 %vm2260_vm4, %v2229_v62  ;;  %v2085_v27 = vpop.xlane.xlu1 %2084  ;;  %v2140_v60 = vsel %vm1875_vm2, %v5310_v40, 0.0 }
 0x223   :  { %v2198_v63 = vmul.f32 %v4468_v26, %v5135_v50  ;;  %4477 = vpow2.f32 %v2058_v35  ;;  %v1962_v41 = vpop.xlane.xlu0 %1961  ;;  %2141 = vadd.xlane.f32.xlu0 %v2140_v60  ;;  %4238 = vmatpush3.bf16.msra.mxu1 %v2404_v37 }
 0x224   :  { %4479 = vrcp.f32 %v2085_v27  ;;  %v2000_v61 = vsub.f32 %v5159_v10, %v1962_v41  ;;  %4239 = vmatprep.mubr.msk.bf16.mxu1 %vm4542_vm1, %v4541_v0  ;;  %4249 = vmatprep.subr.bf16.mxu1 %v4541_v0  ;;  %v87_v10 = vld [vmem:[%s5735_s2 + $0xa] sm:$0x3] }
 0x225   :  { %v5323_v39 = vpop.eup %4469  ;;  %v2230_v42 = vpack.c.bf16 %v2198_v63, %v2198_v63  ;;  %v2496_v56 = vsel %vm2264_vm3, %v87_v10, 0 }
 0x226   :  { %v4472_v49 = vpop.eup %4471  ;;  %v2060_v22 = vmul.f32 1.442695, %v2000_v61  ;;  %v1965_v50 = vpop.xlane.xlu1 %1964  ;;  %v2143_v54 = vsel %vm1875_vm2, %v5323_v39, 0.0 }
 0x227   :  { %v2199_v55 = vmul.f32 %v4472_v49, %v5149_v4  ;;  %v2001_v58 = vsub.f32 %v5174_v8, %v1965_v50  ;;  %4234 = vmatmul.mubr.msk.bf16.vlgmr.msra.gmra.mrb[68].mxu0 %vm2260_vm4, %v2230_v42  ;;  %v2088_v59 = vpop.xlane.xlu0 %2087  ;;  %2144 = vadd.xlane.f32.xlu1 %v2143_v54 }
 0x228   :  { %4481 = vpow2.f32 %v2060_v22  ;;  %4244 = vmatpush3.bf16.msra.mxu0 %v2450_v16  ;;  %4245 = vmatprep.mubr.msk.bf16.mxu0 %vm4542_vm1, %v4541_v0  ;;  %v2634_v22 = vsel %vm2264_vm3, %v90_v28, 0 }
 0x229   :  { %v5336_v2 = vpop.eup %4473  ;;  %v2062_v3 = vmul.f32 1.442695, %v2001_v58  ;;  %4483 = vrcp.f32 %v2088_v59  ;;  %v2231_v23 = vpack.c.bf16 %v2199_v55, %v2199_v55  ;;  %4255 = vmatprep.subr.bf16.mxu0 %v4541_v0 }
 0x22a   :  { %v4476_v4 = vpop.eup %4475  ;;  %v2091_v8 = vpop.xlane.xlu1 %2090  ;;  %v2146_v7 = vsel %vm1875_vm2, %v5336_v2, 0.0 }
 0x22b   :  { %v2200_v17 = vmul.f32 %v4476_v4, %v5164_v12  ;;  %4485 = vpow2.f32 %v2062_v3  ;;  %4240 = vmatmul.mubr.msk.bf16.vlgmr.msra.gmra.mrb[68].mxu1 %vm2260_vm4, %v2231_v23  ;;  %v1968_v24 = vpop.xlane.xlu0 %1967  ;;  %2147 = vadd.xlane.f32.xlu0 %v2146_v7  ;;  %v92_v3 = vld [vmem:[%s5735_s2 + $0x14] sm:$0x3] }
 0x22c   :  { %4487 = vrcp.f32 %v2091_v8  ;;  %v2002_v18 = vsub.f32 %v5185_v29, %v1968_v24  ;;  %4250 = vmatpush3.bf16.msra.mxu1 %v2496_v56  ;;  %4251 = vmatprep.mubr.msk.bf16.mxu1 %vm4542_vm1, %v4541_v0  ;;  %v89_v29 = vld [vmem:[%s5735_s2 + $0xe] sm:$0x3] }
 0x22d   :  { %v5350_v30 = vpop.eup %4477  ;;  %v2232_v34 = vpack.c.bf16 %v2200_v17, %v2200_v17  ;;  %4261 = vmatprep.subr.bf16.mxu1 %v4541_v0  ;;  %v2588_v26 = vsel %vm2264_vm3, %v89_v29, 0  ;;  %v2726_v17 = vsel %vm2264_vm3, %v92_v3, 0 }
 0x22e   :  { %v4480_v12 = vpop.eup %4479  ;;  %v2064_v13 = vmul.f32 1.442695, %v2002_v18  ;;  %v1971_v14 = vpop.xlane.xlu1 %1970  ;;  %v2149_v47 = vsel %vm1875_vm2, %v5350_v30, 0.0 }
 0x22f   :  { %v2201_v25 = vmul.f32 %v4480_v12, %v5166_v46  ;;  %v2003_v43 = vsub.f32 %v5198_v51, %v1971_v14  ;;  %4246 = vmatmul.mubr.msk.bf16.vlgmr.msra.gmra.mrb[72].mxu0 %vm2260_vm4, %v2232_v34  ;;  %v2094_v62 = vpop.xlane.xlu0 %2093  ;;  %2150 = vadd.xlane.f32.xlu1 %v2149_v47 }
 0x230   :  { %4489 = vpow2.f32 %v2064_v13  ;;  %4256 = vmatpush3.bf16.msra.mxu0 %v2542_v11  ;;  %4257 = vmatprep.mubr.msk.bf16.mxu0 %vm4542_vm1, %v4541_v0 }
 0x231   :  { %v2066_v37 = vmul.f32 1.442695, %v2003_v43  ;;  %4491 = vrcp.f32 %v2094_v62  ;;  %v2233_v35 = vpack.c.bf16 %v2201_v25, %v2201_v25  ;;  %4267 = vmatprep.subr.bf16.mxu0 %v4541_v0 }
 0x232   :  { %v5366_v27 = vpop.eup %4481  ;;  %v2097_v46 = vpop.xlane.xlu1 %2096 }
 0x233   :  { %v4484_v51 = vpop.eup %4483  ;;  %4493 = vpow2.f32 %v2066_v37  ;;  %4252 = vmatmul.mubr.msk.bf16.vlgmr.msra.gmra.mrb[72].mxu1 %vm2260_vm4, %v2233_v35  ;;  %v2152_v60 = vsel %vm1875_vm2, %v5366_v27, 0.0 }
 0x234   :  { %v2202_v63 = vmul.f32 %v4484_v51, %v5190_v36  ;;  %4495 = vrcp.f32 %v2097_v46  ;;  %2153 = vadd.xlane.f32.xlu0 %v2152_v60  ;;  %4262 = vmatpush3.bf16.msra.mxu1 %v2588_v26  ;;  %v91_v36 = vld [vmem:[%s5735_s2 + $0x12] sm:$0x3]  ;;  %v96_v51 = vld [vmem:[%s5735_s2 + $0x1c] sm:$0x3] }
 0x235   :  { %v5375_v41 = vpop.eup %4485  ;;  %4263 = vmatprep.mubr.msk.bf16.mxu1 %vm4542_vm1, %v4541_v0  ;;  %4273 = vmatprep.subr.bf16.mxu1 %v4541_v0  ;;  %v2680_v55 = vsel %vm2264_vm3, %v91_v36, 0 }
 0x236   :  { %v4488_v61 = vpop.eup %4487  ;;  %v2103_v42 = vpop.xlane.xlu1 %2102  ;;  %v2234_v16 = vpack.c.bf16 %v2202_v63, %v2202_v63  ;;  %v2155_v49 = vsel %vm1875_vm2, %v5375_v41, 0.0 }
 0x237   :  { %v2203_v50 = vmul.f32 %v4488_v61, %v5192_v15  ;;  %4497 = vrcp.f32 %v2103_v42  ;;  %v2100_v54 = vpop.xlane.xlu0 %2099  ;;  %2156 = vadd.xlane.f32.xlu1 %v2155_v49  ;;  %v2910_v61 = vsel %vm2264_vm3, %v96_v51, 0 }
 0x238   :  { %4258 = vmatmul.mubr.msk.bf16.vlgmr.msra.gmra.mrb[76].mxu0 %vm2260_vm4, %v2234_v16  ;;  %4499 = vrcp.f32 %v2100_v54 }
 0x239   :  { %v2235_v10 = vpack.c.bf16 %v2203_v50, %v2203_v50  ;;  %4268 = vmatpush3.bf16.msra.mxu0 %v2634_v22  ;;  %4269 = vmatprep.mubr.msk.bf16.mxu0 %vm4542_vm1, %v4541_v0  ;;  %v98_v50 = vld [vmem:[%s5735_s2 + $0x20] sm:$0x3] }
 0x23a   :  { %v5391_v58 = vpop.eup %4489  ;;  %4279 = vmatprep.subr.bf16.mxu0 %v4541_v0 }
 0x23b   :  { %v4492_v59 = vpop.eup %4491  ;;  %4264 = vmatmul.mubr.msk.bf16.vlgmr.msra.gmra.mrb[76].mxu1 %vm2260_vm4, %v2235_v10  ;;  %v2158_v15 = vsel %vm1875_vm2, %v5391_v58, 0.0 }
 0x23c   :  { %v2204_v23 = vmul.f32 %v4492_v59, %v5215_v5  ;;  %2159 = vadd.xlane.f32.xlu0 %v2158_v15  ;;  %4274 = vmatpush3.bf16.msra.mxu1 %v2680_v55  ;;  %v93_v5 = vld [vmem:[%s5735_s2 + $0x16] sm:$0x3]  ;;  %v3002_v59 = vsel %vm2264_vm3, %v98_v50, 0 }
 0x23d   :  { %v5401_v56 = vpop.eup %4493  ;;  %4275 = vmatprep.mubr.msk.bf16.mxu1 %vm4542_vm1, %v4541_v0  ;;  %4285 = vmatprep.subr.bf16.mxu1 %v4541_v0  ;;  %v2772_v12 = vsel %vm2264_vm3, %v93_v5, 0 }
 0x23e   :  { %v4496_v4 = vpop.eup %4495  ;;  %v2109_v8 = vpop.xlane.xlu1 %2108  ;;  %v2236_v7 = vpack.c.bf16 %v2204_v23, %v2204_v23  ;;  %v2161_v32 = vsel %vm1875_vm2, %v5401_v56, 0.0 }
 0x23f   :  { %v2205_v24 = vmul.f32 %v4496_v4, %v5217_v31  ;;  %4501 = vrcp.f32 %v2109_v8  ;;  %v2106_v18 = vpop.xlane.xlu0 %2105  ;;  %2162 = vadd.xlane.f32.xlu1 %v2161_v32  ;;  %v94_v31 = vld [vmem:[%s5735_s2 + $0x18] sm:$0x3] }
 0x240   :  { %4270 = vmatmul.mubr.msk.bf16.vlgmr.msra.gmra.mrb[80].mxu0 %vm2260_vm4, %v2236_v7  ;;  %4503 = vrcp.f32 %v2106_v18  ;;  %v2818_v43 = vsel %vm2264_vm3, %v94_v31, 0  ;;  %v100_v7 = vld [vmem:[%s5735_s2 + $0x24] sm:$0x3] }
 0x241   :  { %v4498_v34 = vpop.eup %4497  ;;  %v2237_v11 = vpack.c.bf16 %v2205_v24, %v2205_v24  ;;  %4280 = vmatpush3.bf16.msra.mxu0 %v2726_v17  ;;  %4281 = vmatprep.mubr.msk.bf16.mxu0 %vm4542_vm1, %v4541_v0  ;;  %v3094_v24 = vsel %vm2264_vm3, %v100_v7, 0 }
 0x242   :  { %v4500_v13 = vpop.eup %4499  ;;  %4291 = vmatprep.subr.bf16.mxu0 %v4541_v0  ;;  %v2207_v47 = vmul.f32 %v4498_v34, %v5226_v33 }
 0x243   :  { %v2206_v14 = vmul.f32 %v4500_v13, %v5228_v20  ;;  %4276 = vmatmul.mubr.msk.bf16.vlgmr.msra.gmra.mrb[80].mxu1 %vm2260_vm4, %v2237_v11  ;;  %v95_v20 = vld [vmem:[%s5735_s2 + $0x1a] sm:$0x3] }
 0x244   :  { %4286 = vmatpush3.bf16.msra.mxu1 %v2772_v12  ;;  %4287 = vmatprep.mubr.msk.bf16.mxu1 %vm4542_vm1, %v4541_v0  ;;  %v2239_v35 = vpack.c.bf16 %v2207_v47, %v2207_v47  ;;  %v2864_v33 = vsel %vm2264_vm3, %v95_v20, 0 }
 0x245   :  { %v2238_v29 = vpack.c.bf16 %v2206_v14, %v2206_v14  ;;  %4297 = vmatprep.subr.bf16.mxu1 %v4541_v0  ;;  %v102_v14 = vld [vmem:[%s5735_s2 + $0x28] sm:$0x3] }
 0x246   :  { %v2115_v25 = vpop.xlane.xlu1 %2114 }
 0x247   :  { %4505 = vrcp.f32 %v2115_v25  ;;  %v2112_v62 = vpop.xlane.xlu0 %2111  ;;  %v3186_v25 = vsel %vm2264_vm3, %v102_v14, 0 }
 0x248   :  { %4282 = vmatmul.mubr.msk.bf16.vlgmr.msra.gmra.mrb[84].mxu0 %vm2260_vm4, %v2238_v29  ;;  %4507 = vrcp.f32 %v2112_v62 }
 0x249   :  { %v4502_v37 = vpop.eup %4501  ;;  %4292 = vmatpush3.bf16.msra.mxu0 %v2818_v43  ;;  %4293 = vmatprep.mubr.msk.bf16.mxu0 %vm4542_vm1, %v4541_v0 }
 0x24a   :  { %v4504_v26 = vpop.eup %4503  ;;  %4303 = vmatprep.subr.bf16.mxu0 %v4541_v0  ;;  %v2209_v60 = vmul.f32 %v4502_v37, %v5236_v48 }
 0x24b   :  { %v2208_v46 = vmul.f32 %v4504_v26, %v5238_v9  ;;  %4288 = vmatmul.mubr.msk.bf16.vlgmr.msra.gmra.mrb[84].mxu1 %vm2260_vm4, %v2239_v35  ;;  %v97_v9 = vld [vmem:[%s5735_s2 + $0x1e] sm:$0x3] }
 0x24c   :  { %4298 = vmatpush3.bf16.msra.mxu1 %v2864_v33  ;;  %4299 = vmatprep.mubr.msk.bf16.mxu1 %vm4542_vm1, %v4541_v0  ;;  %v2241_v49 = vpack.c.bf16 %v2209_v60, %v2209_v60  ;;  %v2956_v48 = vsel %vm2264_vm3, %v97_v9, 0  ;;  %v104_v33 = vld [vmem:[%s5735_s2 + $0x2c] sm:$0x3]  ;;  %v106_v9 = vld [vmem:[%s5735_s2 + $0x30] sm:$0x3] }
 0x24d   :  { %v2240_v28 = vpack.c.bf16 %v2208_v46, %v2208_v46  ;;  %4309 = vmatprep.subr.bf16.mxu1 %v4541_v0  ;;  %v3278_v51 = vsel %vm2264_vm3, %v104_v33, 0 }
 0x24e   :  { %v2121_v63 = vpop.xlane.xlu1 %2120 }
 0x24f   :  { %4509 = vrcp.f32 %v2121_v63  ;;  %v2118_v42 = vpop.xlane.xlu0 %2117 }
 0x250   :  { %4294 = vmatmul.mubr.msk.bf16.vlgmr.msra.gmra.mrb[88].mxu0 %vm2260_vm4, %v2240_v28  ;;  %4511 = vrcp.f32 %v2118_v42 }
 0x251   :  { %v4506_v16 = vpop.eup %4505  ;;  %4304 = vmatpush3.bf16.msra.mxu0 %v2910_v61  ;;  %4305 = vmatprep.mubr.msk.bf16.mxu0 %vm4542_vm1, %v4541_v0 }
 0x252   :  { %v4508_v22 = vpop.eup %4507  ;;  %4315 = vmatprep.subr.bf16.mxu0 %v4541_v0  ;;  %v2211_v54 = vmul.f32 %v4506_v16, %v5246_v52 }
 0x253   :  { %v2210_v36 = vmul.f32 %v4508_v22, %v5248_v53  ;;  %4300 = vmatmul.mubr.msk.bf16.vlgmr.msra.gmra.mrb[88].mxu1 %vm2260_vm4, %v2241_v49  ;;  %v99_v53 = vld [vmem:[%s5735_s2 + $0x22] sm:$0x3]  ;;  %v3370_v49 = vsel %vm2264_vm3, %v106_v9, 0 }
 0x254   :  { %4310 = vmatpush3.bf16.msra.mxu1 %v2956_v48  ;;  %4311 = vmatprep.mubr.msk.bf16.mxu1 %vm4542_vm1, %v4541_v0  ;;  %v2243_v23 = vpack.c.bf16 %v2211_v54, %v2211_v54  ;;  %v3048_v52 = vsel %vm2264_vm3, %v99_v53, 0 }
 0x255   :  { %v2242_v10 = vpack.c.bf16 %v2210_v36, %v2210_v36  ;;  %4321 = vmatprep.subr.bf16.mxu1 %v4541_v0 }
 0x256   :  { %v2127_v55 = vpop.xlane.xlu1 %2126 }
 0x257   :  { %4513 = vrcp.f32 %v2127_v55  ;;  %v2124_v15 = vpop.xlane.xlu0 %2123 }
 0x258   :  { %4306 = vmatmul.mubr.msk.bf16.vlgmr.msra.gmra.mrb[92].mxu0 %vm2260_vm4, %v2242_v10  ;;  %4515 = vrcp.f32 %v2124_v15  ;;  %v108_v10 = vld [vmem:[%s5735_s2 + $0x34] sm:$0x3] }
 0x259   :  { %v4510_v3 = vpop.eup %4509  ;;  %4316 = vmatpush3.bf16.msra.mxu0 %v3002_v59  ;;  %4317 = vmatprep.mubr.msk.bf16.mxu0 %vm4542_vm1, %v4541_v0  ;;  %v3462_v15 = vsel %vm2264_vm3, %v108_v10, 0 }
 0x25a   :  { %v4512_v4 = vpop.eup %4511  ;;  %4327 = vmatprep.subr.bf16.mxu0 %v4541_v0  ;;  %v2213_v32 = vmul.f32 %v4510_v3, %v5256_v57 }
 0x25b   :  { %v2212_v8 = vmul.f32 %v4512_v4, %v5258_v6  ;;  %4312 = vmatmul.mubr.msk.bf16.vlgmr.msra.gmra.mrb[92].mxu1 %vm2260_vm4, %v2243_v23  ;;  %v101_v6 = vld [vmem:[%s5735_s2 + $0x26] sm:$0x3]  ;;  %v109_v23 = vld [vmem:[%s5735_s2 + $0x36] sm:$0x3] }
 0x25c   :  { %4322 = vmatpush3.bf16.msra.mxu1 %v3048_v52  ;;  %4323 = vmatprep.mubr.msk.bf16.mxu1 %vm4542_vm1, %v4541_v0  ;;  %v2245_v11 = vpack.c.bf16 %v2213_v32, %v2213_v32  ;;  %v3140_v57 = vsel %vm2264_vm3, %v101_v6, 0  ;;  %v110_v32 = vld [vmem:[%s5735_s2 + $0x38] sm:$0x3] }
 0x25d   :  { %v2244_v17 = vpack.c.bf16 %v2212_v8, %v2212_v8  ;;  %4333 = vmatprep.subr.bf16.mxu1 %v4541_v0  ;;  %v3508_v8 = vsel %vm2264_vm3, %v109_v23, 0 }
 0x25e   :  { %v2133_v5 = vpop.xlane.xlu1 %2132 }
 0x25f   :  { %4517 = vrcp.f32 %v2133_v5  ;;  %v2130_v18 = vpop.xlane.xlu0 %2129 }
 0x260   :  { %4318 = vmatmul.mubr.msk.bf16.vlgmr.msra.gmra.mrb[96].mxu0 %vm2260_vm4, %v2244_v17  ;;  %4519 = vrcp.f32 %v2130_v18  ;;  %v111_v18 = vld [vmem:[%s5735_s2 + $0x3a] sm:$0x3] }
 0x261   :  { %v4514_v34 = vpop.eup %4513  ;;  %4328 = vmatpush3.bf16.msra.mxu0 %v3094_v24  ;;  %4329 = vmatprep.mubr.msk.bf16.mxu0 %vm4542_vm1, %v4541_v0  ;;  %v3554_v24 = vsel %vm2264_vm3, %v110_v32, 0 }
 0x262   :  { %v4516_v12 = vpop.eup %4515  ;;  %4339 = vmatprep.subr.bf16.mxu0 %v4541_v0  ;;  %v2215_v31 = vmul.f32 %v4514_v34, %v5266_v19 }
 0x263   :  { %v2214_v13 = vmul.f32 %v4516_v12, %v5268_v21  ;;  %4324 = vmatmul.mubr.msk.bf16.vlgmr.msra.gmra.mrb[96].mxu1 %vm2260_vm4, %v2245_v11  ;;  %v103_v21 = vld [vmem:[%s5735_s2 + $0x2a] sm:$0x3] }
 0x264   :  { %4334 = vmatpush3.bf16.msra.mxu1 %v3140_v57  ;;  %4335 = vmatprep.mubr.msk.bf16.mxu1 %vm4542_vm1, %v4541_v0  ;;  %v2247_v62 = vpack.c.bf16 %v2215_v31, %v2215_v31  ;;  %v3232_v19 = vsel %vm2264_vm3, %v103_v21, 0  ;;  %v3600_v57 = vsel %vm2264_vm3, %v111_v18, 0 }
 0x265   :  { %v2246_v47 = vpack.c.bf16 %v2214_v13, %v2214_v13  ;;  %4345 = vmatprep.subr.bf16.mxu1 %v4541_v0 }
 0x266   :  { %v2139_v29 = vpop.xlane.xlu1 %2138 }
 0x267   :  { %4521 = vrcp.f32 %v2139_v29  ;;  %v2136_v43 = vpop.xlane.xlu0 %2135 }
 0x268   :  { %4330 = vmatmul.mubr.msk.bf16.vlgmr.msra.gmra.mrb[100].mxu0 %vm2260_vm4, %v2246_v47  ;;  %4523 = vrcp.f32 %v2136_v43 }
 0x269   :  { %v4518_v20 = vpop.eup %4517  ;;  %4340 = vmatpush3.bf16.msra.mxu0 %v3186_v25  ;;  %4341 = vmatprep.mubr.msk.bf16.mxu0 %vm4542_vm1, %v4541_v0  ;;  %v113_v25 = vld [vmem:[%s5735_s2 + $0x3e] sm:$0x3] }
 0x26a   :  { %v4520_v37 = vpop.eup %4519  ;;  %4351 = vmatprep.subr.bf16.mxu0 %v4541_v0  ;;  %v2217_v26 = vmul.f32 %v4518_v20, %v5276_v45  ;;  %v3692_v43 = vsel %vm2264_vm3, %v113_v25, 0 }
 0x26b   :  { %v2216_v35 = vmul.f32 %v4520_v37, %v5278_v44  ;;  %4336 = vmatmul.mubr.msk.bf16.vlgmr.msra.gmra.mrb[100].mxu1 %vm2260_vm4, %v2247_v62  ;;  %v105_v44 = vld [vmem:[%s5735_s2 + $0x2e] sm:$0x3] }
 0x26c   :  { %4346 = vmatpush3.bf16.msra.mxu1 %v3232_v19  ;;  %4347 = vmatprep.mubr.msk.bf16.mxu1 %vm4542_vm1, %v4541_v0  ;;  %v2249_v28 = vpack.c.bf16 %v2217_v26, %v2217_v26  ;;  %v3324_v63 = vsel %vm2264_vm3, %v105_v44, 0 }
 0x26d   :  { %v2248_v46 = vpack.c.bf16 %v2216_v35, %v2216_v35  ;;  %4357 = vmatprep.subr.bf16.mxu1 %v4541_v0 }
 0x270   :  { %4342 = vmatmul.mubr.msk.bf16.vlgmr.msra.gmra.mrb[104].mxu0 %vm2260_vm4, %v2248_v46 }
 0x271   :  { %v4522_v60 = vpop.eup %4521  ;;  %4352 = vmatpush3.bf16.msra.mxu0 %v3278_v51  ;;  %4353 = vmatprep.mubr.msk.bf16.mxu0 %vm4542_vm1, %v4541_v0 }
 0x272   :  { %v4524_v45 = vpop.eup %4523  ;;  %4363 = vmatprep.subr.bf16.mxu0 %v4541_v0  ;;  %v2219_v42 = vmul.f32 %v4522_v60, %v5284_v1 }
 0x273   :  { %v2218_v61 = vmul.f32 %v4524_v45, %v5286_v38  ;;  %4348 = vmatmul.mubr.msk.bf16.vlgmr.msra.gmra.mrb[104].mxu1 %vm2260_vm4, %v2249_v28  ;;  %v107_v38 = vld [vmem:[%s5735_s2 + $0x32] sm:$0x3] }
 0x274   :  { %4358 = vmatpush3.bf16.msra.mxu1 %v3324_v63  ;;  %4359 = vmatprep.mubr.msk.bf16.mxu1 %vm4542_vm1, %v4541_v0  ;;  %v2251_v48 = vpack.c.bf16 %v2219_v42, %v2219_v42  ;;  %v3416_v22 = vsel %vm2264_vm3, %v107_v38, 0 }
 0x275   :  { %v2250_v16 = vpack.c.bf16 %v2218_v61, %v2218_v61  ;;  %4369 = vmatprep.subr.bf16.mxu1 %v4541_v0 }
 0x278   :  { %4354 = vmatmul.mubr.msk.bf16.vlgmr.msra.gmra.mrb[108].mxu0 %vm2260_vm4, %v2250_v16 }
 0x279   :  { %4364 = vmatpush3.bf16.msra.mxu0 %v3370_v49  ;;  %4365 = vmatprep.mubr.msk.bf16.mxu0 %vm4542_vm1, %v4541_v0 }
 0x27a   :  { %4375 = vmatprep.subr.bf16.mxu0 %v4541_v0 }
 0x27b   :  { %4360 = vmatmul.mubr.msk.bf16.vlgmr.msra.gmra.mrb[108].mxu1 %vm2260_vm4, %v2251_v48 }
 0x27c   :  { %4370 = vmatpush3.bf16.msra.mxu1 %v3416_v22  ;;  %4371 = vmatprep.mubr.msk.bf16.mxu1 %vm4542_vm1, %v4541_v0 }
 0x27d   :  { %4381 = vmatprep.subr.bf16.mxu1 %v4541_v0 }
 0x2b0   :  { %v2142_v1 = vpop.xlane.xlu0 %2141 }
 0x2b1   :  { %4525 = vrcp.f32 %v2142_v1 }
 0x2b4   :  { %v2145_v36 = vpop.xlane.xlu1 %2144 }
 0x2b5   :  { %4527 = vrcp.f32 %v2145_v36 }
 0x2b8   :  { %v2148_v50 = vpop.xlane.xlu0 %2147 }
 0x2b9   :  { %4529 = vrcp.f32 %v2148_v50 }
 0x2bb   :  { %v4526_v54 = vpop.eup %4525 }
 0x2bc   :  { %v2220_v55 = vmul.f32 %v4526_v54, %v5310_v40  ;;  %v2151_v59 = vpop.xlane.xlu1 %2150 }
 0x2bd   :  { %4531 = vrcp.f32 %v2151_v59 }
 0x2be   :  { %v2252_v53 = vpack.c.bf16 %v2220_v55, %v2220_v55 }
 0x2bf   :  { %v4528_v3 = vpop.eup %4527 }
 0x2c0   :  { %v2221_v52 = vmul.f32 %v4528_v3, %v5323_v39  ;;  %4366 = vmatmul.mubr.msk.bf16.vlgmr.msra.gmra.mrb[112].mxu0 %vm2260_vm4, %v2252_v53 }
 0x2c1   :  { %v2154_v4 = vpop.xlane.xlu0 %2153  ;;  %4376 = vmatpush3.bf16.msra.mxu0 %v3462_v15  ;;  %4377 = vmatprep.mubr.msk.bf16.mxu0 %vm4542_vm1, %v4541_v0 }
 0x2c2   :  { %4533 = vrcp.f32 %v2154_v4  ;;  %v2253_v40 = vpack.c.bf16 %v2221_v52, %v2221_v52  ;;  %4387 = vmatprep.subr.bf16.mxu0 %v4541_v0 }
 0x2c3   :  { %v4530_v7 = vpop.eup %4529 }
 0x2c4   :  { %v2222_v39 = vmul.f32 %v4530_v7, %v5336_v2  ;;  %4372 = vmatmul.mubr.msk.bf16.vlgmr.msra.gmra.mrb[112].mxu1 %vm2260_vm4, %v2253_v40  ;;  %v2157_v17 = vpop.xlane.xlu1 %2156 }
 0x2c5   :  { %4535 = vrcp.f32 %v2157_v17  ;;  %4382 = vmatpush3.bf16.msra.mxu1 %v3508_v8  ;;  %4383 = vmatprep.mubr.msk.bf16.mxu1 %vm4542_vm1, %v4541_v0 }
 0x2c6   :  { %v2254_v5 = vpack.c.bf16 %v2222_v39, %v2222_v39  ;;  %4393 = vmatprep.subr.bf16.mxu1 %v4541_v0 }
 0x2c7   :  { %v4532_v6 = vpop.eup %4531 }
 0x2c8   :  { %v2223_v2 = vmul.f32 %v4532_v6, %v5350_v30  ;;  %4378 = vmatmul.mubr.msk.bf16.vlgmr.msra.gmra.mrb[116].mxu0 %vm2260_vm4, %v2254_v5  ;;  %v112_v30 = vld [vmem:[%s5735_s2 + $0x3c] sm:$0x3] }
 0x2c9   :  { %v2160_v34 = vpop.xlane.xlu0 %2159  ;;  %4388 = vmatpush3.bf16.msra.mxu0 %v3554_v24  ;;  %4389 = vmatprep.mubr.msk.bf16.mxu0 %vm4542_vm1, %v4541_v0  ;;  %v3646_v29 = vsel %vm2264_vm3, %v112_v30, 0 }
 0x2ca   :  { %4537 = vrcp.f32 %v2160_v34  ;;  %v2255_v11 = vpack.c.bf16 %v2223_v2, %v2223_v2  ;;  %4399 = vmatprep.subr.bf16.mxu0 %v4541_v0 }
 0x2cc   :  { %v4534_v12 = vpop.eup %4533  ;;  %4384 = vmatmul.mubr.msk.bf16.vlgmr.msra.gmra.mrb[116].mxu1 %vm2260_vm4, %v2255_v11  ;;  %v2163_v13 = vpop.xlane.xlu1 %2162 }
 0x2cd   :  { %v2224_v14 = vmul.f32 %v4534_v12, %v5366_v27  ;;  %4539 = vrcp.f32 %v2163_v13  ;;  %4394 = vmatpush3.bf16.msra.mxu1 %v3600_v57  ;;  %4395 = vmatprep.mubr.msk.bf16.mxu1 %vm4542_vm1, %v4541_v0 }
 0x2ce   :  { %4405 = vmatprep.subr.bf16.mxu1 %v4541_v0 }
 0x2cf   :  { %v4536_v31 = vpop.eup %4535  ;;  %v2256_v47 = vpack.c.bf16 %v2224_v14, %v2224_v14 }
 0x2d0   :  { %v2225_v21 = vmul.f32 %v4536_v31, %v5375_v41 }
 0x2d1   :  { %4390 = vmatmul.mubr.msk.bf16.vlgmr.msra.gmra.mrb[120].mxu0 %vm2260_vm4, %v2256_v47 }
 0x2d2   :  { %v2257_v27 = vpack.c.bf16 %v2225_v21, %v2225_v21  ;;  %4400 = vmatpush3.bf16.msra.mxu0 %v3646_v29  ;;  %4401 = vmatprep.mubr.msk.bf16.mxu0 %vm4542_vm1, %v4541_v0 }
 0x2d4   :  { %v4538_v20 = vpop.eup %4537  ;;  %4396 = vmatmul.mubr.msk.bf16.vlgmr.msra.gmra.mrb[120].mxu1 %vm2260_vm4, %v2257_v27 }
 0x2d5   :  { %v2226_v62 = vmul.f32 %v4538_v20, %v5391_v58  ;;  %4406 = vmatpush3.bf16.msra.mxu1 %v3692_v43  ;;  %4407 = vmatprep.mubr.msk.bf16.mxu1 %vm4542_vm1, %v4541_v0 }
 0x2d7   :  { %v4540_v19 = vpop.eup %4539  ;;  %v2258_v41 = vpack.c.bf16 %v2226_v62, %v2226_v62 }
 0x2d8   :  { %v2227_v37 = vmul.f32 %v4540_v19, %v5401_v56 }
 0x2d9   :  { %4402 = vmatmul.mubr.msk.bf16.vlgmr.msra.gmra.mrb[124].mxu0 %vm2260_vm4, %v2258_v41 }
 0x2da   :  { %v2259_v35 = vpack.c.bf16 %v2227_v37, %v2227_v37 }
 0x2dc   :  { %4408 = vmatmul.mubr.msk.bf16.vlgmr.msra.gmra.mrb[124].mxu1 %vm2260_vm4, %v2259_v35 }
 0x2f1   :  { %v2302_v33 = vpop.f32.mrb[64].mxu0 }
 0x2f2   :  { %v3734_v26 = vpack.c.bf16 %v2302_v33, %v2302_v33  ;;  %v4223_v46 = vpop.f32.mrb[65].mxu0 }
 0x2f3   :  { %v2305_v51 = vpop.f32.mrb[66].mxu0 }
 0x2f4   :  { %3767 = vst.msk [vmem:[%s5736_s4] sm:$0x3] %vm3766_vm5, %v3734_v26  ;;  %v4224_v0 = vpop.f32.mrb[67].mxu0 }
 0x2f5   :  { %v2348_v58 = vpop.f32.mrb[64].mxu1 }
 0x2f6   :  { %v3735_v44 = vpack.c.bf16 %v2348_v58, %v2348_v58  ;;  %v4229_v60 = vpop.f32.mrb[65].mxu1 }
 0x2f7   :  { %v2351_v56 = vpop.f32.mrb[66].mxu1 }
 0x2f8   :  { %3768 = vst.msk [vmem:[%s5736_s4 + $0x2] sm:$0x3] %vm3766_vm5, %v3735_v44  ;;  %v4230_v28 = vpop.f32.mrb[67].mxu1 }
 0x2fa   :  { %v2394_v63 = vpop.f32.mrb[68].mxu0 }
 0x2fb   :  { %v3736_v45 = vpack.c.bf16 %v2394_v63, %v2394_v63  ;;  %v4235_v61 = vpop.f32.mrb[69].mxu0 }
 0x2fc   :  { %v2397_v9 = vpop.f32.mrb[70].mxu0 }
 0x2fd   :  { %3769 = vst.msk [vmem:[%s5736_s4 + $0x4] sm:$0x3] %vm3766_vm5, %v3736_v45  ;;  %v4236_v42 = vpop.f32.mrb[71].mxu0 }
 0x2fe   :  { %v2440_v16 = vpop.f32.mrb[68].mxu1 }
 0x2ff   :  { %v3737_v49 = vpack.c.bf16 %v2440_v16, %v2440_v16  ;;  %v4241_v38 = vpop.f32.mrb[69].mxu1 }
 0x300   :  { %v2443_v48 = vpop.f32.mrb[70].mxu1 }
 0x301   :  { %3770 = vst.msk [vmem:[%s5736_s4 + $0x6] sm:$0x3] %vm3766_vm5, %v3737_v49  ;;  %v4242_v22 = vpop.f32.mrb[71].mxu1 }
 0x302   :  { %v2486_v1 = vpop.f32.mrb[72].mxu0 }
 0x303   :  { %v3738_v36 = vpack.c.bf16 %v2486_v1, %v2486_v1  ;;  %v4247_v50 = vpop.f32.mrb[73].mxu0 }
 0x304   :  { %v2489_v54 = vpop.f32.mrb[74].mxu0 }
 0x305   :  { %3771 = vst.msk [vmem:[%s5736_s4 + $0x8] sm:$0x3] %vm3766_vm5, %v3738_v36  ;;  %v4248_v10 = vpop.f32.mrb[75].mxu0 }
 0x306   :  { %v2532_v55 = vpop.f32.mrb[72].mxu1 }
 0x307   :  { %v3739_v59 = vpack.c.bf16 %v2532_v55, %v2532_v55  ;;  %v4253_v53 = vpop.f32.mrb[73].mxu1 }
 0x308   :  { %v2535_v15 = vpop.f32.mrb[74].mxu1 }
 0x309   :  { %3772 = vst.msk [vmem:[%s5736_s4 + $0xa] sm:$0x3] %vm3766_vm5, %v3739_v59  ;;  %v4254_v3 = vpop.f32.mrb[75].mxu1 }
 0x30b   :  { %v2578_v23 = vpop.f32.mrb[76].mxu0 }
 0x30c   :  { %v3740_v52 = vpack.c.bf16 %v2578_v23, %v2578_v23  ;;  %v4259_v4 = vpop.f32.mrb[77].mxu0 }
 0x30d   :  { %v2581_v40 = vpop.f32.mrb[78].mxu0 }
 0x30e   :  { %3773 = vst.msk [vmem:[%s5736_s4 + $0xc] sm:$0x3] %vm3766_vm5, %v3740_v52  ;;  %v4260_v8 = vpop.f32.mrb[79].mxu0  ;;  %v2624_v7 = vpop.f32.mrb[76].mxu1 }
 0x30f   :  { %v3741_v32 = vpack.c.bf16 %v2624_v7, %v2624_v7  ;;  %v4265_v39 = vpop.f32.mrb[77].mxu1 }
 0x310   :  { %v2627_v17 = vpop.f32.mrb[78].mxu1 }
 0x311   :  { %3774 = vst.msk [vmem:[%s5736_s4 + $0xe] sm:$0x3] %vm3766_vm5, %v3741_v32  ;;  %v4266_v5 = vpop.f32.mrb[79].mxu1 }
 0x313   :  { %v2670_v24 = vpop.f32.mrb[80].mxu0 }
 0x314   :  { %v3742_v6 = vpack.c.bf16 %v2670_v24, %v2670_v24  ;;  %v4271_v18 = vpop.f32.mrb[81].mxu0 }
 0x315   :  { %v2673_v2 = vpop.f32.mrb[82].mxu0 }
 0x316   :  { %3775 = vst.msk [vmem:[%s5736_s4 + $0x10] sm:$0x3] %vm3766_vm5, %v3742_v6  ;;  %v4272_v34 = vpop.f32.mrb[83].mxu0  ;;  %v2716_v11 = vpop.f32.mrb[80].mxu1 }
 0x317   :  { %v3743_v57 = vpack.c.bf16 %v2716_v11, %v2716_v11  ;;  %v4277_v12 = vpop.f32.mrb[81].mxu1 }
 0x318   :  { %v2719_v13 = vpop.f32.mrb[82].mxu1 }
 0x319   :  { %3776 = vst.msk [vmem:[%s5736_s4 + $0x12] sm:$0x3] %vm3766_vm5, %v3743_v57  ;;  %v4278_v30 = vpop.f32.mrb[83].mxu1 }
 0x31b   :  { %v2762_v14 = vpop.f32.mrb[84].mxu0 }
 0x31c   :  { %v3744_v31 = vpack.c.bf16 %v2762_v14, %v2762_v14  ;;  %v4283_v47 = vpop.f32.mrb[85].mxu0 }
 0x31d   :  { %v2765_v29 = vpop.f32.mrb[86].mxu0 }
 0x31e   :  { %3777 = vst.msk [vmem:[%s5736_s4 + $0x14] sm:$0x3] %vm3766_vm5, %v3744_v31  ;;  %v4284_v25 = vpop.f32.mrb[87].mxu0  ;;  %v2808_v21 = vpop.f32.mrb[84].mxu1 }
 0x31f   :  { %v3745_v27 = vpack.c.bf16 %v2808_v21, %v2808_v21  ;;  %v4289_v43 = vpop.f32.mrb[85].mxu1 }
 0x320   :  { %v2811_v20 = vpop.f32.mrb[86].mxu1 }
 0x321   :  { %3778 = vst.msk [vmem:[%s5736_s4 + $0x16] sm:$0x3] %vm3766_vm5, %v3745_v27  ;;  %v4290_v62 = vpop.f32.mrb[87].mxu1 }
 0x323   :  { %v2854_v19 = vpop.f32.mrb[88].mxu0 }
 0x324   :  { %v3746_v41 = vpack.c.bf16 %v2854_v19, %v2854_v19  ;;  %v4295_v37 = vpop.f32.mrb[89].mxu0 }
 0x325   :  { %v2857_v35 = vpop.f32.mrb[90].mxu0 }
 0x326   :  { %3779 = vst.msk [vmem:[%s5736_s4 + $0x18] sm:$0x3] %vm3766_vm5, %v3746_v41  ;;  %v4296_v33 = vpop.f32.mrb[91].mxu0  ;;  %v2900_v26 = vpop.f32.mrb[88].mxu1 }
 0x327   :  { %v3747_v46 = vpack.c.bf16 %v2900_v26, %v2900_v26  ;;  %v4301_v51 = vpop.f32.mrb[89].mxu1 }
 0x328   :  { %v2903_v0 = vpop.f32.mrb[90].mxu1 }
 0x329   :  { %3780 = vst.msk [vmem:[%s5736_s4 + $0x1a] sm:$0x3] %vm3766_vm5, %v3747_v46  ;;  %v4302_v58 = vpop.f32.mrb[91].mxu1 }
 0x32b   :  { %v2946_v44 = vpop.f32.mrb[92].mxu0 }
 0x32c   :  { %v3748_v60 = vpack.c.bf16 %v2946_v44, %v2946_v44  ;;  %v4307_v56 = vpop.f32.mrb[93].mxu0 }
 0x32d   :  { %v2949_v28 = vpop.f32.mrb[94].mxu0 }
 0x32e   :  { %3781 = vst.msk [vmem:[%s5736_s4 + $0x1c] sm:$0x3] %vm3766_vm5, %v3748_v60  ;;  %v4308_v63 = vpop.f32.mrb[95].mxu0  ;;  %v2992_v45 = vpop.f32.mrb[92].mxu1 }
 0x32f   :  { %v3749_v61 = vpack.c.bf16 %v2992_v45, %v2992_v45  ;;  %v4313_v9 = vpop.f32.mrb[93].mxu1 }
 0x330   :  { %v2995_v42 = vpop.f32.mrb[94].mxu1 }
 0x331   :  { %3782 = vst.msk [vmem:[%s5736_s4 + $0x1e] sm:$0x3] %vm3766_vm5, %v3749_v61  ;;  %v4314_v16 = vpop.f32.mrb[95].mxu1 }
 0x333   :  { %v3038_v49 = vpop.f32.mrb[96].mxu0 }
 0x334   :  { %v3750_v38 = vpack.c.bf16 %v3038_v49, %v3038_v49  ;;  %v4319_v48 = vpop.f32.mrb[97].mxu0 }
 0x335   :  { %v3041_v22 = vpop.f32.mrb[98].mxu0 }
 0x336   :  { %3783 = vst.msk [vmem:[%s5736_s4 + $0x20] sm:$0x3] %vm3766_vm5, %v3750_v38  ;;  %v4320_v1 = vpop.f32.mrb[99].mxu0  ;;  %v3084_v36 = vpop.f32.mrb[96].mxu1 }
 0x337   :  { %v3751_v50 = vpack.c.bf16 %v3084_v36, %v3084_v36  ;;  %v4325_v54 = vpop.f32.mrb[97].mxu1 }
 0x338   :  { %v3087_v10 = vpop.f32.mrb[98].mxu1 }
 0x339   :  { %3784 = vst.msk [vmem:[%s5736_s4 + $0x22] sm:$0x3] %vm3766_vm5, %v3751_v50  ;;  %v4326_v55 = vpop.f32.mrb[99].mxu1 }
 0x33b   :  { %v3130_v59 = vpop.f32.mrb[100].mxu0 }
 0x33c   :  { %v3752_v53 = vpack.c.bf16 %v3130_v59, %v3130_v59  ;;  %v4331_v15 = vpop.f32.mrb[101].mxu0 }
 0x33d   :  { %v3133_v3 = vpop.f32.mrb[102].mxu0 }
 0x33e   :  { %3785 = vst.msk [vmem:[%s5736_s4 + $0x24] sm:$0x3] %vm3766_vm5, %v3752_v53  ;;  %v4332_v23 = vpop.f32.mrb[103].mxu0  ;;  %v3176_v52 = vpop.f32.mrb[100].mxu1 }
 0x33f   :  { %v3753_v4 = vpack.c.bf16 %v3176_v52, %v3176_v52  ;;  %v4337_v40 = vpop.f32.mrb[101].mxu1 }
 0x340   :  { %v3179_v8 = vpop.f32.mrb[102].mxu1 }
 0x341   :  { %3786 = vst.msk [vmem:[%s5736_s4 + $0x26] sm:$0x3] %vm3766_vm5, %v3753_v4  ;;  %v4338_v7 = vpop.f32.mrb[103].mxu1 }
 0x343   :  { %v3222_v32 = vpop.f32.mrb[104].mxu0 }
 0x344   :  { %v3754_v39 = vpack.c.bf16 %v3222_v32, %v3222_v32  ;;  %v4343_v17 = vpop.f32.mrb[105].mxu0 }
 0x345   :  { %v3225_v5 = vpop.f32.mrb[106].mxu0 }
 0x346   :  { %3787 = vst.msk [vmem:[%s5736_s4 + $0x28] sm:$0x3] %vm3766_vm5, %v3754_v39  ;;  %v4344_v24 = vpop.f32.mrb[107].mxu0  ;;  %v3268_v6 = vpop.f32.mrb[104].mxu1 }
 0x347   :  { %v3755_v18 = vpack.c.bf16 %v3268_v6, %v3268_v6  ;;  %v4349_v2 = vpop.f32.mrb[105].mxu1 }
 0x348   :  { %v3271_v34 = vpop.f32.mrb[106].mxu1 }
 0x349   :  { %3788 = vst.msk [vmem:[%s5736_s4 + $0x2a] sm:$0x3] %vm3766_vm5, %v3755_v18  ;;  %v4350_v11 = vpop.f32.mrb[107].mxu1 }
 0x34b   :  { %v3314_v57 = vpop.f32.mrb[108].mxu0 }
 0x34c   :  { %v3756_v12 = vpack.c.bf16 %v3314_v57, %v3314_v57  ;;  %v4355_v13 = vpop.f32.mrb[109].mxu0 }
 0x34d   :  { %v3317_v30 = vpop.f32.mrb[110].mxu0 }
 0x34e   :  { %3789 = vst.msk [vmem:[%s5736_s4 + $0x2c] sm:$0x3] %vm3766_vm5, %v3756_v12  ;;  %v4356_v14 = vpop.f32.mrb[111].mxu0  ;;  %v3360_v31 = vpop.f32.mrb[108].mxu1 }
 0x34f   :  { %v3757_v47 = vpack.c.bf16 %v3360_v31, %v3360_v31  ;;  %v4361_v29 = vpop.f32.mrb[109].mxu1 }
 0x350   :  { %v3363_v25 = vpop.f32.mrb[110].mxu1 }
 0x351   :  { %3790 = vst.msk [vmem:[%s5736_s4 + $0x2e] sm:$0x3] %vm3766_vm5, %v3757_v47  ;;  %v4362_v21 = vpop.f32.mrb[111].mxu1 }
 0x393   :  { %v3406_v27 = vpop.f32.mrb[112].mxu0 }
 0x394   :  { %v3758_v43 = vpack.c.bf16 %v3406_v27, %v3406_v27  ;;  %v4367_v20 = vpop.f32.mrb[113].mxu0 }
 0x395   :  { %v3409_v62 = vpop.f32.mrb[114].mxu0 }
 0x396   :  { %3791 = vst.msk [vmem:[%s5736_s4 + $0x30] sm:$0x3] %vm3766_vm5, %v3758_v43  ;;  %v4368_v19 = vpop.f32.mrb[115].mxu0 }
 0x397   :  { %v3452_v41 = vpop.f32.mrb[112].mxu1 }
 0x398   :  { %v3759_v37 = vpack.c.bf16 %v3452_v41, %v3452_v41  ;;  %v4373_v35 = vpop.f32.mrb[113].mxu1 }
 0x399   :  { %v3455_v33 = vpop.f32.mrb[114].mxu1 }
 0x39a   :  { %3792 = vst.msk [vmem:[%s5736_s4 + $0x32] sm:$0x3] %vm3766_vm5, %v3759_v37  ;;  %v4374_v26 = vpop.f32.mrb[115].mxu1 }
 0x39b   :  { %v3498_v46 = vpop.f32.mrb[116].mxu0 }
 0x39c   :  { %v3760_v51 = vpack.c.bf16 %v3498_v46, %v3498_v46  ;;  %v4379_v0 = vpop.f32.mrb[117].mxu0 }
 0x39d   :  { %v3501_v58 = vpop.f32.mrb[118].mxu0 }
 0x39e   :  { %3793 = vst.msk [vmem:[%s5736_s4 + $0x34] sm:$0x3] %vm3766_vm5, %v3760_v51  ;;  %v4380_v44 = vpop.f32.mrb[119].mxu0 }
 0x39f   :  { %v3544_v60 = vpop.f32.mrb[116].mxu1 }
 0x3a0   :  { %v3761_v56 = vpack.c.bf16 %v3544_v60, %v3544_v60  ;;  %v4385_v28 = vpop.f32.mrb[117].mxu1 }
 0x3a1   :  { %v3547_v63 = vpop.f32.mrb[118].mxu1 }
 0x3a2   :  { %3794 = vst.msk [vmem:[%s5736_s4 + $0x36] sm:$0x3] %vm3766_vm5, %v3761_v56  ;;  %v4386_v45 = vpop.f32.mrb[119].mxu1 }
 0x3a4   :  { %v3590_v61 = vpop.f32.mrb[120].mxu0 }
 0x3a5   :  { %v3762_v9 = vpack.c.bf16 %v3590_v61, %v3590_v61  ;;  %v4391_v42 = vpop.f32.mrb[121].mxu0 }
 0x3a6   :  { %v3593_v16 = vpop.f32.mrb[122].mxu0 }
 0x3a7   :  { %3795 = vst.msk [vmem:[%s5736_s4 + $0x38] sm:$0x3] %vm3766_vm5, %v3762_v9  ;;  %v4392_v49 = vpop.f32.mrb[123].mxu0  ;;  %v3636_v38 = vpop.f32.mrb[120].mxu1 }
 0x3a8   :  { %v3763_v48 = vpack.c.bf16 %v3636_v38, %v3636_v38  ;;  %v4397_v22 = vpop.f32.mrb[121].mxu1 }
 0x3a9   :  { %v3639_v1 = vpop.f32.mrb[122].mxu1 }
 0x3aa   :  { %3796 = vst.msk [vmem:[%s5736_s4 + $0x3a] sm:$0x3] %vm3766_vm5, %v3763_v48  ;;  %v4398_v36 = vpop.f32.mrb[123].mxu1 }
 0x3ac   :  { %v3682_v50 = vpop.f32.mrb[124].mxu0 }
 0x3ad   :  { %v3764_v54 = vpack.c.bf16 %v3682_v50, %v3682_v50  ;;  %v4403_v10 = vpop.f32.mrb[125].mxu0 }
 0x3ae   :  { %v3685_v55 = vpop.f32.mrb[126].mxu0 }
 0x3af   :  { %3797 = vst.msk [vmem:[%s5736_s4 + $0x3c] sm:$0x3] %vm3766_vm5, %v3764_v54  ;;  %v4404_v59 = vpop.f32.mrb[127].mxu0  ;;  %v3728_v53 = vpop.f32.mrb[124].mxu1 }
 0x3b0   :  { %v3765_v15 = vpack.c.bf16 %v3728_v53, %v3728_v53  ;;  %v4409_v3 = vpop.f32.mrb[125].mxu1 }
 0x3b1   :  { %v3731_v23 = vpop.f32.mrb[126].mxu1 }
 0x3b2   :  { %3798 = vst.msk [vmem:[%s5736_s4 + $0x3e] sm:$0x3] %vm3766_vm5, %v3765_v15  ;;  %v4410_v52 = vpop.f32.mrb[127].mxu1 }

// kernel: msa_transformer_forward.60
= control target key start
LH: loop header
LB: loop body
LE: loop exit
PB: predicated region body
PF: predicated region fallthrough
CT: control target
= control target key end

     0   :  { %vm225_vm0 = vcmask 1043456   ;;  %vm83_vm1 = vsmask.f32 3328  ;;  %vm84_vm2 = vsmask.f32 7440  ;;  %vm212_vm3 = vcmask 64512   ;;  %s1898_s1 = inlined_call_operand.vmem [shape: bf16[9,8,8], index: 1, kind: input, shape index: {}]   ;;  %s1899_s0 = inlined_call_operand.vmem [shape: f32[1,10,10,8], index: 0, kind: input, shape index: {}]   ;;  %s1900_s2 = inlined_call_operand.vmem [shape: f32[1,8,8,8], index: 2, kind: output, shape index: {}]  }
   0x1   :  { %v1129_v0 = vld [vmem:[%s1898_s1 + $0x4] sm:$0xf]  ;;  %v1475_v1 = vld [vmem:[%s1898_s1 + $0x10] sm:$0xf]  ;;  %v13_v5 = vld [vmem:[%s1899_s0 + $0x8] sm:$0x3] }
   0x2   :  { %v1480_v2 = vld [vmem:[%s1899_s0] sm:$0xff]  ;;  %1444 = vmatprep.subr.msk.bf16.mxu1 %vm225_vm0, %v1129_v0  ;;  %1448 = vmatprep.subr.msk.bf16.mxu0 %vm225_vm0, %v1475_v1  ;;  %v227_v3 = vsel %vm225_vm0, %v1129_v0, 0  ;;  %v1488_v4 = vsel %vm225_vm0, %v1475_v1, 0  ;;  %v1496_v6 = vld [vmem:[%s1899_s0 + $0x10] sm:$0xff]  ;;  %v15_v8 = vld [vmem:[%s1899_s0 + $0x18] sm:$0x3]  ;;  %v1506_v9 = vpack.c.bf16 %v13_v5, %v13_v5 }
   0x3   :  { %v1500_v7 = vpack.c.bf16 %v1480_v2, %v1480_v2  ;;  %1289 = vmatpush3.bf16.msra.mxu1 %v227_v3  ;;  %1329 = vmatpush3.bf16.msra.mxu0 %v1488_v4  ;;  %v1510_v10 = vpack.c.bf16 %v1496_v6, %v1496_v6  ;;  %v1515_v11 = vld [vmem:[%s1898_s1] sm:$0xf]  ;;  %v1522_v13 = vpack.c.bf16 %v15_v8, %v15_v8  ;;  %v17_v16 = vld [vmem:[%s1899_s0 + $0x28] sm:$0x3]  ;;  %v1534_v17 = vld [vmem:[%s1899_s0 + $0x30] sm:$0xff]  ;;  %vm378_vm5 = vcmask 1042432  }
   0x4   :  { %v1520_v12 = vld [vmem:[%s1899_s0 + $0x20] sm:$0xff]  ;;  %1445 = vmatprep.subr.msk.bf16.mxu1 %vm225_vm0, %v1515_v11  ;;  %v96_v18 = vshll.u32 %v1506_v9, 16  ;;  %v19_v21 = vld [vmem:[%s1899_s0 + $0x38] sm:$0x3]  ;;  %v21_v28 = vld [vmem:[%s1899_s0 + $0x48] sm:$0x3]  ;;  %v1556_v32 = vpack.c.bf16 %v17_v16, %v17_v16  ;;  %v1563_v36 = vpack.c.bf16 %v1534_v17, %v1534_v17 }
   0x5   :  { %v87_v14 = vshrl.u32 %v1500_v7, 16  ;;  %v90_v15 = vshll.u32 %v1500_v7, 16  ;;  %v101_v19 = vshrl.u32 %v1510_v10, 16  ;;  %v104_v20 = vshll.u32 %v1510_v10, 16  ;;  %v1545_v22 = vld [vmem:[%s1899_s0 + $0x40] sm:$0xff]  ;;  %vm1570_vm4 = vmor %vm83_vm1, %vm84_vm2  ;;  %v1596_v63 = vld [vmem:[%s1899_s0 + $0x50] sm:$0xff] }
   0x6   :  { %v1549_v23 = vpack.c.bf16 %v1520_v12, %v1520_v12  ;;  %v110_v26 = vshll.u32 %v1522_v13, 16  ;;  %v387_v27 = vrot.slane %v1522_v13, 5  ;;  %v98_v29 = vrot.slane %v96_v18, 5  ;;  %v1184_v33 = vld [vmem:[%s1898_s1 + $0x14] sm:$0xf] }
   0x7   :  { %v89_v24 = vrot.slane %v87_v14, 4  ;;  %v92_v25 = vrot.slane %v90_v15, 5  ;;  %v103_v30 = vrot.slane %v101_v19, 4  ;;  %v106_v31 = vrot.slane %v104_v20, 5  ;;  %1450 = vmatprep.subr.msk.bf16.mxu0 %vm225_vm0, %v1184_v33  ;;  %v23_v14 = vld [vmem:[%s1899_s0 + $0x58] sm:$0x3] }
   0x8   :  { %v112_v35 = vrot.slane %v110_v26, 5  ;;  %v1565_v37 = vpack.c.bf16 %v19_v21, %v19_v21  ;;  %v1576_v40 = vpack.c.bf16 %v1545_v22, %v1545_v22  ;;  %v1578_v41 = vpack.c.bf16 %v21_v28, %v21_v28  ;;  %v1606_v15 = vld [vmem:[%s1899_s0 + $0x60] sm:$0xff]  ;;  %v25_v28 = vld [vmem:[%s1899_s0 + $0x68] sm:$0x3] }
   0x9   :  { %v93_v34 = vor.u32 %v92_v25, %v89_v24  ;;  %v107_v39 = vor.u32 %v106_v31, %v103_v30  ;;  %v115_v42 = vshrl.u32 %v1549_v23, 16  ;;  %v118_v44 = vshll.u32 %v1549_v23, 16 }
   0xa   :  { %v124_v45 = vshll.u32 %v1556_v32, 16  ;;  %v129_v46 = vshrl.u32 %v1563_v36, 16  ;;  %v132_v49 = vshll.u32 %v1563_v36, 16  ;;  %v138_v50 = vshll.u32 %v1565_v37, 16 }
   0xb   :  { %v94_v43 = vrot.slane %v93_v34, 4  ;;  %v108_v47 = vrot.slane %v107_v39, 4  ;;  %v117_v48 = vrot.slane %v115_v42, 4  ;;  %v120_v52 = vrot.slane %v118_v44, 5 }
   0xc   :  { %v126_v53 = vrot.slane %v124_v45, 5  ;;  %v131_v54 = vrot.slane %v129_v46, 4  ;;  %v134_v56 = vrot.slane %v132_v49, 5  ;;  %v140_v57 = vrot.slane %v138_v50, 5 }
   0xd   :  { %v99_v51 = vsel %vm1570_vm4, %v94_v43, %v98_v29  ;;  %v113_v55 = vsel %vm1570_vm4, %v108_v47, %v112_v35  ;;  %v143_v58 = vshrl.u32 %v1576_v40, 16  ;;  %vm379_vm6 = vcmask 1046532  }
   0xe   :  { %v1130_v59 = vcombine.low %v99_v51, %v113_v55  ;;  %v121_v60 = vor.u32 %v120_v52, %v117_v48  ;;  %v146_v61 = vshll.u32 %v1576_v40, 16  ;;  %v152_v62 = vshll.u32 %v1578_v41, 16  ;;  %v1655_v52 = vld [vmem:[%s1898_s1 + $0x8] sm:$0xf]  ;;  %vm1669_vm7 = vmor %vm378_vm5, %vm379_vm6 }
   0xf   :  { %v135_v0 = vor.u32 %v134_v56, %v131_v54  ;;  %v145_v3 = vrot.slane %v143_v58, 4  ;;  %v391_v5 = vrot.slane %v1556_v32, 5  ;;  %v395_v8 = vrot.slane %v1565_v37, 5 }
  0x10   :  { %1290 = vmatprep.mubr.msk.bf16.mxu1 %vm212_vm3, %v1130_v59  ;;  %v122_v16 = vrot.slane %v121_v60, 4  ;;  %v148_v18 = vrot.slane %v146_v61, 5  ;;  %v154_v19 = vrot.slane %v152_v62, 5  ;;  %v399_v20 = vrot.slane %v1578_v41, 5 }
  0x11   :  { %v136_v21 = vrot.slane %v135_v0, 4  ;;  %v311_v24 = vsel %vm225_vm0, %v1515_v11, 0  ;;  %v747_v25 = vsel %vm225_vm0, %v1184_v33, 0  ;;  %v1615_v26 = vpack.c.bf16 %v1596_v63, %v1596_v63  ;;  %v1627_v11 = vld [vmem:[%s1899_s0 + $0x70] sm:$0xff]  ;;  %v27_v33 = vld [vmem:[%s1899_s0 + $0x78] sm:$0x3] }
  0x12   :  { %v127_v29 = vsel %vm1570_vm4, %v122_v16, %v126_v53  ;;  %v149_v30 = vor.u32 %v148_v18, %v145_v3  ;;  %v1622_v31 = vpack.c.bf16 %v23_v14, %v23_v14  ;;  %v1634_v34 = vpack.c.bf16 %v1606_v15, %v1606_v15  ;;  %v1193_v16 = vld [vmem:[%s1898_s1 + $0x18] sm:$0xf] }
  0x13   :  { %v141_v35 = vsel %vm1570_vm4, %v136_v21, %v140_v57  ;;  %v1175_v39 = vcombine.low %v113_v55, %v127_v29  ;;  %v157_v42 = vshrl.u32 %v1615_v26, 16  ;;  %v160_v43 = vshll.u32 %v1615_v26, 16 }
  0x14   :  { %v150_v44 = vrot.slane %v149_v30, 4  ;;  %v1640_v45 = vcombine.low %v127_v29, %v141_v35  ;;  %v166_v46 = vshll.u32 %v1622_v31, 16  ;;  %v1643_v47 = vpack.c.bf16 %v25_v28, %v25_v28 }
  0x15   :  { %1330 = vmatprep.mubr.msk.bf16.mxu0 %vm212_vm3, %v1175_v39  ;;  %v159_v48 = vrot.slane %v157_v42, 4  ;;  %v162_v49 = vrot.slane %v160_v43, 5  ;;  %v1648_v50 = vpack.c.bf16 %v1627_v11, %v1627_v11  ;;  %v1650_v51 = vpack.c.bf16 %v27_v33, %v27_v33 }
  0x16   :  { %v155_v53 = vsel %vm1570_vm4, %v150_v44, %v154_v19  ;;  %1291 = vmatmul.mubr.msk.bf16.vlgmr.msra.gmra.mrb[0].mxu1 %vm212_vm3, %v1640_v45  ;;  %v168_v54 = vrot.slane %v166_v46, 5  ;;  %v171_v55 = vshrl.u32 %v1634_v34, 16  ;;  %v174_v56 = vshll.u32 %v1634_v34, 16  ;;  %v1724_v44 = vld [vmem:[%s1899_s0 + $0x80] sm:$0xff] }
  0x17   :  { %v1176_v57 = vcombine.low %v141_v35, %v155_v53  ;;  %1299 = vmatpush3.bf16.msra.mxu1 %v311_v24  ;;  %v163_v58 = vor.u32 %v162_v49, %v159_v48  ;;  %v180_v59 = vshll.u32 %v1643_v47, 16  ;;  %v185_v60 = vshrl.u32 %v1648_v50, 16 }
  0x18   :  { %v173_v61 = vrot.slane %v171_v55, 4  ;;  %v176_v62 = vrot.slane %v174_v56, 5  ;;  %v188_v0 = vshll.u32 %v1648_v50, 16  ;;  %v194_v3 = vshll.u32 %v1650_v51, 16  ;;  %1446 = vmatprep.subr.msk.bf16.mxu1 %vm225_vm0, %v1655_v52 }
  0x19   :  { %1331 = vmatmul.mubr.msk.bf16.vlgmr.msra.gmra.mrb[0].mxu0 %vm212_vm3, %v1176_v57  ;;  %v164_v18 = vrot.slane %v163_v58, 4  ;;  %v182_v19 = vrot.slane %v180_v59, 5  ;;  %v187_v21 = vrot.slane %v185_v60, 4  ;;  %v1147_v24 = vrot.slane %v1510_v10, 9 }
  0x1a   :  { %1339 = vmatpush3.bf16.msra.mxu0 %v747_v25  ;;  %v177_v28 = vor.u32 %v176_v62, %v173_v61  ;;  %v190_v29 = vrot.slane %v188_v0, 5  ;;  %v196_v30 = vrot.slane %v194_v3, 5  ;;  %v1148_v33 = vrot.slane %v1549_v23, 9 }
  0x1b   :  { %v1683_v35 = vsel %vm1570_vm4, %v164_v18, %v168_v54  ;;  %v1689_v39 = vsel %vm1669_vm7, %v1147_v24, %v387_v27  ;;  %v1149_v42 = vrot.slane %v1563_v36, 9  ;;  %v1150_v10 = vrot.slane %v1576_v40, 9  ;;  %1451 = vmatprep.subr.msk.bf16.mxu0 %vm225_vm0, %v1193_v16 }
  0x1c   :  { %v1695_v25 = vcombine.low %v155_v53, %v1683_v35  ;;  %v178_v23 = vrot.slane %v177_v28, 4  ;;  %v191_v43 = vor.u32 %v190_v29, %v187_v21  ;;  %v1701_v13 = vsel %vm1669_vm7, %v1148_v33, %v391_v5  ;;  %v30_v21 = vld [vmem:[%s1899_s0 + $0x90] sm:$0xff]  ;;  %v1208_v29 = vld [vmem:[%s1898_s1 + $0x20] sm:$0xf] }
  0x1d   :  { %v1185_v27 = vcombine.low %v1689_v39, %v1701_v13  ;;  %v396_v32 = vsel %vm1669_vm7, %v1149_v42, %v395_v8  ;;  %v1719_v5 = vsel %vm1669_vm7, %v1150_v10, %v399_v20  ;;  %v1151_v46 = vrot.slane %v1615_v26, 9  ;;  %v29_v8 = vld [vmem:[%s1899_s0 + $0x88] sm:$0x3] }
  0x1e   :  { %1294 = vmatprep.mubr.msk.bf16.mxu1 %vm212_vm3, %v1695_v25  ;;  %v1709_v36 = vsel %vm1570_vm4, %v178_v23, %v182_v19  ;;  %v192_v40 = vrot.slane %v191_v43, 4  ;;  %v403_v37 = vrot.slane %v1622_v31, 5  ;;  %v1230_v20 = vpack.c.bf16 %v1496_v6, %v1480_v2  ;;  %v1163_v19 = vld [vmem:[%s1898_s1 + $0xc] sm:$0xf]  ;;  %v31_v23 = vld [vmem:[%s1899_s0 + $0x98] sm:$0x3] }
  0x1f   :  { %1340 = vmatprep.mubr.msk.bf16.mxu0 %vm212_vm3, %v1185_v27  ;;  %v1152_v48 = vrot.slane %v1634_v34, 9  ;;  %v407_v49 = vrot.slane %v1643_v47, 5  ;;  %v1186_v31 = vcombine.low %v396_v32, %v1719_v5  ;;  %v1238_v54 = vpack.c.bf16 %v1724_v44, %v1724_v44 }
  0x20   :  { %v1734_v41 = vsel %vm1570_vm4, %v192_v40, %v196_v30  ;;  %v404_v53 = vsel %vm1669_vm7, %v1151_v46, %v403_v37  ;;  %v1153_v2 = vrot.slane %v1648_v50, 9  ;;  %v411_v34 = vrot.slane %v1650_v51, 5  ;;  %v1201_v50 = vld [vmem:[%s1898_s1 + $0x1c] sm:$0xf] }
  0x21   :  { %v1742_v26 = vcombine.low %v1709_v36, %v1734_v41  ;;  %v1751_v55 = vsel %vm1669_vm7, %v1152_v48, %v407_v49  ;;  %v1755_v47 = vpack.c.bf16 %v29_v8, %v29_v8  ;;  %v831_v56 = vsel %vm225_vm0, %v1193_v16, 0 }
  0x22   :  { %v1187_v57 = vcombine.low %v404_v53, %v1751_v55  ;;  %v1183_v58 = vrot.slane %v1238_v54, 9  ;;  %v412_v51 = vsel %vm1669_vm7, %v1153_v2, %v411_v34  ;;  %v1231_v61 = vpack.c.bf16 %v1534_v17, %v1520_v12 }
  0x23   :  { %1295 = vmatmul.mubr.msk.bf16.gmra.mrb[4].mxu1 %vm212_vm3, %v1742_v26  ;;  %v725_v59 = vrot.slane %v1755_v47, 5  ;;  %v1232_v62 = vpack.c.bf16 %v1596_v63, %v1545_v22  ;;  %v383_v0 = vrot.slane %v1506_v9, 5  ;;  %v440_v3 = vsel %vm225_vm0, %v1655_v52, 0 }
  0x24   :  { %1300 = vmatprep.mubr.msk.bf16.mxu1 %vm212_vm3, %v1230_v20  ;;  %v1146_v18 = vrot.slane %v1500_v7, 9  ;;  %v1233_v7 = vpack.c.bf16 %v1627_v11, %v1606_v15  ;;  %v1800_v24 = vpack.c.bf16 %v30_v21, %v30_v21  ;;  %v931_v28 = vsel %vm225_vm0, %v1201_v50, 0 }
  0x25   :  { %1341 = vmatmul.mubr.msk.bf16.vlgmr.msra.gmra.mrb[0].mxu0 %vm212_vm3, %v1186_v31  ;;  %v1772_v60 = vsel %vm1669_vm7, %v1183_v58, %v725_v59  ;;  %v615_v30 = vshrl.u32 %v1238_v54, 16  ;;  %v618_v42 = vshll.u32 %v1238_v54, 16  ;;  %v1156_v10 = vcombine.low %v1701_v13, %v396_v32 }
  0x26   :  { %1349 = vmatpush3.bf16.msra.mxu0 %v831_v56  ;;  %1344 = vmatprep.mubr.msk.bf16.mxu0 %vm212_vm3, %v1187_v57  ;;  %v1188_v16 = vcombine.low %v412_v51, %v1772_v60  ;;  %v384_v9 = vsel %vm1669_vm7, %v1146_v18, %v383_v0  ;;  %v910_v33 = vshrl.u32 %v1800_v24, 16  ;;  %v1157_v43 = vcombine.low %v1719_v5, %v404_v53 }
  0x27   :  { %1452 = vmatprep.subr.msk.bf16.mxu0 %vm225_vm0, %v1201_v50  ;;  %v1155_v52 = vcombine.low %v384_v9, %v1689_v39  ;;  %v913_v39 = vshll.u32 %v1800_v24, 16  ;;  %v536_v27 = vsel %vm225_vm0, %v1163_v19, 0  ;;  %v1240_v40 = vpack.c.bf16 %v30_v21, %v1724_v44 }
  0x28   :  { %v617_v46 = vrot.slane %v615_v30, 4  ;;  %v912_v37 = vrot.slane %v910_v33, 4  ;;  %v620_v20 = vrot.slane %v618_v42, 5  ;;  %v1242_v48 = vpack.c.bf16 %v31_v23, %v31_v23 }
  0x29   :  { %v915_v8 = vrot.slane %v913_v39, 5  ;;  %v624_v32 = vshll.u32 %v1755_v47, 16  ;;  %v1158_v31 = vcombine.low %v1751_v55, %v412_v51  ;;  %v1234_v53 = vpack.c.bf16 %v1520_v12, %v1496_v6 }
  0x2a   :  { %v621_v13 = vor.u32 %v620_v20, %v617_v46  ;;  %v919_v49 = vshll.u32 %v1242_v48, 16  ;;  %v1236_v55 = vpack.c.bf16 %v1606_v15, %v1596_v63  ;;  %v1237_v38 = vpack.c.bf16 %v1724_v44, %v1627_v11 }
  0x2b   :  { %1301 = vmatmul.mubr.msk.bf16.vlgmr.msra.gmra.mrb[0].mxu1 %vm212_vm3, %v1231_v61  ;;  %v916_v5 = vor.u32 %v915_v8, %v912_v37  ;;  %v626_v2 = vrot.slane %v624_v32, 5  ;;  %v1008_v63 = vrot.slane %v1242_v48, 5 }
  0x2c   :  { %1309 = vmatpush3.bf16.msra.mxu1 %v440_v3  ;;  %1304 = vmatprep.mubr.msk.bf16.mxu1 %vm212_vm3, %v1232_v62  ;;  %v622_v54 = vrot.slane %v621_v13, 4  ;;  %v921_v56 = vrot.slane %v919_v49, 5 }
  0x2d   :  { %1345 = vmatmul.mubr.msk.bf16.gmra.mrb[4].mxu0 %vm212_vm3, %v1188_v16  ;;  %1447 = vmatprep.subr.msk.bf16.mxu1 %vm225_vm0, %v1163_v19  ;;  %v917_v34 = vrot.slane %v916_v5, 4 }
  0x2e   :  { %1350 = vmatprep.mubr.msk.bf16.mxu0 %vm212_vm3, %v1231_v61  ;;  %v627_v6 = vsel %vm1570_vm4, %v622_v54, %v626_v2 }
  0x2f   :  { %v922_v12 = vsel %vm1570_vm4, %v917_v34, %v921_v56  ;;  %v1178_v11 = vcombine.low %v1734_v41, %v627_v6 }
  0x30   :  { %v1202_v47 = vcombine.low %v627_v6, %v922_v12 }
  0x33   :  { %1305 = vmatmul.mubr.msk.bf16.gmra.mrb[4].mxu1 %vm212_vm3, %v1233_v7 }
  0x34   :  { %1310 = vmatprep.mubr.msk.bf16.mxu1 %vm212_vm3, %v1155_v52 }
  0x35   :  { %1351 = vmatmul.mubr.msk.bf16.vlgmr.msra.gmra.mrb[0].mxu0 %vm212_vm3, %v1232_v62 }
  0x36   :  { %1359 = vmatpush3.bf16.msra.mxu0 %v931_v28  ;;  %1354 = vmatprep.mubr.msk.bf16.mxu0 %vm212_vm3, %v1233_v7 }
  0x37   :  { %1453 = vmatprep.subr.msk.bf16.mxu0 %vm225_vm0, %v1208_v29 }
  0x3b   :  { %1311 = vmatmul.mubr.msk.bf16.vlgmr.msra.gmra.mrb[0].mxu1 %vm212_vm3, %v1156_v10 }
  0x3c   :  { %1319 = vmatpush3.bf16.msra.mxu1 %v536_v27  ;;  %1314 = vmatprep.mubr.msk.bf16.mxu1 %vm212_vm3, %v1157_v43 }
  0x3d   :  { %1355 = vmatmul.mubr.msk.bf16.gmra.mrb[4].mxu0 %vm212_vm3, %v1240_v40  ;;  %1449 = vmatprep.subr.msk.bf16.mxu1 %vm225_vm0, %v1475_v1  ;;  %v1018_v1 = vsel %vm225_vm0, %v1208_v29, 0 }
  0x3e   :  { %1360 = vmatprep.mubr.msk.bf16.mxu0 %vm212_vm3, %v1640_v45  ;;  %v1235_v45 = vpack.c.bf16 %v1545_v22, %v1534_v17  ;;  %v1177_v17 = vcombine.low %v1683_v35, %v1709_v36  ;;  %v1207_v22 = vrot.slane %v1800_v24, 9 }
  0x43   :  { %1315 = vmatmul.mubr.msk.bf16.gmra.mrb[4].mxu1 %vm212_vm3, %v1158_v31 }
  0x44   :  { %1320 = vmatprep.mubr.msk.bf16.mxu1 %vm212_vm3, %v1234_v53 }
  0x45   :  { %1361 = vmatmul.mubr.msk.bf16.vlgmr.msra.gmra.mrb[0].mxu0 %vm212_vm3, %v1695_v25 }
  0x46   :  { %1369 = vmatpush3.bf16.msra.mxu0 %v1018_v1  ;;  %1364 = vmatprep.mubr.msk.bf16.mxu0 %vm212_vm3, %v1742_v26 }
  0x4b   :  { %1321 = vmatmul.mubr.msk.bf16.vlgmr.msra.gmra.mrb[0].mxu1 %vm212_vm3, %v1235_v45 }
  0x4c   :  { %1379 = vmatpush3.bf16.msra.mxu1 %v1488_v4  ;;  %1324 = vmatprep.mubr.msk.bf16.mxu1 %vm212_vm3, %v1236_v55  ;;  %v1009_v4 = vsel %vm1669_vm7, %v1207_v22, %v1008_v63 }
  0x4d   :  { %1365 = vmatmul.mubr.msk.bf16.gmra.mrb[4].mxu0 %vm212_vm3, %v1202_v47  ;;  %v1209_v15 = vcombine.low %v1772_v60, %v1009_v4 }
  0x4e   :  { %1370 = vmatprep.mubr.msk.bf16.mxu0 %vm212_vm3, %v1156_v10 }
  0x53   :  { %1325 = vmatmul.mubr.msk.bf16.gmra.mrb[4].mxu1 %vm212_vm3, %v1237_v38 }
  0x54   :  { %1334 = vmatprep.mubr.msk.bf16.mxu1 %vm212_vm3, %v1177_v17 }
  0x55   :  { %1371 = vmatmul.mubr.msk.bf16.vlgmr.msra.gmra.mrb[0].mxu0 %vm212_vm3, %v1157_v43 }
  0x56   :  { %1374 = vmatprep.mubr.msk.bf16.mxu0 %vm212_vm3, %v1158_v31 }
  0x5d   :  { %1375 = vmatmul.mubr.msk.bf16.gmra.mrb[4].mxu0 %vm212_vm3, %v1209_v15 }
  0x5f   :  { %1335 = vmatmul.mubr.msk.bf16.vlgmr.msra.gmra.mrb[4].mxu1 %vm212_vm3, %v1178_v11 }
 0x11e   :  { %v1322_v35 = vpop.f32.mrb[0].mxu1 }
 0x11f   :  { %v572_v25 = vpop.f32.mrb[1].mxu1 }
 0x120   :  { %v1323_v36 = vpop.f32.mrb[2].mxu1 }
 0x121   :  { %v575_v44 = vpop.f32.mrb[3].mxu1 }
 0x128   :  { %v1372_v26 = vpop.f32.mrb[0].mxu0 }
 0x129   :  { %v1380_v57 = vadd.f32 %v1372_v26, %v1322_v35  ;;  %v1054_v58 = vpop.f32.mrb[1].mxu0 }
 0x12a   :  { %v1381_v59 = vadd.f32 %v1054_v58, %v572_v25  ;;  %v1373_v50 = vpop.f32.mrb[2].mxu0 }
 0x12b   :  { %v1095_v51 = vmax.f32 %v1380_v57, 0.0  ;;  %v1382_v14 = vadd.f32 %v1373_v50, %v1323_v36  ;;  %v1057_v61 = vpop.f32.mrb[3].mxu0 }
 0x12c   :  { %v1093_v62 = vmax.f32 %v1381_v59, 0.0  ;;  %v1383_v60 = vadd.f32 %v1057_v61, %v575_v44 }
 0x12d   :  { %1103 = vst.msk [vmem:[%s1900_s2 + $0x10] sm:$0xff] %vm212_vm3, %v1095_v51  ;;  %v1096_v41 = vmax.f32 %v1382_v14, 0.0 }
 0x12e   :  { %1101 = vst.msk [vmem:[%s1900_s2] sm:$0xff] %vm212_vm3, %v1093_v62  ;;  %v1094_v0 = vmax.f32 %v1383_v60, 0.0 }
 0x12f   :  { %1104 = vst.msk [vmem:[%s1900_s2 + $0x18] sm:$0xff] %vm212_vm3, %v1096_v41 }
 0x130   :  { %1102 = vst.msk [vmem:[%s1900_s2 + $0x8] sm:$0xff] %vm212_vm3, %v1094_v0  ;;  %v1376_v3 = vpop.f32.mrb[4].mxu0 }
 0x131   :  { %v1070_v16 = vpop.f32.mrb[5].mxu0 }
 0x132   :  { %v1336_v18 = vpop.f32.mrb[4].mxu1  ;;  %v1377_v19 = vpop.f32.mrb[6].mxu0 }
 0x133   :  { %v1384_v9 = vadd.f32 %v1376_v3, %v1336_v18  ;;  %v700_v7 = vpop.f32.mrb[5].mxu1  ;;  %v1073_v52 = vpop.f32.mrb[7].mxu0 }
 0x134   :  { %v1385_v21 = vadd.f32 %v1070_v16, %v700_v7  ;;  %v1337_v24 = vpop.f32.mrb[6].mxu1 }
 0x135   :  { %v1099_v28 = vmax.f32 %v1384_v9, 0.0  ;;  %v1386_v29 = vadd.f32 %v1377_v19, %v1337_v24  ;;  %v703_v30 = vpop.f32.mrb[7].mxu1 }
 0x136   :  { %v1097_v33 = vmax.f32 %v1385_v21, 0.0  ;;  %v1387_v39 = vadd.f32 %v1073_v52, %v703_v30 }
 0x137   :  { %1107 = vst.msk [vmem:[%s1900_s2 + $0x30] sm:$0xff] %vm212_vm3, %v1099_v28  ;;  %v1100_v42 = vmax.f32 %v1386_v29, 0.0 }
 0x138   :  { %1105 = vst.msk [vmem:[%s1900_s2 + $0x20] sm:$0xff] %vm212_vm3, %v1097_v33  ;;  %v1098_v10 = vmax.f32 %v1387_v39, 0.0 }
 0x139   :  { %1108 = vst.msk [vmem:[%s1900_s2 + $0x38] sm:$0xff] %vm212_vm3, %v1100_v42 }
 0x13a   :  { %1106 = vst.msk [vmem:[%s1900_s2 + $0x28] sm:$0xff] %vm212_vm3, %v1098_v10 }

// kernel: msa_transformer_forward.63
= control target key start
LH: loop header
LB: loop body
LE: loop exit
PB: predicated region body
PF: predicated region fallthrough
CT: control target
= control target key end

     0   :  { %vm42_vm0 = vcmask 130048   ;;  %vm120_vm1 = vcmask 261120   ;;  %s243_s1 = inlined_call_operand.vmem [shape: bf16[16,32], index: 1, kind: input, shape index: {}]   ;;  %s244_s0 = inlined_call_operand.vmem [shape: f32[64,16], index: 0, kind: input, shape index: {}]   ;;  %s245_s2 = inlined_call_operand.vmem [shape: f32[1,32], index: 2, kind: input, shape index: {}]   ;;  %s246_s3 = inlined_call_operand.vmem [shape: f32[64,32], index: 3, kind: output, shape index: {}]  }
   0x1   :  { %v156_v0 = vld [vmem:[%s243_s1] sm:$0xff]   ;;  %v16_v2 = vld [vmem:[%s244_s0 + $0x8] sm:$0xff]  ;;  %v17_v6 = vld [vmem:[%s244_s0 + $0x10] sm:$0xff] }
   0x2   :  { %v15_v1 = vld [vmem:[%s244_s0] sm:$0xff]  ;;  %144 = vmatprep.subr.bf16.mxu0 %v156_v0  ;;  %154 = vmatprep.subr.bf16.mxu1 %v156_v0  ;;  %v20_v5 = vld [vmem:[%s244_s0 + $0x28] sm:$0xff]  ;;  %v18_v7 = vld [vmem:[%s244_s0 + $0x18] sm:$0xff] }
   0x3   :  { %v19_v3 = vld [vmem:[%s244_s0 + $0x20] sm:$0xff]  ;;  %v23_v4 = vpack.c.bf16 %v16_v2, %v15_v1  ;;  %145 = vmatpush3.bf16.msra.mxu0 %v156_v0  ;;  %155 = vmatpush3.bf16.msra.mxu1 %v156_v0  ;;  %v24_v9 = vpack.c.bf16 %v18_v7, %v17_v6  ;;  %v21_v10 = vld [vmem:[%s244_s0 + $0x30] sm:$0xff]  ;;  %v22_v11 = vld [vmem:[%s244_s0 + $0x38] sm:$0xff] }
   0x4   :  { %v25_v8 = vpack.c.bf16 %v20_v5, %v19_v3  ;;  %v26_v12 = vpack.c.bf16 %v22_v11, %v21_v10  ;;  %v133_v13 = vld [vmem:[%s245_s2] ss:$0 sm:$0xff] }
   0x5   :  { %146 = vmatprep.mubr.msk.bf16.mxu0 %vm42_vm0, %v23_v4 }
   0x6   :  { %150 = vmatprep.mubr.msk.bf16.mxu1 %vm42_vm0, %v25_v8  ;;  %147 = vmatmul.mubr.msk.bf16.vlgmr.msra.gmra.mrb[0].mxu0 %vm42_vm0, %v24_v9 }
   0x7   :  { %151 = vmatmul.mubr.msk.bf16.vlgmr.msra.gmra.mrb[0].mxu1 %vm42_vm0, %v26_v12 }
  0xd9   :  { %v148_v14 = vpop.f32.mrb[0].mxu0 }
  0xda   :  { %v152_v15 = vpop.f32.mrb[0].mxu1  ;;  %v98_v16 = vadd.f32 %v148_v14, %v133_v13  ;;  %v89_v18 = vpop.f32.mrb[1].mxu0 }
  0xdb   :  { %v114_v17 = vadd.f32 %v152_v15, %v133_v13  ;;  %v105_v19 = vpop.f32.mrb[1].mxu1  ;;  %v90_v20 = vadd.f32 %v133_v13, %v89_v18  ;;  %v149_v22 = vpop.f32.mrb[2].mxu0 }
  0xdc   :  { %v106_v21 = vadd.f32 %v133_v13, %v105_v19  ;;  %v153_v23 = vpop.f32.mrb[2].mxu1  ;;  %123 = vst.msk [vmem:[%s246_s3 + $0x10] sm:$0xff] %vm120_vm1, %v98_v16  ;;  %v101_v24 = vadd.f32 %v149_v22, %v133_v13  ;;  %v92_v26 = vpop.f32.mrb[3].mxu0 }
  0xdd   :  { %127 = vst.msk [vmem:[%s246_s3 + $0x30] sm:$0xff] %vm120_vm1, %v114_v17  ;;  %v117_v25 = vadd.f32 %v153_v23, %v133_v13  ;;  %v108_v27 = vpop.f32.mrb[3].mxu1  ;;  %121 = vst.msk [vmem:[%s246_s3] sm:$0xff] %vm120_vm1, %v90_v20  ;;  %v93_v28 = vadd.f32 %v133_v13, %v92_v26 }
  0xde   :  { %125 = vst.msk [vmem:[%s246_s3 + $0x20] sm:$0xff] %vm120_vm1, %v106_v21  ;;  %v109_v29 = vadd.f32 %v133_v13, %v108_v27  ;;  %124 = vst.msk [vmem:[%s246_s3 + $0x18] sm:$0xff] %vm120_vm1, %v101_v24 }
  0xdf   :  { %128 = vst.msk [vmem:[%s246_s3 + $0x38] sm:$0xff] %vm120_vm1, %v117_v25  ;;  %122 = vst.msk [vmem:[%s246_s3 + $0x8] sm:$0xff] %vm120_vm1, %v93_v28 }
  0xe0   :  { %126 = vst.msk [vmem:[%s246_s3 + $0x28] sm:$0xff] %vm120_vm1, %v109_v29 }

// kernel: msa_transformer_forward.65
= control target key start
LH: loop header
LB: loop body
LE: loop exit
PB: predicated region body
PF: predicated region fallthrough
CT: control target
= control target key end

     0   :  { %vm50_vm0 = vcmask 261120   ;;  %s268_s1 = inlined_call_operand.vmem [shape: bf16[32,32], index: 1, kind: input, shape index: {}]   ;;  %s269_s0 = inlined_call_operand.vmem [shape: f32[64,32], index: 0, kind: input, shape index: {}]   ;;  %s270_s2 = inlined_call_operand.vmem [shape: f32[1,32], index: 2, kind: input, shape index: {}]   ;;  %s271_s3 = inlined_call_operand.vmem [shape: f32[64,32], index: 3, kind: output, shape index: {}]  }
   0x1   :  { %v177_v0 = vld [vmem:[%s268_s1] sm:$0xff]   ;;  %v178_v1 = vld [vmem:[%s268_s1 + $0x8] sm:$0xff]   ;;  %v17_v7 = vld [vmem:[%s269_s0 + $0x10] sm:$0xff] }
   0x2   :  { %161 = vmatprep.subr.bf16.mxu0 %v177_v0  ;;  %173 = vmatprep.subr.bf16.mxu1 %v177_v0  ;;  %v15_v2 = vld [vmem:[%s269_s0] sm:$0xff]  ;;  %v16_v3 = vld [vmem:[%s269_s0 + $0x8] sm:$0xff]  ;;  %v18_v8 = vld [vmem:[%s269_s0 + $0x18] sm:$0xff] }
   0x3   :  { %v19_v4 = vld [vmem:[%s269_s0 + $0x20] sm:$0xff]  ;;  %162 = vmatpush3.bf16.msra.mxu0 %v177_v0  ;;  %175 = vmatpush3.bf16.msra.mxu1 %v177_v0  ;;  %v23_v5 = vpack.c.bf16 %v16_v3, %v15_v2  ;;  %v20_v6 = vld [vmem:[%s269_s0 + $0x28] sm:$0xff]  ;;  %v21_v10 = vld [vmem:[%s269_s0 + $0x30] sm:$0xff]  ;;  %v24_v12 = vpack.c.bf16 %v18_v8, %v17_v7 }
   0x4   :  { %163 = vmatprep.subr.bf16.mxu0 %v178_v1  ;;  %174 = vmatprep.subr.bf16.mxu1 %v178_v1  ;;  %v25_v9 = vpack.c.bf16 %v20_v6, %v19_v4  ;;  %v22_v11 = vld [vmem:[%s269_s0 + $0x38] sm:$0xff]  ;;  %v148_v14 = vld [vmem:[%s270_s2] ss:$0 sm:$0xff] }
   0x5   :  { %165 = vmatprep.mubr.msk.bf16.mxu0 %vm50_vm0, %v23_v5  ;;  %v26_v13 = vpack.c.bf16 %v22_v11, %v21_v10 }
   0x6   :  { %169 = vmatprep.mubr.msk.bf16.mxu1 %vm50_vm0, %v25_v9 }
   0x7   :  { %164 = vmatpush3.bf16.msra.mxu0 %v178_v1  ;;  %176 = vmatpush3.bf16.msra.mxu1 %v178_v1 }
   0xa   :  { %166 = vmatmul.mubr.msk.bf16.vlgmr.msra.gmra.mrb[0].mxu0 %vm50_vm0, %v24_v12  ;;  %170 = vmatmul.mubr.msk.bf16.vlgmr.msra.gmra.mrb[0].mxu1 %vm50_vm0, %v26_v13 }
  0xdd   :  { %v167_v15 = vpop.f32.mrb[0].mxu0  ;;  %v171_v16 = vpop.f32.mrb[0].mxu1 }
  0xde   :  { %v106_v17 = vadd.f32 %v167_v15, %v148_v14  ;;  %v122_v18 = vadd.f32 %v171_v16, %v148_v14  ;;  %v97_v19 = vpop.f32.mrb[1].mxu0  ;;  %v113_v20 = vpop.f32.mrb[1].mxu1 }
  0xdf   :  { %v98_v21 = vadd.f32 %v148_v14, %v97_v19  ;;  %v114_v22 = vadd.f32 %v148_v14, %v113_v20  ;;  %v168_v23 = vpop.f32.mrb[2].mxu0  ;;  %v172_v24 = vpop.f32.mrb[2].mxu1 }
  0xe0   :  { %v130_v25 = vmax.f32 %v106_v17, 0.0  ;;  %v134_v26 = vmax.f32 %v122_v18, 0.0  ;;  %v109_v27 = vadd.f32 %v168_v23, %v148_v14  ;;  %v125_v28 = vadd.f32 %v172_v24, %v148_v14  ;;  %v100_v29 = vpop.f32.mrb[3].mxu0  ;;  %v116_v30 = vpop.f32.mrb[3].mxu1 }
  0xe1   :  { %v128_v31 = vmax.f32 %v98_v21, 0.0  ;;  %v132_v32 = vmax.f32 %v114_v22, 0.0  ;;  %v101_v33 = vadd.f32 %v148_v14, %v100_v29  ;;  %v117_v34 = vadd.f32 %v148_v14, %v116_v30 }
  0xe2   :  { %138 = vst.msk [vmem:[%s271_s3 + $0x10] sm:$0xff] %vm50_vm0, %v130_v25  ;;  %142 = vst.msk [vmem:[%s271_s3 + $0x30] sm:$0xff] %vm50_vm0, %v134_v26  ;;  %v131_v35 = vmax.f32 %v109_v27, 0.0  ;;  %v135_v36 = vmax.f32 %v125_v28, 0.0 }
  0xe3   :  { %136 = vst.msk [vmem:[%s271_s3] sm:$0xff] %vm50_vm0, %v128_v31  ;;  %140 = vst.msk [vmem:[%s271_s3 + $0x20] sm:$0xff] %vm50_vm0, %v132_v32  ;;  %v129_v37 = vmax.f32 %v101_v33, 0.0  ;;  %v133_v38 = vmax.f32 %v117_v34, 0.0 }
  0xe4   :  { %139 = vst.msk [vmem:[%s271_s3 + $0x18] sm:$0xff] %vm50_vm0, %v131_v35  ;;  %143 = vst.msk [vmem:[%s271_s3 + $0x38] sm:$0xff] %vm50_vm0, %v135_v36 }
  0xe5   :  { %137 = vst.msk [vmem:[%s271_s3 + $0x8] sm:$0xff] %vm50_vm0, %v129_v37  ;;  %141 = vst.msk [vmem:[%s271_s3 + $0x28] sm:$0xff] %vm50_vm0, %v133_v38 }

// kernel: msa_transformer_forward.71
= control target key start
LH: loop header
LB: loop body
LE: loop exit
PB: predicated region body
PF: predicated region fallthrough
CT: control target
= control target key end

     0   :  { %vm50_vm0 = vcmask 261120   ;;  %vm128_vm1 = vcmask 31744   ;;  %s261_s1 = inlined_call_operand.vmem [shape: bf16[32,4], index: 1, kind: input, shape index: {}]   ;;  %s262_s0 = inlined_call_operand.vmem [shape: f32[64,32], index: 0, kind: input, shape index: {}]   ;;  %s263_s2 = inlined_call_operand.vmem [shape: f32[1,4], index: 2, kind: input, shape index: {}]   ;;  %s264_s3 = inlined_call_operand.vmem [shape: f32[64,4], index: 3, kind: output, shape index: {}]  }
   0x1   :  { %v170_v0 = vld [vmem:[%s261_s1] sm:$0xff]   ;;  %v171_v1 = vld [vmem:[%s261_s1 + $0x8] sm:$0xff]   ;;  %v17_v7 = vld [vmem:[%s262_s0 + $0x10] sm:$0xff] }
   0x2   :  { %154 = vmatprep.subr.bf16.mxu0 %v170_v0  ;;  %166 = vmatprep.subr.bf16.mxu1 %v170_v0  ;;  %v15_v2 = vld [vmem:[%s262_s0] sm:$0xff]  ;;  %v16_v3 = vld [vmem:[%s262_s0 + $0x8] sm:$0xff]  ;;  %v18_v8 = vld [vmem:[%s262_s0 + $0x18] sm:$0xff] }
   0x3   :  { %v19_v4 = vld [vmem:[%s262_s0 + $0x20] sm:$0xff]  ;;  %155 = vmatpush3.bf16.msra.mxu0 %v170_v0  ;;  %168 = vmatpush3.bf16.msra.mxu1 %v170_v0  ;;  %v23_v5 = vpack.c.bf16 %v16_v3, %v15_v2  ;;  %v20_v6 = vld [vmem:[%s262_s0 + $0x28] sm:$0xff]  ;;  %v21_v10 = vld [vmem:[%s262_s0 + $0x30] sm:$0xff]  ;;  %v24_v12 = vpack.c.bf16 %v18_v8, %v17_v7 }
   0x4   :  { %156 = vmatprep.subr.bf16.mxu0 %v171_v1  ;;  %167 = vmatprep.subr.bf16.mxu1 %v171_v1  ;;  %v25_v9 = vpack.c.bf16 %v20_v6, %v19_v4  ;;  %v22_v11 = vld [vmem:[%s262_s0 + $0x38] sm:$0xff]  ;;  %v141_v14 = vld [vmem:[%s263_s2] ss:$0 sm:$0xff] }
   0x5   :  { %158 = vmatprep.mubr.msk.bf16.mxu0 %vm50_vm0, %v23_v5  ;;  %v26_v13 = vpack.c.bf16 %v22_v11, %v21_v10 }
   0x6   :  { %162 = vmatprep.mubr.msk.bf16.mxu1 %vm50_vm0, %v25_v9 }
   0x7   :  { %157 = vmatpush3.bf16.msra.mxu0 %v171_v1  ;;  %169 = vmatpush3.bf16.msra.mxu1 %v171_v1 }
   0xa   :  { %159 = vmatmul.mubr.msk.bf16.vlgmr.msra.gmra.mrb[0].mxu0 %vm50_vm0, %v24_v12  ;;  %163 = vmatmul.mubr.msk.bf16.vlgmr.msra.gmra.mrb[0].mxu1 %vm50_vm0, %v26_v13 }
  0xdd   :  { %v160_v15 = vpop.f32.mrb[0].mxu0  ;;  %v164_v16 = vpop.f32.mrb[0].mxu1 }
  0xde   :  { %v106_v17 = vadd.f32 %v160_v15, %v141_v14  ;;  %v122_v18 = vadd.f32 %v164_v16, %v141_v14  ;;  %v97_v19 = vpop.f32.mrb[1].mxu0  ;;  %v113_v20 = vpop.f32.mrb[1].mxu1 }
  0xdf   :  { %v98_v21 = vadd.f32 %v141_v14, %v97_v19  ;;  %v114_v22 = vadd.f32 %v141_v14, %v113_v20  ;;  %v161_v23 = vpop.f32.mrb[2].mxu0  ;;  %v165_v24 = vpop.f32.mrb[2].mxu1 }
  0xe0   :  { %131 = vst.msk [vmem:[%s264_s3 + $0x10] sm:$0xff] %vm128_vm1, %v106_v17  ;;  %135 = vst.msk [vmem:[%s264_s3 + $0x30] sm:$0xff] %vm128_vm1, %v122_v18  ;;  %v109_v25 = vadd.f32 %v161_v23, %v141_v14  ;;  %v125_v26 = vadd.f32 %v165_v24, %v141_v14  ;;  %v100_v27 = vpop.f32.mrb[3].mxu0  ;;  %v116_v28 = vpop.f32.mrb[3].mxu1 }
  0xe1   :  { %129 = vst.msk [vmem:[%s264_s3] sm:$0xff] %vm128_vm1, %v98_v21  ;;  %133 = vst.msk [vmem:[%s264_s3 + $0x20] sm:$0xff] %vm128_vm1, %v114_v22  ;;  %v101_v29 = vadd.f32 %v141_v14, %v100_v27  ;;  %v117_v30 = vadd.f32 %v141_v14, %v116_v28 }
  0xe2   :  { %132 = vst.msk [vmem:[%s264_s3 + $0x18] sm:$0xff] %vm128_vm1, %v109_v25  ;;  %136 = vst.msk [vmem:[%s264_s3 + $0x38] sm:$0xff] %vm128_vm1, %v125_v26 }
  0xe3   :  { %130 = vst.msk [vmem:[%s264_s3 + $0x8] sm:$0xff] %vm128_vm1, %v101_v29  ;;  %134 = vst.msk [vmem:[%s264_s3 + $0x28] sm:$0xff] %vm128_vm1, %v117_v30 }

// kernel: msa_transformer_forward.81
= control target key start
LH: loop header
LB: loop body
LE: loop exit
PB: predicated region body
PF: predicated region fallthrough
CT: control target
= control target key end

     0   :  { %vm61_vm0 = vcmask 130048   ;;  %vm155_vm1 = vcmask 261120   ;;  %s299_s1 = inlined_call_operand.vmem [shape: bf16[16,32], index: 1, kind: input, shape index: {}]   ;;  %s300_s0 = inlined_call_operand.vmem [shape: bf16[64,16], index: 0, kind: input, shape index: {}]   ;;  %s301_s2 = inlined_call_operand.vmem [shape: f32[1,32], index: 2, kind: input, shape index: {}]   ;;  %s302_s3 = inlined_call_operand.vmem [shape: f32[64,32], index: 3, kind: input, shape index: {}]   ;;  %s303_s4 = inlined_call_operand.vmem [shape: f32[64,32], index: 4, kind: output, shape index: {}]  }
   0x1   :  { %v195_v0 = vld [vmem:[%s299_s1] sm:$0xff]   ;;  %v197_v2 = vld [vmem:[%s300_s0 + $0x10] sm:$0xff]   ;;  %v198_v3 = vld [vmem:[%s300_s0 + $0x8] sm:$0xff]  }
   0x2   :  { %v196_v1 = vld [vmem:[%s300_s0] sm:$0xff]   ;;  %183 = vmatprep.subr.bf16.mxu0 %v195_v0  ;;  %193 = vmatprep.subr.bf16.mxu1 %v195_v0  ;;  %v199_v4 = vld [vmem:[%s300_s0 + $0x18] sm:$0xff]   ;;  %v141_v7 = vld [vmem:[%s302_s3 + $0x10] sm:$0xff] }
   0x3   :  { %184 = vmatpush3.bf16.msra.mxu0 %v195_v0  ;;  %194 = vmatpush3.bf16.msra.mxu1 %v195_v0  ;;  %v168_v5 = vld [vmem:[%s301_s2] ss:$0 sm:$0xff]  ;;  %v145_v9 = vld [vmem:[%s302_s3 + $0x30] sm:$0xff]  ;;  %v142_v19 = vld [vmem:[%s302_s3 + $0x18] sm:$0xff] }
   0x4   :  { %185 = vmatprep.mubr.msk.bf16.mxu0 %vm61_vm0, %v196_v1  ;;  %189 = vmatprep.mubr.msk.bf16.mxu1 %vm61_vm0, %v197_v2  ;;  %v139_v13 = vld [vmem:[%s302_s3] sm:$0xff]  ;;  %v146_v21 = vld [vmem:[%s302_s3 + $0x38] sm:$0xff]  ;;  %v140_v27 = vld [vmem:[%s302_s3 + $0x8] sm:$0xff] }
   0x5   :  { %v143_v15 = vld [vmem:[%s302_s3 + $0x20] sm:$0xff]  ;;  %v144_v29 = vld [vmem:[%s302_s3 + $0x28] sm:$0xff] }
   0x6   :  { %186 = vmatmul.mubr.msk.bf16.vlgmr.msra.gmra.mrb[0].mxu0 %vm61_vm0, %v198_v3  ;;  %190 = vmatmul.mubr.msk.bf16.vlgmr.msra.gmra.mrb[0].mxu1 %vm61_vm0, %v199_v4 }
  0xd9   :  { %v187_v6 = vpop.f32.mrb[0].mxu0  ;;  %v191_v8 = vpop.f32.mrb[0].mxu1 }
  0xda   :  { %v117_v10 = vadd.f32 %v187_v6, %v168_v5  ;;  %v133_v11 = vadd.f32 %v191_v8, %v168_v5  ;;  %v108_v12 = vpop.f32.mrb[1].mxu0  ;;  %v124_v14 = vpop.f32.mrb[1].mxu1 }
  0xdb   :  { %v109_v16 = vadd.f32 %v168_v5, %v108_v12  ;;  %v125_v17 = vadd.f32 %v168_v5, %v124_v14  ;;  %v188_v18 = vpop.f32.mrb[2].mxu0  ;;  %v192_v20 = vpop.f32.mrb[2].mxu1 }
  0xdc   :  { %v149_v22 = vadd.f32 %v141_v7, %v117_v10  ;;  %v153_v23 = vadd.f32 %v145_v9, %v133_v11  ;;  %v120_v24 = vadd.f32 %v188_v18, %v168_v5  ;;  %v136_v25 = vadd.f32 %v192_v20, %v168_v5  ;;  %v111_v26 = vpop.f32.mrb[3].mxu0  ;;  %v127_v28 = vpop.f32.mrb[3].mxu1 }
  0xdd   :  { %v147_v30 = vadd.f32 %v139_v13, %v109_v16  ;;  %v151_v31 = vadd.f32 %v143_v15, %v125_v17  ;;  %v112_v32 = vadd.f32 %v168_v5, %v111_v26  ;;  %v128_v33 = vadd.f32 %v168_v5, %v127_v28 }
  0xde   :  { %158 = vst.msk [vmem:[%s303_s4 + $0x10] sm:$0xff] %vm155_vm1, %v149_v22  ;;  %162 = vst.msk [vmem:[%s303_s4 + $0x30] sm:$0xff] %vm155_vm1, %v153_v23  ;;  %v150_v34 = vadd.f32 %v142_v19, %v120_v24  ;;  %v154_v35 = vadd.f32 %v146_v21, %v136_v25 }
  0xdf   :  { %156 = vst.msk [vmem:[%s303_s4] sm:$0xff] %vm155_vm1, %v147_v30  ;;  %160 = vst.msk [vmem:[%s303_s4 + $0x20] sm:$0xff] %vm155_vm1, %v151_v31  ;;  %v148_v36 = vadd.f32 %v140_v27, %v112_v32  ;;  %v152_v37 = vadd.f32 %v144_v29, %v128_v33 }
  0xe0   :  { %159 = vst.msk [vmem:[%s303_s4 + $0x18] sm:$0xff] %vm155_vm1, %v150_v34  ;;  %163 = vst.msk [vmem:[%s303_s4 + $0x38] sm:$0xff] %vm155_vm1, %v154_v35 }
  0xe1   :  { %157 = vst.msk [vmem:[%s303_s4 + $0x8] sm:$0xff] %vm155_vm1, %v148_v36  ;;  %161 = vst.msk [vmem:[%s303_s4 + $0x28] sm:$0xff] %vm155_vm1, %v152_v37 }

// kernel: msa_transformer_forward.66
= control target key start
LH: loop header
LB: loop body
LE: loop exit
PB: predicated region body
PF: predicated region fallthrough
CT: control target
= control target key end

     0   :  { %vm151_vm0 = vcmask 1043456   ;;  %vm89_vm1 = vcmask 1042432   ;;  %vm90_vm2 = vcmask 1046532   ;;  %vm138_vm4 = vcmask 64512   ;;  %s1742_s1 = inlined_call_operand.vmem [shape: bf16[9,8,8], index: 1, kind: input, shape index: {}]   ;;  %s1743_s0 = inlined_call_operand.vmem [shape: f32[1,12,12,8], index: 0, kind: input, shape index: {}]   ;;  %s1744_s2 = inlined_call_operand.vmem [shape: f32[1,8,8,8], index: 2, kind: output, shape index: {}]  }
   0x1   :  { %v1037_v0 = vld [vmem:[%s1742_s1 + $0x4] sm:$0xf]  ;;  %v1385_v1 = vld [vmem:[%s1742_s1 + $0x10] sm:$0xf]  ;;  %v13_v5 = vld [vmem:[%s1743_s0 + $0x8] sm:$0xf] }
   0x2   :  { %v1390_v2 = vld [vmem:[%s1743_s0] sm:$0xff]  ;;  %1354 = vmatprep.subr.msk.bf16.mxu1 %vm151_vm0, %v1037_v0  ;;  %1358 = vmatprep.subr.msk.bf16.mxu0 %vm151_vm0, %v1385_v1  ;;  %v153_v3 = vsel %vm151_vm0, %v1037_v0, 0  ;;  %v1398_v4 = vsel %vm151_vm0, %v1385_v1, 0  ;;  %v1406_v6 = vld [vmem:[%s1743_s0 + $0x10] sm:$0xff]  ;;  %v15_v8 = vld [vmem:[%s1743_s0 + $0x18] sm:$0xf]  ;;  %v1416_v9 = vpack.c.bf16 %v13_v5, %v13_v5 }
   0x3   :  { %v1410_v7 = vpack.c.bf16 %v1390_v2, %v1390_v2  ;;  %1199 = vmatpush3.bf16.msra.mxu1 %v153_v3  ;;  %1239 = vmatpush3.bf16.msra.mxu0 %v1398_v4  ;;  %v1420_v10 = vpack.c.bf16 %v1406_v6, %v1406_v6  ;;  %v48_v11 = vld [vmem:[%s1742_s1] sm:$0xf]  ;;  %v1430_v13 = vpack.c.bf16 %v15_v8, %v15_v8  ;;  %vm1434_vm3 = vmor %vm89_vm1, %vm90_vm2  ;;  %v17_v16 = vld [vmem:[%s1743_s0 + $0x28] sm:$0xf]  ;;  %vm304_vm5 = vcmask 1041408  }
   0x4   :  { %v1428_v12 = vld [vmem:[%s1743_s0 + $0x20] sm:$0xff]  ;;  %1355 = vmatprep.subr.msk.bf16.mxu1 %vm151_vm0, %v48_v11  ;;  %v1446_v17 = vld [vmem:[%s1743_s0 + $0x30] sm:$0xff]  ;;  %v94_v19 = vrot.slane %v1416_v9, 5  ;;  %v19_v21 = vld [vmem:[%s1743_s0 + $0x38] sm:$0xf]  ;;  %v1128_v23 = vpack.c.bf16 %v17_v16, %v17_v16  ;;  %vm305_vm6 = vcmask 1045508  }
   0x5   :  { %v1029_v15 = vrot.slane %v1410_v7, 9  ;;  %v1450_v18 = vpack.c.bf16 %v1428_v12, %v1428_v12  ;;  %v1030_v20 = vrot.slane %v1420_v10, 9  ;;  %v98_v22 = vrot.slane %v1430_v13, 5  ;;  %v1091_v25 = vld [vmem:[%s1742_s1 + $0x14] sm:$0xf]  ;;  %v1470_v29 = vld [vmem:[%s1743_s0 + $0x40] sm:$0xff]  ;;  %vm1517_vm7 = vmor %vm304_vm5, %vm305_vm6 }
   0x6   :  { %v1129_v24 = vpack.c.bf16 %v1446_v17, %v1446_v17  ;;  %v1130_v27 = vpack.c.bf16 %v19_v21, %v19_v21  ;;  %1360 = vmatprep.subr.msk.bf16.mxu0 %vm151_vm0, %v1091_v25  ;;  %v21_v30 = vld [vmem:[%s1743_s0 + $0x48] sm:$0xf]  ;;  %v102_v32 = vrot.slane %v1128_v23, 5  ;;  %v1480_v34 = vld [vmem:[%s1743_s0 + $0x50] sm:$0xff]  ;;  %v23_v35 = vld [vmem:[%s1743_s0 + $0x58] sm:$0xf]  ;;  %v1490_v41 = vpack.c.bf16 %v1470_v29, %v1470_v29 }
   0x7   :  { %v95_v26 = vsel %vm1434_vm3, %v1029_v15, %v94_v19  ;;  %v1031_v28 = vrot.slane %v1450_v18, 9  ;;  %v99_v31 = vsel %vm1434_vm3, %v1030_v20, %v98_v22  ;;  %v1056_v39 = vrot.slane %v1450_v18, 10  ;;  %v1500_v46 = vld [vmem:[%s1743_s0 + $0x60] sm:$0xff]  ;;  %v25_v47 = vld [vmem:[%s1743_s0 + $0x68] sm:$0xf]  ;;  %v1510_v52 = vld [vmem:[%s1743_s0 + $0x70] sm:$0xff] }
   0x8   :  { %v1032_v33 = vrot.slane %v1129_v24, 9  ;;  %v1038_v36 = vcombine.low %v95_v26, %v99_v31  ;;  %v106_v37 = vrot.slane %v1130_v27, 5  ;;  %v317_v40 = vrot.slane %v1128_v23, 6  ;;  %v27_v53 = vld [vmem:[%s1743_s0 + $0x78] sm:$0xf]  ;;  %v28_v31 = vld [vmem:[%s1743_s0 + $0x80] sm:$0xff] }
   0x9   :  { %v103_v38 = vsel %vm1434_vm3, %v1031_v28, %v102_v32  ;;  %v1132_v43 = vpack.c.bf16 %v21_v30, %v21_v30  ;;  %v1133_v44 = vpack.c.bf16 %v1480_v34, %v1480_v34  ;;  %v1134_v45 = vpack.c.bf16 %v23_v35, %v23_v35  ;;  %v1524_v59 = vld [vmem:[%s1742_s1 + $0x8] sm:$0xf]  ;;  %v1097_v23 = vld [vmem:[%s1742_s1 + $0x18] sm:$0xf]  ;;  %v30_v35 = vld [vmem:[%s1743_s0 + $0x90] sm:$0xff] }
   0xa   :  { %1200 = vmatprep.mubr.msk.bf16.mxu1 %vm138_vm4, %v1038_v36  ;;  %v107_v42 = vsel %vm1434_vm3, %v1032_v33, %v106_v37  ;;  %v1057_v49 = vrot.slane %v1129_v24, 10  ;;  %v237_v50 = vsel %vm151_vm0, %v48_v11, 0  ;;  %v1033_v51 = vrot.slane %v1490_v41, 9  ;;  %v29_v33 = vld [vmem:[%s1743_s0 + $0x88] sm:$0xf] }
   0xb   :  { %v1039_v48 = vcombine.low %v103_v38, %v107_v42  ;;  %v321_v54 = vrot.slane %v1130_v27, 6  ;;  %v110_v55 = vrot.slane %v1132_v43, 5  ;;  %v1034_v56 = vrot.slane %v1133_v44, 9 }
   0xc   :  { %v114_v57 = vrot.slane %v1134_v45, 5  ;;  %v1058_v60 = vrot.slane %v1490_v41, 10  ;;  %v642_v61 = vsel %vm151_vm0, %v1091_v25, 0  ;;  %v1135_v62 = vpack.c.bf16 %v1500_v46, %v1500_v46 }
   0xd   :  { %1240 = vmatprep.mubr.msk.bf16.mxu0 %vm138_vm4, %v1039_v48  ;;  %1201 = vmatmul.mubr.msk.bf16.vlgmr.msra.gmra.mrb[0].mxu1 %vm138_vm4, %v1039_v48  ;;  %v1136_v63 = vpack.c.bf16 %v25_v47, %v25_v47  ;;  %v111_v0 = vsel %vm1434_vm3, %v1033_v51, %v110_v55  ;;  %v1137_v5 = vpack.c.bf16 %v1510_v52, %v1510_v52  ;;  %v325_v19 = vrot.slane %v1132_v43, 6 }
   0xe   :  { %1209 = vmatpush3.bf16.msra.mxu1 %v237_v50  ;;  %v115_v3 = vsel %vm1434_vm3, %v1034_v56, %v114_v57  ;;  %v1138_v8 = vpack.c.bf16 %v27_v53, %v27_v53  ;;  %v1035_v15 = vrot.slane %v1135_v62, 9  ;;  %v318_v18 = vsel %vm1517_vm7, %v1056_v39, %v317_v40 }
   0xf   :  { %v1538_v11 = vcombine.low %v111_v0, %v115_v3  ;;  %v118_v16 = vrot.slane %v1136_v63, 5  ;;  %1356 = vmatprep.subr.msk.bf16.mxu1 %vm151_vm0, %v1524_v59  ;;  %v1036_v20 = vrot.slane %v1137_v5, 9  ;;  %v322_v22 = vsel %vm1517_vm7, %v1057_v49, %v321_v54 }
  0x10   :  { %v122_v21 = vrot.slane %v1138_v8, 5  ;;  %v1059_v24 = vrot.slane %v1133_v44, 10  ;;  %v329_v25 = vrot.slane %v1134_v45, 6  ;;  %v1555_v27 = vcombine.low %v318_v18, %v322_v22  ;;  %v33_v18 = vld [vmem:[%s1743_s0 + $0xa8] sm:$0xf] }
  0x11   :  { %1241 = vmatmul.mubr.msk.bf16.vlgmr.msra.gmra.mrb[0].mxu0 %vm138_vm4, %v1538_v11  ;;  %1204 = vmatprep.mubr.msk.bf16.mxu1 %vm138_vm4, %v1538_v11  ;;  %v119_v26 = vsel %vm1434_vm3, %v1035_v15, %v118_v16  ;;  %v1139_v30 = vpack.c.bf16 %v1406_v6, %v1390_v2  ;;  %v31_v2 = vld [vmem:[%s1743_s0 + $0x98] sm:$0xf]  ;;  %v1060_v6 = vrot.slane %v1135_v62, 10  ;;  %v333_v36 = vrot.slane %v1136_v63, 6  ;;  %v34_v15 = vld [vmem:[%s1743_s0 + $0xb0] sm:$0xff] }
  0x12   :  { %1249 = vmatpush3.bf16.msra.mxu0 %v642_v61  ;;  %v123_v28 = vsel %vm1434_vm3, %v1036_v20, %v122_v21  ;;  %1250 = vmatprep.mubr.msk.bf16.mxu0 %vm138_vm4, %v1555_v27  ;;  %v1061_v37 = vrot.slane %v1137_v5, 10  ;;  %v337_v38 = vrot.slane %v1138_v8, 6  ;;  %v326_v39 = vsel %vm1517_vm7, %v1058_v60, %v325_v19  ;;  %v35_v19 = vld [vmem:[%s1743_s0 + $0xb8] sm:$0xf] }
  0x13   :  { %v1564_v32 = vcombine.low %v119_v26, %v123_v28  ;;  %1361 = vmatprep.subr.msk.bf16.mxu0 %vm151_vm0, %v1097_v23  ;;  %v330_v40 = vsel %vm1517_vm7, %v1059_v24, %v329_v25  ;;  %v1585_v41 = vpack.c.bf16 %v28_v31, %v28_v31  ;;  %v1587_v42 = vpack.c.bf16 %v29_v33, %v29_v33 }
  0x14   :  { %v1589_v43 = vpack.c.bf16 %v30_v35, %v30_v35  ;;  %v1591_v44 = vpack.c.bf16 %v31_v2, %v31_v2  ;;  %v1054_v45 = vrot.slane %v1410_v7, 10  ;;  %v309_v47 = vrot.slane %v1416_v9, 6 }
  0x15   :  { %1205 = vmatmul.mubr.msk.bf16.gmra.mrb[4].mxu1 %vm138_vm4, %v1564_v32  ;;  %v334_v48 = vsel %vm1517_vm7, %v1060_v6, %v333_v36  ;;  %v338_v49 = vsel %vm1517_vm7, %v1061_v37, %v337_v38  ;;  %v1055_v50 = vrot.slane %v1420_v10, 10  ;;  %v313_v51 = vrot.slane %v1430_v13, 6  ;;  %v1109_v13 = vld [vmem:[%s1742_s1 + $0x1c] sm:$0xf] }
  0x16   :  { %1210 = vmatprep.mubr.msk.bf16.mxu1 %vm138_vm4, %v1139_v30  ;;  %v1140_v53 = vpack.c.bf16 %v1446_v17, %v1428_v12  ;;  %v1603_v54 = vcombine.low %v326_v39, %v330_v40  ;;  %v1089_v55 = vrot.slane %v1585_v41, 10  ;;  %v627_v7 = vrot.slane %v1587_v42, 6  ;;  %v1071_v17 = vld [vmem:[%s1742_s1 + $0xc] sm:$0xf] }
  0x17   :  { %v1090_v9 = vrot.slane %v1589_v43, 10  ;;  %v631_v56 = vrot.slane %v1591_v44, 6  ;;  %v728_v57 = vsel %vm151_vm0, %v1097_v23, 0  ;;  %v366_v10 = vsel %vm151_vm0, %v1524_v59, 0 }
  0x18   :  { %v1612_v60 = vcombine.low %v334_v48, %v338_v49  ;;  %v1141_v12 = vpack.c.bf16 %v1480_v34, %v1470_v29  ;;  %v628_v59 = vsel %vm1517_vm7, %v1089_v55, %v627_v7  ;;  %v310_v34 = vsel %vm1517_vm7, %v1054_v45, %v309_v47 }
  0x19   :  { %v632_v29 = vsel %vm1517_vm7, %v1090_v9, %v631_v56  ;;  %v314_v61 = vsel %vm1517_vm7, %v1055_v50, %v313_v51  ;;  %v1142_v63 = vpack.c.bf16 %v1510_v52, %v1500_v46  ;;  %v826_v3 = vsel %vm151_vm0, %v1109_v13, 0  ;;  %v1117_v46 = vld [vmem:[%s1742_s1 + $0x20] sm:$0xf] }
  0x1a   :  { %v1092_v62 = vcombine.low %v628_v59, %v632_v29  ;;  %v1063_v0 = vcombine.low %v310_v34, %v314_v61  ;;  %v452_v5 = vsel %vm151_vm0, %v1071_v17, 0  ;;  %v1143_v8 = vpack.c.bf16 %v30_v35, %v28_v31  ;;  %v32_v52 = vld [vmem:[%s1743_s0 + $0xa0] sm:$0xff] }
  0x1b   :  { %v1148_v16 = vpack.c.bf16 %v34_v15, %v32_v52  ;;  %v1081_v20 = vrot.slane %v1585_v41, 9  ;;  %v535_v21 = vrot.slane %v1587_v42, 5  ;;  %v1082_v22 = vrot.slane %v1589_v43, 9 }
  0x1c   :  { %v539_v23 = vrot.slane %v1591_v44, 5  ;;  %v1151_v24 = vpack.c.bf16 %v34_v15, %v34_v15  ;;  %v1150_v25 = vpack.c.bf16 %v33_v18, %v33_v18  ;;  %v1152_v26 = vpack.c.bf16 %v35_v19, %v35_v19 }
  0x1d   :  { %1251 = vmatmul.mubr.msk.bf16.vlgmr.msra.gmra.mrb[0].mxu0 %vm138_vm4, %v1603_v54  ;;  %1211 = vmatmul.mubr.msk.bf16.vlgmr.msra.gmra.mrb[0].mxu1 %vm138_vm4, %v1140_v53  ;;  %v918_v2 = vsel %vm151_vm0, %v1117_v46, 0 }
  0x1e   :  { %1259 = vmatpush3.bf16.msra.mxu0 %v728_v57  ;;  %1219 = vmatpush3.bf16.msra.mxu1 %v366_v10  ;;  %v540_v28 = vsel %vm1434_vm3, %v1082_v22, %v539_v23  ;;  %v1108_v31 = vrot.slane %v1151_v24, 9  ;;  %v811_v33 = vrot.slane %v1150_v25, 5  ;;  %v815_v35 = vrot.slane %v1152_v26, 5 }
  0x1f   :  { %1254 = vmatprep.mubr.msk.bf16.mxu0 %vm138_vm4, %v1612_v60  ;;  %1214 = vmatprep.mubr.msk.bf16.mxu1 %vm138_vm4, %v1141_v12  ;;  %v1116_v38 = vrot.slane %v1151_v24, 10  ;;  %v903_v39 = vrot.slane %v1150_v25, 6  ;;  %v907_v14 = vrot.slane %v1152_v26, 6 }
  0x20   :  { %1362 = vmatprep.subr.msk.bf16.mxu0 %vm151_vm0, %v1109_v13  ;;  %1357 = vmatprep.subr.msk.bf16.mxu1 %vm151_vm0, %v1071_v17  ;;  %v816_v36 = vsel %vm1434_vm3, %v1108_v31, %v815_v35 }
  0x21   :  { %v908_v41 = vsel %vm1517_vm7, %v1116_v38, %v907_v14 }
  0x25   :  { %1255 = vmatmul.mubr.msk.bf16.gmra.mrb[4].mxu0 %vm138_vm4, %v1092_v62  ;;  %1215 = vmatmul.mubr.msk.bf16.gmra.mrb[4].mxu1 %vm138_vm4, %v1142_v63 }
  0x26   :  { %1260 = vmatprep.mubr.msk.bf16.mxu0 %vm138_vm4, %v1141_v12  ;;  %1220 = vmatprep.mubr.msk.bf16.mxu1 %vm138_vm4, %v1063_v0 }
  0x2d   :  { %1261 = vmatmul.mubr.msk.bf16.vlgmr.msra.gmra.mrb[0].mxu0 %vm138_vm4, %v1142_v63  ;;  %1221 = vmatmul.mubr.msk.bf16.vlgmr.msra.gmra.mrb[0].mxu1 %vm138_vm4, %v1555_v27  ;;  %v536_v27 = vsel %vm1434_vm3, %v1081_v20, %v535_v21 }
  0x2e   :  { %1269 = vmatpush3.bf16.msra.mxu0 %v826_v3  ;;  %1229 = vmatpush3.bf16.msra.mxu1 %v452_v5  ;;  %v1084_v6 = vcombine.low %v536_v27, %v540_v28 }
  0x2f   :  { %1264 = vmatprep.mubr.msk.bf16.mxu0 %vm138_vm4, %v1143_v8  ;;  %1224 = vmatprep.mubr.msk.bf16.mxu1 %vm138_vm4, %v1603_v54 }
  0x30   :  { %1363 = vmatprep.subr.msk.bf16.mxu0 %vm151_vm0, %v1117_v46  ;;  %1359 = vmatprep.subr.msk.bf16.mxu1 %vm151_vm0, %v1385_v1  ;;  %v1149_v1 = vpack.c.bf16 %v32_v52, %v32_v52 }
  0x32   :  { %v1107_v30 = vrot.slane %v1149_v1, 9 }
  0x35   :  { %1265 = vmatmul.mubr.msk.bf16.gmra.mrb[4].mxu0 %vm138_vm4, %v1148_v16  ;;  %1225 = vmatmul.mubr.msk.bf16.gmra.mrb[4].mxu1 %vm138_vm4, %v1612_v60 }
  0x36   :  { %1270 = vmatprep.mubr.msk.bf16.mxu0 %vm138_vm4, %v1538_v11  ;;  %1230 = vmatprep.mubr.msk.bf16.mxu1 %vm138_vm4, %v1140_v53  ;;  %v812_v11 = vsel %vm1434_vm3, %v1107_v30, %v811_v33 }
  0x37   :  { %v1110_v37 = vcombine.low %v812_v11, %v816_v36 }
  0x3d   :  { %1271 = vmatmul.mubr.msk.bf16.vlgmr.msra.gmra.mrb[0].mxu0 %vm138_vm4, %v1564_v32  ;;  %1231 = vmatmul.mubr.msk.bf16.vlgmr.msra.gmra.mrb[0].mxu1 %vm138_vm4, %v1141_v12 }
  0x3e   :  { %1279 = vmatpush3.bf16.msra.mxu0 %v918_v2  ;;  %1289 = vmatpush3.bf16.msra.mxu1 %v1398_v4  ;;  %v1115_v4 = vrot.slane %v1149_v1, 10 }
  0x3f   :  { %1274 = vmatprep.mubr.msk.bf16.mxu0 %vm138_vm4, %v1084_v6  ;;  %1234 = vmatprep.mubr.msk.bf16.mxu1 %vm138_vm4, %v1142_v63 }
  0x40   :  { %v904_v40 = vsel %vm1517_vm7, %v1115_v4, %v903_v39 }
  0x41   :  { %v1118_v42 = vcombine.low %v904_v40, %v908_v41 }
  0x45   :  { %1275 = vmatmul.mubr.msk.bf16.gmra.mrb[4].mxu0 %vm138_vm4, %v1110_v37  ;;  %1235 = vmatmul.mubr.msk.bf16.gmra.mrb[4].mxu1 %vm138_vm4, %v1143_v8 }
  0x46   :  { %1280 = vmatprep.mubr.msk.bf16.mxu0 %vm138_vm4, %v1603_v54  ;;  %1244 = vmatprep.mubr.msk.bf16.mxu1 %vm138_vm4, %v1564_v32 }
  0x4d   :  { %1281 = vmatmul.mubr.msk.bf16.vlgmr.msra.gmra.mrb[0].mxu0 %vm138_vm4, %v1612_v60 }
  0x4e   :  { %1284 = vmatprep.mubr.msk.bf16.mxu0 %vm138_vm4, %v1092_v62 }
  0x51   :  { %1245 = vmatmul.mubr.msk.bf16.vlgmr.msra.gmra.mrb[4].mxu1 %vm138_vm4, %v1084_v6 }
  0x55   :  { %1285 = vmatmul.mubr.msk.bf16.gmra.mrb[4].mxu0 %vm138_vm4, %v1118_v42 }
 0x110   :  { %v1232_v32 = vpop.f32.mrb[0].mxu1 }
 0x111   :  { %v488_v43 = vpop.f32.mrb[1].mxu1 }
 0x112   :  { %v1233_v44 = vpop.f32.mrb[2].mxu1 }
 0x113   :  { %v491_v45 = vpop.f32.mrb[3].mxu1 }
 0x120   :  { %v1282_v47 = vpop.f32.mrb[0].mxu0 }
 0x121   :  { %v1290_v48 = vadd.f32 %v1282_v47, %v1232_v32  ;;  %v954_v49 = vpop.f32.mrb[1].mxu0 }
 0x122   :  { %v1291_v50 = vadd.f32 %v954_v49, %v488_v43  ;;  %v1283_v51 = vpop.f32.mrb[2].mxu0 }
 0x123   :  { %v995_v53 = vmax.f32 %v1290_v48, 0.0  ;;  %v1292_v54 = vadd.f32 %v1283_v51, %v1233_v44  ;;  %v957_v55 = vpop.f32.mrb[3].mxu0 }
 0x124   :  { %v993_v7 = vmax.f32 %v1291_v50, 0.0  ;;  %v1293_v58 = vadd.f32 %v957_v55, %v491_v45  ;;  %v1246_v9 = vpop.f32.mrb[4].mxu1 }
 0x125   :  { %1003 = vst.msk [vmem:[%s1744_s2 + $0x10] sm:$0xff] %vm138_vm4, %v995_v53  ;;  %v996_v56 = vmax.f32 %v1292_v54, 0.0  ;;  %v602_v57 = vpop.f32.mrb[5].mxu1 }
 0x126   :  { %1001 = vst.msk [vmem:[%s1744_s2] sm:$0xff] %vm138_vm4, %v993_v7  ;;  %v994_v10 = vmax.f32 %v1293_v58, 0.0  ;;  %v1247_v60 = vpop.f32.mrb[6].mxu1 }
 0x127   :  { %1004 = vst.msk [vmem:[%s1744_s2 + $0x18] sm:$0xff] %vm138_vm4, %v996_v56  ;;  %v605_v12 = vpop.f32.mrb[7].mxu1 }
 0x128   :  { %1002 = vst.msk [vmem:[%s1744_s2 + $0x8] sm:$0xff] %vm138_vm4, %v994_v10  ;;  %v1286_v13 = vpop.f32.mrb[4].mxu0 }
 0x129   :  { %v1294_v17 = vadd.f32 %v1286_v13, %v1246_v9  ;;  %v970_v59 = vpop.f32.mrb[5].mxu0 }
 0x12a   :  { %v1295_v29 = vadd.f32 %v970_v59, %v602_v57  ;;  %v1287_v34 = vpop.f32.mrb[6].mxu0 }
 0x12b   :  { %v999_v61 = vmax.f32 %v1294_v17, 0.0  ;;  %v1296_v62 = vadd.f32 %v1287_v34, %v1247_v60  ;;  %v973_v63 = vpop.f32.mrb[7].mxu0 }
 0x12c   :  { %v997_v0 = vmax.f32 %v1295_v29, 0.0  ;;  %v1297_v3 = vadd.f32 %v973_v63, %v605_v12 }
 0x12d   :  { %1007 = vst.msk [vmem:[%s1744_s2 + $0x30] sm:$0xff] %vm138_vm4, %v999_v61  ;;  %v1000_v5 = vmax.f32 %v1296_v62, 0.0 }
 0x12e   :  { %1005 = vst.msk [vmem:[%s1744_s2 + $0x20] sm:$0xff] %vm138_vm4, %v997_v0  ;;  %v998_v8 = vmax.f32 %v1297_v3, 0.0 }
 0x12f   :  { %1008 = vst.msk [vmem:[%s1744_s2 + $0x38] sm:$0xff] %vm138_vm4, %v1000_v5 }
 0x130   :  { %1006 = vst.msk [vmem:[%s1744_s2 + $0x28] sm:$0xff] %vm138_vm4, %v998_v8 }

// kernel: msa_transformer_forward.91
= control target key start
LH: loop header
LB: loop body
LE: loop exit
PB: predicated region body
PF: predicated region fallthrough
CT: control target
= control target key end

     0   :  { %vm54_vm0 = vcmask 261120   ;;  %s347_s0 = inlined_call_operand.vmem [shape: f32[64,32], index: 0, kind: input, shape index: {}]   ;;  %s348_s1 = inlined_call_operand.vmem [shape: bf16[32,32], index: 1, kind: input, shape index: {}]   ;;  %s349_s2 = inlined_call_operand.vmem [shape: f32[1,32], index: 2, kind: input, shape index: {}]   ;;  %s350_s3 = inlined_call_operand.vmem [shape: f32[64,32], index: 3, kind: input, shape index: {}]   ;;  %s351_s4 = inlined_call_operand.hbm [shape: f32[64,32], index: 4, kind: output, shape index: {}]  }
   0x1   :  { %v212_v0 = vld [vmem:[%s348_s1] sm:$0xff]   ;;  %v213_v1 = vld [vmem:[%s348_s1 + $0x8] sm:$0xff]   ;;  %v21_v7 = vld [vmem:[%s347_s0 + $0x10] sm:$0xff] }
   0x2   :  { %193 = vmatprep.subr.bf16.mxu0 %v212_v0  ;;  %205 = vmatprep.subr.bf16.mxu1 %v212_v0  ;;  %v19_v2 = vld [vmem:[%s347_s0] sm:$0xff]  ;;  %v20_v3 = vld [vmem:[%s347_s0 + $0x8] sm:$0xff]  ;;  %v22_v8 = vld [vmem:[%s347_s0 + $0x18] sm:$0xff] }
   0x3   :  { %v23_v4 = vld [vmem:[%s347_s0 + $0x20] sm:$0xff]  ;;  %194 = vmatpush3.bf16.msra.mxu0 %v212_v0  ;;  %207 = vmatpush3.bf16.msra.mxu1 %v212_v0  ;;  %v27_v5 = vpack.c.bf16 %v20_v3, %v19_v2  ;;  %v24_v6 = vld [vmem:[%s347_s0 + $0x28] sm:$0xff]  ;;  %v25_v10 = vld [vmem:[%s347_s0 + $0x30] sm:$0xff] }
   0x4   :  { %195 = vmatprep.subr.bf16.mxu0 %v213_v1  ;;  %206 = vmatprep.subr.bf16.mxu1 %v213_v1  ;;  %v29_v9 = vpack.c.bf16 %v24_v6, %v23_v4  ;;  %v26_v11 = vld [vmem:[%s347_s0 + $0x38] sm:$0xff] }
   0x5   :  { %9 = vsyncpa [#allocation3], 0  ;;  %197 = vmatprep.mubr.msk.bf16.mxu0 %vm54_vm0, %v27_v5  ;;  %v28_v12 = vpack.c.bf16 %v22_v8, %v21_v7  ;;  %v30_v13 = vpack.c.bf16 %v26_v11, %v25_v10  ;;  %v180_v14 = vld [vmem:[%s349_s2] ss:$0 sm:$0xff]  ;;  %v134_v16 = vld [vmem:[%s350_s3 + $0x10] sm:$0xff]  ;;  %s238_s24 = smov [#allocation2]  }
   0x6   :  { %201 = vmatprep.mubr.msk.bf16.mxu1 %vm54_vm0, %v29_v9  ;;  %v138_v18 = vld [vmem:[%s350_s3 + $0x30] sm:$0xff]  ;;  %v132_v22 = vld [vmem:[%s350_s3] sm:$0xff]  ;;  %v135_v28 = vld [vmem:[%s350_s3 + $0x18] sm:$0xff]  ;;  %s169_s25 = sshll.u32 %s238_s24, 4  ;;  %s170_s25 = int_to_ptr.vmem [resolvable:$true] %s169_s25 }
   0x7   :  { %196 = vmatpush3.bf16.msra.mxu0 %v213_v1  ;;  %208 = vmatpush3.bf16.msra.mxu1 %v213_v1  ;;  %v136_v24 = vld [vmem:[%s350_s3 + $0x20] sm:$0xff]  ;;  %v139_v30 = vld [vmem:[%s350_s3 + $0x38] sm:$0xff]  ;;  %v133_v36 = vld [vmem:[%s350_s3 + $0x8] sm:$0xff]  ;;  %p219_p1 = scmp.lt.s32.totalorder %s170_s25, %s170_s25 }
   0x8   :  { %v137_v38 = vld [vmem:[%s350_s3 + $0x28] sm:$0xff]  ;;  %s214_s3 = scalar_lea.vmem %s170_s25, 1024 }
   0x9   :  { %p215_p0 = scmp.ne.s32.totalorder %s170_s25, %s214_s3  ;;  %p220_p2 = scmp.lt.s32.totalorder %s214_s3, %s214_s3 }
   0xa   :  { %198 = vmatmul.mubr.msk.bf16.vlgmr.msra.gmra.mrb[0].mxu0 %vm54_vm0, %v28_v12  ;;  %202 = vmatmul.mubr.msk.bf16.vlgmr.msra.gmra.mrb[0].mxu1 %vm54_vm0, %v30_v13 }
   0xb   :  { %p221_p3 = por %p220_p2, %p219_p1 }
   0xd   :  { %p222_p4 = pnand %p221_p3, %p215_p0 }
  0xdd   :  { %v199_v15 = vpop.f32.mrb[0].mxu0  ;;  %v203_v17 = vpop.f32.mrb[0].mxu1 }
  0xde   :  { %v110_v19 = vadd.f32 %v199_v15, %v180_v14  ;;  %v126_v20 = vadd.f32 %v203_v17, %v180_v14  ;;  %v101_v21 = vpop.f32.mrb[1].mxu0  ;;  %v117_v23 = vpop.f32.mrb[1].mxu1 }
  0xdf   :  { %v102_v25 = vadd.f32 %v180_v14, %v101_v21  ;;  %v118_v26 = vadd.f32 %v180_v14, %v117_v23  ;;  %v200_v27 = vpop.f32.mrb[2].mxu0  ;;  %v204_v29 = vpop.f32.mrb[2].mxu1 }
  0xe0   :  { %v142_v31 = vadd.f32 %v134_v16, %v110_v19  ;;  %v146_v32 = vadd.f32 %v138_v18, %v126_v20  ;;  %v113_v33 = vadd.f32 %v200_v27, %v180_v14  ;;  %v129_v34 = vadd.f32 %v204_v29, %v180_v14  ;;  %v104_v35 = vpop.f32.mrb[3].mxu0  ;;  %v120_v37 = vpop.f32.mrb[3].mxu1 }
  0xe1   :  { %v140_v39 = vadd.f32 %v132_v22, %v102_v25  ;;  %v144_v40 = vadd.f32 %v136_v24, %v118_v26  ;;  %v105_v41 = vadd.f32 %v180_v14, %v104_v35  ;;  %v121_v42 = vadd.f32 %v180_v14, %v120_v37 }
  0xe2   :  { %v150_v43 = vmax.f32 %v142_v31, 0.0  ;;  %v154_v44 = vmax.f32 %v146_v32, 0.0  ;;  %v143_v45 = vadd.f32 %v135_v28, %v113_v33  ;;  %v147_v46 = vadd.f32 %v139_v30, %v129_v34 }
  0xe3   :  { %v148_v47 = vmax.f32 %v140_v39, 0.0  ;;  %v152_v48 = vmax.f32 %v144_v40, 0.0  ;;  %v141_v49 = vadd.f32 %v133_v36, %v105_v41  ;;  %v145_v50 = vadd.f32 %v137_v38, %v121_v42 }
  0xe4   :  { %158 = vst.msk [vmem:[#allocation2 + $0x10] sm:$0xff] %vm54_vm0, %v150_v43  ;;  %162 = vst.msk [vmem:[#allocation2 + $0x30] sm:$0xff] %vm54_vm0, %v154_v44  ;;  %v151_v51 = vmax.f32 %v143_v45, 0.0  ;;  %v155_v52 = vmax.f32 %v147_v46, 0.0 }
  0xe5   :  { %156 = vst.msk [vmem:[#allocation2] sm:$0xff] %vm54_vm0, %v148_v47  ;;  %160 = vst.msk [vmem:[#allocation2 + $0x20] sm:$0xff] %vm54_vm0, %v152_v48  ;;  %v149_v53 = vmax.f32 %v141_v49, 0.0  ;;  %v153_v54 = vmax.f32 %v145_v50, 0.0 }
  0xe6   :  { %159 = vst.msk [vmem:[#allocation2 + $0x18] sm:$0xff] %vm54_vm0, %v151_v51  ;;  %163 = vst.msk [vmem:[#allocation2 + $0x38] sm:$0xff] %vm54_vm0, %v155_v52 }
  0xe7   :  { %157 = vst.msk [vmem:[#allocation2 + $0x8] sm:$0xff] %vm54_vm0, %v149_v53  ;;  %161 = vst.msk [vmem:[#allocation2 + $0x28] sm:$0xff] %vm54_vm0, %v153_v54 }
  0xe8   :  { %225 = shalt.err (!%p222_p4)
}
  0xe9   :  { %s226_s27 = scalar_lea.hbm %s351_s4, 1024 }
  0xea   :  { %p227_p5 = scmp.ne.s32.totalorder %s351_s4, %s226_s27  ;;  %p230_p6 = scmp.lt.u32.totalorder %s226_s27, %s351_s4 }
  0xec   :  { %p232_p7 = pnand %p230_p6, %p227_p5 }
  0xee   :  { %235 = shalt.err (!%p232_p7)
}
  0xef   :  { %s239_s6 = smov 128   ;;  %s240_s7 = smov 8  }
  0xf0   :  { %175 = dma.vmem_to_hbm [thread:$0]  %s170_s25, 1024, %s351_s4, [#allocation3], %s239_s6, %s239_s6, %s240_s7  }
  0xf1   :  { %236 = dma.done.wait [#allocation3], 1024  }
  0xf2   :  { %237 = vsyncadd [#allocation3], 4294966272 }
  0xf3   :  { %179 = vsyncpa [#allocation3], 1 }

</bundles_post_ra>
